<compile_context>
chip_gen: v7x
topology: tpu7x:2x2x1
jax: 0.10.0
libtpu: 0.0.40
codegen_flags: <defaults>
</compile_context>

<pallas_src>
import functools
import math

import numpy as np
import jax
import jax.numpy as jnp
from jax import lax
from jax.experimental import pallas as pl
from jax.experimental.pallas import tpu as pltpu

BN_EPS = 1e-5


def _round_up(x, m):
    return ((x + m - 1) // m) * m


# ----------------------------------------------------------------------------
# Pallas kernel 1: batched-pair fused matmul   act((x @ w) * scale + bias)
#   x: (2, M, K) bf16, w: (2, K, N) bf16 -> out (2, M, N)
#   (leading grid axis selects which RGB encoder's weights are used)
# ----------------------------------------------------------------------------
def _pair_mm_kernel(x_ref, w_ref, s_ref, b_ref, o_ref, *, act):
    acc = jnp.dot(x_ref[0], w_ref[0], preferred_element_type=jnp.float32)
    y = acc * s_ref[0] + b_ref[0]
    if act == "relu":
        y = jnp.maximum(y, 0.0)
    o_ref[0] = y.astype(o_ref.dtype)


def pair_matmul_fused(x, w, scale, bias, act=None, tm=1024,
                      out_dtype=jnp.float32, keep_padded_n=False):
    E, M, K = x.shape
    _, _, N = w.shape
    Kp = _round_up(K, 128)                  # aligned contraction (clean vreg loads)
    Np = _round_up(N, 128)                  # lane-dense output stores
    if Kp != K:
        x = jnp.pad(x, ((0, 0), (0, 0), (0, Kp - K)))
        w = jnp.pad(w, ((0, 0), (0, Kp - K), (0, 0)))
    if Np != N:
        w = jnp.pad(w, ((0, 0), (0, 0), (0, Np - N)))
        scale = jnp.pad(scale, ((0, 0), (0, Np - N)))
        bias = jnp.pad(bias, ((0, 0), (0, Np - N)))
    tm_eff = min(tm, _round_up(M, 8))
    Mp = _round_up(M, tm_eff)
    if Mp != M:
        x = jnp.pad(x, ((0, 0), (0, Mp - M), (0, 0)))
    scale = scale.reshape(E, 1, Np).astype(jnp.float32)
    bias = bias.reshape(E, 1, Np).astype(jnp.float32)

    # TODO(synk): allow_input_fusion=[0] could let XLA fuse the im2col stack into
    # the input DMA and avoid materializing the patch matrix in HBM.
    out = pl.pallas_call(
        functools.partial(_pair_mm_kernel, act=act),
        out_shape=jax.ShapeDtypeStruct((E, Mp, Np), out_dtype),
        grid=(E, Mp // tm_eff),
        in_specs=[
            pl.BlockSpec((1, tm_eff, Kp), lambda e, i: (e, i, 0)),
            pl.BlockSpec((1, Kp, Np), lambda e, i: (e, 0, 0)),
            pl.BlockSpec((1, 1, Np), lambda e, i: (e, 0, 0)),
            pl.BlockSpec((1, 1, Np), lambda e, i: (e, 0, 0)),
        ],
        out_specs=pl.BlockSpec((1, tm_eff, Np), lambda e, i: (e, i, 0)),
        compiler_params=pltpu.CompilerParams(
            dimension_semantics=("parallel", "parallel")),
    )(x.astype(jnp.bfloat16), w.astype(jnp.bfloat16), scale, bias)
    out = out[:, :M, :]
    if not keep_padded_n:
        out = out[:, :, :N]
    return out


# ----------------------------------------------------------------------------
# 2-D conv glue (im2col in XLA; hot matmuls in Pallas)
# ----------------------------------------------------------------------------
def _im2col_2d(x, KH, KW, stride, pad):
    N, H, W, C = x.shape
    xp = jnp.pad(x, ((0, 0), (pad, pad), (pad, pad), (0, 0)))
    OH = (H + 2 * pad - KH) // stride + 1
    OW = (W + 2 * pad - KW) // stride + 1
    patches = []
    for i in range(KH):
        for j in range(KW):
            patches.append(xp[:, i:i + stride * OH:stride, j:j + stride * OW:stride, :])
    cols = jnp.stack(patches, axis=3).reshape(N * OH * OW, KH * KW * C)
    return cols, OH, OW


def _conv3x3_gather(IH, IW, stride, pad):
    """Per-image one-hot tap-gather matrices (9, OH*OW, IH*IW) for a 3x3 conv."""
    OH = (IH + 2 * pad - 3) // stride + 1
    OW = (IW + 2 * pad - 3) // stride + 1
    g = np.zeros((9, OH * OW, IH * IW), np.float32)
    oh = np.arange(OH)[:, None]
    ow = np.arange(OW)[None, :]
    oidx = (oh * OW + ow).reshape(-1)
    for i in range(3):
        for j in range(3):
            ih = oh * stride + i - pad
            iw = ow * stride + j - pad
            valid = ((ih >= 0) & (ih < IH) & (iw >= 0) & (iw < IW)).reshape(-1)
            iidx = (np.clip(ih, 0, IH - 1) * IW + np.clip(iw, 0, IW - 1)).reshape(-1)
            g[i * 3 + j, oidx[valid], iidx[valid]] = 1.0
    return g, OH, OW


# ----------------------------------------------------------------------------
# Pallas kernel 2: fused encoder tail  conv2 -> bn -> relu -> conv3 -> bn ->
# relu -> adaptive avgpool -> fc, one grid step per (encoder, 8-image group)
# ----------------------------------------------------------------------------
_GRP = 8    # images per grid step (keeps all block row dims 8-aligned)


def _enc_tail_kernel(cols_ref, w2_ref, b2_ref, g3_ref, w3_ref, b3_ref,
                     pool_ref, wfc_ref, bfc_ref, o_ref):
    # conv2 (im2col matmul) + folded BN + ReLU
    y2 = jnp.dot(cols_ref[0], w2_ref[0], preferred_element_type=jnp.float32)
    y2 = jnp.maximum(y2 + b2_ref[0], 0.0).astype(jnp.bfloat16)          # (GRP*s2, 128)
    # conv3 as 9 taps: tiny one-hot spatial gather + matmul, BN folded
    acc = b3_ref[0]
    for k in range(9):
        g = jnp.dot(g3_ref[k], y2, preferred_element_type=jnp.float32)  # (GRP*s3, 128)
        acc = acc + jnp.dot(g.astype(jnp.bfloat16), w3_ref[0, k],
                            preferred_element_type=jnp.float32)
    y3 = jnp.maximum(acc, 0.0)                                          # (GRP*s3, 128)
    # AdaptiveAvgPool2d((1,1)) per image + Linear
    pooled = jnp.dot(pool_ref[...], y3, preferred_element_type=jnp.float32)
    out = jnp.dot(pooled.astype(jnp.bfloat16), wfc_ref[0],
                  preferred_element_type=jnp.float32) + bfc_ref[0]
    o_ref[0] = out.astype(o_ref.dtype)


def encoder_tail_pair(p1, p2, xpool):
    # xpool: (2, N, PH, PW, Cp) bf16 (post maxpool, channels padded to Cp=128)
    E, N, PH, PW, Cp = xpool.shape
    cols0, OH2, OW2 = _im2col_2d(xpool[0], 3, 3, 2, 1)
    cols1, _, _ = _im2col_2d(xpool[1], 3, 3, 2, 1)
    cols = jnp.stack([cols0, cols1], 0).astype(jnp.bfloat16)            # (2, N*s2, 9*Cp)
    K2 = 9 * Cp
    s2 = OH2 * OW2

    def w2mat(p):
        w = p["conv2_w"]                                                # (64, 32, 3, 3)
        oc, ic = w.shape[0], w.shape[1]
        w = jnp.pad(w, ((0, 0), (0, Cp - ic), (0, 0), (0, 0)))
        m = jnp.transpose(w, (2, 3, 1, 0)).reshape(K2, oc) * p["bn2"][0][None, :]
        return jnp.pad(m, ((0, 0), (0, 128 - oc)))

    def b2vec(p):
        b = p["bn2"][1]
        return jnp.pad(b, (0, 128 - b.shape[0]))

    def w3mat(p):
        w = p["conv3_w"]                                                # (128, 64, 3, 3)
        oc, ic = w.shape[0], w.shape[1]
        taps = []
        for i in range(3):
            for j in range(3):
                t = jnp.pad(w[:, :, i, j].T, ((0, 128 - ic), (0, 0)))
                taps.append(t * p["bn3"][0][None, :])
        return jnp.stack(taps, 0)                                       # (9, 128, 128)

    w2 = jnp.stack([w2mat(p1), w2mat(p2)], 0).astype(jnp.bfloat16)
    b2 = jnp.stack([b2vec(p1), b2vec(p2)], 0).reshape(E, 1, 128).astype(jnp.float32)
    w3 = jnp.stack([w3mat(p1), w3mat(p2)], 0).astype(jnp.bfloat16)
    b3 = jnp.stack([p1["bn3"][1], p2["bn3"][1]], 0).reshape(E, 1, 128).astype(jnp.float32)
    wfc = jnp.stack([p1["fc_w"].T, p2["fc_w"].T], 0).astype(jnp.bfloat16)
    D = wfc.shape[-1]
    bfc = jnp.stack([p1["fc_b"], p2["fc_b"]], 0).reshape(E, 1, D).astype(jnp.float32)

    # fixed-size (independent of N/B) per-group gather / pool constants
    g3_img, OH3, OW3 = _conv3x3_gather(OH2, OW2, 2, 1)
    s3 = OH3 * OW3
    eye = np.eye(_GRP, dtype=np.float32)
    g3 = np.stack([np.kron(eye, g3_img[k]) for k in range(9)], 0)       # (9, GRP*s3, GRP*s2)
    pool = np.kron(eye, np.full((1, s3), 1.0 / s3, np.float32))         # (GRP, GRP*s3)

    Ng = _round_up(N, _GRP)
    if Ng != N:
        cols = jnp.pad(cols, ((0, 0), (0, (Ng - N) * s2), (0, 0)))

    out = pl.pallas_call(
        _enc_tail_kernel,
        out_shape=jax.ShapeDtypeStruct((E, Ng, D), jnp.float32),
        grid=(E, Ng // _GRP),
        in_specs=[
            pl.BlockSpec((1, _GRP * s2, K2), lambda e, g: (e, g, 0)),
            pl.BlockSpec((1, K2, 128), lambda e, g: (e, 0, 0)),
            pl.BlockSpec((1, 1, 128), lambda e, g: (e, 0, 0)),
            pl.BlockSpec((9, _GRP * s3, _GRP * s2), lambda e, g: (0, 0, 0)),
            pl.BlockSpec((1, 9, 128, 128), lambda e, g: (e, 0, 0, 0)),
            pl.BlockSpec((1, 1, 128), lambda e, g: (e, 0, 0)),
            pl.BlockSpec((_GRP, _GRP * s3), lambda e, g: (0, 0)),
            pl.BlockSpec((1, 128, D), lambda e, g: (e, 0, 0)),
            pl.BlockSpec((1, 1, D), lambda e, g: (e, 0, 0)),
        ],
        out_specs=pl.BlockSpec((1, _GRP, D), lambda e, g: (e, g, 0)),
        compiler_params=pltpu.CompilerParams(
            dimension_semantics=("parallel", "parallel")),
    )(cols, w2, b2, jnp.asarray(g3, jnp.bfloat16), w3, b3,
      jnp.asarray(pool, jnp.float32), wfc, bfc)
    return out[:, :N, :]


def rgb_pair_forward(p1, p2, rgb1, rgb2):
    # rgb*: (B, F, H, W, 3) -> two (B, F, rgb_dim) f32 feature tensors
    B, F, H, W, C = rgb1.shape
    N = B * F
    x = jnp.stack([rgb1.reshape(N, H, W, C),
                   rgb2.reshape(N, H, W, C)], 0).astype(jnp.bfloat16)

    # conv1 7x7/s2/p3 + folded BN + ReLU; output kept 128-lane padded so no
    # slice/copy is needed before maxpool / conv2.
    cols0, OH, OW = _im2col_2d(x[0], 7, 7, 2, 3)
    cols1, _, _ = _im2col_2d(x[1], 7, 7, 2, 3)
    cols = jnp.stack([cols0, cols1], 0)
    w1 = jnp.stack([p1["conv1_w"], p2["conv1_w"]], 0)                   # (2, 32, 3, 7, 7)
    wmat = jnp.transpose(w1, (0, 3, 4, 2, 1)).reshape(2, 7 * 7 * 3, 32)
    scale = jnp.stack([p1["bn1"][0], p2["bn1"][0]], 0)
    bias = jnp.stack([p1["bn1"][1], p2["bn1"][1]], 0)
    y1 = pair_matmul_fused(cols, wmat, scale, bias, act="relu",
                           out_dtype=jnp.bfloat16, keep_padded_n=True)  # (2, N*OH*OW, 128)
    OCp = y1.shape[-1]
    y1 = y1.reshape(2 * N, OH, OW, OCp)

    # MaxPool2d(kernel=3, stride=2, padding=1)  -- XLA reduce_window
    # TODO(synk): could be folded into the tail kernel to save one HBM roundtrip.
    y1 = lax.reduce_window(y1, jnp.array(-jnp.inf, y1.dtype), lax.max,
                           (1, 3, 3, 1), (1, 2, 2, 1),
                           padding=((0, 0), (1, 1), (1, 1), (0, 0)))
    PH, PW = y1.shape[1], y1.shape[2]
    y1 = y1.reshape(2, N, PH, PW, OCp)

    # fused conv2 -> conv3 -> avgpool -> fc (one pallas_call)
    feats = encoder_tail_pair(p1, p2, y1)                               # (2, N, D)
    D = feats.shape[-1]
    return feats[0].reshape(B, F, D), feats[1].reshape(B, F, D)


def linear_interp_time(x_btc, out_t):
    # torch F.interpolate(mode='linear', align_corners=False) over the time axis
    B, F, D = x_btc.shape
    if F == out_t:
        return x_btc
    src = (jnp.arange(out_t, dtype=jnp.float32) + 0.5) * (F / out_t) - 0.5
    src = jnp.clip(src, 0.0, F - 1.0)
    x0 = jnp.floor(src).astype(jnp.int32)
    x1 = jnp.minimum(x0 + 1, F - 1)
    w = (src - x0.astype(jnp.float32))[None, :, None]
    g0 = jnp.take(x_btc, x0, axis=1)
    g1 = jnp.take(x_btc, x1, axis=1)
    return (1.0 - w) * g0 + w * g1


# ----------------------------------------------------------------------------
# Pallas kernel 3: the whole 1-D trunk, gridded over batch, VMEM-resident
# ----------------------------------------------------------------------------
def _shift_rows(x, d):
    """y[t] = x[t+d] with zeros outside [0, T), d in {-1, +1}.  Implemented as a
    sublane shift: pltpu.roll + edge mask (XLU) when rows are 8-aligned, else a
    tiny static slice+concat (same hardware path)."""
    T, C = x.shape
    if T == 1:
        return jnp.zeros_like(x)
    if T % 8 == 0:
        shift = 1 if d == -1 else T - 1
        rolled = pltpu.roll(x, shift=shift, axis=0)
        row = lax.broadcasted_iota(jnp.int32, (T, C), 0)
        keep = (row >= 1) if d == -1 else (row <= T - 2)
        return jnp.where(keep, rolled, 0.0)
    z = jnp.zeros((1, C), x.dtype)
    if d == -1:
        return jnp.concatenate([z, x[:-1, :]], axis=0)
    return jnp.concatenate([x[1:, :], z], axis=0)


def _conv1d_3tap(xm, xc, xp, w_ref, b_ref):
    """kernel=3 / pad=1 Conv1d given pre-aligned tap rows (x[t-1], x[t], x[t+1])."""
    return (jnp.dot(xm.astype(jnp.bfloat16), w_ref[0], preferred_element_type=jnp.float32)
            + jnp.dot(xc.astype(jnp.bfloat16), w_ref[1], preferred_element_type=jnp.float32)
            + jnp.dot(xp.astype(jnp.bfloat16), w_ref[2], preferred_element_type=jnp.float32)
            + b_ref[...])


def _trunk_kernel(*refs, block_meta):
    out_ref = refs[-1]
    it = iter(refs[:-1])
    x_ref, wf_ref, bf_ref = next(it), next(it), next(it)

    # fusion 1x1 conv + folded BN + ReLU
    x = jnp.dot(x_ref[0], wf_ref[...], preferred_element_type=jnp.float32)
    x = jnp.maximum(x + bf_ref[...], 0.0)                  # (T, 128)

    for stride, down in block_meta:
        sel_ref = next(it) if stride != 1 else None
        w1_ref, b1_ref = next(it), next(it)
        w2_ref, b2_ref = next(it), next(it)
        if down:
            wd_ref, bd_ref = next(it), next(it)

        xb = x.astype(jnp.bfloat16)
        if stride == 1:
            out1 = _conv1d_3tap(_shift_rows(x, -1), x, _shift_rows(x, +1),
                                w1_ref, b1_ref)
            if down:
                idn = jnp.dot(xb, wd_ref[...],
                              preferred_element_type=jnp.float32) + bd_ref[...]
            else:
                idn = x
        else:
            # stride-2: even/odd rows via tiny per-batch one-hot selectors.
            # TODO(synk): a VMEM scratch + pl.ds(0, OT, stride=2) read would drop
            # even these small matmuls at large T.
            xe = jnp.dot(sel_ref[0], xb, preferred_element_type=jnp.float32)
            xo = jnp.dot(sel_ref[1], xb, preferred_element_type=jnp.float32)
            out1 = _conv1d_3tap(_shift_rows(xo, -1), xe, xo, w1_ref, b1_ref)
            if down:
                idn = jnp.dot(xe.astype(jnp.bfloat16), wd_ref[...],
                              preferred_element_type=jnp.float32) + bd_ref[...]
            else:
                idn = xe
        out1 = jnp.maximum(out1, 0.0)

        out2 = _conv1d_3tap(_shift_rows(out1, -1), out1, _shift_rows(out1, +1),
                            w2_ref, b2_ref)
        x = jnp.maximum(out2 + idn, 0.0)                    # fused residual + ReLU

    # AdaptiveAvgPool1d(1) + Linear(512 -> 1) + Sigmoid
    fcw_ref, fcb_ref = next(it), next(it)
    pooled = jnp.mean(x, axis=0, keepdims=True)             # (1, 512)
    logit = jnp.sum(pooled * fcw_ref[...], axis=-1, keepdims=True) + fcb_ref[...]
    out_ref[0] = jnp.broadcast_to(jax.nn.sigmoid(logit), out_ref.shape[1:])


def _evenodd_select(t_in, t_out):
    """sel[0] selects rows 2i, sel[1] rows 2i+1 (zero rows when out of range)."""
    sel = np.zeros((2, t_out, t_in), np.float32)
    r = np.arange(t_out)
    e, o = 2 * r, 2 * r + 1
    ve, vo = e < t_in, o < t_in
    sel[0, r[ve], e[ve]] = 1.0
    sel[1, r[vo], o[vo]] = 1.0
    return sel


def trunk_forward(params, x_btc):
    B, T, C = x_btc.shape
    Kp = _round_up(C, 128)
    x = jnp.pad(x_btc, ((0, 0), (0, 0), (0, Kp - C))).astype(jnp.bfloat16)

    def cpad(c):
        return max(_round_up(c, 128), 128)

    inputs = [x]
    in_specs = [pl.BlockSpec((1, T, Kp), lambda b: (b, 0, 0))]

    def add_full(arr):
        inputs.append(arr)
        in_specs.append(pl.BlockSpec(arr.shape, lambda b, _n=arr.ndim: (0,) * _n))

    # fusion 1x1 conv, BN folded, channels padded to 128 lanes
    fs, fb = params["fusion_bn"]
    wf = params["fusion_w"][:, :, 0].T * fs[None, :]
    wf = jnp.pad(wf, ((0, Kp - C), (0, cpad(64) - 64)))
    add_full(wf.astype(jnp.bfloat16))
    add_full(jnp.pad(fb, (0, cpad(64) - 64)).reshape(1, -1).astype(jnp.float32))

    block_meta = []
    t, in_c = T, 64
    for lname in ("layer1", "layer2", "layer3", "layer4"):
        for bp in params[lname]:
            s = bp["stride"]
            out_c = bp["conv1_w"].shape[0]
            icp, ocp = cpad(in_c), cpad(out_c)
            t_out = (t + 2 - 3) // s + 1
            down = "down_w" in bp
            block_meta.append((s, down))

            if s != 1:
                add_full(jnp.asarray(_evenodd_select(t, t_out), jnp.bfloat16))

            s1, b1 = bp["bn1"]
            s2_, b2_ = bp["bn2"]
            w1 = jnp.transpose(bp["conv1_w"], (2, 1, 0)) * s1[None, None, :]
            w1 = jnp.pad(w1, ((0, 0), (0, icp - in_c), (0, ocp - out_c)))
            w2 = jnp.transpose(bp["conv2_w"], (2, 1, 0)) * s2_[None, None, :]
            w2 = jnp.pad(w2, ((0, 0), (0, ocp - out_c), (0, ocp - out_c)))
            add_full(w1.astype(jnp.bfloat16))
            add_full(jnp.pad(b1, (0, ocp - out_c)).reshape(1, -1).astype(jnp.float32))
            add_full(w2.astype(jnp.bfloat16))
            add_full(jnp.pad(b2_, (0, ocp - out_c)).reshape(1, -1).astype(jnp.float32))

            if down:
                sd, bd = bp["down_bn"]
                wd = bp["down_w"][:, :, 0].T * sd[None, :]
                wd = jnp.pad(wd, ((0, icp - in_c), (0, ocp - out_c)))
                add_full(wd.astype(jnp.bfloat16))
                add_full(jnp.pad(bd, (0, ocp - out_c)).reshape(1, -1).astype(jnp.float32))

            in_c, t = out_c, t_out

    add_full(params["fc_w"].astype(jnp.float32))            # (1, 512)
    add_full(params["fc_b"].reshape(1, 1).astype(jnp.float32))

    # explicit VMEM budget (v7x physical = 64 MiB; default scoped limit = 32 MiB)
    in_bytes = sum(int(np.prod(a.shape)) * a.dtype.itemsize for a in inputs)
    vmem_limit = int(min(max(4 * in_bytes + (4 << 20), 16 << 20), 64 << 20))

    out = pl.pallas_call(
        functools.partial(_trunk_kernel, block_meta=tuple(block_meta)),
        out_shape=jax.ShapeDtypeStruct((B, 8, 128), jnp.float32),
        grid=(B,),
        in_specs=in_specs,
        out_specs=pl.BlockSpec((1, 8, 128), lambda b: (b, 0, 0)),
        compiler_params=pltpu.CompilerParams(
            dimension_semantics=("parallel",),
            vmem_limit_bytes=vmem_limit),
    )(*inputs)
    return out[:, 0, :1]                                     # (B, 1)


# ----------------------------------------------------------------------------
# Parameter init (deterministic; matches the PyTorch module's __init__ shapes)
# ----------------------------------------------------------------------------
def bn_eval(c):
    gamma = jnp.ones((c,), jnp.float32)
    beta = jnp.zeros((c,), jnp.float32)
    rm = jnp.zeros((c,), jnp.float32)
    rv = jnp.ones((c,), jnp.float32)
    scale = gamma / jnp.sqrt(rv + BN_EPS)
    bias = beta - rm * scale
    return scale, bias


def kaiming(key, shape):  # conv weight (OC, IC, *k), fan_out mode, relu gain
    fan_out = shape[0] * int(math.prod(shape[2:]))
    std = math.sqrt(2.0 / fan_out)
    return std * jax.random.normal(key, shape, jnp.float32)


def linear_w(key, shape):  # (out, in)
    bound = 1.0 / math.sqrt(shape[1])
    return jax.random.uniform(key, shape, jnp.float32, -bound, bound)


def linear_b(key, fan_in, out):
    bound = 1.0 / math.sqrt(fan_in)
    return jax.random.uniform(key, (out,), jnp.float32, -bound, bound)


def init_params(key, state_channels=9, rgb_dim=128, layers=(1, 1, 1, 1)):
    keys = iter(jax.random.split(key, 64))
    nk = lambda: next(keys)

    def enc():
        return dict(
            conv1_w=kaiming(nk(), (32, 3, 7, 7)), bn1=bn_eval(32),
            conv2_w=kaiming(nk(), (64, 32, 3, 3)), bn2=bn_eval(64),
            conv3_w=kaiming(nk(), (128, 64, 3, 3)), bn3=bn_eval(128),
            fc_w=linear_w(nk(), (rgb_dim, 128)), fc_b=linear_b(nk(), 128, rgb_dim),
        )

    p = dict(enc1=enc(), enc2=enc())
    fused = state_channels + 2 * rgb_dim
    p["fusion_w"] = kaiming(nk(), (64, fused, 1))
    p["fusion_bn"] = bn_eval(64)

    in_c = 64
    plan = [(64, layers[0], 1), (128, layers[1], 2), (256, layers[2], 2), (512, layers[3], 2)]
    for li, (out_c, nb, stride) in enumerate(plan, start=1):
        blocks = []
        for b in range(nb):
            s = stride if b == 0 else 1
            bp = dict(
                conv1_w=kaiming(nk(), (out_c, in_c, 3)), bn1=bn_eval(out_c),
                conv2_w=kaiming(nk(), (out_c, out_c, 3)), bn2=bn_eval(out_c),
                stride=s,
            )
            if s != 1 or in_c != out_c:
                bp["down_w"] = kaiming(nk(), (out_c, in_c, 1))
                bp["down_bn"] = bn_eval(out_c)
            blocks.append(bp)
            in_c = out_c
        p[f"layer{li}"] = blocks

    p["fc_w"] = linear_w(nk(), (1, 512))
    p["fc_b"] = linear_b(nk(), 512, 1)
    return p


# ----------------------------------------------------------------------------
# Forward pass
# ----------------------------------------------------------------------------
def model_forward(params, states, rgb1, rgb2):
    # states: (B, state_channels, T) (PyTorch channel-first convention)
    B, Cs, T = states.shape
    r1, r2 = rgb_pair_forward(params["enc1"], params["enc2"], rgb1, rgb2)
    r1 = linear_interp_time(r1, T)
    r2 = linear_interp_time(r2, T)
    s_btc = jnp.transpose(states, (0, 2, 1))
    x = jnp.concatenate([s_btc, r1, r2], axis=-1)            # (B, T, 9+128+128)
    # TODO(synk): nn.Dropout(0.5) in training mode is stochastic; eval-mode identity used.
    return trunk_forward(params, x)                          # (B, 1)


# ----------------------------------------------------------------------------
if __name__ == "__main__":
    key = jax.random.PRNGKey(0)
    kp, ks, k1, k2 = jax.random.split(key, 4)

    params = init_params(kp)

    B, F, H, W, T = 2, 4, 32, 32, 8
    states = jax.random.normal(ks, (B, 9, T), jnp.float32)
    rgb1 = jax.random.normal(k1, (B, F, H, W, 3), jnp.float32)
    rgb2 = jax.random.normal(k2, (B, F, H, W, 3), jnp.float32)

    fwd = jax.jit(lambda s, a, b: model_forward(params, s, a, b))
    out = fwd(states, rgb1, rgb2)
    jax.block_until_ready(out)
    assert out.shape == (B, 1)
    assert bool(jnp.all(jnp.isfinite(out)))
    print("KERNEL_OK")
</pallas_src>

<mosaic_0001>
module attributes {stable_mosaic.version = 11 : i64} {
  func.func @_pair_mm_kernel(%arg0: i32, %arg1: i32, %arg2: memref<1x1024x256xbf16, #tpu.memory_space<vmem>>, %arg3: memref<1x256x128xbf16, #tpu.memory_space<vmem>>, %arg4: memref<1x1x128xf32, #tpu.memory_space<vmem>>, %arg5: memref<1x1x128xf32, #tpu.memory_space<vmem>>, %arg6: memref<1x1024x128xbf16, #tpu.memory_space<vmem>>) attributes {dimension_semantics = [#tpu.dimension_semantics<parallel>, #tpu.dimension_semantics<parallel>], iteration_bounds = array<i64: 2, 2>, scalar_prefetch = 0 : i64, scratch_operands = 0 : i64, tpu.core_type = #tpu.core_type<tc>, window_params = [{transform_indices = @transform_0, window_bounds = array<i64: 1, 1024, 256>}, {transform_indices = @transform_1, window_bounds = array<i64: 1, 256, 128>}, {transform_indices = @transform_2, window_bounds = array<i64: 1, 1, 128>}, {transform_indices = @transform_3, window_bounds = array<i64: 1, 1, 128>}, {transform_indices = @transform_4, window_bounds = array<i64: 1, 1024, 128>}]} {
    %c0 = arith.constant 0 : index
    %c0_0 = arith.constant 0 : index
    %c0_1 = arith.constant 0 : index
    %0 = vector.load %arg2[%c0, %c0_0, %c0_1] : memref<1x1024x256xbf16, #tpu.memory_space<vmem>>, vector<1x1024x256xbf16>
    %1 = vector.shape_cast %0 : vector<1x1024x256xbf16> to vector<1024x256xbf16>
    %c0_2 = arith.constant 0 : index
    %c0_3 = arith.constant 0 : index
    %c0_4 = arith.constant 0 : index
    %2 = vector.load %arg3[%c0_2, %c0_3, %c0_4] : memref<1x256x128xbf16, #tpu.memory_space<vmem>>, vector<1x256x128xbf16>
    %3 = vector.shape_cast %2 : vector<1x256x128xbf16> to vector<256x128xbf16>
    %cst = arith.constant dense<0.000000e+00> : vector<1024x128xf32>
    %4 = tpu.matmul %1, %3, %cst {dimension_numbers = #tpu.dot_dimension_numbers<[1], [0], [0], [1], [0, 0, 1, 1], [], []>} : vector<1024x256xbf16>, vector<256x128xbf16>, vector<1024x128xf32> -> vector<1024x128xf32>
    %c0_5 = arith.constant 0 : index
    %c0_6 = arith.constant 0 : index
    %c0_7 = arith.constant 0 : index
    %5 = vector.load %arg4[%c0_5, %c0_6, %c0_7] : memref<1x1x128xf32, #tpu.memory_space<vmem>>, vector<1x1x128xf32>
    %6 = vector.shape_cast %5 : vector<1x1x128xf32> to vector<1x128xf32>
    %7 = vector.broadcast %6 : vector<1x128xf32> to vector<1024x128xf32>
    %8 = arith.mulf %4, %7 : vector<1024x128xf32>
    %c0_8 = arith.constant 0 : index
    %c0_9 = arith.constant 0 : index
    %c0_10 = arith.constant 0 : index
    %9 = vector.load %arg5[%c0_8, %c0_9, %c0_10] : memref<1x1x128xf32, #tpu.memory_space<vmem>>, vector<1x1x128xf32>
    %10 = vector.shape_cast %9 : vector<1x1x128xf32> to vector<1x128xf32>
    %11 = vector.broadcast %10 : vector<1x128xf32> to vector<1024x128xf32>
    %12 = arith.addf %8, %11 : vector<1024x128xf32>
    %cst_11 = arith.constant 0.000000e+00 : f32
    %13 = vector.broadcast %cst_11 : f32 to vector<1024x128xf32>
    %14 = arith.maximumf %12, %13 : vector<1024x128xf32>
    %15 = arith.truncf %14 : vector<1024x128xf32> to vector<1024x128xbf16>
    %c0_12 = arith.constant 0 : index
    %c0_13 = arith.constant 0 : index
    %c0_14 = arith.constant 0 : index
    %16 = vector.load %arg6[%c0_12, %c0_13, %c0_14] : memref<1x1024x128xbf16, #tpu.memory_space<vmem>>, vector<1x1024x128xbf16>
    %17 = vector.shape_cast %16 : vector<1x1024x128xbf16> to vector<1024x128xbf16>
    %18 = vector.shape_cast %15 : vector<1024x128xbf16> to vector<1x1024x128xbf16>
    tpu.vector_store %arg6[%c0_12, %c0_13, %c0_14], %18 {strides = array<i32>} : memref<1x1024x128xbf16, #tpu.memory_space<vmem>>, vector<1x1024x128xbf16>,
    return
  }
  func.func @transform_0(%arg0: i32, %arg1: i32) -> (i32, i32, i32) {
    %c0_i32 = arith.constant 0 : i32
    %c0_i32_0 = arith.constant 0 : i32
    return %arg0, %arg1, %c0_i32 : i32, i32, i32
  }
  func.func @transform_1(%arg0: i32, %arg1: i32) -> (i32, i32, i32) {
    %c0_i32 = arith.constant 0 : i32
    %c0_i32_0 = arith.constant 0 : i32
    %c0_i32_1 = arith.constant 0 : i32
    return %arg0, %c0_i32, %c0_i32_0 : i32, i32, i32
  }
  func.func @transform_2(%arg0: i32, %arg1: i32) -> (i32, i32, i32) {
    %c0_i32 = arith.constant 0 : i32
    %c0_i32_0 = arith.constant 0 : i32
    %c0_i32_1 = arith.constant 0 : i32
    return %arg0, %c0_i32, %c0_i32_0 : i32, i32, i32
  }
  func.func @transform_3(%arg0: i32, %arg1: i32) -> (i32, i32, i32) {
    %c0_i32 = arith.constant 0 : i32
    %c0_i32_0 = arith.constant 0 : i32
    %c0_i32_1 = arith.constant 0 : i32
    return %arg0, %c0_i32, %c0_i32_0 : i32, i32, i32
  }
  func.func @transform_4(%arg0: i32, %arg1: i32) -> (i32, i32, i32) {
    %c0_i32 = arith.constant 0 : i32
    %c0_i32_0 = arith.constant 0 : i32
    return %arg0, %arg1, %c0_i32 : i32, i32, i32
  }
}

module attributes {stable_mosaic.version = 11 : i64} {
  func.func @_enc_tail_kernel(%arg0: i32, %arg1: i32, %arg2: memref<1x128x1152xbf16, #tpu.memory_space<vmem>>, %arg3: memref<1x1152x128xbf16, #tpu.memory_space<vmem>>, %arg4: memref<1x1x128xf32, #tpu.memory_space<vmem>>, %arg5: memref<9x32x128xbf16, #tpu.memory_space<vmem>>, %arg6: memref<1x9x128x128xbf16, #tpu.memory_space<vmem>>, %arg7: memref<1x1x128xf32, #tpu.memory_space<vmem>>, %arg8: memref<8x32xf32, #tpu.memory_space<vmem>>, %arg9: memref<1x128x128xbf16, #tpu.memory_space<vmem>>, %arg10: memref<1x1x128xf32, #tpu.memory_space<vmem>>, %arg11: memref<1x8x128xf32, #tpu.memory_space<vmem>>) attributes {dimension_semantics = [#tpu.dimension_semantics<parallel>, #tpu.dimension_semantics<parallel>], iteration_bounds = array<i64: 2, 1>, scalar_prefetch = 0 : i64, scratch_operands = 0 : i64, tpu.core_type = #tpu.core_type<tc>, window_params = [{transform_indices = @transform_0, window_bounds = array<i64: 1, 128, 1152>}, {transform_indices = @transform_1, window_bounds = array<i64: 1, 1152, 128>}, {transform_indices = @transform_2, window_bounds = array<i64: 1, 1, 128>}, {pipeline_mode = #tpu.pipeline_mode<synchronous>, transform_indices = @transform_3, window_bounds = array<i64: 9, 32, 128>}, {transform_indices = @transform_4, window_bounds = array<i64: 1, 9, 128, 128>}, {transform_indices = @transform_5, window_bounds = array<i64: 1, 1, 128>}, {pipeline_mode = #tpu.pipeline_mode<synchronous>, transform_indices = @transform_6, window_bounds = array<i64: 8, 32>}, {transform_indices = @transform_7, window_bounds = array<i64: 1, 128, 128>}, {transform_indices = @transform_8, window_bounds = array<i64: 1, 1, 128>}, {transform_indices = @transform_9, window_bounds = array<i64: 1, 8, 128>}]} {
    %c0 = arith.constant 0 : index
    %c0_0 = arith.constant 0 : index
    %c0_1 = arith.constant 0 : index
    %0 = vector.load %arg2[%c0, %c0_0, %c0_1] : memref<1x128x1152xbf16, #tpu.memory_space<vmem>>, vector<1x128x1152xbf16>
    %1 = vector.shape_cast %0 : vector<1x128x1152xbf16> to vector<128x1152xbf16>
    %c0_2 = arith.constant 0 : index
    %c0_3 = arith.constant 0 : index
    %c0_4 = arith.constant 0 : index
    %2 = vector.load %arg3[%c0_2, %c0_3, %c0_4] : memref<1x1152x128xbf16, #tpu.memory_space<vmem>>, vector<1x1152x128xbf16>
    %3 = vector.shape_cast %2 : vector<1x1152x128xbf16> to vector<1152x128xbf16>
    %cst = arith.constant dense<0.000000e+00> : vector<128x128xf32>
    %4 = tpu.matmul %1, %3, %cst {dimension_numbers = #tpu.dot_dimension_numbers<[1], [0], [0], [1], [0, 0, 1, 1], [], []>} : vector<128x1152xbf16>, vector<1152x128xbf16>, vector<128x128xf32> -> vector<128x128xf32>
    %c0_5 = arith.constant 0 : index
    %c0_6 = arith.constant 0 : index
    %c0_7 = arith.constant 0 : index
    %5 = vector.load %arg4[%c0_5, %c0_6, %c0_7] : memref<1x1x128xf32, #tpu.memory_space<vmem>>, vector<1x1x128xf32>
    %6 = vector.shape_cast %5 : vector<1x1x128xf32> to vector<1x128xf32>
    %7 = vector.broadcast %6 : vector<1x128xf32> to vector<128x128xf32>
    %8 = arith.addf %4, %7 : vector<128x128xf32>
    %cst_8 = arith.constant 0.000000e+00 : f32
    %9 = vector.broadcast %cst_8 : f32 to vector<128x128xf32>
    %10 = arith.maximumf %8, %9 : vector<128x128xf32>
    %11 = arith.truncf %10 : vector<128x128xf32> to vector<128x128xbf16>
    %c0_9 = arith.constant 0 : index
    %c0_10 = arith.constant 0 : index
    %c0_11 = arith.constant 0 : index
    %12 = vector.load %arg7[%c0_9, %c0_10, %c0_11] : memref<1x1x128xf32, #tpu.memory_space<vmem>>, vector<1x1x128xf32>
    %13 = vector.shape_cast %12 : vector<1x1x128xf32> to vector<1x128xf32>
    %c0_12 = arith.constant 0 : index
    %c0_13 = arith.constant 0 : index
    %c0_14 = arith.constant 0 : index
    %14 = vector.load %arg5[%c0_12, %c0_13, %c0_14] : memref<9x32x128xbf16, #tpu.memory_space<vmem>>, vector<1x32x128xbf16>
    %15 = vector.shape_cast %14 : vector<1x32x128xbf16> to vector<32x128xbf16>
    %cst_15 = arith.constant dense<0.000000e+00> : vector<32x128xf32>
    %16 = tpu.matmul %15, %11, %cst_15 {dimension_numbers = #tpu.dot_dimension_numbers<[1], [0], [0], [1], [0, 0, 1, 1], [], []>} : vector<32x128xbf16>, vector<128x128xbf16>, vector<32x128xf32> -> vector<32x128xf32>
    %17 = arith.truncf %16 : vector<32x128xf32> to vector<32x128xbf16>
    %c0_16 = arith.constant 0 : index
    %c0_17 = arith.constant 0 : index
    %c0_18 = arith.constant 0 : index
    %c0_19 = arith.constant 0 : index
    %18 = vector.load %arg6[%c0_16, %c0_17, %c0_18, %c0_19] : memref<1x9x128x128xbf16, #tpu.memory_space<vmem>>, vector<1x1x128x128xbf16>
    %19 = vector.shape_cast %18 : vector<1x1x128x128xbf16> to vector<128x128xbf16>
    %cst_20 = arith.constant dense<0.000000e+00> : vector<32x128xf32>
    %20 = tpu.matmul %17, %19, %cst_20 {dimension_numbers = #tpu.dot_dimension_numbers<[1], [0], [0], [1], [0, 0, 1, 1], [], []>} : vector<32x128xbf16>, vector<128x128xbf16>, vector<32x128xf32> -> vector<32x128xf32>
    %21 = vector.broadcast %13 : vector<1x128xf32> to vector<32x128xf32>
    %22 = arith.addf %21, %20 : vector<32x128xf32>
    %c1 = arith.constant 1 : index
    %c0_21 = arith.constant 0 : index
    %c0_22 = arith.constant 0 : index
    %23 = vector.load %arg5[%c1, %c0_21, %c0_22] : memref<9x32x128xbf16, #tpu.memory_space<vmem>>, vector<1x32x128xbf16>
    %24 = vector.shape_cast %23 : vector<1x32x128xbf16> to vector<32x128xbf16>
    %cst_23 = arith.constant dense<0.000000e+00> : vector<32x128xf32>
    %25 = tpu.matmul %24, %11, %cst_23 {dimension_numbers = #tpu.dot_dimension_numbers<[1], [0], [0], [1], [0, 0, 1, 1], [], []>} : vector<32x128xbf16>, vector<128x128xbf16>, vector<32x128xf32> -> vector<32x128xf32>
    %26 = arith.truncf %25 : vector<32x128xf32> to vector<32x128xbf16>
    %c0_24 = arith.constant 0 : index
    %c1_25 = arith.constant 1 : index
    %c0_26 = arith.constant 0 : index
    %c0_27 = arith.constant 0 : index
    %27 = vector.load %arg6[%c0_24, %c1_25, %c0_26, %c0_27] : memref<1x9x128x128xbf16, #tpu.memory_space<vmem>>, vector<1x1x128x128xbf16>
    %28 = vector.shape_cast %27 : vector<1x1x128x128xbf16> to vector<128x128xbf16>
    %cst_28 = arith.constant dense<0.000000e+00> : vector<32x128xf32>
    %29 = tpu.matmul %26, %28, %cst_28 {dimension_numbers = #tpu.dot_dimension_numbers<[1], [0], [0], [1], [0, 0, 1, 1], [], []>} : vector<32x128xbf16>, vector<128x128xbf16>, vector<32x128xf32> -> vector<32x128xf32>
    %30 = arith.addf %22, %29 : vector<32x128xf32>
    %c2 = arith.constant 2 : index
    %c0_29 = arith.constant 0 : index
    %c0_30 = arith.constant 0 : index
    %31 = vector.load %arg5[%c2, %c0_29, %c0_30] : memref<9x32x128xbf16, #tpu.memory_space<vmem>>, vector<1x32x128xbf16>
    %32 = vector.shape_cast %31 : vector<1x32x128xbf16> to vector<32x128xbf16>
    %cst_31 = arith.constant dense<0.000000e+00> : vector<32x128xf32>
    %33 = tpu.matmul %32, %11, %cst_31 {dimension_numbers = #tpu.dot_dimension_numbers<[1], [0], [0], [1], [0, 0, 1, 1], [], []>} : vector<32x128xbf16>, vector<128x128xbf16>, vector<32x128xf32> -> vector<32x128xf32>
    %34 = arith.truncf %33 : vector<32x128xf32> to vector<32x128xbf16>
    %c0_32 = arith.constant 0 : index
    %c2_33 = arith.constant 2 : index
    %c0_34 = arith.constant 0 : index
    %c0_35 = arith.constant 0 : index
    %35 = vector.load %arg6[%c0_32, %c2_33, %c0_34, %c0_35] : memref<1x9x128x128xbf16, #tpu.memory_space<vmem>>, vector<1x1x128x128xbf16>
    %36 = vector.shape_cast %35 : vector<1x1x128x128xbf16> to vector<128x128xbf16>
    %cst_36 = arith.constant dense<0.000000e+00> : vector<32x128xf32>
    %37 = tpu.matmul %34, %36, %cst_36 {dimension_numbers = #tpu.dot_dimension_numbers<[1], [0], [0], [1], [0, 0, 1, 1], [], []>} : vector<32x128xbf16>, vector<128x128xbf16>, vector<32x128xf32> -> vector<32x128xf32>
    %38 = arith.addf %30, %37 : vector<32x128xf32>
    %c3 = arith.constant 3 : index
    %c0_37 = arith.constant 0 : index
    %c0_38 = arith.constant 0 : index
    %39 = vector.load %arg5[%c3, %c0_37, %c0_38] : memref<9x32x128xbf16, #tpu.memory_space<vmem>>, vector<1x32x128xbf16>
    %40 = vector.shape_cast %39 : vector<1x32x128xbf16> to vector<32x128xbf16>
    %cst_39 = arith.constant dense<0.000000e+00> : vector<32x128xf32>
    %41 = tpu.matmul %40, %11, %cst_39 {dimension_numbers = #tpu.dot_dimension_numbers<[1], [0], [0], [1], [0, 0, 1, 1], [], []>} : vector<32x128xbf16>, vector<128x128xbf16>, vector<32x128xf32> -> vector<32x128xf32>
    %42 = arith.truncf %41 : vector<32x128xf32> to vector<32x128xbf16>
    %c0_40 = arith.constant 0 : index
    %c3_41 = arith.constant 3 : index
    %c0_42 = arith.constant 0 : index
    %c0_43 = arith.constant 0 : index
    %43 = vector.load %arg6[%c0_40, %c3_41, %c0_42, %c0_43] : memref<1x9x128x128xbf16, #tpu.memory_space<vmem>>, vector<1x1x128x128xbf16>
    %44 = vector.shape_cast %43 : vector<1x1x128x128xbf16> to vector<128x128xbf16>
    %cst_44 = arith.constant dense<0.000000e+00> : vector<32x128xf32>
    %45 = tpu.matmul %42, %44, %cst_44 {dimension_numbers = #tpu.dot_dimension_numbers<[1], [0], [0], [1], [0, 0, 1, 1], [], []>} : vector<32x128xbf16>, vector<128x128xbf16>, vector<32x128xf32> -> vector<32x128xf32>
    %46 = arith.addf %38, %45 : vector<32x128xf32>
    %c4 = arith.constant 4 : index
    %c0_45 = arith.constant 0 : index
    %c0_46 = arith.constant 0 : index
    %47 = vector.load %arg5[%c4, %c0_45, %c0_46] : memref<9x32x128xbf16, #tpu.memory_space<vmem>>, vector<1x32x128xbf16>
    %48 = vector.shape_cast %47 : vector<1x32x128xbf16> to vector<32x128xbf16>
    %cst_47 = arith.constant dense<0.000000e+00> : vector<32x128xf32>
    %49 = tpu.matmul %48, %11, %cst_47 {dimension_numbers = #tpu.dot_dimension_numbers<[1], [0], [0], [1], [0, 0, 1, 1], [], []>} : vector<32x128xbf16>, vector<128x128xbf16>, vector<32x128xf32> -> vector<32x128xf32>
    %50 = arith.truncf %49 : vector<32x128xf32> to vector<32x128xbf16>
    %c0_48 = arith.constant 0 : index
    %c4_49 = arith.constant 4 : index
    %c0_50 = arith.constant 0 : index
    %c0_51 = arith.constant 0 : index
    %51 = vector.load %arg6[%c0_48, %c4_49, %c0_50, %c0_51] : memref<1x9x128x128xbf16, #tpu.memory_space<vmem>>, vector<1x1x128x128xbf16>
    %52 = vector.shape_cast %51 : vector<1x1x128x128xbf16> to vector<128x128xbf16>
    %cst_52 = arith.constant dense<0.000000e+00> : vector<32x128xf32>
    %53 = tpu.matmul %50, %52, %cst_52 {dimension_numbers = #tpu.dot_dimension_numbers<[1], [0], [0], [1], [0, 0, 1, 1], [], []>} : vector<32x128xbf16>, vector<128x128xbf16>, vector<32x128xf32> -> vector<32x128xf32>
    %54 = arith.addf %46, %53 : vector<32x128xf32>
    %c5 = arith.constant 5 : index
    %c0_53 = arith.constant 0 : index
    %c0_54 = arith.constant 0 : index
    %55 = vector.load %arg5[%c5, %c0_53, %c0_54] : memref<9x32x128xbf16, #tpu.memory_space<vmem>>, vector<1x32x128xbf16>
    %56 = vector.shape_cast %55 : vector<1x32x128xbf16> to vector<32x128xbf16>
    %cst_55 = arith.constant dense<0.000000e+00> : vector<32x128xf32>
    %57 = tpu.matmul %56, %11, %cst_55 {dimension_numbers = #tpu.dot_dimension_numbers<[1], [0], [0], [1], [0, 0, 1, 1], [], []>} : vector<32x128xbf16>, vector<128x128xbf16>, vector<32x128xf32> -> vector<32x128xf32>
    %58 = arith.truncf %57 : vector<32x128xf32> to vector<32x128xbf16>
    %c0_56 = arith.constant 0 : index
    %c5_57 = arith.constant 5 : index
    %c0_58 = arith.constant 0 : index
    %c0_59 = arith.constant 0 : index
    %59 = vector.load %arg6[%c0_56, %c5_57, %c0_58, %c0_59] : memref<1x9x128x128xbf16, #tpu.memory_space<vmem>>, vector<1x1x128x128xbf16>
    %60 = vector.shape_cast %59 : vector<1x1x128x128xbf16> to vector<128x128xbf16>
    %cst_60 = arith.constant dense<0.000000e+00> : vector<32x128xf32>
    %61 = tpu.matmul %58, %60, %cst_60 {dimension_numbers = #tpu.dot_dimension_numbers<[1], [0], [0], [1], [0, 0, 1, 1], [], []>} : vector<32x128xbf16>, vector<128x128xbf16>, vector<32x128xf32> -> vector<32x128xf32>
    %62 = arith.addf %54, %61 : vector<32x128xf32>
    %c6 = arith.constant 6 : index
    %c0_61 = arith.constant 0 : index
    %c0_62 = arith.constant 0 : index
    %63 = vector.load %arg5[%c6, %c0_61, %c0_62] : memref<9x32x128xbf16, #tpu.memory_space<vmem>>, vector<1x32x128xbf16>
    %64 = vector.shape_cast %63 : vector<1x32x128xbf16> to vector<32x128xbf16>
    %cst_63 = arith.constant dense<0.000000e+00> : vector<32x128xf32>
    %65 = tpu.matmul %64, %11, %cst_63 {dimension_numbers = #tpu.dot_dimension_numbers<[1], [0], [0], [1], [0, 0, 1, 1], [], []>} : vector<32x128xbf16>, vector<128x128xbf16>, vector<32x128xf32> -> vector<32x128xf32>
    %66 = arith.truncf %65 : vector<32x128xf32> to vector<32x128xbf16>
    %c0_64 = arith.constant 0 : index
    %c6_65 = arith.constant 6 : index
    %c0_66 = arith.constant 0 : index
    %c0_67 = arith.constant 0 : index
    %67 = vector.load %arg6[%c0_64, %c6_65, %c0_66, %c0_67] : memref<1x9x128x128xbf16, #tpu.memory_space<vmem>>, vector<1x1x128x128xbf16>
    %68 = vector.shape_cast %67 : vector<1x1x128x128xbf16> to vector<128x128xbf16>
    %cst_68 = arith.constant dense<0.000000e+00> : vector<32x128xf32>
    %69 = tpu.matmul %66, %68, %cst_68 {dimension_numbers = #tpu.dot_dimension_numbers<[1], [0], [0], [1], [0, 0, 1, 1], [], []>} : vector<32x128xbf16>, vector<128x128xbf16>, vector<32x128xf32> -> vector<32x128xf32>
    %70 = arith.addf %62, %69 : vector<32x128xf32>
    %c7 = arith.constant 7 : index
    %c0_69 = arith.constant 0 : index
    %c0_70 = arith.constant 0 : index
    %71 = vector.load %arg5[%c7, %c0_69, %c0_70] : memref<9x32x128xbf16, #tpu.memory_space<vmem>>, vector<1x32x128xbf16>
    %72 = vector.shape_cast %71 : vector<1x32x128xbf16> to vector<32x128xbf16>
    %cst_71 = arith.constant dense<0.000000e+00> : vector<32x128xf32>
    %73 = tpu.matmul %72, %11, %cst_71 {dimension_numbers = #tpu.dot_dimension_numbers<[1], [0], [0], [1], [0, 0, 1, 1], [], []>} : vector<32x128xbf16>, vector<128x128xbf16>, vector<32x128xf32> -> vector<32x128xf32>
    %74 = arith.truncf %73 : vector<32x128xf32> to vector<32x128xbf16>
    %c0_72 = arith.constant 0 : index
    %c7_73 = arith.constant 7 : index
    %c0_74 = arith.constant 0 : index
    %c0_75 = arith.constant 0 : index
    %75 = vector.load %arg6[%c0_72, %c7_73, %c0_74, %c0_75] : memref<1x9x128x128xbf16, #tpu.memory_space<vmem>>, vector<1x1x128x128xbf16>
    %76 = vector.shape_cast %75 : vector<1x1x128x128xbf16> to vector<128x128xbf16>
    %cst_76 = arith.constant dense<0.000000e+00> : vector<32x128xf32>
    %77 = tpu.matmul %74, %76, %cst_76 {dimension_numbers = #tpu.dot_dimension_numbers<[1], [0], [0], [1], [0, 0, 1, 1], [], []>} : vector<32x128xbf16>, vector<128x128xbf16>, vector<32x128xf32> -> vector<32x128xf32>
    %78 = arith.addf %70, %77 : vector<32x128xf32>
    %c8 = arith.constant 8 : index
    %c0_77 = arith.constant 0 : index
    %c0_78 = arith.constant 0 : index
    %79 = vector.load %arg5[%c8, %c0_77, %c0_78] : memref<9x32x128xbf16, #tpu.memory_space<vmem>>, vector<1x32x128xbf16>
    %80 = vector.shape_cast %79 : vector<1x32x128xbf16> to vector<32x128xbf16>
    %cst_79 = arith.constant dense<0.000000e+00> : vector<32x128xf32>
    %81 = tpu.matmul %80, %11, %cst_79 {dimension_numbers = #tpu.dot_dimension_numbers<[1], [0], [0], [1], [0, 0, 1, 1], [], []>} : vector<32x128xbf16>, vector<128x128xbf16>, vector<32x128xf32> -> vector<32x128xf32>
    %82 = arith.truncf %81 : vector<32x128xf32> to vector<32x128xbf16>
    %c0_80 = arith.constant 0 : index
    %c8_81 = arith.constant 8 : index
    %c0_82 = arith.constant 0 : index
    %c0_83 = arith.constant 0 : index
    %83 = vector.load %arg6[%c0_80, %c8_81, %c0_82, %c0_83] : memref<1x9x128x128xbf16, #tpu.memory_space<vmem>>, vector<1x1x128x128xbf16>
    %84 = vector.shape_cast %83 : vector<1x1x128x128xbf16> to vector<128x128xbf16>
    %cst_84 = arith.constant dense<0.000000e+00> : vector<32x128xf32>
    %85 = tpu.matmul %82, %84, %cst_84 {dimension_numbers = #tpu.dot_dimension_numbers<[1], [0], [0], [1], [0, 0, 1, 1], [], []>} : vector<32x128xbf16>, vector<128x128xbf16>, vector<32x128xf32> -> vector<32x128xf32>
    %86 = arith.addf %78, %85 : vector<32x128xf32>
    %cst_85 = arith.constant 0.000000e+00 : f32
    %87 = vector.broadcast %cst_85 : f32 to vector<32x128xf32>
    %88 = arith.maximumf %86, %87 : vector<32x128xf32>
    %c0_86 = arith.constant 0 : index
    %c0_87 = arith.constant 0 : index
    %89 = vector.load %arg8[%c0_86, %c0_87] : memref<8x32xf32, #tpu.memory_space<vmem>>, vector<8x32xf32>
    %cst_88 = arith.constant dense<0.000000e+00> : vector<8x128xf32>
    %90 = tpu.matmul %89, %88, %cst_88 {dimension_numbers = #tpu.dot_dimension_numbers<[1], [0], [0], [1], [0, 0, 1, 1], [], []>} : vector<8x32xf32>, vector<32x128xf32>, vector<8x128xf32> -> vector<8x128xf32>
    %91 = arith.truncf %90 : vector<8x128xf32> to vector<8x128xbf16>
    %c0_89 = arith.constant 0 : index
    %c0_90 = arith.constant 0 : index
    %c0_91 = arith.constant 0 : index
    %92 = vector.load %arg9[%c0_89, %c0_90, %c0_91] : memref<1x128x128xbf16, #tpu.memory_space<vmem>>, vector<1x128x128xbf16>
    %93 = vector.shape_cast %92 : vector<1x128x128xbf16> to vector<128x128xbf16>
    %cst_92 = arith.constant dense<0.000000e+00> : vector<8x128xf32>
    %94 = tpu.matmul %91, %93, %cst_92 {dimension_numbers = #tpu.dot_dimension_numbers<[1], [0], [0], [1], [0, 0, 1, 1], [], []>} : vector<8x128xbf16>, vector<128x128xbf16>, vector<8x128xf32> -> vector<8x128xf32>
    %c0_93 = arith.constant 0 : index
    %c0_94 = arith.constant 0 : index
    %c0_95 = arith.constant 0 : index
    %95 = vector.load %arg10[%c0_93, %c0_94, %c0_95] : memref<1x1x128xf32, #tpu.memory_space<vmem>>, vector<1x1x128xf32>
    %96 = vector.shape_cast %95 : vector<1x1x128xf32> to vector<1x128xf32>
    %97 = vector.broadcast %96 : vector<1x128xf32> to vector<8x128xf32>
    %98 = arith.addf %94, %97 : vector<8x128xf32>
    %c0_96 = arith.constant 0 : index
    %c0_97 = arith.constant 0 : index
    %c0_98 = arith.constant 0 : index
    %99 = vector.load %arg11[%c0_96, %c0_97, %c0_98] : memref<1x8x128xf32, #tpu.memory_space<vmem>>, vector<1x8x128xf32>
    %100 = vector.shape_cast %99 : vector<1x8x128xf32> to vector<8x128xf32>
    %101 = vector.shape_cast %98 : vector<8x128xf32> to vector<1x8x128xf32>
    tpu.vector_store %arg11[%c0_96, %c0_97, %c0_98], %101 {strides = array<i32>} : memref<1x8x128xf32, #tpu.memory_space<vmem>>, vector<1x8x128xf32>,
    return
  }
  func.func @transform_0(%arg0: i32, %arg1: i32) -> (i32, i32, i32) {
    %c0_i32 = arith.constant 0 : i32
    %c0_i32_0 = arith.constant 0 : i32
    return %arg0, %arg1, %c0_i32 : i32, i32, i32
  }
  func.func @transform_1(%arg0: i32, %arg1: i32) -> (i32, i32, i32) {
    %c0_i32 = arith.constant 0 : i32
    %c0_i32_0 = arith.constant 0 : i32
    %c0_i32_1 = arith.constant 0 : i32
    return %arg0, %c0_i32, %c0_i32_0 : i32, i32, i32
  }
  func.func @transform_2(%arg0: i32, %arg1: i32) -> (i32, i32, i32) {
    %c0_i32 = arith.constant 0 : i32
    %c0_i32_0 = arith.constant 0 : i32
    %c0_i32_1 = arith.constant 0 : i32
    return %arg0, %c0_i32, %c0_i32_0 : i32, i32, i32
  }
  func.func @transform_3(%arg0: i32, %arg1: i32) -> (i32, i32, i32) {
    %c0_i32 = arith.constant 0 : i32
    %c0_i32_0 = arith.constant 0 : i32
    %c0_i32_1 = arith.constant 0 : i32
    %c0_i32_2 = arith.constant 0 : i32
    return %c0_i32, %c0_i32_0, %c0_i32_1 : i32, i32, i32
  }
  func.func @transform_4(%arg0: i32, %arg1: i32) -> (i32, i32, i32, i32) {
    %c0_i32 = arith.constant 0 : i32
    %c0_i32_0 = arith.constant 0 : i32
    %c0_i32_1 = arith.constant 0 : i32
    %c0_i32_2 = arith.constant 0 : i32
    return %arg0, %c0_i32, %c0_i32_0, %c0_i32_1 : i32, i32, i32, i32
  }
  func.func @transform_5(%arg0: i32, %arg1: i32) -> (i32, i32, i32) {
    %c0_i32 = arith.constant 0 : i32
    %c0_i32_0 = arith.constant 0 : i32
    %c0_i32_1 = arith.constant 0 : i32
    return %arg0, %c0_i32, %c0_i32_0 : i32, i32, i32
  }
  func.func @transform_6(%arg0: i32, %arg1: i32) -> (i32, i32) {
    %c0_i32 = arith.constant 0 : i32
    %c0_i32_0 = arith.constant 0 : i32
    %c0_i32_1 = arith.constant 0 : i32
    return %c0_i32, %c0_i32_0 : i32, i32
  }
  func.func @transform_7(%arg0: i32, %arg1: i32) -> (i32, i32, i32) {
    %c0_i32 = arith.constant 0 : i32
    %c0_i32_0 = arith.constant 0 : i32
    %c0_i32_1 = arith.constant 0 : i32
    return %arg0, %c0_i32, %c0_i32_0 : i32, i32, i32
  }
  func.func @transform_8(%arg0: i32, %arg1: i32) -> (i32, i32, i32) {
    %c0_i32 = arith.constant 0 : i32
    %c0_i32_0 = arith.constant 0 : i32
    %c0_i32_1 = arith.constant 0 : i32
    return %arg0, %c0_i32, %c0_i32_0 : i32, i32, i32
  }
  func.func @transform_9(%arg0: i32, %arg1: i32) -> (i32, i32, i32) {
    %c0_i32 = arith.constant 0 : i32
    %c0_i32_0 = arith.constant 0 : i32
    return %arg0, %arg1, %c0_i32 : i32, i32, i32
  }
}

module attributes {stable_mosaic.version = 11 : i64} {
  func.func @_trunk_kernel(%arg0: i32, %arg1: memref<1x8x384xbf16, #tpu.memory_space<vmem>>, %arg2: memref<384x128xbf16, #tpu.memory_space<vmem>>, %arg3: memref<1x128xf32, #tpu.memory_space<vmem>>, %arg4: memref<3x128x128xbf16, #tpu.memory_space<vmem>>, %arg5: memref<1x128xf32, #tpu.memory_space<vmem>>, %arg6: memref<3x128x128xbf16, #tpu.memory_space<vmem>>, %arg7: memref<1x128xf32, #tpu.memory_space<vmem>>, %arg8: memref<2x4x8xbf16, #tpu.memory_space<vmem>>, %arg9: memref<3x128x128xbf16, #tpu.memory_space<vmem>>, %arg10: memref<1x128xf32, #tpu.memory_space<vmem>>, %arg11: memref<3x128x128xbf16, #tpu.memory_space<vmem>>, %arg12: memref<1x128xf32, #tpu.memory_space<vmem>>, %arg13: memref<128x128xbf16, #tpu.memory_space<vmem>>, %arg14: memref<1x128xf32, #tpu.memory_space<vmem>>, %arg15: memref<2x2x4xbf16, #tpu.memory_space<vmem>>, %arg16: memref<3x128x256xbf16, #tpu.memory_space<vmem>>, %arg17: memref<1x256xf32, #tpu.memory_space<vmem>>, %arg18: memref<3x256x256xbf16, #tpu.memory_space<vmem>>, %arg19: memref<1x256xf32, #tpu.memory_space<vmem>>, %arg20: memref<128x256xbf16, #tpu.memory_space<vmem>>, %arg21: memref<1x256xf32, #tpu.memory_space<vmem>>, %arg22: memref<2x1x2xbf16, #tpu.memory_space<vmem>>, %arg23: memref<3x256x512xbf16, #tpu.memory_space<vmem>>, %arg24: memref<1x512xf32, #tpu.memory_space<vmem>>, %arg25: memref<3x512x512xbf16, #tpu.memory_space<vmem>>, %arg26: memref<1x512xf32, #tpu.memory_space<vmem>>, %arg27: memref<256x512xbf16, #tpu.memory_space<vmem>>, %arg28: memref<1x512xf32, #tpu.memory_space<vmem>>, %arg29: memref<1x512xf32, #tpu.memory_space<vmem>>, %arg30: memref<1x1xf32, #tpu.memory_space<vmem>>, %arg31: memref<1x8x128xf32, #tpu.memory_space<vmem>>) attributes {dimension_semantics = [#tpu.dimension_semantics<parallel>], iteration_bounds = array<i64: 2>, scalar_prefetch = 0 : i64, scratch_operands = 0 : i64, tpu.core_type = #tpu.core_type<tc>, window_params = [{transform_indices = @transform_0, window_bounds = array<i64: 1, 8, 384>}, {pipeline_mode = #tpu.pipeline_mode<synchronous>, transform_indices = @transform_1, window_bounds = array<i64: 384, 128>}, {pipeline_mode = #tpu.pipeline_mode<synchronous>, transform_indices = @transform_2, window_bounds = array<i64: 1, 128>}, {pipeline_mode = #tpu.pipeline_mode<synchronous>, transform_indices = @transform_3, window_bounds = array<i64: 3, 128, 128>}, {pipeline_mode = #tpu.pipeline_mode<synchronous>, transform_indices = @transform_4, window_bounds = array<i64: 1, 128>}, {pipeline_mode = #tpu.pipeline_mode<synchronous>, transform_indices = @transform_5, window_bounds = array<i64: 3, 128, 128>}, {pipeline_mode = #tpu.pipeline_mode<synchronous>, transform_indices = @transform_6, window_bounds = array<i64: 1, 128>}, {pipeline_mode = #tpu.pipeline_mode<synchronous>, transform_indices = @transform_7, window_bounds = array<i64: 2, 4, 8>}, {pipeline_mode = #tpu.pipeline_mode<synchronous>, transform_indices = @transform_8, window_bounds = array<i64: 3, 128, 128>}, {pipeline_mode = #tpu.pipeline_mode<synchronous>, transform_indices = @transform_9, window_bounds = array<i64: 1, 128>}, {pipeline_mode = #tpu.pipeline_mode<synchronous>, transform_indices = @transform_10, window_bounds = array<i64: 3, 128, 128>}, {pipeline_mode = #tpu.pipeline_mode<synchronous>, transform_indices = @transform_11, window_bounds = array<i64: 1, 128>}, {pipeline_mode = #tpu.pipeline_mode<synchronous>, transform_indices = @transform_12, window_bounds = array<i64: 128, 128>}, {pipeline_mode = #tpu.pipeline_mode<synchronous>, transform_indices = @transform_13, window_bounds = array<i64: 1, 128>}, {pipeline_mode = #tpu.pipeline_mode<synchronous>, transform_indices = @transform_14, window_bounds = array<i64: 2, 2, 4>}, {pipeline_mode = #tpu.pipeline_mode<synchronous>, transform_indices = @transform_15, window_bounds = array<i64: 3, 128, 256>}, {pipeline_mode = #tpu.pipeline_mode<synchronous>, transform_indices = @transform_16, window_bounds = array<i64: 1, 256>}, {pipeline_mode = #tpu.pipeline_mode<synchronous>, transform_indices = @transform_17, window_bounds = array<i64: 3, 256, 256>}, {pipeline_mode = #tpu.pipeline_mode<synchronous>, transform_indices = @transform_18, window_bounds = array<i64: 1, 256>}, {pipeline_mode = #tpu.pipeline_mode<synchronous>, transform_indices = @transform_19, window_bounds = array<i64: 128, 256>}, {pipeline_mode = #tpu.pipeline_mode<synchronous>, transform_indices = @transform_20, window_bounds = array<i64: 1, 256>}, {pipeline_mode = #tpu.pipeline_mode<synchronous>, transform_indices = @transform_21, window_bounds = array<i64: 2, 1, 2>}, {pipeline_mode = #tpu.pipeline_mode<synchronous>, transform_indices = @transform_22, window_bounds = array<i64: 3, 256, 512>}, {pipeline_mode = #tpu.pipeline_mode<synchronous>, transform_indices = @transform_23, window_bounds = array<i64: 1, 512>}, {pipeline_mode = #tpu.pipeline_mode<synchronous>, transform_indices = @transform_24, window_bounds = array<i64: 3, 512, 512>}, {pipeline_mode = #tpu.pipeline_mode<synchronous>, transform_indices = @transform_25, window_bounds = array<i64: 1, 512>}, {pipeline_mode = #tpu.pipeline_mode<synchronous>, transform_indices = @transform_26, window_bounds = array<i64: 256, 512>}, {pipeline_mode = #tpu.pipeline_mode<synchronous>, transform_indices = @transform_27, window_bounds = array<i64: 1, 512>}, {pipeline_mode = #tpu.pipeline_mode<synchronous>, transform_indices = @transform_28, window_bounds = array<i64: 1, 512>}, {pipeline_mode = #tpu.pipeline_mode<synchronous>, transform_indices = @transform_29, window_bounds = array<i64: 1, 1>}, {transform_indices = @transform_30, window_bounds = array<i64: 1, 8, 128>}]} {
    %c0 = arith.constant 0 : index
    %c0_0 = arith.constant 0 : index
    %c0_1 = arith.constant 0 : index
    %0 = vector.load %arg1[%c0, %c0_0, %c0_1] : memref<1x8x384xbf16, #tpu.memory_space<vmem>>, vector<1x8x384xbf16>
    %1 = vector.shape_cast %0 : vector<1x8x384xbf16> to vector<8x384xbf16>
    %c0_2 = arith.constant 0 : index
    %c0_3 = arith.constant 0 : index
    %2 = vector.load %arg2[%c0_2, %c0_3] : memref<384x128xbf16, #tpu.memory_space<vmem>>, vector<384x128xbf16>
    %cst = arith.constant dense<0.000000e+00> : vector<8x128xf32>
    %3 = tpu.matmul %1, %2, %cst {dimension_numbers = #tpu.dot_dimension_numbers<[1], [0], [0], [1], [0, 0, 1, 1], [], []>} : vector<8x384xbf16>, vector<384x128xbf16>, vector<8x128xf32> -> vector<8x128xf32>
    %c0_4 = arith.constant 0 : index
    %c0_5 = arith.constant 0 : index
    %4 = vector.load %arg3[%c0_4, %c0_5] : memref<1x128xf32, #tpu.memory_space<vmem>>, vector<1x128xf32>
    %5 = vector.broadcast %4 : vector<1x128xf32> to vector<8x128xf32>
    %6 = arith.addf %3, %5 : vector<8x128xf32>
    %cst_6 = arith.constant 0.000000e+00 : f32
    %7 = vector.broadcast %cst_6 : f32 to vector<8x128xf32>
    %8 = arith.maximumf %6, %7 : vector<8x128xf32>
    %c1_i32 = arith.constant 1 : i32
    %9 = tpu.dynamic_rotate %8 by %c1_i32 dim 0 : vector<8x128xf32>, i32 -> vector<8x128xf32>
    %10 = tpu.iota {dimensions = array<i32: 0>} : vector<8x128xi32>
    %c1_i32_7 = arith.constant 1 : i32
    %11 = vector.broadcast %c1_i32_7 : i32 to vector<8x128xi32>
    %12 = arith.cmpi sge, %10, %11 : vector<8x128xi32>
    %cst_8 = arith.constant 0.000000e+00 : f32
    %13 = vector.broadcast %cst_8 : f32 to vector<8x128xf32>
    %14 = arith.select %12, %9, %13 : vector<8x128xi1>, vector<8x128xf32>
    %c7_i32 = arith.constant 7 : i32
    %15 = tpu.dynamic_rotate %8 by %c7_i32 dim 0 : vector<8x128xf32>, i32 -> vector<8x128xf32>
    %16 = tpu.iota {dimensions = array<i32: 0>} : vector<8x128xi32>
    %c6_i32 = arith.constant 6 : i32
    %17 = vector.broadcast %c6_i32 : i32 to vector<8x128xi32>
    %18 = arith.cmpi sle, %16, %17 : vector<8x128xi32>
    %cst_9 = arith.constant 0.000000e+00 : f32
    %19 = vector.broadcast %cst_9 : f32 to vector<8x128xf32>
    %20 = arith.select %18, %15, %19 : vector<8x128xi1>, vector<8x128xf32>
    %21 = arith.truncf %14 : vector<8x128xf32> to vector<8x128xbf16>
    %c0_10 = arith.constant 0 : index
    %c0_11 = arith.constant 0 : index
    %c0_12 = arith.constant 0 : index
    %22 = vector.load %arg4[%c0_10, %c0_11, %c0_12] : memref<3x128x128xbf16, #tpu.memory_space<vmem>>, vector<1x128x128xbf16>
    %23 = vector.shape_cast %22 : vector<1x128x128xbf16> to vector<128x128xbf16>
    %cst_13 = arith.constant dense<0.000000e+00> : vector<8x128xf32>
    %24 = tpu.matmul %21, %23, %cst_13 {dimension_numbers = #tpu.dot_dimension_numbers<[1], [0], [0], [1], [0, 0, 1, 1], [], []>} : vector<8x128xbf16>, vector<128x128xbf16>, vector<8x128xf32> -> vector<8x128xf32>
    %25 = arith.truncf %8 : vector<8x128xf32> to vector<8x128xbf16>
    %c1 = arith.constant 1 : index
    %c0_14 = arith.constant 0 : index
    %c0_15 = arith.constant 0 : index
    %26 = vector.load %arg4[%c1, %c0_14, %c0_15] : memref<3x128x128xbf16, #tpu.memory_space<vmem>>, vector<1x128x128xbf16>
    %27 = vector.shape_cast %26 : vector<1x128x128xbf16> to vector<128x128xbf16>
    %cst_16 = arith.constant dense<0.000000e+00> : vector<8x128xf32>
    %28 = tpu.matmul %25, %27, %cst_16 {dimension_numbers = #tpu.dot_dimension_numbers<[1], [0], [0], [1], [0, 0, 1, 1], [], []>} : vector<8x128xbf16>, vector<128x128xbf16>, vector<8x128xf32> -> vector<8x128xf32>
    %29 = arith.addf %24, %28 : vector<8x128xf32>
    %30 = arith.truncf %20 : vector<8x128xf32> to vector<8x128xbf16>
    %c2 = arith.constant 2 : index
    %c0_17 = arith.constant 0 : index
    %c0_18 = arith.constant 0 : index
    %31 = vector.load %arg4[%c2, %c0_17, %c0_18] : memref<3x128x128xbf16, #tpu.memory_space<vmem>>, vector<1x128x128xbf16>
    %32 = vector.shape_cast %31 : vector<1x128x128xbf16> to vector<128x128xbf16>
    %cst_19 = arith.constant dense<0.000000e+00> : vector<8x128xf32>
    %33 = tpu.matmul %30, %32, %cst_19 {dimension_numbers = #tpu.dot_dimension_numbers<[1], [0], [0], [1], [0, 0, 1, 1], [], []>} : vector<8x128xbf16>, vector<128x128xbf16>, vector<8x128xf32> -> vector<8x128xf32>
    %34 = arith.addf %29, %33 : vector<8x128xf32>
    %c0_20 = arith.constant 0 : index
    %c0_21 = arith.constant 0 : index
    %35 = vector.load %arg5[%c0_20, %c0_21] : memref<1x128xf32, #tpu.memory_space<vmem>>, vector<1x128xf32>
    %36 = vector.broadcast %35 : vector<1x128xf32> to vector<8x128xf32>
    %37 = arith.addf %34, %36 : vector<8x128xf32>
    %cst_22 = arith.constant 0.000000e+00 : f32
    %38 = vector.broadcast %cst_22 : f32 to vector<8x128xf32>
    %39 = arith.maximumf %37, %38 : vector<8x128xf32>
    %c1_i32_23 = arith.constant 1 : i32
    %40 = tpu.dynamic_rotate %39 by %c1_i32_23 dim 0 : vector<8x128xf32>, i32 -> vector<8x128xf32>
    %41 = tpu.iota {dimensions = array<i32: 0>} : vector<8x128xi32>
    %c1_i32_24 = arith.constant 1 : i32
    %42 = vector.broadcast %c1_i32_24 : i32 to vector<8x128xi32>
    %43 = arith.cmpi sge, %41, %42 : vector<8x128xi32>
    %cst_25 = arith.constant 0.000000e+00 : f32
    %44 = vector.broadcast %cst_25 : f32 to vector<8x128xf32>
    %45 = arith.select %43, %40, %44 : vector<8x128xi1>, vector<8x128xf32>
    %c7_i32_26 = arith.constant 7 : i32
    %46 = tpu.dynamic_rotate %39 by %c7_i32_26 dim 0 : vector<8x128xf32>, i32 -> vector<8x128xf32>
    %47 = tpu.iota {dimensions = array<i32: 0>} : vector<8x128xi32>
    %c6_i32_27 = arith.constant 6 : i32
    %48 = vector.broadcast %c6_i32_27 : i32 to vector<8x128xi32>
    %49 = arith.cmpi sle, %47, %48 : vector<8x128xi32>
    %cst_28 = arith.constant 0.000000e+00 : f32
    %50 = vector.broadcast %cst_28 : f32 to vector<8x128xf32>
    %51 = arith.select %49, %46, %50 : vector<8x128xi1>, vector<8x128xf32>
    %52 = arith.truncf %45 : vector<8x128xf32> to vector<8x128xbf16>
    %c0_29 = arith.constant 0 : index
    %c0_30 = arith.constant 0 : index
    %c0_31 = arith.constant 0 : index
    %53 = vector.load %arg6[%c0_29, %c0_30, %c0_31] : memref<3x128x128xbf16, #tpu.memory_space<vmem>>, vector<1x128x128xbf16>
    %54 = vector.shape_cast %53 : vector<1x128x128xbf16> to vector<128x128xbf16>
    %cst_32 = arith.constant dense<0.000000e+00> : vector<8x128xf32>
    %55 = tpu.matmul %52, %54, %cst_32 {dimension_numbers = #tpu.dot_dimension_numbers<[1], [0], [0], [1], [0, 0, 1, 1], [], []>} : vector<8x128xbf16>, vector<128x128xbf16>, vector<8x128xf32> -> vector<8x128xf32>
    %56 = arith.truncf %39 : vector<8x128xf32> to vector<8x128xbf16>
    %c1_33 = arith.constant 1 : index
    %c0_34 = arith.constant 0 : index
    %c0_35 = arith.constant 0 : index
    %57 = vector.load %arg6[%c1_33, %c0_34, %c0_35] : memref<3x128x128xbf16, #tpu.memory_space<vmem>>, vector<1x128x128xbf16>
    %58 = vector.shape_cast %57 : vector<1x128x128xbf16> to vector<128x128xbf16>
    %cst_36 = arith.constant dense<0.000000e+00> : vector<8x128xf32>
    %59 = tpu.matmul %56, %58, %cst_36 {dimension_numbers = #tpu.dot_dimension_numbers<[1], [0], [0], [1], [0, 0, 1, 1], [], []>} : vector<8x128xbf16>, vector<128x128xbf16>, vector<8x128xf32> -> vector<8x128xf32>
    %60 = arith.addf %55, %59 : vector<8x128xf32>
    %61 = arith.truncf %51 : vector<8x128xf32> to vector<8x128xbf16>
    %c2_37 = arith.constant 2 : index
    %c0_38 = arith.constant 0 : index
    %c0_39 = arith.constant 0 : index
    %62 = vector.load %arg6[%c2_37, %c0_38, %c0_39] : memref<3x128x128xbf16, #tpu.memory_space<vmem>>, vector<1x128x128xbf16>
    %63 = vector.shape_cast %62 : vector<1x128x128xbf16> to vector<128x128xbf16>
    %cst_40 = arith.constant dense<0.000000e+00> : vector<8x128xf32>
    %64 = tpu.matmul %61, %63, %cst_40 {dimension_numbers = #tpu.dot_dimension_numbers<[1], [0], [0], [1], [0, 0, 1, 1], [], []>} : vector<8x128xbf16>, vector<128x128xbf16>, vector<8x128xf32> -> vector<8x128xf32>
    %65 = arith.addf %60, %64 : vector<8x128xf32>
    %c0_41 = arith.constant 0 : index
    %c0_42 = arith.constant 0 : index
    %66 = vector.load %arg7[%c0_41, %c0_42] : memref<1x128xf32, #tpu.memory_space<vmem>>, vector<1x128xf32>
    %67 = vector.broadcast %66 : vector<1x128xf32> to vector<8x128xf32>
    %68 = arith.addf %65, %67 : vector<8x128xf32>
    %69 = arith.addf %68, %8 : vector<8x128xf32>
    %cst_43 = arith.constant 0.000000e+00 : f32
    %70 = vector.broadcast %cst_43 : f32 to vector<8x128xf32>
    %71 = arith.maximumf %69, %70 : vector<8x128xf32>
    %72 = arith.truncf %71 : vector<8x128xf32> to vector<8x128xbf16>
    %c0_44 = arith.constant 0 : index
    %c0_45 = arith.constant 0 : index
    %c0_46 = arith.constant 0 : index
    %73 = vector.load %arg8[%c0_44, %c0_45, %c0_46] : memref<2x4x8xbf16, #tpu.memory_space<vmem>>, vector<1x4x8xbf16>
    %74 = vector.shape_cast %73 : vector<1x4x8xbf16> to vector<4x8xbf16>
    %cst_47 = arith.constant dense<0.000000e+00> : vector<4x128xf32>
    %75 = tpu.matmul %74, %72, %cst_47 {dimension_numbers = #tpu.dot_dimension_numbers<[1], [0], [0], [1], [0, 0, 1, 1], [], []>} : vector<4x8xbf16>, vector<8x128xbf16>, vector<4x128xf32> -> vector<4x128xf32>
    %c1_48 = arith.constant 1 : index
    %c0_49 = arith.constant 0 : index
    %c0_50 = arith.constant 0 : index
    %76 = vector.load %arg8[%c1_48, %c0_49, %c0_50] : memref<2x4x8xbf16, #tpu.memory_space<vmem>>, vector<1x4x8xbf16>
    %77 = vector.shape_cast %76 : vector<1x4x8xbf16> to vector<4x8xbf16>
    %cst_51 = arith.constant dense<0.000000e+00> : vector<4x128xf32>
    %78 = tpu.matmul %77, %72, %cst_51 {dimension_numbers = #tpu.dot_dimension_numbers<[1], [0], [0], [1], [0, 0, 1, 1], [], []>} : vector<4x8xbf16>, vector<8x128xbf16>, vector<4x128xf32> -> vector<4x128xf32>
    %cst_52 = arith.constant 0.000000e+00 : f32
    %79 = vector.broadcast %cst_52 : f32 to vector<1x128xf32>
    %80 = vector.extract_strided_slice %78 {offsets = [0, 0], sizes = [3, 128], strides = [1, 1]} : vector<4x128xf32> to vector<3x128xf32>
    %81 = tpu.concatenate %79, %80 in 0 : vector<1x128xf32>, vector<3x128xf32> -> vector<4x128xf32>
    %82 = arith.truncf %81 : vector<4x128xf32> to vector<4x128xbf16>
    %c0_53 = arith.constant 0 : index
    %c0_54 = arith.constant 0 : index
    %c0_55 = arith.constant 0 : index
    %83 = vector.load %arg9[%c0_53, %c0_54, %c0_55] : memref<3x128x128xbf16, #tpu.memory_space<vmem>>, vector<1x128x128xbf16>
    %84 = vector.shape_cast %83 : vector<1x128x128xbf16> to vector<128x128xbf16>
    %cst_56 = arith.constant dense<0.000000e+00> : vector<4x128xf32>
    %85 = tpu.matmul %82, %84, %cst_56 {dimension_numbers = #tpu.dot_dimension_numbers<[1], [0], [0], [1], [0, 0, 1, 1], [], []>} : vector<4x128xbf16>, vector<128x128xbf16>, vector<4x128xf32> -> vector<4x128xf32>
    %86 = arith.truncf %75 : vector<4x128xf32> to vector<4x128xbf16>
    %c1_57 = arith.constant 1 : index
    %c0_58 = arith.constant 0 : index
    %c0_59 = arith.constant 0 : index
    %87 = vector.load %arg9[%c1_57, %c0_58, %c0_59] : memref<3x128x128xbf16, #tpu.memory_space<vmem>>, vector<1x128x128xbf16>
    %88 = vector.shape_cast %87 : vector<1x128x128xbf16> to vector<128x128xbf16>
    %cst_60 = arith.constant dense<0.000000e+00> : vector<4x128xf32>
    %89 = tpu.matmul %86, %88, %cst_60 {dimension_numbers = #tpu.dot_dimension_numbers<[1], [0], [0], [1], [0, 0, 1, 1], [], []>} : vector<4x128xbf16>, vector<128x128xbf16>, vector<4x128xf32> -> vector<4x128xf32>
    %90 = arith.addf %85, %89 : vector<4x128xf32>
    %91 = arith.truncf %78 : vector<4x128xf32> to vector<4x128xbf16>
    %c2_61 = arith.constant 2 : index
    %c0_62 = arith.constant 0 : index
    %c0_63 = arith.constant 0 : index
    %92 = vector.load %arg9[%c2_61, %c0_62, %c0_63] : memref<3x128x128xbf16, #tpu.memory_space<vmem>>, vector<1x128x128xbf16>
    %93 = vector.shape_cast %92 : vector<1x128x128xbf16> to vector<128x128xbf16>
    %cst_64 = arith.constant dense<0.000000e+00> : vector<4x128xf32>
    %94 = tpu.matmul %91, %93, %cst_64 {dimension_numbers = #tpu.dot_dimension_numbers<[1], [0], [0], [1], [0, 0, 1, 1], [], []>} : vector<4x128xbf16>, vector<128x128xbf16>, vector<4x128xf32> -> vector<4x128xf32>
    %95 = arith.addf %90, %94 : vector<4x128xf32>
    %c0_65 = arith.constant 0 : index
    %c0_66 = arith.constant 0 : index
    %96 = vector.load %arg10[%c0_65, %c0_66] : memref<1x128xf32, #tpu.memory_space<vmem>>, vector<1x128xf32>
    %97 = vector.broadcast %96 : vector<1x128xf32> to vector<4x128xf32>
    %98 = arith.addf %95, %97 : vector<4x128xf32>
    %99 = arith.truncf %75 : vector<4x128xf32> to vector<4x128xbf16>
    %c0_67 = arith.constant 0 : index
    %c0_68 = arith.constant 0 : index
    %100 = vector.load %arg13[%c0_67, %c0_68] : memref<128x128xbf16, #tpu.memory_space<vmem>>, vector<128x128xbf16>
    %cst_69 = arith.constant dense<0.000000e+00> : vector<4x128xf32>
    %101 = tpu.matmul %99, %100, %cst_69 {dimension_numbers = #tpu.dot_dimension_numbers<[1], [0], [0], [1], [0, 0, 1, 1], [], []>} : vector<4x128xbf16>, vector<128x128xbf16>, vector<4x128xf32> -> vector<4x128xf32>
    %c0_70 = arith.constant 0 : index
    %c0_71 = arith.constant 0 : index
    %102 = vector.load %arg14[%c0_70, %c0_71] : memref<1x128xf32, #tpu.memory_space<vmem>>, vector<1x128xf32>
    %103 = vector.broadcast %102 : vector<1x128xf32> to vector<4x128xf32>
    %104 = arith.addf %101, %103 : vector<4x128xf32>
    %cst_72 = arith.constant 0.000000e+00 : f32
    %105 = vector.broadcast %cst_72 : f32 to vector<4x128xf32>
    %106 = arith.maximumf %98, %105 : vector<4x128xf32>
    %cst_73 = arith.constant 0.000000e+00 : f32
    %107 = vector.broadcast %cst_73 : f32 to vector<1x128xf32>
    %108 = vector.extract_strided_slice %106 {offsets = [0, 0], sizes = [3, 128], strides = [1, 1]} : vector<4x128xf32> to vector<3x128xf32>
    %109 = tpu.concatenate %107, %108 in 0 : vector<1x128xf32>, vector<3x128xf32> -> vector<4x128xf32>
    %cst_74 = arith.constant 0.000000e+00 : f32
    %110 = vector.broadcast %cst_74 : f32 to vector<1x128xf32>
    %111 = vector.extract_strided_slice %106 {offsets = [1, 0], sizes = [3, 128], strides = [1, 1]} : vector<4x128xf32> to vector<3x128xf32>
    %112 = tpu.concatenate %111, %110 in 0 : vector<3x128xf32>, vector<1x128xf32> -> vector<4x128xf32>
    %113 = arith.truncf %109 : vector<4x128xf32> to vector<4x128xbf16>
    %c0_75 = arith.constant 0 : index
    %c0_76 = arith.constant 0 : index
    %c0_77 = arith.constant 0 : index
    %114 = vector.load %arg11[%c0_75, %c0_76, %c0_77] : memref<3x128x128xbf16, #tpu.memory_space<vmem>>, vector<1x128x128xbf16>
    %115 = vector.shape_cast %114 : vector<1x128x128xbf16> to vector<128x128xbf16>
    %cst_78 = arith.constant dense<0.000000e+00> : vector<4x128xf32>
    %116 = tpu.matmul %113, %115, %cst_78 {dimension_numbers = #tpu.dot_dimension_numbers<[1], [0], [0], [1], [0, 0, 1, 1], [], []>} : vector<4x128xbf16>, vector<128x128xbf16>, vector<4x128xf32> -> vector<4x128xf32>
    %117 = arith.truncf %106 : vector<4x128xf32> to vector<4x128xbf16>
    %c1_79 = arith.constant 1 : index
    %c0_80 = arith.constant 0 : index
    %c0_81 = arith.constant 0 : index
    %118 = vector.load %arg11[%c1_79, %c0_80, %c0_81] : memref<3x128x128xbf16, #tpu.memory_space<vmem>>, vector<1x128x128xbf16>
    %119 = vector.shape_cast %118 : vector<1x128x128xbf16> to vector<128x128xbf16>
    %cst_82 = arith.constant dense<0.000000e+00> : vector<4x128xf32>
    %120 = tpu.matmul %117, %119, %cst_82 {dimension_numbers = #tpu.dot_dimension_numbers<[1], [0], [0], [1], [0, 0, 1, 1], [], []>} : vector<4x128xbf16>, vector<128x128xbf16>, vector<4x128xf32> -> vector<4x128xf32>
    %121 = arith.addf %116, %120 : vector<4x128xf32>
    %122 = arith.truncf %112 : vector<4x128xf32> to vector<4x128xbf16>
    %c2_83 = arith.constant 2 : index
    %c0_84 = arith.constant 0 : index
    %c0_85 = arith.constant 0 : index
    %123 = vector.load %arg11[%c2_83, %c0_84, %c0_85] : memref<3x128x128xbf16, #tpu.memory_space<vmem>>, vector<1x128x128xbf16>
    %124 = vector.shape_cast %123 : vector<1x128x128xbf16> to vector<128x128xbf16>
    %cst_86 = arith.constant dense<0.000000e+00> : vector<4x128xf32>
    %125 = tpu.matmul %122, %124, %cst_86 {dimension_numbers = #tpu.dot_dimension_numbers<[1], [0], [0], [1], [0, 0, 1, 1], [], []>} : vector<4x128xbf16>, vector<128x128xbf16>, vector<4x128xf32> -> vector<4x128xf32>
    %126 = arith.addf %121, %125 : vector<4x128xf32>
    %c0_87 = arith.constant 0 : index
    %c0_88 = arith.constant 0 : index
    %127 = vector.load %arg12[%c0_87, %c0_88] : memref<1x128xf32, #tpu.memory_space<vmem>>, vector<1x128xf32>
    %128 = vector.broadcast %127 : vector<1x128xf32> to vector<4x128xf32>
    %129 = arith.addf %126, %128 : vector<4x128xf32>
    %130 = arith.addf %129, %104 : vector<4x128xf32>
    %cst_89 = arith.constant 0.000000e+00 : f32
    %131 = vector.broadcast %cst_89 : f32 to vector<4x128xf32>
    %132 = arith.maximumf %130, %131 : vector<4x128xf32>
    %133 = arith.truncf %132 : vector<4x128xf32> to vector<4x128xbf16>
    %c0_90 = arith.constant 0 : index
    %c0_91 = arith.constant 0 : index
    %c0_92 = arith.constant 0 : index
    %134 = vector.load %arg15[%c0_90, %c0_91, %c0_92] : memref<2x2x4xbf16, #tpu.memory_space<vmem>>, vector<1x2x4xbf16>
    %135 = vector.shape_cast %134 : vector<1x2x4xbf16> to vector<2x4xbf16>
    %cst_93 = arith.constant dense<0.000000e+00> : vector<2x128xf32>
    %136 = tpu.matmul %135, %133, %cst_93 {dimension_numbers = #tpu.dot_dimension_numbers<[1], [0], [0], [1], [0, 0, 1, 1], [], []>} : vector<2x4xbf16>, vector<4x128xbf16>, vector<2x128xf32> -> vector<2x128xf32>
    %c1_94 = arith.constant 1 : index
    %c0_95 = arith.constant 0 : index
    %c0_96 = arith.constant 0 : index
    %137 = vector.load %arg15[%c1_94, %c0_95, %c0_96] : memref<2x2x4xbf16, #tpu.memory_space<vmem>>, vector<1x2x4xbf16>
    %138 = vector.shape_cast %137 : vector<1x2x4xbf16> to vector<2x4xbf16>
    %cst_97 = arith.constant dense<0.000000e+00> : vector<2x128xf32>
    %139 = tpu.matmul %138, %133, %cst_97 {dimension_numbers = #tpu.dot_dimension_numbers<[1], [0], [0], [1], [0, 0, 1, 1], [], []>} : vector<2x4xbf16>, vector<4x128xbf16>, vector<2x128xf32> -> vector<2x128xf32>
    %cst_98 = arith.constant 0.000000e+00 : f32
    %140 = vector.broadcast %cst_98 : f32 to vector<1x128xf32>
    %141 = vector.extract_strided_slice %139 {offsets = [0, 0], sizes = [1, 128], strides = [1, 1]} : vector<2x128xf32> to vector<1x128xf32>
    %142 = tpu.concatenate %140, %141 in 0 : vector<1x128xf32>, vector<1x128xf32> -> vector<2x128xf32>
    %143 = arith.truncf %142 : vector<2x128xf32> to vector<2x128xbf16>
    %c0_99 = arith.constant 0 : index
    %c0_100 = arith.constant 0 : index
    %c0_101 = arith.constant 0 : index
    %144 = vector.load %arg16[%c0_99, %c0_100, %c0_101] : memref<3x128x256xbf16, #tpu.memory_space<vmem>>, vector<1x128x256xbf16>
    %145 = vector.shape_cast %144 : vector<1x128x256xbf16> to vector<128x256xbf16>
    %cst_102 = arith.constant dense<0.000000e+00> : vector<2x256xf32>
    %146 = tpu.matmul %143, %145, %cst_102 {dimension_numbers = #tpu.dot_dimension_numbers<[1], [0], [0], [1], [0, 0, 1, 1], [], []>} : vector<2x128xbf16>, vector<128x256xbf16>, vector<2x256xf32> -> vector<2x256xf32>
    %147 = arith.truncf %136 : vector<2x128xf32> to vector<2x128xbf16>
    %c1_103 = arith.constant 1 : index
    %c0_104 = arith.constant 0 : index
    %c0_105 = arith.constant 0 : index
    %148 = vector.load %arg16[%c1_103, %c0_104, %c0_105] : memref<3x128x256xbf16, #tpu.memory_space<vmem>>, vector<1x128x256xbf16>
    %149 = vector.shape_cast %148 : vector<1x128x256xbf16> to vector<128x256xbf16>
    %cst_106 = arith.constant dense<0.000000e+00> : vector<2x256xf32>
    %150 = tpu.matmul %147, %149, %cst_106 {dimension_numbers = #tpu.dot_dimension_numbers<[1], [0], [0], [1], [0, 0, 1, 1], [], []>} : vector<2x128xbf16>, vector<128x256xbf16>, vector<2x256xf32> -> vector<2x256xf32>
    %151 = arith.addf %146, %150 : vector<2x256xf32>
    %152 = arith.truncf %139 : vector<2x128xf32> to vector<2x128xbf16>
    %c2_107 = arith.constant 2 : index
    %c0_108 = arith.constant 0 : index
    %c0_109 = arith.constant 0 : index
    %153 = vector.load %arg16[%c2_107, %c0_108, %c0_109] : memref<3x128x256xbf16, #tpu.memory_space<vmem>>, vector<1x128x256xbf16>
    %154 = vector.shape_cast %153 : vector<1x128x256xbf16> to vector<128x256xbf16>
    %cst_110 = arith.constant dense<0.000000e+00> : vector<2x256xf32>
    %155 = tpu.matmul %152, %154, %cst_110 {dimension_numbers = #tpu.dot_dimension_numbers<[1], [0], [0], [1], [0, 0, 1, 1], [], []>} : vector<2x128xbf16>, vector<128x256xbf16>, vector<2x256xf32> -> vector<2x256xf32>
    %156 = arith.addf %151, %155 : vector<2x256xf32>
    %c0_111 = arith.constant 0 : index
    %c0_112 = arith.constant 0 : index
    %157 = vector.load %arg17[%c0_111, %c0_112] : memref<1x256xf32, #tpu.memory_space<vmem>>, vector<1x256xf32>
    %158 = vector.broadcast %157 : vector<1x256xf32> to vector<2x256xf32>
    %159 = arith.addf %156, %158 : vector<2x256xf32>
    %160 = arith.truncf %136 : vector<2x128xf32> to vector<2x128xbf16>
    %c0_113 = arith.constant 0 : index
    %c0_114 = arith.constant 0 : index
    %161 = vector.load %arg20[%c0_113, %c0_114] : memref<128x256xbf16, #tpu.memory_space<vmem>>, vector<128x256xbf16>
    %cst_115 = arith.constant dense<0.000000e+00> : vector<2x256xf32>
    %162 = tpu.matmul %160, %161, %cst_115 {dimension_numbers = #tpu.dot_dimension_numbers<[1], [0], [0], [1], [0, 0, 1, 1], [], []>} : vector<2x128xbf16>, vector<128x256xbf16>, vector<2x256xf32> -> vector<2x256xf32>
    %c0_116 = arith.constant 0 : index
    %c0_117 = arith.constant 0 : index
    %163 = vector.load %arg21[%c0_116, %c0_117] : memref<1x256xf32, #tpu.memory_space<vmem>>, vector<1x256xf32>
    %164 = vector.broadcast %163 : vector<1x256xf32> to vector<2x256xf32>
    %165 = arith.addf %162, %164 : vector<2x256xf32>
    %cst_118 = arith.constant 0.000000e+00 : f32
    %166 = vector.broadcast %cst_118 : f32 to vector<2x256xf32>
    %167 = arith.maximumf %159, %166 : vector<2x256xf32>
    %cst_119 = arith.constant 0.000000e+00 : f32
    %168 = vector.broadcast %cst_119 : f32 to vector<1x256xf32>
    %169 = vector.extract_strided_slice %167 {offsets = [0, 0], sizes = [1, 256], strides = [1, 1]} : vector<2x256xf32> to vector<1x256xf32>
    %170 = tpu.concatenate %168, %169 in 0 : vector<1x256xf32>, vector<1x256xf32> -> vector<2x256xf32>
    %cst_120 = arith.constant 0.000000e+00 : f32
    %171 = vector.broadcast %cst_120 : f32 to vector<1x256xf32>
    %172 = vector.extract_strided_slice %167 {offsets = [1, 0], sizes = [1, 256], strides = [1, 1]} : vector<2x256xf32> to vector<1x256xf32>
    %173 = tpu.concatenate %172, %171 in 0 : vector<1x256xf32>, vector<1x256xf32> -> vector<2x256xf32>
    %174 = arith.truncf %170 : vector<2x256xf32> to vector<2x256xbf16>
    %c0_121 = arith.constant 0 : index
    %c0_122 = arith.constant 0 : index
    %c0_123 = arith.constant 0 : index
    %175 = vector.load %arg18[%c0_121, %c0_122, %c0_123] : memref<3x256x256xbf16, #tpu.memory_space<vmem>>, vector<1x256x256xbf16>
    %176 = vector.shape_cast %175 : vector<1x256x256xbf16> to vector<256x256xbf16>
    %cst_124 = arith.constant dense<0.000000e+00> : vector<2x256xf32>
    %177 = tpu.matmul %174, %176, %cst_124 {dimension_numbers = #tpu.dot_dimension_numbers<[1], [0], [0], [1], [0, 0, 1, 1], [], []>} : vector<2x256xbf16>, vector<256x256xbf16>, vector<2x256xf32> -> vector<2x256xf32>
    %178 = arith.truncf %167 : vector<2x256xf32> to vector<2x256xbf16>
    %c1_125 = arith.constant 1 : index
    %c0_126 = arith.constant 0 : index
    %c0_127 = arith.constant 0 : index
    %179 = vector.load %arg18[%c1_125, %c0_126, %c0_127] : memref<3x256x256xbf16, #tpu.memory_space<vmem>>, vector<1x256x256xbf16>
    %180 = vector.shape_cast %179 : vector<1x256x256xbf16> to vector<256x256xbf16>
    %cst_128 = arith.constant dense<0.000000e+00> : vector<2x256xf32>
    %181 = tpu.matmul %178, %180, %cst_128 {dimension_numbers = #tpu.dot_dimension_numbers<[1], [0], [0], [1], [0, 0, 1, 1], [], []>} : vector<2x256xbf16>, vector<256x256xbf16>, vector<2x256xf32> -> vector<2x256xf32>
    %182 = arith.addf %177, %181 : vector<2x256xf32>
    %183 = arith.truncf %173 : vector<2x256xf32> to vector<2x256xbf16>
    %c2_129 = arith.constant 2 : index
    %c0_130 = arith.constant 0 : index
    %c0_131 = arith.constant 0 : index
    %184 = vector.load %arg18[%c2_129, %c0_130, %c0_131] : memref<3x256x256xbf16, #tpu.memory_space<vmem>>, vector<1x256x256xbf16>
    %185 = vector.shape_cast %184 : vector<1x256x256xbf16> to vector<256x256xbf16>
    %cst_132 = arith.constant dense<0.000000e+00> : vector<2x256xf32>
    %186 = tpu.matmul %183, %185, %cst_132 {dimension_numbers = #tpu.dot_dimension_numbers<[1], [0], [0], [1], [0, 0, 1, 1], [], []>} : vector<2x256xbf16>, vector<256x256xbf16>, vector<2x256xf32> -> vector<2x256xf32>
    %187 = arith.addf %182, %186 : vector<2x256xf32>
    %c0_133 = arith.constant 0 : index
    %c0_134 = arith.constant 0 : index
    %188 = vector.load %arg19[%c0_133, %c0_134] : memref<1x256xf32, #tpu.memory_space<vmem>>, vector<1x256xf32>
    %189 = vector.broadcast %188 : vector<1x256xf32> to vector<2x256xf32>
    %190 = arith.addf %187, %189 : vector<2x256xf32>
    %191 = arith.addf %190, %165 : vector<2x256xf32>
    %cst_135 = arith.constant 0.000000e+00 : f32
    %192 = vector.broadcast %cst_135 : f32 to vector<2x256xf32>
    %193 = arith.maximumf %191, %192 : vector<2x256xf32>
    %194 = arith.truncf %193 : vector<2x256xf32> to vector<2x256xbf16>
    %c0_136 = arith.constant 0 : index
    %c0_137 = arith.constant 0 : index
    %c0_138 = arith.constant 0 : index
    %195 = vector.load %arg22[%c0_136, %c0_137, %c0_138] : memref<2x1x2xbf16, #tpu.memory_space<vmem>>, vector<1x1x2xbf16>
    %196 = vector.shape_cast %195 : vector<1x1x2xbf16> to vector<1x2xbf16>
    %cst_139 = arith.constant dense<0.000000e+00> : vector<1x256xf32>
    %197 = tpu.matmul %196, %194, %cst_139 {dimension_numbers = #tpu.dot_dimension_numbers<[1], [0], [0], [1], [0, 0, 1, 1], [], []>} : vector<1x2xbf16>, vector<2x256xbf16>, vector<1x256xf32> -> vector<1x256xf32>
    %c1_140 = arith.constant 1 : index
    %c0_141 = arith.constant 0 : index
    %c0_142 = arith.constant 0 : index
    %198 = vector.load %arg22[%c1_140, %c0_141, %c0_142] : memref<2x1x2xbf16, #tpu.memory_space<vmem>>, vector<1x1x2xbf16>
    %199 = vector.shape_cast %198 : vector<1x1x2xbf16> to vector<1x2xbf16>
    %cst_143 = arith.constant dense<0.000000e+00> : vector<1x256xf32>
    %200 = tpu.matmul %199, %194, %cst_143 {dimension_numbers = #tpu.dot_dimension_numbers<[1], [0], [0], [1], [0, 0, 1, 1], [], []>} : vector<1x2xbf16>, vector<2x256xbf16>, vector<1x256xf32> -> vector<1x256xf32>
    %cst_144 = arith.constant 0.000000e+00 : f32
    %201 = vector.broadcast %cst_144 : f32 to vector<1x256xf32>
    %202 = arith.truncf %201 : vector<1x256xf32> to vector<1x256xbf16>
    %c0_145 = arith.constant 0 : index
    %c0_146 = arith.constant 0 : index
    %c0_147 = arith.constant 0 : index
    %203 = vector.load %arg23[%c0_145, %c0_146, %c0_147] : memref<3x256x512xbf16, #tpu.memory_space<vmem>>, vector<1x256x512xbf16>
    %204 = vector.shape_cast %203 : vector<1x256x512xbf16> to vector<256x512xbf16>
    %cst_148 = arith.constant dense<0.000000e+00> : vector<1x512xf32>
    %205 = tpu.matmul %202, %204, %cst_148 {dimension_numbers = #tpu.dot_dimension_numbers<[1], [0], [0], [1], [0, 0, 1, 1], [], []>} : vector<1x256xbf16>, vector<256x512xbf16>, vector<1x512xf32> -> vector<1x512xf32>
    %206 = arith.truncf %197 : vector<1x256xf32> to vector<1x256xbf16>
    %c1_149 = arith.constant 1 : index
    %c0_150 = arith.constant 0 : index
    %c0_151 = arith.constant 0 : index
    %207 = vector.load %arg23[%c1_149, %c0_150, %c0_151] : memref<3x256x512xbf16, #tpu.memory_space<vmem>>, vector<1x256x512xbf16>
    %208 = vector.shape_cast %207 : vector<1x256x512xbf16> to vector<256x512xbf16>
    %cst_152 = arith.constant dense<0.000000e+00> : vector<1x512xf32>
    %209 = tpu.matmul %206, %208, %cst_152 {dimension_numbers = #tpu.dot_dimension_numbers<[1], [0], [0], [1], [0, 0, 1, 1], [], []>} : vector<1x256xbf16>, vector<256x512xbf16>, vector<1x512xf32> -> vector<1x512xf32>
    %210 = arith.addf %205, %209 : vector<1x512xf32>
    %211 = arith.truncf %200 : vector<1x256xf32> to vector<1x256xbf16>
    %c2_153 = arith.constant 2 : index
    %c0_154 = arith.constant 0 : index
    %c0_155 = arith.constant 0 : index
    %212 = vector.load %arg23[%c2_153, %c0_154, %c0_155] : memref<3x256x512xbf16, #tpu.memory_space<vmem>>, vector<1x256x512xbf16>
    %213 = vector.shape_cast %212 : vector<1x256x512xbf16> to vector<256x512xbf16>
    %cst_156 = arith.constant dense<0.000000e+00> : vector<1x512xf32>
    %214 = tpu.matmul %211, %213, %cst_156 {dimension_numbers = #tpu.dot_dimension_numbers<[1], [0], [0], [1], [0, 0, 1, 1], [], []>} : vector<1x256xbf16>, vector<256x512xbf16>, vector<1x512xf32> -> vector<1x512xf32>
    %215 = arith.addf %210, %214 : vector<1x512xf32>
    %c0_157 = arith.constant 0 : index
    %c0_158 = arith.constant 0 : index
    %216 = vector.load %arg24[%c0_157, %c0_158] : memref<1x512xf32, #tpu.memory_space<vmem>>, vector<1x512xf32>
    %217 = arith.addf %215, %216 : vector<1x512xf32>
    %218 = arith.truncf %197 : vector<1x256xf32> to vector<1x256xbf16>
    %c0_159 = arith.constant 0 : index
    %c0_160 = arith.constant 0 : index
    %219 = vector.load %arg27[%c0_159, %c0_160] : memref<256x512xbf16, #tpu.memory_space<vmem>>, vector<256x512xbf16>
    %cst_161 = arith.constant dense<0.000000e+00> : vector<1x512xf32>
    %220 = tpu.matmul %218, %219, %cst_161 {dimension_numbers = #tpu.dot_dimension_numbers<[1], [0], [0], [1], [0, 0, 1, 1], [], []>} : vector<1x256xbf16>, vector<256x512xbf16>, vector<1x512xf32> -> vector<1x512xf32>
    %c0_162 = arith.constant 0 : index
    %c0_163 = arith.constant 0 : index
    %221 = vector.load %arg28[%c0_162, %c0_163] : memref<1x512xf32, #tpu.memory_space<vmem>>, vector<1x512xf32>
    %222 = arith.addf %220, %221 : vector<1x512xf32>
    %cst_164 = arith.constant 0.000000e+00 : f32
    %223 = vector.broadcast %cst_164 : f32 to vector<1x512xf32>
    %224 = arith.maximumf %217, %223 : vector<1x512xf32>
    %cst_165 = arith.constant 0.000000e+00 : f32
    %225 = vector.broadcast %cst_165 : f32 to vector<1x512xf32>
    %cst_166 = arith.constant 0.000000e+00 : f32
    %226 = vector.broadcast %cst_166 : f32 to vector<1x512xf32>
    %227 = arith.truncf %225 : vector<1x512xf32> to vector<1x512xbf16>
    %c0_167 = arith.constant 0 : index
    %c0_168 = arith.constant 0 : index
    %c0_169 = arith.constant 0 : index
    %228 = vector.load %arg25[%c0_167, %c0_168, %c0_169] : memref<3x512x512xbf16, #tpu.memory_space<vmem>>, vector<1x512x512xbf16>
    %229 = vector.shape_cast %228 : vector<1x512x512xbf16> to vector<512x512xbf16>
    %cst_170 = arith.constant dense<0.000000e+00> : vector<1x512xf32>
    %230 = tpu.matmul %227, %229, %cst_170 {dimension_numbers = #tpu.dot_dimension_numbers<[1], [0], [0], [1], [0, 0, 1, 1], [], []>} : vector<1x512xbf16>, vector<512x512xbf16>, vector<1x512xf32> -> vector<1x512xf32>
    %231 = arith.truncf %224 : vector<1x512xf32> to vector<1x512xbf16>
    %c1_171 = arith.constant 1 : index
    %c0_172 = arith.constant 0 : index
    %c0_173 = arith.constant 0 : index
    %232 = vector.load %arg25[%c1_171, %c0_172, %c0_173] : memref<3x512x512xbf16, #tpu.memory_space<vmem>>, vector<1x512x512xbf16>
    %233 = vector.shape_cast %232 : vector<1x512x512xbf16> to vector<512x512xbf16>
    %cst_174 = arith.constant dense<0.000000e+00> : vector<1x512xf32>
    %234 = tpu.matmul %231, %233, %cst_174 {dimension_numbers = #tpu.dot_dimension_numbers<[1], [0], [0], [1], [0, 0, 1, 1], [], []>} : vector<1x512xbf16>, vector<512x512xbf16>, vector<1x512xf32> -> vector<1x512xf32>
    %235 = arith.addf %230, %234 : vector<1x512xf32>
    %236 = arith.truncf %226 : vector<1x512xf32> to vector<1x512xbf16>
    %c2_175 = arith.constant 2 : index
    %c0_176 = arith.constant 0 : index
    %c0_177 = arith.constant 0 : index
    %237 = vector.load %arg25[%c2_175, %c0_176, %c0_177] : memref<3x512x512xbf16, #tpu.memory_space<vmem>>, vector<1x512x512xbf16>
    %238 = vector.shape_cast %237 : vector<1x512x512xbf16> to vector<512x512xbf16>
    %cst_178 = arith.constant dense<0.000000e+00> : vector<1x512xf32>
    %239 = tpu.matmul %236, %238, %cst_178 {dimension_numbers = #tpu.dot_dimension_numbers<[1], [0], [0], [1], [0, 0, 1, 1], [], []>} : vector<1x512xbf16>, vector<512x512xbf16>, vector<1x512xf32> -> vector<1x512xf32>
    %240 = arith.addf %235, %239 : vector<1x512xf32>
    %c0_179 = arith.constant 0 : index
    %c0_180 = arith.constant 0 : index
    %241 = vector.load %arg26[%c0_179, %c0_180] : memref<1x512xf32, #tpu.memory_space<vmem>>, vector<1x512xf32>
    %242 = arith.addf %240, %241 : vector<1x512xf32>
    %243 = arith.addf %242, %222 : vector<1x512xf32>
    %cst_181 = arith.constant 0.000000e+00 : f32
    %244 = vector.broadcast %cst_181 : f32 to vector<1x512xf32>
    %245 = arith.maximumf %243, %244 : vector<1x512xf32>
    %cst_182 = arith.constant dense<0.000000e+00> : vector<512xf32>
    %246 = vector.multi_reduction <add>, %245, %cst_182 [0] : vector<1x512xf32> to vector<512xf32>
    %247 = vector.shape_cast %246 : vector<512xf32> to vector<1x512xf32>
    %cst_183 = arith.constant 1.000000e+00 : f32
    %248 = vector.broadcast %cst_183 : f32 to vector<1x512xf32>
    %249 = arith.divf %247, %248 : vector<1x512xf32>
    %c0_184 = arith.constant 0 : index
    %c0_185 = arith.constant 0 : index
    %250 = vector.load %arg29[%c0_184, %c0_185] : memref<1x512xf32, #tpu.memory_space<vmem>>, vector<1x512xf32>
    %251 = arith.mulf %249, %250 : vector<1x512xf32>
    %cst_186 = arith.constant dense<0.000000e+00> : vector<1xf32>
    %252 = vector.multi_reduction <add>, %251, %cst_186 [1] : vector<1x512xf32> to vector<1xf32>
    %253 = vector.shape_cast %252 : vector<1xf32> to vector<1x1xf32>
    %c0_187 = arith.constant 0 : index
    %c0_188 = arith.constant 0 : index
    %254 = vector.load %arg30[%c0_187, %c0_188] : memref<1x1xf32, #tpu.memory_space<vmem>>, vector<1x1xf32>
    %255 = arith.addf %253, %254 : vector<1x1xf32>
    %256 = arith.negf %255 : vector<1x1xf32>
    %257 = math.exp %256 : vector<1x1xf32>
    %cst_189 = arith.constant 1.000000e+00 : f32
    %258 = vector.broadcast %cst_189 : f32 to vector<1x1xf32>
    %259 = arith.addf %258, %257 : vector<1x1xf32>
    %260 = arith.divf %258, %259 : vector<1x1xf32>
    %261 = vector.shape_cast %260 : vector<1x1xf32> to vector<1x1xf32>
    %262 = vector.broadcast %261 : vector<1x1xf32> to vector<8x128xf32>
    %c0_190 = arith.constant 0 : index
    %c0_191 = arith.constant 0 : index
    %c0_192 = arith.constant 0 : index
    %263 = vector.load %arg31[%c0_190, %c0_191, %c0_192] : memref<1x8x128xf32, #tpu.memory_space<vmem>>, vector<1x8x128xf32>
    %264 = vector.shape_cast %263 : vector<1x8x128xf32> to vector<8x128xf32>
    %265 = vector.shape_cast %262 : vector<8x128xf32> to vector<1x8x128xf32>
    tpu.vector_store %arg31[%c0_190, %c0_191, %c0_192], %265 {strides = array<i32>} : memref<1x8x128xf32, #tpu.memory_space<vmem>>, vector<1x8x128xf32>,
    return
  }
  func.func @transform_0(%arg0: i32) -> (i32, i32, i32) {
    %c0_i32 = arith.constant 0 : i32
    %c0_i32_0 = arith.constant 0 : i32
    %c0_i32_1 = arith.constant 0 : i32
    return %arg0, %c0_i32, %c0_i32_0 : i32, i32, i32
  }
  func.func @transform_1(%arg0: i32) -> (i32, i32) {
    %c0_i32 = arith.constant 0 : i32
    %c0_i32_0 = arith.constant 0 : i32
    %c0_i32_1 = arith.constant 0 : i32
    return %c0_i32, %c0_i32_0 : i32, i32
  }
  func.func @transform_2(%arg0: i32) -> (i32, i32) {
    %c0_i32 = arith.constant 0 : i32
    %c0_i32_0 = arith.constant 0 : i32
    %c0_i32_1 = arith.constant 0 : i32
    return %c0_i32, %c0_i32_0 : i32, i32
  }
  func.func @transform_3(%arg0: i32) -> (i32, i32, i32) {
    %c0_i32 = arith.constant 0 : i32
    %c0_i32_0 = arith.constant 0 : i32
    %c0_i32_1 = arith.constant 0 : i32
    %c0_i32_2 = arith.constant 0 : i32
    return %c0_i32, %c0_i32_0, %c0_i32_1 : i32, i32, i32
  }
  func.func @transform_4(%arg0: i32) -> (i32, i32) {
    %c0_i32 = arith.constant 0 : i32
    %c0_i32_0 = arith.constant 0 : i32
    %c0_i32_1 = arith.constant 0 : i32
    return %c0_i32, %c0_i32_0 : i32, i32
  }
  func.func @transform_5(%arg0: i32) -> (i32, i32, i32) {
    %c0_i32 = arith.constant 0 : i32
    %c0_i32_0 = arith.constant 0 : i32
    %c0_i32_1 = arith.constant 0 : i32
    %c0_i32_2 = arith.constant 0 : i32
    return %c0_i32, %c0_i32_0, %c0_i32_1 : i32, i32, i32
  }
  func.func @transform_6(%arg0: i32) -> (i32, i32) {
    %c0_i32 = arith.constant 0 : i32
    %c0_i32_0 = arith.constant 0 : i32
    %c0_i32_1 = arith.constant 0 : i32
    return %c0_i32, %c0_i32_0 : i32, i32
  }
  func.func @transform_7(%arg0: i32) -> (i32, i32, i32) {
    %c0_i32 = arith.constant 0 : i32
    %c0_i32_0 = arith.constant 0 : i32
    %c0_i32_1 = arith.constant 0 : i32
    %c0_i32_2 = arith.constant 0 : i32
    return %c0_i32, %c0_i32_0, %c0_i32_1 : i32, i32, i32
  }
  func.func @transform_8(%arg0: i32) -> (i32, i32, i32) {
    %c0_i32 = arith.constant 0 : i32
    %c0_i32_0 = arith.constant 0 : i32
    %c0_i32_1 = arith.constant 0 : i32
    %c0_i32_2 = arith.constant 0 : i32
    return %c0_i32, %c0_i32_0, %c0_i32_1 : i32, i32, i32
  }
  func.func @transform_9(%arg0: i32) -> (i32, i32) {
    %c0_i32 = arith.constant 0 : i32
    %c0_i32_0 = arith.constant 0 : i32
    %c0_i32_1 = arith.constant 0 : i32
    return %c0_i32, %c0_i32_0 : i32, i32
  }
  func.func @transform_10(%arg0: i32) -> (i32, i32, i32) {
    %c0_i32 = arith.constant 0 : i32
    %c0_i32_0 = arith.constant 0 : i32
    %c0_i32_1 = arith.constant 0 : i32
    %c0_i32_2 = arith.constant 0 : i32
    return %c0_i32, %c0_i32_0, %c0_i32_1 : i32, i32, i32
  }
  func.func @transform_11(%arg0: i32) -> (i32, i32) {
    %c0_i32 = arith.constant 0 : i32
    %c0_i32_0 = arith.constant 0 : i32
    %c0_i32_1 = arith.constant 0 : i32
    return %c0_i32, %c0_i32_0 : i32, i32
  }
  func.func @transform_12(%arg0: i32) -> (i32, i32) {
    %c0_i32 = arith.constant 0 : i32
    %c0_i32_0 = arith.constant 0 : i32
    %c0_i32_1 = arith.constant 0 : i32
    return %c0_i32, %c0_i32_0 : i32, i32
  }
  func.func @transform_13(%arg0: i32) -> (i32, i32) {
    %c0_i32 = arith.constant 0 : i32
    %c0_i32_0 = arith.constant 0 : i32
    %c0_i32_1 = arith.constant 0 : i32
    return %c0_i32, %c0_i32_0 : i32, i32
  }
  func.func @transform_14(%arg0: i32) -> (i32, i32, i32) {
    %c0_i32 = arith.constant 0 : i32
    %c0_i32_0 = arith.constant 0 : i32
    %c0_i32_1 = arith.constant 0 : i32
    %c0_i32_2 = arith.constant 0 : i32
    return %c0_i32, %c0_i32_0, %c0_i32_1 : i32, i32, i32
  }
  func.func @transform_15(%arg0: i32) -> (i32, i32, i32) {
    %c0_i32 = arith.constant 0 : i32
    %c0_i32_0 = arith.constant 0 : i32
    %c0_i32_1 = arith.constant 0 : i32
    %c0_i32_2 = arith.constant 0 : i32
    return %c0_i32, %c0_i32_0, %c0_i32_1 : i32, i32, i32
  }
  func.func @transform_16(%arg0: i32) -> (i32, i32) {
    %c0_i32 = arith.constant 0 : i32
    %c0_i32_0 = arith.constant 0 : i32
    %c0_i32_1 = arith.constant 0 : i32
    return %c0_i32, %c0_i32_0 : i32, i32
  }
  func.func @transform_17(%arg0: i32) -> (i32, i32, i32) {
    %c0_i32 = arith.constant 0 : i32
    %c0_i32_0 = arith.constant 0 : i32
    %c0_i32_1 = arith.constant 0 : i32
    %c0_i32_2 = arith.constant 0 : i32
    return %c0_i32, %c0_i32_0, %c0_i32_1 : i32, i32, i32
  }
  func.func @transform_18(%arg0: i32) -> (i32, i32) {
    %c0_i32 = arith.constant 0 : i32
    %c0_i32_0 = arith.constant 0 : i32
    %c0_i32_1 = arith.constant 0 : i32
    return %c0_i32, %c0_i32_0 : i32, i32
  }
  func.func @transform_19(%arg0: i32) -> (i32, i32) {
    %c0_i32 = arith.constant 0 : i32
    %c0_i32_0 = arith.constant 0 : i32
    %c0_i32_1 = arith.constant 0 : i32
    return %c0_i32, %c0_i32_0 : i32, i32
  }
  func.func @transform_20(%arg0: i32) -> (i32, i32) {
    %c0_i32 = arith.constant 0 : i32
    %c0_i32_0 = arith.constant 0 : i32
    %c0_i32_1 = arith.constant 0 : i32
    return %c0_i32, %c0_i32_0 : i32, i32
  }
  func.func @transform_21(%arg0: i32) -> (i32, i32, i32) {
    %c0_i32 = arith.constant 0 : i32
    %c0_i32_0 = arith.constant 0 : i32
    %c0_i32_1 = arith.constant 0 : i32
    %c0_i32_2 = arith.constant 0 : i32
    return %c0_i32, %c0_i32_0, %c0_i32_1 : i32, i32, i32
  }
  func.func @transform_22(%arg0: i32) -> (i32, i32, i32) {
    %c0_i32 = arith.constant 0 : i32
    %c0_i32_0 = arith.constant 0 : i32
    %c0_i32_1 = arith.constant 0 : i32
    %c0_i32_2 = arith.constant 0 : i32
    return %c0_i32, %c0_i32_0, %c0_i32_1 : i32, i32, i32
  }
  func.func @transform_23(%arg0: i32) -> (i32, i32) {
    %c0_i32 = arith.constant 0 : i32
    %c0_i32_0 = arith.constant 0 : i32
    %c0_i32_1 = arith.constant 0 : i32
    return %c0_i32, %c0_i32_0 : i32, i32
  }
  func.func @transform_24(%arg0: i32) -> (i32, i32, i32) {
    %c0_i32 = arith.constant 0 : i32
    %c0_i32_0 = arith.constant 0 : i32
    %c0_i32_1 = arith.constant 0 : i32
    %c0_i32_2 = arith.constant 0 : i32
    return %c0_i32, %c0_i32_0, %c0_i32_1 : i32, i32, i32
  }
  func.func @transform_25(%arg0: i32) -> (i32, i32) {
    %c0_i32 = arith.constant 0 : i32
    %c0_i32_0 = arith.constant 0 : i32
    %c0_i32_1 = arith.constant 0 : i32
    return %c0_i32, %c0_i32_0 : i32, i32
  }
  func.func @transform_26(%arg0: i32) -> (i32, i32) {
    %c0_i32 = arith.constant 0 : i32
    %c0_i32_0 = arith.constant 0 : i32
    %c0_i32_1 = arith.constant 0 : i32
    return %c0_i32, %c0_i32_0 : i32, i32
  }
  func.func @transform_27(%arg0: i32) -> (i32, i32) {
    %c0_i32 = arith.constant 0 : i32
    %c0_i32_0 = arith.constant 0 : i32
    %c0_i32_1 = arith.constant 0 : i32
    return %c0_i32, %c0_i32_0 : i32, i32
  }
  func.func @transform_28(%arg0: i32) -> (i32, i32) {
    %c0_i32 = arith.constant 0 : i32
    %c0_i32_0 = arith.constant 0 : i32
    %c0_i32_1 = arith.constant 0 : i32
    return %c0_i32, %c0_i32_0 : i32, i32
  }
  func.func @transform_29(%arg0: i32) -> (i32, i32) {
    %c0_i32 = arith.constant 0 : i32
    %c0_i32_0 = arith.constant 0 : i32
    %c0_i32_1 = arith.constant 0 : i32
    return %c0_i32, %c0_i32_0 : i32, i32
  }
  func.func @transform_30(%arg0: i32) -> (i32, i32, i32) {
    %c0_i32 = arith.constant 0 : i32
    %c0_i32_0 = arith.constant 0 : i32
    %c0_i32_1 = arith.constant 0 : i32
    return %arg0, %c0_i32, %c0_i32_0 : i32, i32, i32
  }
}

</mosaic_0001>

<bundles_post_ra>
// kernel: _lambda_.3
= control target key start
LH: loop header
LB: loop body
LE: loop exit
PB: predicated region body
PF: predicated region fallthrough
CT: control target
= control target key end

     0   :  { %s4042_s15 = smov 0   ;;  %s4044_s16 = smov 0   ;;  %s4631_s0 = inlined_call_operand.vmem [shape: bf16[2,2048,256], index: 0, kind: input, shape index: {}]   ;;  %s4632_s1 = inlined_call_operand.vmem [shape: bf16[2,256,128], index: 1, kind: input, shape index: {}]   ;;  %s4633_s2 = inlined_call_operand.vmem [shape: f32[2,1,128], index: 2, kind: input, shape index: {}]   ;;  %s4634_s3 = inlined_call_operand.vmem [shape: f32[2,1,128], index: 3, kind: input, shape index: {}]   ;;  %s4635_s4 = inlined_call_operand.vmem [shape: bf16[2,2048,128], index: 4, kind: output, shape index: {}]  }
   0x1   :  { %s4046_s17 = smov 0   ;;  %s4048_s18 = smov 0  }
   0x2   :  { %s4050_s19 = smov 0  }
   0x3 LB: > { %s23_s20 = sadd.s32 1, %s4006_s17  ;;  %s26_s21 = sadd.s32 1, %s4010_s18  ;;  %s4014_s19 = sphi %s4050_s19, %s14_s19   ;;  %s4010_s18 = sphi %s4048_s18, %s4639_s18   ;;  %s4006_s17 = sphi %s4046_s17, %s4638_s17   ;;  %s4002_s16 = sphi %s4044_s16, %s4637_s16   ;;  %s3998_s15 = sphi %s4042_s15, %s4636_s15  }
   0x4   : > { %p24_p0 = scmp.ge.s32.totalorder %s23_s20, 2  ;;  %p2895_p1 = scmp.ge.s32.totalorder %s4014_s19, 1 }
   0x5   : > { %p210_p2 = scmp.lt.s32.totalorder %s4014_s19, 5 }
   0x6   : > { %s4641_s20 = smov (%p24_p0, %s23_s20), 0  ;;  %s4643_s21 = smov (!%p24_p0, %s26_s21), %s4010_s18 }
   0x7   : > { %p211_p3 = pnand %p2895_p1, %p210_p2  ;;  %p28_p4 = scmp.ge.s32.totalorder %s4643_s21, 2 }
   0x8   : > { %p257_p5 = scmp.lt.s32.totalorder (!%p211_p3), %s4002_s16, 1  ;;  %s2896_s22 = sshll.u32 (!%p211_p3), %s3998_s15, 7  ;;  %v4016_v0 = vmov (!%p211_p3), 0  }
   0x9   : > { %s4645_s21 = smov (%p28_p4, %s4643_s21), 0  ;;  %214 = sbr.rel (%p211_p3) target bundleno = 555 (0x22b), region = 36 }
   0xa   : > { %1185 = vmatprep.subr.bf16.mxu0 (!%p211_p3), %v4016_v0  ;;  %3693 = vmatprep.subr.bf16.mxu1 (!%p211_p3), %v4016_v0  ;;  %p259_p6 = scmp.lt.s32.totalorder (!%p211_p3), %s2896_s22, 255 }
  0x10   : > { %s4647_s16 = smov (!%p257_p5, %s4002_s16), 1  ;;  %s4649_s22 = smov (!%p259_p6, %s2896_s22), 255 }
  0x11   : > { %s3181_s23 = sshll.u32 %s4647_s16, 7  ;;  %s2897_s27 = sshll.u32 %s4649_s22, 1 }
  0x12   : > { %s4080_s26 = scalar_lea.vmem %s4632_s1, %s3181_s23  ;;  %s2898_s28 = sshll.u32 %s4647_s16, 9 }
  0x13   : > { %v3766_v1 = vld [vmem:[%s4080_s26] sm:$0xff]   ;;  %v3767_v2 = vld [vmem:[%s4080_s26 + $0x8] sm:$0xff]   ;;  %v3768_v3 = vld [vmem:[%s4080_s26 + $0x10] sm:$0xff]   ;;  %s263_s29 = sadd.s32 %s2898_s28, %s2897_s27  ;;  %s4251_s10 = scalar_lea.vmem %s4633_s2, %s4647_s16 }
  0x14   : > { %1186 = vmatpush1.bf16.msra.mxu0 %v3766_v1  ;;  %3709 = vmatpush1.bf16.msra.mxu1 %v3766_v1  ;;  %v3769_v4 = vld [vmem:[%s4080_s26 + $0x18] sm:$0xff]   ;;  %s2899_s30 = sshll.u32 %s263_s29, 2  ;;  %v3770_v5 = vld [vmem:[%s4080_s26 + $0x20] sm:$0xff]   ;;  %v3771_v7 = vld [vmem:[%s4080_s26 + $0x28] sm:$0xff]   ;;  %s4257_s13 = scalar_lea.vmem %s4634_s3, %s4647_s16 }
  0x15   : > { %1187 = vmatprep.subr.bf16.mxu0 %v4016_v0  ;;  %3694 = vmatprep.subr.bf16.mxu1 %v4016_v0  ;;  %s4100_s7 = scalar_lea.vmem %s4631_s0, %s2899_s30  ;;  %v3772_v9 = vld [vmem:[%s4080_s26 + $0x30] sm:$0xff]   ;;  %v3773_v10 = vld [vmem:[%s4080_s26 + $0x38] sm:$0xff]   ;;  %v3774_v11 = vld [vmem:[%s4080_s26 + $0x40] sm:$0xff]   ;;  %s2903_s14 = sshll.u32 %s4647_s16, 8 }
  0x16   : > { %v3784_v6 = vld [vmem:[%s4100_s7 + $0x4] ss:$8 sps:$4 sm:$0xff]   ;;  %v3776_v13 = vld [vmem:[%s4080_s26 + $0x50] sm:$0xff]   ;;  %v3777_v14 = vld [vmem:[%s4080_s26 + $0x58] sm:$0xff]   ;;  %s284_s15 = sadd.s32 %s2903_s14, %s4649_s22 }
  0x17   : > { %v3787_v8 = vld [vmem:[%s4100_s7 + $0x204] ss:$8 sps:$4 sm:$0xff]   ;;  %1217 = vmatprep.mubr.bf16.mxu0 %v3784_v6  ;;  %v3780_v17 = vld [vmem:[%s4080_s26 + $0x70] sm:$0xff]   ;;  %v3781_v18 = vld [vmem:[%s4080_s26 + $0x78] sm:$0xff]   ;;  %s2904_s16 = sshll.u32 %s284_s15, 2 }
  0x18   : > { %1188 = vmatpush1.bf16.msra.mxu0 %v3767_v2  ;;  %3710 = vmatpush1.bf16.msra.mxu1 %v3767_v2  ;;  %v3775_v12 = vld [vmem:[%s4080_s26 + $0x48] sm:$0xff]   ;;  %v3778_v15 = vld [vmem:[%s4080_s26 + $0x60] sm:$0xff]   ;;  %v3788_v21 = vld [vmem:[%s4100_s7 + $0x14] ss:$8 sps:$4 sm:$0xff]   ;;  %s4282_s24 = scalar_lea.vmem %s4635_s4, %s2904_s16 }
  0x19   : > { %1189 = vmatprep.subr.bf16.mxu0 %v4016_v0  ;;  %3695 = vmatprep.subr.bf16.mxu1 %v4016_v0  ;;  %v3779_v16 = vld [vmem:[%s4080_s26 + $0x68] sm:$0xff]   ;;  %v3790_v22 = vld [vmem:[%s4100_s7 + $0x214] ss:$8 sps:$4 sm:$0xff]   ;;  %v3792_v23 = vld [vmem:[%s4100_s7 + $0x10] ss:$8 sps:$4 sm:$0xff]  }
  0x1a   : > { %1473 = vmatprep.mubr.bf16.mxu1 %v3787_v8  ;;  %v3782_v19 = vld [vmem:[%s4100_s7] ss:$8 sps:$4 sm:$0xff]   ;;  %v3793_v24 = vld [vmem:[%s4100_s7 + $0x210] ss:$8 sps:$4 sm:$0xff]   ;;  %v3794_v25 = vld [vmem:[%s4100_s7 + $0x24] ss:$8 sps:$4 sm:$0xff]  }
  0x1b   : > { %v3785_v20 = vld [vmem:[%s4100_s7 + $0x200] ss:$8 sps:$4 sm:$0xff]   ;;  %v3796_v26 = vld [vmem:[%s4100_s7 + $0x224] ss:$8 sps:$4 sm:$0xff]   ;;  %v3800_v29 = vld [vmem:[%s4100_s7 + $0x34] ss:$8 sps:$4 sm:$0xff]  }
  0x1c   : > { %1190 = vmatpush1.bf16.msra.mxu0 %v3768_v3  ;;  %3711 = vmatpush1.bf16.msra.mxu1 %v3768_v3  ;;  %v3798_v27 = vld [vmem:[%s4100_s7 + $0x20] ss:$8 sps:$4 sm:$0xff]   ;;  %v3802_v30 = vld [vmem:[%s4100_s7 + $0x234] ss:$8 sps:$4 sm:$0xff]   ;;  %v3804_v31 = vld [vmem:[%s4100_s7 + $0x30] ss:$8 sps:$4 sm:$0xff]  }
  0x1d   : > { %1191 = vmatprep.subr.bf16.mxu0 %v4016_v0  ;;  %3696 = vmatprep.subr.bf16.mxu1 %v4016_v0  ;;  %v3799_v28 = vld [vmem:[%s4100_s7 + $0x220] ss:$8 sps:$4 sm:$0xff]   ;;  %v3805_v32 = vld [vmem:[%s4100_s7 + $0x230] ss:$8 sps:$4 sm:$0xff]   ;;  %v3806_v33 = vld [vmem:[%s4100_s7 + $0x44] ss:$8 sps:$4 sm:$0xff]  }
  0x1e   : > { %v3808_v34 = vld [vmem:[%s4100_s7 + $0x244] ss:$8 sps:$4 sm:$0xff]   ;;  %v3810_v35 = vld [vmem:[%s4100_s7 + $0x40] ss:$8 sps:$4 sm:$0xff]   ;;  %v3812_v37 = vld [vmem:[%s4100_s7 + $0x54] ss:$8 sps:$4 sm:$0xff]  }
  0x1f   : > { %v3811_v36 = vld [vmem:[%s4100_s7 + $0x240] ss:$8 sps:$4 sm:$0xff]   ;;  %v3814_v38 = vld [vmem:[%s4100_s7 + $0x254] ss:$8 sps:$4 sm:$0xff]   ;;  %v3816_v39 = vld [vmem:[%s4100_s7 + $0x50] ss:$8 sps:$4 sm:$0xff]  }
  0x20   : > { %1192 = vmatpush1.bf16.msra.mxu0 %v3769_v4  ;;  %3712 = vmatpush1.bf16.msra.mxu1 %v3769_v4  ;;  %v3817_v40 = vld [vmem:[%s4100_s7 + $0x250] ss:$8 sps:$4 sm:$0xff]   ;;  %v3818_v41 = vld [vmem:[%s4100_s7 + $0x64] ss:$8 sps:$4 sm:$0xff]   ;;  %v3822_v43 = vld [vmem:[%s4100_s7 + $0x60] ss:$8 sps:$4 sm:$0xff]  }
  0x21   : > { %1193 = vmatprep.subr.bf16.mxu0 %v4016_v0  ;;  %3697 = vmatprep.subr.bf16.mxu1 %v4016_v0  ;;  %v3820_v42 = vld [vmem:[%s4100_s7 + $0x264] ss:$8 sps:$4 sm:$0xff]   ;;  %v3823_v44 = vld [vmem:[%s4100_s7 + $0x260] ss:$8 sps:$4 sm:$0xff]   ;;  %v3824_v45 = vld [vmem:[%s4100_s7 + $0x74] ss:$8 sps:$4 sm:$0xff]  }
  0x22   : > { %v3826_v46 = vld [vmem:[%s4100_s7 + $0x274] ss:$8 sps:$4 sm:$0xff]   ;;  %v3828_v47 = vld [vmem:[%s4100_s7 + $0x70] ss:$8 sps:$4 sm:$0xff]   ;;  %v3830_v49 = vld [vmem:[%s4100_s7 + $0x84] ss:$8 sps:$4 sm:$0xff]  }
  0x23   : > { %v3829_v48 = vld [vmem:[%s4100_s7 + $0x270] ss:$8 sps:$4 sm:$0xff]   ;;  %v3832_v50 = vld [vmem:[%s4100_s7 + $0x284] ss:$8 sps:$4 sm:$0xff]   ;;  %v3834_v51 = vld [vmem:[%s4100_s7 + $0x80] ss:$8 sps:$4 sm:$0xff]  }
  0x24   : > { %1194 = vmatpush1.bf16.msra.mxu0 %v3770_v5  ;;  %3713 = vmatpush1.bf16.msra.mxu1 %v3770_v5  ;;  %v3835_v52 = vld [vmem:[%s4100_s7 + $0x280] ss:$8 sps:$4 sm:$0xff]   ;;  %v3836_v53 = vld [vmem:[%s4100_s7 + $0x94] ss:$8 sps:$4 sm:$0xff]   ;;  %v3840_v55 = vld [vmem:[%s4100_s7 + $0x90] ss:$8 sps:$4 sm:$0xff]  }
  0x25   : > { %1195 = vmatprep.subr.bf16.mxu0 %v4016_v0  ;;  %3698 = vmatprep.subr.bf16.mxu1 %v4016_v0  ;;  %v3838_v54 = vld [vmem:[%s4100_s7 + $0x294] ss:$8 sps:$4 sm:$0xff]   ;;  %v3841_v56 = vld [vmem:[%s4100_s7 + $0x290] ss:$8 sps:$4 sm:$0xff]   ;;  %v3842_v57 = vld [vmem:[%s4100_s7 + $0xa4] ss:$8 sps:$4 sm:$0xff]  }
  0x26   : > { %v3844_v58 = vld [vmem:[%s4100_s7 + $0x2a4] ss:$8 sps:$4 sm:$0xff]   ;;  %v3846_v59 = vld [vmem:[%s4100_s7 + $0xa0] ss:$8 sps:$4 sm:$0xff]   ;;  %v3848_v61 = vld [vmem:[%s4100_s7 + $0xb4] ss:$8 sps:$4 sm:$0xff]  }
  0x27   : > { %v3847_v60 = vld [vmem:[%s4100_s7 + $0x2a0] ss:$8 sps:$4 sm:$0xff]   ;;  %v3850_v62 = vld [vmem:[%s4100_s7 + $0x2b4] ss:$8 sps:$4 sm:$0xff]   ;;  %v3852_v63 = vld [vmem:[%s4100_s7 + $0xb0] ss:$8 sps:$4 sm:$0xff]  }
  0x28   : > { %1196 = vmatpush1.bf16.msra.mxu0 %v3771_v7  ;;  %3714 = vmatpush1.bf16.msra.mxu1 %v3771_v7  ;;  %v3854_v1 = vld [vmem:[%s4100_s7 + $0xc4] ss:$8 sps:$4 sm:$0xff]   ;;  %v3858_v3 = vld [vmem:[%s4100_s7 + $0xc0] ss:$8 sps:$4 sm:$0xff]   ;;  %v3860_v5 = vld [vmem:[%s4100_s7 + $0xd4] ss:$8 sps:$4 sm:$0xff]  }
  0x29   : > { %1197 = vmatprep.subr.bf16.mxu0 %v4016_v0  ;;  %3699 = vmatprep.subr.bf16.mxu1 %v4016_v0  ;;  %v3856_v2 = vld [vmem:[%s4100_s7 + $0x2c4] ss:$8 sps:$4 sm:$0xff]   ;;  %v3859_v4 = vld [vmem:[%s4100_s7 + $0x2c0] ss:$8 sps:$4 sm:$0xff]   ;;  %v3862_v6 = vld [vmem:[%s4100_s7 + $0x2d4] ss:$8 sps:$4 sm:$0xff]  }
  0x2a   : > { %v3864_v7 = vld [vmem:[%s4100_s7 + $0xd0] ss:$8 sps:$4 sm:$0xff]  }
  0x2b   : > { %v3865_v8 = vld [vmem:[%s4100_s7 + $0x2d0] ss:$8 sps:$4 sm:$0xff]  }
  0x2c   : > { %1198 = vmatpush1.bf16.msra.mxu0 %v3772_v9  ;;  %3715 = vmatpush1.bf16.msra.mxu1 %v3772_v9  ;;  %v3866_v9 = vld [vmem:[%s4100_s7 + $0xe4] ss:$8 sps:$4 sm:$0xff]  }
  0x2d   : > { %1199 = vmatprep.subr.bf16.mxu0 %v4016_v0  ;;  %3700 = vmatprep.subr.bf16.mxu1 %v4016_v0 }
  0x30   : > { %1200 = vmatpush1.bf16.msra.mxu0 %v3773_v10  ;;  %3716 = vmatpush1.bf16.msra.mxu1 %v3773_v10  ;;  %v3868_v10 = vld [vmem:[%s4100_s7 + $0x2e4] ss:$8 sps:$4 sm:$0xff]  }
  0x31   : > { %1201 = vmatprep.subr.bf16.mxu0 %v4016_v0  ;;  %3701 = vmatprep.subr.bf16.mxu1 %v4016_v0 }
  0x34   : > { %1202 = vmatpush1.bf16.msra.mxu0 %v3774_v11  ;;  %3717 = vmatpush1.bf16.msra.mxu1 %v3774_v11  ;;  %v3870_v11 = vld [vmem:[%s4100_s7 + $0xe0] ss:$8 sps:$4 sm:$0xff]  }
  0x35   : > { %1203 = vmatprep.subr.bf16.mxu0 %v4016_v0  ;;  %3702 = vmatprep.subr.bf16.mxu1 %v4016_v0 }
  0x38   : > { %1204 = vmatpush1.bf16.msra.mxu0 %v3775_v12  ;;  %3718 = vmatpush1.bf16.msra.mxu1 %v3775_v12  ;;  %v3871_v12 = vld [vmem:[%s4100_s7 + $0x2e0] ss:$8 sps:$4 sm:$0xff]  }
  0x39   : > { %1205 = vmatprep.subr.bf16.mxu0 %v4016_v0  ;;  %3703 = vmatprep.subr.bf16.mxu1 %v4016_v0 }
  0x3c   : > { %1206 = vmatpush1.bf16.msra.mxu0 %v3776_v13  ;;  %3719 = vmatpush1.bf16.msra.mxu1 %v3776_v13  ;;  %v3872_v13 = vld [vmem:[%s4100_s7 + $0xf4] ss:$8 sps:$4 sm:$0xff]  }
  0x3d   : > { %1207 = vmatprep.subr.bf16.mxu0 %v4016_v0  ;;  %3704 = vmatprep.subr.bf16.mxu1 %v4016_v0 }
  0x40   : > { %1208 = vmatpush1.bf16.msra.mxu0 %v3777_v14  ;;  %3720 = vmatpush1.bf16.msra.mxu1 %v3777_v14  ;;  %v3874_v14 = vld [vmem:[%s4100_s7 + $0x2f4] ss:$8 sps:$4 sm:$0xff]  }
  0x41   : > { %1209 = vmatprep.subr.bf16.mxu0 %v4016_v0  ;;  %3705 = vmatprep.subr.bf16.mxu1 %v4016_v0 }
  0x44   : > { %1210 = vmatpush1.bf16.msra.mxu0 %v3778_v15  ;;  %3721 = vmatpush1.bf16.msra.mxu1 %v3778_v15  ;;  %v3876_v15 = vld [vmem:[%s4100_s7 + $0xf0] ss:$8 sps:$4 sm:$0xff]  }
  0x45   : > { %1211 = vmatprep.subr.bf16.mxu0 %v4016_v0  ;;  %3706 = vmatprep.subr.bf16.mxu1 %v4016_v0 }
  0x48   : > { %1212 = vmatpush1.bf16.msra.mxu0 %v3779_v16  ;;  %3722 = vmatpush1.bf16.msra.mxu1 %v3779_v16  ;;  %v3877_v16 = vld [vmem:[%s4100_s7 + $0x2f0] ss:$8 sps:$4 sm:$0xff]  }
  0x49   : > { %1213 = vmatprep.subr.bf16.mxu0 %v4016_v0  ;;  %3707 = vmatprep.subr.bf16.mxu1 %v4016_v0 }
  0x4c   : > { %1214 = vmatpush1.bf16.msra.mxu0 %v3780_v17  ;;  %3723 = vmatpush1.bf16.msra.mxu1 %v3780_v17  ;;  %v3878_v17 = vld [vmem:[%s4100_s7 + $0x104] ss:$8 sps:$4 sm:$0xff]  }
  0x4d   : > { %1215 = vmatprep.subr.bf16.mxu0 %v4016_v0  ;;  %3708 = vmatprep.subr.bf16.mxu1 %v4016_v0  ;;  %v3853_v0 = vld [vmem:[%s4100_s7 + $0x2b0] ss:$8 sps:$4 sm:$0xff]  }
  0x50   : > { %1216 = vmatpush1.bf16.msra.mxu0 %v3781_v18  ;;  %3724 = vmatpush1.bf16.msra.mxu1 %v3781_v18  ;;  %v3880_v18 = vld [vmem:[%s4100_s7 + $0x304] ss:$8 sps:$4 sm:$0xff]  }
  0x53   : > { %1218 = vmatmul.mubr.bf16.vlgmr.msra.gmra.mrb[0].mxu0 %v3782_v19  ;;  %1474 = vmatmul.mubr.bf16.vlgmr.msra.gmra.mrb[0].mxu1 %v3785_v20  ;;  %v3882_v19 = vld [vmem:[%s4100_s7 + $0x100] ss:$8 sps:$4 sm:$0xff]  }
  0x54   : > { %1225 = vmatprep.mubr.bf16.mxu0 %v3788_v21  ;;  %1481 = vmatprep.mubr.bf16.mxu1 %v3790_v22  ;;  %v3883_v20 = vld [vmem:[%s4100_s7 + $0x300] ss:$8 sps:$4 sm:$0xff]   ;;  %v3884_v21 = vld [vmem:[%s4100_s7 + $0x114] ss:$8 sps:$4 sm:$0xff]  }
  0x55   : > { %v3886_v22 = vld [vmem:[%s4100_s7 + $0x314] ss:$8 sps:$4 sm:$0xff]  }
  0x5b   : > { %1226 = vmatmul.mubr.bf16.gmra.mrb[4].mxu0 %v3792_v23  ;;  %1482 = vmatmul.mubr.bf16.gmra.mrb[4].mxu1 %v3793_v24  ;;  %v3888_v23 = vld [vmem:[%s4100_s7 + $0x110] ss:$8 sps:$4 sm:$0xff]  }
  0x5c   : > { %1233 = vmatprep.mubr.bf16.mxu0 %v3794_v25  ;;  %1489 = vmatprep.mubr.bf16.mxu1 %v3796_v26  ;;  %v3889_v24 = vld [vmem:[%s4100_s7 + $0x310] ss:$8 sps:$4 sm:$0xff]   ;;  %v3890_v25 = vld [vmem:[%s4100_s7 + $0x124] ss:$8 sps:$4 sm:$0xff]  }
  0x5d   : > { %v3892_v26 = vld [vmem:[%s4100_s7 + $0x324] ss:$8 sps:$4 sm:$0xff]  }
  0x63   : > { %1234 = vmatmul.mubr.bf16.gmra.mrb[8].mxu0 %v3798_v27  ;;  %1490 = vmatmul.mubr.bf16.gmra.mrb[8].mxu1 %v3799_v28  ;;  %v3894_v27 = vld [vmem:[%s4100_s7 + $0x120] ss:$8 sps:$4 sm:$0xff]  }
  0x64   : > { %1241 = vmatprep.mubr.bf16.mxu0 %v3800_v29  ;;  %1497 = vmatprep.mubr.bf16.mxu1 %v3802_v30  ;;  %v3895_v28 = vld [vmem:[%s4100_s7 + $0x320] ss:$8 sps:$4 sm:$0xff]   ;;  %v3896_v29 = vld [vmem:[%s4100_s7 + $0x134] ss:$8 sps:$4 sm:$0xff]  }
  0x65   : > { %v3898_v30 = vld [vmem:[%s4100_s7 + $0x334] ss:$8 sps:$4 sm:$0xff]  }
  0x6b   : > { %1242 = vmatmul.mubr.bf16.gmra.mrb[12].mxu0 %v3804_v31  ;;  %1498 = vmatmul.mubr.bf16.gmra.mrb[12].mxu1 %v3805_v32  ;;  %v3900_v31 = vld [vmem:[%s4100_s7 + $0x130] ss:$8 sps:$4 sm:$0xff]  }
  0x6c   : > { %1249 = vmatprep.mubr.bf16.mxu0 %v3806_v33  ;;  %1505 = vmatprep.mubr.bf16.mxu1 %v3808_v34  ;;  %v3901_v32 = vld [vmem:[%s4100_s7 + $0x330] ss:$8 sps:$4 sm:$0xff]   ;;  %v3902_v33 = vld [vmem:[%s4100_s7 + $0x144] ss:$8 sps:$4 sm:$0xff]  }
  0x6d   : > { %v3904_v34 = vld [vmem:[%s4100_s7 + $0x344] ss:$8 sps:$4 sm:$0xff]  }
  0x73   : > { %1250 = vmatmul.mubr.bf16.gmra.mrb[16].mxu0 %v3810_v35  ;;  %1506 = vmatmul.mubr.bf16.gmra.mrb[16].mxu1 %v3811_v36  ;;  %v3906_v35 = vld [vmem:[%s4100_s7 + $0x140] ss:$8 sps:$4 sm:$0xff]  }
  0x74   : > { %1257 = vmatprep.mubr.bf16.mxu0 %v3812_v37  ;;  %1513 = vmatprep.mubr.bf16.mxu1 %v3814_v38  ;;  %v3907_v36 = vld [vmem:[%s4100_s7 + $0x340] ss:$8 sps:$4 sm:$0xff]   ;;  %v3908_v37 = vld [vmem:[%s4100_s7 + $0x154] ss:$8 sps:$4 sm:$0xff]  }
  0x75   : > { %v3910_v38 = vld [vmem:[%s4100_s7 + $0x354] ss:$8 sps:$4 sm:$0xff]  }
  0x7b   : > { %1258 = vmatmul.mubr.bf16.gmra.mrb[20].mxu0 %v3816_v39  ;;  %1514 = vmatmul.mubr.bf16.gmra.mrb[20].mxu1 %v3817_v40  ;;  %v3912_v39 = vld [vmem:[%s4100_s7 + $0x150] ss:$8 sps:$4 sm:$0xff]  }
  0x7c   : > { %1265 = vmatprep.mubr.bf16.mxu0 %v3818_v41  ;;  %1521 = vmatprep.mubr.bf16.mxu1 %v3820_v42  ;;  %v3913_v40 = vld [vmem:[%s4100_s7 + $0x350] ss:$8 sps:$4 sm:$0xff]   ;;  %v3914_v41 = vld [vmem:[%s4100_s7 + $0x164] ss:$8 sps:$4 sm:$0xff]  }
  0x7d   : > { %v3916_v42 = vld [vmem:[%s4100_s7 + $0x364] ss:$8 sps:$4 sm:$0xff]  }
  0x83   : > { %1266 = vmatmul.mubr.bf16.gmra.mrb[24].mxu0 %v3822_v43  ;;  %1522 = vmatmul.mubr.bf16.gmra.mrb[24].mxu1 %v3823_v44  ;;  %v3918_v43 = vld [vmem:[%s4100_s7 + $0x160] ss:$8 sps:$4 sm:$0xff]  }
  0x84   : > { %1273 = vmatprep.mubr.bf16.mxu0 %v3824_v45  ;;  %1529 = vmatprep.mubr.bf16.mxu1 %v3826_v46  ;;  %v3919_v44 = vld [vmem:[%s4100_s7 + $0x360] ss:$8 sps:$4 sm:$0xff]   ;;  %v3920_v45 = vld [vmem:[%s4100_s7 + $0x174] ss:$8 sps:$4 sm:$0xff]  }
  0x85   : > { %v3922_v46 = vld [vmem:[%s4100_s7 + $0x374] ss:$8 sps:$4 sm:$0xff]  }
  0x8b   : > { %1274 = vmatmul.mubr.bf16.gmra.mrb[28].mxu0 %v3828_v47  ;;  %1530 = vmatmul.mubr.bf16.gmra.mrb[28].mxu1 %v3829_v48  ;;  %v3924_v47 = vld [vmem:[%s4100_s7 + $0x170] ss:$8 sps:$4 sm:$0xff]  }
  0x8c   : > { %1281 = vmatprep.mubr.bf16.mxu0 %v3830_v49  ;;  %1537 = vmatprep.mubr.bf16.mxu1 %v3832_v50  ;;  %v3925_v48 = vld [vmem:[%s4100_s7 + $0x370] ss:$8 sps:$4 sm:$0xff]   ;;  %v3926_v49 = vld [vmem:[%s4100_s7 + $0x184] ss:$8 sps:$4 sm:$0xff]  }
  0x8d   : > { %v3928_v50 = vld [vmem:[%s4100_s7 + $0x384] ss:$8 sps:$4 sm:$0xff]  }
  0x93   : > { %1282 = vmatmul.mubr.bf16.gmra.mrb[32].mxu0 %v3834_v51  ;;  %1538 = vmatmul.mubr.bf16.gmra.mrb[32].mxu1 %v3835_v52  ;;  %v3930_v51 = vld [vmem:[%s4100_s7 + $0x180] ss:$8 sps:$4 sm:$0xff]  }
  0x94   : > { %1289 = vmatprep.mubr.bf16.mxu0 %v3836_v53  ;;  %1545 = vmatprep.mubr.bf16.mxu1 %v3838_v54  ;;  %v3931_v52 = vld [vmem:[%s4100_s7 + $0x380] ss:$8 sps:$4 sm:$0xff]   ;;  %v3932_v53 = vld [vmem:[%s4100_s7 + $0x194] ss:$8 sps:$4 sm:$0xff]  }
  0x95   : > { %v3934_v54 = vld [vmem:[%s4100_s7 + $0x394] ss:$8 sps:$4 sm:$0xff]  }
  0x9b   : > { %1290 = vmatmul.mubr.bf16.gmra.mrb[36].mxu0 %v3840_v55  ;;  %1546 = vmatmul.mubr.bf16.gmra.mrb[36].mxu1 %v3841_v56  ;;  %v3936_v55 = vld [vmem:[%s4100_s7 + $0x190] ss:$8 sps:$4 sm:$0xff]  }
  0x9c   : > { %1297 = vmatprep.mubr.bf16.mxu0 %v3842_v57  ;;  %1553 = vmatprep.mubr.bf16.mxu1 %v3844_v58  ;;  %v3937_v56 = vld [vmem:[%s4100_s7 + $0x390] ss:$8 sps:$4 sm:$0xff]   ;;  %v3938_v57 = vld [vmem:[%s4100_s7 + $0x1a4] ss:$8 sps:$4 sm:$0xff]  }
  0x9d   : > { %v3940_v58 = vld [vmem:[%s4100_s7 + $0x3a4] ss:$8 sps:$4 sm:$0xff]  }
  0xa3   : > { %1298 = vmatmul.mubr.bf16.gmra.mrb[40].mxu0 %v3846_v59  ;;  %1554 = vmatmul.mubr.bf16.gmra.mrb[40].mxu1 %v3847_v60  ;;  %v3942_v59 = vld [vmem:[%s4100_s7 + $0x1a0] ss:$8 sps:$4 sm:$0xff]  }
  0xa4   : > { %1305 = vmatprep.mubr.bf16.mxu0 %v3848_v61  ;;  %1561 = vmatprep.mubr.bf16.mxu1 %v3850_v62  ;;  %v3943_v60 = vld [vmem:[%s4100_s7 + $0x3a0] ss:$8 sps:$4 sm:$0xff]   ;;  %v3944_v61 = vld [vmem:[%s4100_s7 + $0x1b4] ss:$8 sps:$4 sm:$0xff]  }
  0xa5   : > { %v3946_v62 = vld [vmem:[%s4100_s7 + $0x3b4] ss:$8 sps:$4 sm:$0xff]  }
  0xab   : > { %1306 = vmatmul.mubr.bf16.gmra.mrb[44].mxu0 %v3852_v63  ;;  %1562 = vmatmul.mubr.bf16.gmra.mrb[44].mxu1 %v3853_v0  ;;  %v4260_v63 = vld [vmem:[%s4251_s10] ss:$0 sm:$0xff] }
  0xac   : > { %1313 = vmatprep.mubr.bf16.mxu0 %v3854_v1  ;;  %1569 = vmatprep.mubr.bf16.mxu1 %v3856_v2  ;;  %v4264_v1 = vld [vmem:[%s4257_s13] ss:$0 sm:$0xff] }
  0xb3   : > { %1314 = vmatmul.mubr.bf16.gmra.mrb[48].mxu0 %v3858_v3  ;;  %1570 = vmatmul.mubr.bf16.gmra.mrb[48].mxu1 %v3859_v4 }
  0xb4   : > { %1321 = vmatprep.mubr.bf16.mxu0 %v3860_v5  ;;  %1577 = vmatprep.mubr.bf16.mxu1 %v3862_v6 }
  0xbb   : > { %1322 = vmatmul.mubr.bf16.gmra.mrb[52].mxu0 %v3864_v7  ;;  %1578 = vmatmul.mubr.bf16.gmra.mrb[52].mxu1 %v3865_v8  ;;  %v3948_v7 = vld [vmem:[%s4100_s7 + $0x1b0] ss:$8 sps:$4 sm:$0xff]  }
  0xbc   : > { %1329 = vmatprep.mubr.bf16.mxu0 %v3866_v9  ;;  %1585 = vmatprep.mubr.bf16.mxu1 %v3868_v10  ;;  %v3949_v8 = vld [vmem:[%s4100_s7 + $0x3b0] ss:$8 sps:$4 sm:$0xff]  }
  0xc3   : > { %1330 = vmatmul.mubr.bf16.gmra.mrb[56].mxu0 %v3870_v11  ;;  %1586 = vmatmul.mubr.bf16.gmra.mrb[56].mxu1 %v3871_v12  ;;  %v3950_v11 = vld [vmem:[%s4100_s7 + $0x1c4] ss:$8 sps:$4 sm:$0xff]  }
  0xc4   : > { %1337 = vmatprep.mubr.bf16.mxu0 %v3872_v13  ;;  %1593 = vmatprep.mubr.bf16.mxu1 %v3874_v14  ;;  %v3952_v12 = vld [vmem:[%s4100_s7 + $0x3c4] ss:$8 sps:$4 sm:$0xff]  }
  0xcb   : > { %1338 = vmatmul.mubr.bf16.gmra.mrb[60].mxu0 %v3876_v15  ;;  %1594 = vmatmul.mubr.bf16.gmra.mrb[60].mxu1 %v3877_v16 }
  0xcc   : > { %1345 = vmatprep.mubr.bf16.mxu0 %v3878_v17  ;;  %1601 = vmatprep.mubr.bf16.mxu1 %v3880_v18 }
  0xd3   : > { %1346 = vmatmul.mubr.bf16.gmra.mrb[64].mxu0 %v3882_v19  ;;  %1602 = vmatmul.mubr.bf16.gmra.mrb[64].mxu1 %v3883_v20 }
  0xd4   : > { %1353 = vmatprep.mubr.bf16.mxu0 %v3884_v21  ;;  %1609 = vmatprep.mubr.bf16.mxu1 %v3886_v22 }
  0xdb   : > { %1354 = vmatmul.mubr.bf16.gmra.mrb[68].mxu0 %v3888_v23  ;;  %1610 = vmatmul.mubr.bf16.gmra.mrb[68].mxu1 %v3889_v24 }
  0xdc   : > { %1361 = vmatprep.mubr.bf16.mxu0 %v3890_v25  ;;  %1617 = vmatprep.mubr.bf16.mxu1 %v3892_v26 }
  0xe3   : > { %1362 = vmatmul.mubr.bf16.gmra.mrb[72].mxu0 %v3894_v27  ;;  %1618 = vmatmul.mubr.bf16.gmra.mrb[72].mxu1 %v3895_v28 }
  0xe4   : > { %1369 = vmatprep.mubr.bf16.mxu0 %v3896_v29  ;;  %1625 = vmatprep.mubr.bf16.mxu1 %v3898_v30 }
  0xeb   : > { %1370 = vmatmul.mubr.bf16.gmra.mrb[76].mxu0 %v3900_v31  ;;  %1626 = vmatmul.mubr.bf16.gmra.mrb[76].mxu1 %v3901_v32 }
  0xec   : > { %1377 = vmatprep.mubr.bf16.mxu0 %v3902_v33  ;;  %1633 = vmatprep.mubr.bf16.mxu1 %v3904_v34  ;;  %v3954_v33 = vld [vmem:[%s4100_s7 + $0x1c0] ss:$8 sps:$4 sm:$0xff]  }
  0xed   : > { %v3955_v34 = vld [vmem:[%s4100_s7 + $0x3c0] ss:$8 sps:$4 sm:$0xff]  }
  0xf3   : > { %1378 = vmatmul.mubr.bf16.gmra.mrb[80].mxu0 %v3906_v35  ;;  %1634 = vmatmul.mubr.bf16.gmra.mrb[80].mxu1 %v3907_v36 }
  0xf4   : > { %1385 = vmatprep.mubr.bf16.mxu0 %v3908_v37  ;;  %1641 = vmatprep.mubr.bf16.mxu1 %v3910_v38  ;;  %v3956_v37 = vld [vmem:[%s4100_s7 + $0x1d4] ss:$8 sps:$4 sm:$0xff]  }
  0xf5   : > { %v3958_v38 = vld [vmem:[%s4100_s7 + $0x3d4] ss:$8 sps:$4 sm:$0xff]  }
  0xfb   : > { %1386 = vmatmul.mubr.bf16.gmra.mrb[84].mxu0 %v3912_v39  ;;  %1642 = vmatmul.mubr.bf16.gmra.mrb[84].mxu1 %v3913_v40 }
  0xfc   : > { %1393 = vmatprep.mubr.bf16.mxu0 %v3914_v41  ;;  %1649 = vmatprep.mubr.bf16.mxu1 %v3916_v42 }
 0x103   : > { %1394 = vmatmul.mubr.bf16.gmra.mrb[88].mxu0 %v3918_v43  ;;  %1650 = vmatmul.mubr.bf16.gmra.mrb[88].mxu1 %v3919_v44 }
 0x104   : > { %1401 = vmatprep.mubr.bf16.mxu0 %v3920_v45  ;;  %1657 = vmatprep.mubr.bf16.mxu1 %v3922_v46 }
 0x10b   : > { %1402 = vmatmul.mubr.bf16.gmra.mrb[92].mxu0 %v3924_v47  ;;  %1658 = vmatmul.mubr.bf16.gmra.mrb[92].mxu1 %v3925_v48 }
 0x10c   : > { %1409 = vmatprep.mubr.bf16.mxu0 %v3926_v49  ;;  %1665 = vmatprep.mubr.bf16.mxu1 %v3928_v50 }
 0x113   : > { %1410 = vmatmul.mubr.bf16.gmra.mrb[96].mxu0 %v3930_v51  ;;  %1666 = vmatmul.mubr.bf16.gmra.mrb[96].mxu1 %v3931_v52 }
 0x114   : > { %1417 = vmatprep.mubr.bf16.mxu0 %v3932_v53  ;;  %1673 = vmatprep.mubr.bf16.mxu1 %v3934_v54 }
 0x11b   : > { %1418 = vmatmul.mubr.bf16.gmra.mrb[100].mxu0 %v3936_v55  ;;  %1674 = vmatmul.mubr.bf16.gmra.mrb[100].mxu1 %v3937_v56 }
 0x11c   : > { %1425 = vmatprep.mubr.bf16.mxu0 %v3938_v57  ;;  %1681 = vmatprep.mubr.bf16.mxu1 %v3940_v58 }
 0x123   : > { %1426 = vmatmul.mubr.bf16.gmra.mrb[104].mxu0 %v3942_v59  ;;  %1682 = vmatmul.mubr.bf16.gmra.mrb[104].mxu1 %v3943_v60  ;;  %v3960_v59 = vld [vmem:[%s4100_s7 + $0x1d0] ss:$8 sps:$4 sm:$0xff]  }
 0x124   : > { %1433 = vmatprep.mubr.bf16.mxu0 %v3944_v61  ;;  %1689 = vmatprep.mubr.bf16.mxu1 %v3946_v62  ;;  %v3961_v60 = vld [vmem:[%s4100_s7 + $0x3d0] ss:$8 sps:$4 sm:$0xff]  }
 0x126   : > { %v1219_v0 = vpop.f32.mrb[0].mxu0  ;;  %v1475_v2 = vpop.f32.mrb[0].mxu1 }
 0x127   : > { %v1737_v3 = vmul.f32 %v4260_v63, %v1219_v0  ;;  %v1801_v4 = vmul.f32 %v4260_v63, %v1475_v2  ;;  %v1221_v5 = vpop.f32.mrb[1].mxu0  ;;  %v1477_v6 = vpop.f32.mrb[1].mxu1  ;;  %v3962_v0 = vld [vmem:[%s4100_s7 + $0x1e4] ss:$8 sps:$4 sm:$0xff]  }
 0x128   : > { %v1222_v9 = vpop.f32.mrb[2].mxu0  ;;  %v1478_v10 = vpop.f32.mrb[2].mxu1  ;;  %v3964_v2 = vld [vmem:[%s4100_s7 + $0x3e4] ss:$8 sps:$4 sm:$0xff]  }
 0x129   : > { %v1872_v13 = vadd.f32 %v4264_v1, %v1737_v3  ;;  %v1936_v14 = vadd.f32 %v4264_v1, %v1801_v4  ;;  %v1738_v15 = vmul.f32 %v4260_v63, %v1222_v9  ;;  %v1802_v16 = vmul.f32 %v4260_v63, %v1478_v10  ;;  %v1224_v17 = vpop.f32.mrb[3].mxu0  ;;  %v1480_v18 = vpop.f32.mrb[3].mxu1 }
 0x12b   : > { %v1873_v19 = vadd.f32 %v4264_v1, %v1738_v15  ;;  %v1937_v20 = vadd.f32 %v4264_v1, %v1802_v16  ;;  %1434 = vmatmul.mubr.bf16.gmra.mrb[108].mxu0 %v3948_v7  ;;  %1690 = vmatmul.mubr.bf16.gmra.mrb[108].mxu1 %v3949_v8  ;;  %v2000_v21 = vmax.f32 %v1872_v13, 0.0  ;;  %v2064_v22 = vmax.f32 %v1936_v14, 0.0 }
 0x12c   : > { %1441 = vmatprep.mubr.bf16.mxu0 %v3950_v11  ;;  %1697 = vmatprep.mubr.bf16.mxu1 %v3952_v12 }
 0x12d   : > { %v2001_v23 = vmax.f32 %v1873_v19, 0.0  ;;  %v2065_v24 = vmax.f32 %v1937_v20, 0.0 }
 0x12e   : > { %v1227_v25 = vpop.f32.mrb[4].mxu0  ;;  %v1483_v26 = vpop.f32.mrb[4].mxu1 }
 0x12f   : > { %v3313_v27 = vpack.c.bf16 %v2001_v23, %v2000_v21  ;;  %v3473_v28 = vpack.c.bf16 %v2065_v24, %v2064_v22  ;;  %v1739_v29 = vmul.f32 %v4260_v63, %v1227_v25  ;;  %v1803_v30 = vmul.f32 %v4260_v63, %v1483_v26  ;;  %v1229_v31 = vpop.f32.mrb[5].mxu0  ;;  %v1485_v32 = vpop.f32.mrb[5].mxu1  ;;  %v3966_v23 = vld [vmem:[%s4100_s7 + $0x1e0] ss:$8 sps:$4 sm:$0xff]  }
 0x130   : > { %v1230_v35 = vpop.f32.mrb[6].mxu0  ;;  %v1486_v36 = vpop.f32.mrb[6].mxu1  ;;  %v3967_v24 = vld [vmem:[%s4100_s7 + $0x3e0] ss:$8 sps:$4 sm:$0xff]  }
 0x131   : > { %3314 = vst [vmem:[%s4282_s24] sm:$0xff] %v3313_v27   ;;  %3661 = vst [vmem:[%s4282_s24 + $0x100] sm:$0xff] %v3473_v28   ;;  %v1874_v39 = vadd.f32 %v4264_v1, %v1739_v29  ;;  %v1938_v40 = vadd.f32 %v4264_v1, %v1803_v30  ;;  %v1740_v41 = vmul.f32 %v4260_v63, %v1230_v35  ;;  %v1232_v43 = vpop.f32.mrb[7].mxu0  ;;  %v1488_v44 = vpop.f32.mrb[7].mxu1  ;;  %v3968_v27 = vld [vmem:[%s4100_s7 + $0x1f4] ss:$8 sps:$4 sm:$0xff]  }
 0x132   : > { %v1804_v42 = vmul.f32 %v4260_v63, %v1486_v36  ;;  %v3970_v28 = vld [vmem:[%s4100_s7 + $0x3f4] ss:$8 sps:$4 sm:$0xff]  }
 0x133   : > { %v1875_v45 = vadd.f32 %v4264_v1, %v1740_v41  ;;  %1442 = vmatmul.mubr.bf16.gmra.mrb[112].mxu0 %v3954_v33  ;;  %1698 = vmatmul.mubr.bf16.gmra.mrb[112].mxu1 %v3955_v34  ;;  %v2002_v47 = vmax.f32 %v1874_v39, 0.0  ;;  %v2066_v48 = vmax.f32 %v1938_v40, 0.0 }
 0x134   : > { %v1939_v46 = vadd.f32 %v4264_v1, %v1804_v42  ;;  %1449 = vmatprep.mubr.bf16.mxu0 %v3956_v37  ;;  %1705 = vmatprep.mubr.bf16.mxu1 %v3958_v38 }
 0x135   : > { %v2003_v49 = vmax.f32 %v1875_v45, 0.0 }
 0x136   : > { %v2067_v50 = vmax.f32 %v1939_v46, 0.0  ;;  %v1235_v51 = vpop.f32.mrb[8].mxu0  ;;  %v1491_v52 = vpop.f32.mrb[8].mxu1 }
 0x137   : > { %v3318_v53 = vpack.c.bf16 %v2003_v49, %v2002_v47  ;;  %v1741_v55 = vmul.f32 %v4260_v63, %v1235_v51  ;;  %v1805_v56 = vmul.f32 %v4260_v63, %v1491_v52  ;;  %v1237_v57 = vpop.f32.mrb[9].mxu0  ;;  %v1493_v58 = vpop.f32.mrb[9].mxu1  ;;  %v3972_v49 = vld [vmem:[%s4100_s7 + $0x1f0] ss:$8 sps:$4 sm:$0xff]  }
 0x138   : > { %v3478_v54 = vpack.c.bf16 %v2067_v50, %v2066_v48  ;;  %v1238_v61 = vpop.f32.mrb[10].mxu0  ;;  %v1494_v62 = vpop.f32.mrb[10].mxu1  ;;  %v3973_v50 = vld [vmem:[%s4100_s7 + $0x3f0] ss:$8 sps:$4 sm:$0xff]  }
 0x139   : > { %3630 = vst [vmem:[%s4282_s24 + $0x8] sm:$0xff] %v3318_v53   ;;  %v1876_v3 = vadd.f32 %v4264_v1, %v1741_v55  ;;  %v1940_v4 = vadd.f32 %v4264_v1, %v1805_v56  ;;  %v1742_v5 = vmul.f32 %v4260_v63, %v1238_v61  ;;  %v1806_v6 = vmul.f32 %v4260_v63, %v1494_v62  ;;  %v1240_v7 = vpop.f32.mrb[11].mxu0  ;;  %v1496_v8 = vpop.f32.mrb[11].mxu1 }
 0x13a   : > { %3662 = vst [vmem:[%s4282_s24 + $0x108] sm:$0xff] %v3478_v54  }
 0x13b   : > { %v1877_v9 = vadd.f32 %v4264_v1, %v1742_v5  ;;  %v1941_v10 = vadd.f32 %v4264_v1, %v1806_v6  ;;  %1450 = vmatmul.mubr.bf16.gmra.mrb[116].mxu0 %v3960_v59  ;;  %1706 = vmatmul.mubr.bf16.gmra.mrb[116].mxu1 %v3961_v60  ;;  %v2004_v11 = vmax.f32 %v1876_v3, 0.0  ;;  %v2068_v12 = vmax.f32 %v1940_v4, 0.0 }
 0x13c   : > { %1457 = vmatprep.mubr.bf16.mxu0 %v3962_v0  ;;  %1713 = vmatprep.mubr.bf16.mxu1 %v3964_v2 }
 0x13d   : > { %v2005_v13 = vmax.f32 %v1877_v9, 0.0  ;;  %v2069_v14 = vmax.f32 %v1941_v10, 0.0 }
 0x13e   : > { %v1243_v15 = vpop.f32.mrb[12].mxu0  ;;  %v1499_v16 = vpop.f32.mrb[12].mxu1 }
 0x13f   : > { %v3323_v17 = vpack.c.bf16 %v2005_v13, %v2004_v11  ;;  %v3483_v18 = vpack.c.bf16 %v2069_v14, %v2068_v12  ;;  %v1743_v19 = vmul.f32 %v4260_v63, %v1243_v15  ;;  %v1807_v20 = vmul.f32 %v4260_v63, %v1499_v16  ;;  %v1245_v21 = vpop.f32.mrb[13].mxu0  ;;  %v1501_v22 = vpop.f32.mrb[13].mxu1 }
 0x140   : > { %v1246_v25 = vpop.f32.mrb[14].mxu0  ;;  %v1502_v26 = vpop.f32.mrb[14].mxu1 }
 0x141   : > { %3631 = vst [vmem:[%s4282_s24 + $0x10] sm:$0xff] %v3323_v17   ;;  %3663 = vst [vmem:[%s4282_s24 + $0x110] sm:$0xff] %v3483_v18   ;;  %v1878_v29 = vadd.f32 %v4264_v1, %v1743_v19  ;;  %v1942_v30 = vadd.f32 %v4264_v1, %v1807_v20  ;;  %v1744_v31 = vmul.f32 %v4260_v63, %v1246_v25  ;;  %v1248_v33 = vpop.f32.mrb[15].mxu0  ;;  %v1504_v34 = vpop.f32.mrb[15].mxu1 }
 0x142   : > { %v1808_v32 = vmul.f32 %v4260_v63, %v1502_v26 }
 0x143   : > { %v1879_v35 = vadd.f32 %v4264_v1, %v1744_v31  ;;  %1458 = vmatmul.mubr.bf16.gmra.mrb[120].mxu0 %v3966_v23  ;;  %1714 = vmatmul.mubr.bf16.gmra.mrb[120].mxu1 %v3967_v24  ;;  %v2006_v37 = vmax.f32 %v1878_v29, 0.0  ;;  %v2070_v38 = vmax.f32 %v1942_v30, 0.0 }
 0x144   : > { %v1943_v36 = vadd.f32 %v4264_v1, %v1808_v32  ;;  %1465 = vmatprep.mubr.bf16.mxu0 %v3968_v27  ;;  %1721 = vmatprep.mubr.bf16.mxu1 %v3970_v28 }
 0x145   : > { %v2007_v39 = vmax.f32 %v1879_v35, 0.0 }
 0x146   : > { %v2071_v40 = vmax.f32 %v1943_v36, 0.0  ;;  %v1251_v41 = vpop.f32.mrb[16].mxu0  ;;  %v1507_v42 = vpop.f32.mrb[16].mxu1 }
 0x147   : > { %v3328_v43 = vpack.c.bf16 %v2007_v39, %v2006_v37  ;;  %v1745_v45 = vmul.f32 %v4260_v63, %v1251_v41  ;;  %v1809_v46 = vmul.f32 %v4260_v63, %v1507_v42  ;;  %v1253_v47 = vpop.f32.mrb[17].mxu0  ;;  %v1509_v48 = vpop.f32.mrb[17].mxu1 }
 0x148   : > { %v3488_v44 = vpack.c.bf16 %v2071_v40, %v2070_v38  ;;  %v1254_v51 = vpop.f32.mrb[18].mxu0  ;;  %v1510_v52 = vpop.f32.mrb[18].mxu1 }
 0x149   : > { %3632 = vst [vmem:[%s4282_s24 + $0x18] sm:$0xff] %v3328_v43   ;;  %v1880_v53 = vadd.f32 %v4264_v1, %v1745_v45  ;;  %v1944_v54 = vadd.f32 %v4264_v1, %v1809_v46  ;;  %v1746_v55 = vmul.f32 %v4260_v63, %v1254_v51  ;;  %v1810_v56 = vmul.f32 %v4260_v63, %v1510_v52  ;;  %v1256_v57 = vpop.f32.mrb[19].mxu0  ;;  %v1512_v58 = vpop.f32.mrb[19].mxu1 }
 0x14a   : > { %3664 = vst [vmem:[%s4282_s24 + $0x118] sm:$0xff] %v3488_v44  }
 0x14b   : > { %v1881_v59 = vadd.f32 %v4264_v1, %v1746_v55  ;;  %v1945_v60 = vadd.f32 %v4264_v1, %v1810_v56  ;;  %1466 = vmatmul.mubr.bf16.gmra.mrb[124].mxu0 %v3972_v49  ;;  %1722 = vmatmul.mubr.bf16.gmra.mrb[124].mxu1 %v3973_v50  ;;  %v2008_v61 = vmax.f32 %v1880_v53, 0.0  ;;  %v2072_v62 = vmax.f32 %v1944_v54, 0.0 }
 0x14d   : > { %v2009_v0 = vmax.f32 %v1881_v59, 0.0  ;;  %v2073_v2 = vmax.f32 %v1945_v60, 0.0 }
 0x14e   : > { %v1259_v3 = vpop.f32.mrb[20].mxu0  ;;  %v1515_v4 = vpop.f32.mrb[20].mxu1 }
 0x14f   : > { %v3333_v5 = vpack.c.bf16 %v2009_v0, %v2008_v61  ;;  %v3493_v6 = vpack.c.bf16 %v2073_v2, %v2072_v62  ;;  %v1747_v7 = vmul.f32 %v4260_v63, %v1259_v3  ;;  %v1811_v8 = vmul.f32 %v4260_v63, %v1515_v4  ;;  %v1261_v9 = vpop.f32.mrb[21].mxu0  ;;  %v1517_v10 = vpop.f32.mrb[21].mxu1 }
 0x150   : > { %v1262_v11 = vpop.f32.mrb[22].mxu0  ;;  %v1518_v12 = vpop.f32.mrb[22].mxu1 }
 0x151   : > { %3633 = vst [vmem:[%s4282_s24 + $0x20] sm:$0xff] %v3333_v5   ;;  %3665 = vst [vmem:[%s4282_s24 + $0x120] sm:$0xff] %v3493_v6   ;;  %v1882_v13 = vadd.f32 %v4264_v1, %v1747_v7  ;;  %v1946_v14 = vadd.f32 %v4264_v1, %v1811_v8  ;;  %v1748_v15 = vmul.f32 %v4260_v63, %v1262_v11  ;;  %v1264_v17 = vpop.f32.mrb[23].mxu0  ;;  %v1520_v18 = vpop.f32.mrb[23].mxu1 }
 0x152   : > { %v1812_v16 = vmul.f32 %v4260_v63, %v1518_v12 }
 0x153   : > { %v1883_v19 = vadd.f32 %v4264_v1, %v1748_v15  ;;  %v2010_v21 = vmax.f32 %v1882_v13, 0.0  ;;  %v2074_v22 = vmax.f32 %v1946_v14, 0.0 }
 0x154   : > { %v1947_v20 = vadd.f32 %v4264_v1, %v1812_v16 }
 0x155   : > { %v2011_v23 = vmax.f32 %v1883_v19, 0.0 }
 0x156   : > { %v2075_v24 = vmax.f32 %v1947_v20, 0.0  ;;  %v1267_v25 = vpop.f32.mrb[24].mxu0  ;;  %v1523_v26 = vpop.f32.mrb[24].mxu1 }
 0x157   : > { %v3338_v27 = vpack.c.bf16 %v2011_v23, %v2010_v21  ;;  %v1749_v29 = vmul.f32 %v4260_v63, %v1267_v25  ;;  %v1813_v30 = vmul.f32 %v4260_v63, %v1523_v26  ;;  %v1269_v31 = vpop.f32.mrb[25].mxu0  ;;  %v1525_v32 = vpop.f32.mrb[25].mxu1 }
 0x158   : > { %v3498_v28 = vpack.c.bf16 %v2075_v24, %v2074_v22  ;;  %v1270_v33 = vpop.f32.mrb[26].mxu0  ;;  %v1526_v34 = vpop.f32.mrb[26].mxu1 }
 0x159   : > { %3634 = vst [vmem:[%s4282_s24 + $0x28] sm:$0xff] %v3338_v27   ;;  %v1884_v35 = vadd.f32 %v4264_v1, %v1749_v29  ;;  %v1948_v36 = vadd.f32 %v4264_v1, %v1813_v30  ;;  %v1750_v37 = vmul.f32 %v4260_v63, %v1270_v33  ;;  %v1814_v38 = vmul.f32 %v4260_v63, %v1526_v34  ;;  %v1272_v39 = vpop.f32.mrb[27].mxu0  ;;  %v1528_v40 = vpop.f32.mrb[27].mxu1 }
 0x15a   : > { %3666 = vst [vmem:[%s4282_s24 + $0x128] sm:$0xff] %v3498_v28  }
 0x15b   : > { %v1885_v41 = vadd.f32 %v4264_v1, %v1750_v37  ;;  %v1949_v42 = vadd.f32 %v4264_v1, %v1814_v38  ;;  %v2012_v43 = vmax.f32 %v1884_v35, 0.0  ;;  %v2076_v44 = vmax.f32 %v1948_v36, 0.0 }
 0x15d   : > { %v2013_v45 = vmax.f32 %v1885_v41, 0.0  ;;  %v2077_v46 = vmax.f32 %v1949_v42, 0.0 }
 0x15e   : > { %v1275_v47 = vpop.f32.mrb[28].mxu0  ;;  %v1531_v48 = vpop.f32.mrb[28].mxu1 }
 0x15f   : > { %v3343_v49 = vpack.c.bf16 %v2013_v45, %v2012_v43  ;;  %v3503_v50 = vpack.c.bf16 %v2077_v46, %v2076_v44  ;;  %v1751_v51 = vmul.f32 %v4260_v63, %v1275_v47  ;;  %v1815_v52 = vmul.f32 %v4260_v63, %v1531_v48  ;;  %v1277_v53 = vpop.f32.mrb[29].mxu0  ;;  %v1533_v54 = vpop.f32.mrb[29].mxu1 }
 0x160   : > { %v1278_v55 = vpop.f32.mrb[30].mxu0  ;;  %v1534_v56 = vpop.f32.mrb[30].mxu1 }
 0x161   : > { %3635 = vst [vmem:[%s4282_s24 + $0x30] sm:$0xff] %v3343_v49   ;;  %3667 = vst [vmem:[%s4282_s24 + $0x130] sm:$0xff] %v3503_v50   ;;  %v1886_v57 = vadd.f32 %v4264_v1, %v1751_v51  ;;  %v1950_v58 = vadd.f32 %v4264_v1, %v1815_v52  ;;  %v1752_v59 = vmul.f32 %v4260_v63, %v1278_v55  ;;  %v1280_v61 = vpop.f32.mrb[31].mxu0  ;;  %v1536_v62 = vpop.f32.mrb[31].mxu1 }
 0x162   : > { %v1816_v60 = vmul.f32 %v4260_v63, %v1534_v56 }
 0x163   : > { %v1887_v0 = vadd.f32 %v4264_v1, %v1752_v59  ;;  %v2014_v3 = vmax.f32 %v1886_v57, 0.0  ;;  %v2078_v4 = vmax.f32 %v1950_v58, 0.0 }
 0x164   : > { %v1951_v2 = vadd.f32 %v4264_v1, %v1816_v60 }
 0x165   : > { %v2015_v5 = vmax.f32 %v1887_v0, 0.0 }
 0x166   : > { %v2079_v6 = vmax.f32 %v1951_v2, 0.0  ;;  %v1283_v7 = vpop.f32.mrb[32].mxu0  ;;  %v1539_v8 = vpop.f32.mrb[32].mxu1 }
 0x167   : > { %v3348_v9 = vpack.c.bf16 %v2015_v5, %v2014_v3  ;;  %v1753_v11 = vmul.f32 %v4260_v63, %v1283_v7  ;;  %v1817_v12 = vmul.f32 %v4260_v63, %v1539_v8  ;;  %v1285_v13 = vpop.f32.mrb[33].mxu0  ;;  %v1541_v14 = vpop.f32.mrb[33].mxu1 }
 0x168   : > { %v3508_v10 = vpack.c.bf16 %v2079_v6, %v2078_v4  ;;  %v1286_v15 = vpop.f32.mrb[34].mxu0  ;;  %v1542_v16 = vpop.f32.mrb[34].mxu1 }
 0x169   : > { %3636 = vst [vmem:[%s4282_s24 + $0x38] sm:$0xff] %v3348_v9   ;;  %v1888_v17 = vadd.f32 %v4264_v1, %v1753_v11  ;;  %v1952_v18 = vadd.f32 %v4264_v1, %v1817_v12  ;;  %v1754_v19 = vmul.f32 %v4260_v63, %v1286_v15  ;;  %v1818_v20 = vmul.f32 %v4260_v63, %v1542_v16  ;;  %v1288_v21 = vpop.f32.mrb[35].mxu0  ;;  %v1544_v22 = vpop.f32.mrb[35].mxu1 }
 0x16a   : > { %3668 = vst [vmem:[%s4282_s24 + $0x138] sm:$0xff] %v3508_v10  }
 0x16b   : > { %v1889_v23 = vadd.f32 %v4264_v1, %v1754_v19  ;;  %v1953_v24 = vadd.f32 %v4264_v1, %v1818_v20  ;;  %v2016_v25 = vmax.f32 %v1888_v17, 0.0  ;;  %v2080_v26 = vmax.f32 %v1952_v18, 0.0 }
 0x16d   : > { %v2017_v27 = vmax.f32 %v1889_v23, 0.0  ;;  %v2081_v28 = vmax.f32 %v1953_v24, 0.0 }
 0x16e   : > { %v1291_v29 = vpop.f32.mrb[36].mxu0  ;;  %v1547_v30 = vpop.f32.mrb[36].mxu1 }
 0x16f   : > { %v3353_v31 = vpack.c.bf16 %v2017_v27, %v2016_v25  ;;  %v3513_v32 = vpack.c.bf16 %v2081_v28, %v2080_v26  ;;  %v1755_v33 = vmul.f32 %v4260_v63, %v1291_v29  ;;  %v1819_v34 = vmul.f32 %v4260_v63, %v1547_v30  ;;  %v1293_v35 = vpop.f32.mrb[37].mxu0  ;;  %v1549_v36 = vpop.f32.mrb[37].mxu1 }
 0x170   : > { %v1294_v37 = vpop.f32.mrb[38].mxu0  ;;  %v1550_v38 = vpop.f32.mrb[38].mxu1 }
 0x171   : > { %3637 = vst [vmem:[%s4282_s24 + $0x40] sm:$0xff] %v3353_v31   ;;  %3669 = vst [vmem:[%s4282_s24 + $0x140] sm:$0xff] %v3513_v32   ;;  %v1890_v39 = vadd.f32 %v4264_v1, %v1755_v33  ;;  %v1954_v40 = vadd.f32 %v4264_v1, %v1819_v34  ;;  %v1756_v41 = vmul.f32 %v4260_v63, %v1294_v37  ;;  %v1296_v43 = vpop.f32.mrb[39].mxu0  ;;  %v1552_v44 = vpop.f32.mrb[39].mxu1 }
 0x172   : > { %v1820_v42 = vmul.f32 %v4260_v63, %v1550_v38 }
 0x173   : > { %v1891_v45 = vadd.f32 %v4264_v1, %v1756_v41  ;;  %v2018_v47 = vmax.f32 %v1890_v39, 0.0  ;;  %v2082_v48 = vmax.f32 %v1954_v40, 0.0 }
 0x174   : > { %v1955_v46 = vadd.f32 %v4264_v1, %v1820_v42 }
 0x175   : > { %v2019_v49 = vmax.f32 %v1891_v45, 0.0 }
 0x176   : > { %v2083_v50 = vmax.f32 %v1955_v46, 0.0  ;;  %v1299_v51 = vpop.f32.mrb[40].mxu0  ;;  %v1555_v52 = vpop.f32.mrb[40].mxu1 }
 0x177   : > { %v3358_v53 = vpack.c.bf16 %v2019_v49, %v2018_v47  ;;  %v1757_v55 = vmul.f32 %v4260_v63, %v1299_v51  ;;  %v1821_v56 = vmul.f32 %v4260_v63, %v1555_v52  ;;  %v1301_v57 = vpop.f32.mrb[41].mxu0  ;;  %v1557_v58 = vpop.f32.mrb[41].mxu1 }
 0x178   : > { %v3518_v54 = vpack.c.bf16 %v2083_v50, %v2082_v48  ;;  %v1302_v59 = vpop.f32.mrb[42].mxu0  ;;  %v1558_v60 = vpop.f32.mrb[42].mxu1 }
 0x179   : > { %3638 = vst [vmem:[%s4282_s24 + $0x48] sm:$0xff] %v3358_v53   ;;  %v1892_v61 = vadd.f32 %v4264_v1, %v1757_v55  ;;  %v1956_v62 = vadd.f32 %v4264_v1, %v1821_v56  ;;  %v1758_v0 = vmul.f32 %v4260_v63, %v1302_v59  ;;  %v1822_v2 = vmul.f32 %v4260_v63, %v1558_v60  ;;  %v1304_v3 = vpop.f32.mrb[43].mxu0  ;;  %v1560_v4 = vpop.f32.mrb[43].mxu1 }
 0x17a   : > { %3670 = vst [vmem:[%s4282_s24 + $0x148] sm:$0xff] %v3518_v54  }
 0x17b   : > { %v1893_v5 = vadd.f32 %v4264_v1, %v1758_v0  ;;  %v1957_v6 = vadd.f32 %v4264_v1, %v1822_v2  ;;  %v2020_v7 = vmax.f32 %v1892_v61, 0.0  ;;  %v2084_v8 = vmax.f32 %v1956_v62, 0.0 }
 0x17d   : > { %v2021_v9 = vmax.f32 %v1893_v5, 0.0  ;;  %v2085_v10 = vmax.f32 %v1957_v6, 0.0 }
 0x17e   : > { %v1307_v11 = vpop.f32.mrb[44].mxu0  ;;  %v1563_v12 = vpop.f32.mrb[44].mxu1 }
 0x17f   : > { %v3363_v13 = vpack.c.bf16 %v2021_v9, %v2020_v7  ;;  %v3523_v14 = vpack.c.bf16 %v2085_v10, %v2084_v8  ;;  %v1759_v15 = vmul.f32 %v4260_v63, %v1307_v11  ;;  %v1823_v16 = vmul.f32 %v4260_v63, %v1563_v12  ;;  %v1309_v17 = vpop.f32.mrb[45].mxu0  ;;  %v1565_v18 = vpop.f32.mrb[45].mxu1 }
 0x180   : > { %v1310_v19 = vpop.f32.mrb[46].mxu0  ;;  %v1566_v20 = vpop.f32.mrb[46].mxu1 }
 0x181   : > { %3639 = vst [vmem:[%s4282_s24 + $0x50] sm:$0xff] %v3363_v13   ;;  %3671 = vst [vmem:[%s4282_s24 + $0x150] sm:$0xff] %v3523_v14   ;;  %v1894_v21 = vadd.f32 %v4264_v1, %v1759_v15  ;;  %v1958_v22 = vadd.f32 %v4264_v1, %v1823_v16  ;;  %v1760_v23 = vmul.f32 %v4260_v63, %v1310_v19  ;;  %v1312_v25 = vpop.f32.mrb[47].mxu0  ;;  %v1568_v26 = vpop.f32.mrb[47].mxu1 }
 0x182   : > { %v1824_v24 = vmul.f32 %v4260_v63, %v1566_v20 }
 0x183   : > { %v1895_v27 = vadd.f32 %v4264_v1, %v1760_v23  ;;  %v2022_v29 = vmax.f32 %v1894_v21, 0.0  ;;  %v2086_v30 = vmax.f32 %v1958_v22, 0.0 }
 0x184   : > { %v1959_v28 = vadd.f32 %v4264_v1, %v1824_v24 }
 0x185   : > { %v2023_v31 = vmax.f32 %v1895_v27, 0.0 }
 0x186   : > { %v2087_v32 = vmax.f32 %v1959_v28, 0.0  ;;  %v1315_v33 = vpop.f32.mrb[48].mxu0  ;;  %v1571_v34 = vpop.f32.mrb[48].mxu1 }
 0x187   : > { %v3368_v35 = vpack.c.bf16 %v2023_v31, %v2022_v29  ;;  %v1761_v37 = vmul.f32 %v4260_v63, %v1315_v33  ;;  %v1825_v38 = vmul.f32 %v4260_v63, %v1571_v34  ;;  %v1317_v39 = vpop.f32.mrb[49].mxu0  ;;  %v1573_v40 = vpop.f32.mrb[49].mxu1 }
 0x188   : > { %v3528_v36 = vpack.c.bf16 %v2087_v32, %v2086_v30  ;;  %v1318_v41 = vpop.f32.mrb[50].mxu0  ;;  %v1574_v42 = vpop.f32.mrb[50].mxu1 }
 0x189   : > { %3640 = vst [vmem:[%s4282_s24 + $0x58] sm:$0xff] %v3368_v35   ;;  %v1896_v43 = vadd.f32 %v4264_v1, %v1761_v37  ;;  %v1960_v44 = vadd.f32 %v4264_v1, %v1825_v38  ;;  %v1762_v45 = vmul.f32 %v4260_v63, %v1318_v41  ;;  %v1826_v46 = vmul.f32 %v4260_v63, %v1574_v42  ;;  %v1320_v47 = vpop.f32.mrb[51].mxu0  ;;  %v1576_v48 = vpop.f32.mrb[51].mxu1 }
 0x18a   : > { %3672 = vst [vmem:[%s4282_s24 + $0x158] sm:$0xff] %v3528_v36  }
 0x18b   : > { %v1897_v49 = vadd.f32 %v4264_v1, %v1762_v45  ;;  %v1961_v50 = vadd.f32 %v4264_v1, %v1826_v46  ;;  %v2024_v51 = vmax.f32 %v1896_v43, 0.0  ;;  %v2088_v52 = vmax.f32 %v1960_v44, 0.0 }
 0x18d   : > { %v2025_v53 = vmax.f32 %v1897_v49, 0.0  ;;  %v2089_v54 = vmax.f32 %v1961_v50, 0.0 }
 0x18e   : > { %v1323_v55 = vpop.f32.mrb[52].mxu0  ;;  %v1579_v56 = vpop.f32.mrb[52].mxu1 }
 0x18f   : > { %v3373_v57 = vpack.c.bf16 %v2025_v53, %v2024_v51  ;;  %v3533_v58 = vpack.c.bf16 %v2089_v54, %v2088_v52  ;;  %v1763_v59 = vmul.f32 %v4260_v63, %v1323_v55  ;;  %v1827_v60 = vmul.f32 %v4260_v63, %v1579_v56  ;;  %v1325_v61 = vpop.f32.mrb[53].mxu0  ;;  %v1581_v62 = vpop.f32.mrb[53].mxu1 }
 0x190   : > { %v1326_v0 = vpop.f32.mrb[54].mxu0  ;;  %v1582_v2 = vpop.f32.mrb[54].mxu1 }
 0x191   : > { %3641 = vst [vmem:[%s4282_s24 + $0x60] sm:$0xff] %v3373_v57   ;;  %3673 = vst [vmem:[%s4282_s24 + $0x160] sm:$0xff] %v3533_v58   ;;  %v1898_v3 = vadd.f32 %v4264_v1, %v1763_v59  ;;  %v1962_v4 = vadd.f32 %v4264_v1, %v1827_v60  ;;  %v1764_v5 = vmul.f32 %v4260_v63, %v1326_v0  ;;  %v1328_v7 = vpop.f32.mrb[55].mxu0  ;;  %v1584_v8 = vpop.f32.mrb[55].mxu1 }
 0x192   : > { %v1828_v6 = vmul.f32 %v4260_v63, %v1582_v2 }
 0x193   : > { %v1899_v9 = vadd.f32 %v4264_v1, %v1764_v5  ;;  %v2026_v11 = vmax.f32 %v1898_v3, 0.0  ;;  %v2090_v12 = vmax.f32 %v1962_v4, 0.0 }
 0x194   : > { %v1963_v10 = vadd.f32 %v4264_v1, %v1828_v6 }
 0x195   : > { %v2027_v13 = vmax.f32 %v1899_v9, 0.0 }
 0x196   : > { %v2091_v14 = vmax.f32 %v1963_v10, 0.0  ;;  %v1331_v15 = vpop.f32.mrb[56].mxu0  ;;  %v1587_v16 = vpop.f32.mrb[56].mxu1 }
 0x197   : > { %v3378_v17 = vpack.c.bf16 %v2027_v13, %v2026_v11  ;;  %v1765_v19 = vmul.f32 %v4260_v63, %v1331_v15  ;;  %v1829_v20 = vmul.f32 %v4260_v63, %v1587_v16  ;;  %v1333_v21 = vpop.f32.mrb[57].mxu0  ;;  %v1589_v22 = vpop.f32.mrb[57].mxu1 }
 0x198   : > { %v3538_v18 = vpack.c.bf16 %v2091_v14, %v2090_v12  ;;  %v1334_v23 = vpop.f32.mrb[58].mxu0  ;;  %v1590_v24 = vpop.f32.mrb[58].mxu1 }
 0x199   : > { %3642 = vst [vmem:[%s4282_s24 + $0x68] sm:$0xff] %v3378_v17   ;;  %v1900_v25 = vadd.f32 %v4264_v1, %v1765_v19  ;;  %v1964_v26 = vadd.f32 %v4264_v1, %v1829_v20  ;;  %v1766_v27 = vmul.f32 %v4260_v63, %v1334_v23  ;;  %v1830_v28 = vmul.f32 %v4260_v63, %v1590_v24  ;;  %v1336_v29 = vpop.f32.mrb[59].mxu0  ;;  %v1592_v30 = vpop.f32.mrb[59].mxu1 }
 0x19a   : > { %3674 = vst [vmem:[%s4282_s24 + $0x168] sm:$0xff] %v3538_v18  }
 0x19b   : > { %v1901_v31 = vadd.f32 %v4264_v1, %v1766_v27  ;;  %v1965_v32 = vadd.f32 %v4264_v1, %v1830_v28  ;;  %v2028_v33 = vmax.f32 %v1900_v25, 0.0  ;;  %v2092_v34 = vmax.f32 %v1964_v26, 0.0 }
 0x19d   : > { %v2029_v35 = vmax.f32 %v1901_v31, 0.0  ;;  %v2093_v36 = vmax.f32 %v1965_v32, 0.0 }
 0x19e   : > { %v1339_v37 = vpop.f32.mrb[60].mxu0  ;;  %v1595_v38 = vpop.f32.mrb[60].mxu1 }
 0x19f   : > { %v3383_v39 = vpack.c.bf16 %v2029_v35, %v2028_v33  ;;  %v3543_v40 = vpack.c.bf16 %v2093_v36, %v2092_v34  ;;  %v1767_v41 = vmul.f32 %v4260_v63, %v1339_v37  ;;  %v1831_v42 = vmul.f32 %v4260_v63, %v1595_v38  ;;  %v1341_v43 = vpop.f32.mrb[61].mxu0  ;;  %v1597_v44 = vpop.f32.mrb[61].mxu1 }
 0x1a0   : > { %v1342_v45 = vpop.f32.mrb[62].mxu0  ;;  %v1598_v46 = vpop.f32.mrb[62].mxu1 }
 0x1a1   : > { %3643 = vst [vmem:[%s4282_s24 + $0x70] sm:$0xff] %v3383_v39   ;;  %3675 = vst [vmem:[%s4282_s24 + $0x170] sm:$0xff] %v3543_v40   ;;  %v1902_v47 = vadd.f32 %v4264_v1, %v1767_v41  ;;  %v1966_v48 = vadd.f32 %v4264_v1, %v1831_v42  ;;  %v1768_v49 = vmul.f32 %v4260_v63, %v1342_v45  ;;  %v1344_v51 = vpop.f32.mrb[63].mxu0  ;;  %v1600_v52 = vpop.f32.mrb[63].mxu1 }
 0x1a2   : > { %v1832_v50 = vmul.f32 %v4260_v63, %v1598_v46 }
 0x1a3   : > { %v1903_v53 = vadd.f32 %v4264_v1, %v1768_v49  ;;  %v2030_v55 = vmax.f32 %v1902_v47, 0.0  ;;  %v2094_v56 = vmax.f32 %v1966_v48, 0.0 }
 0x1a4   : > { %v1967_v54 = vadd.f32 %v4264_v1, %v1832_v50 }
 0x1a5   : > { %v2031_v57 = vmax.f32 %v1903_v53, 0.0 }
 0x1a6   : > { %v2095_v58 = vmax.f32 %v1967_v54, 0.0  ;;  %v1347_v59 = vpop.f32.mrb[64].mxu0  ;;  %v1603_v60 = vpop.f32.mrb[64].mxu1 }
 0x1a7   : > { %v3388_v61 = vpack.c.bf16 %v2031_v57, %v2030_v55  ;;  %v1769_v0 = vmul.f32 %v4260_v63, %v1347_v59  ;;  %v1833_v2 = vmul.f32 %v4260_v63, %v1603_v60  ;;  %v1349_v3 = vpop.f32.mrb[65].mxu0  ;;  %v1605_v4 = vpop.f32.mrb[65].mxu1 }
 0x1a8   : > { %v3548_v62 = vpack.c.bf16 %v2095_v58, %v2094_v56  ;;  %v1350_v5 = vpop.f32.mrb[66].mxu0  ;;  %v1606_v6 = vpop.f32.mrb[66].mxu1 }
 0x1a9   : > { %3644 = vst [vmem:[%s4282_s24 + $0x78] sm:$0xff] %v3388_v61   ;;  %v1904_v7 = vadd.f32 %v4264_v1, %v1769_v0  ;;  %v1968_v8 = vadd.f32 %v4264_v1, %v1833_v2  ;;  %v1770_v9 = vmul.f32 %v4260_v63, %v1350_v5  ;;  %v1834_v10 = vmul.f32 %v4260_v63, %v1606_v6  ;;  %v1352_v11 = vpop.f32.mrb[67].mxu0  ;;  %v1608_v12 = vpop.f32.mrb[67].mxu1 }
 0x1aa   : > { %3676 = vst [vmem:[%s4282_s24 + $0x178] sm:$0xff] %v3548_v62  }
 0x1ab   : > { %v1905_v13 = vadd.f32 %v4264_v1, %v1770_v9  ;;  %v1969_v14 = vadd.f32 %v4264_v1, %v1834_v10  ;;  %v2032_v15 = vmax.f32 %v1904_v7, 0.0  ;;  %v2096_v16 = vmax.f32 %v1968_v8, 0.0 }
 0x1ad   : > { %v2033_v17 = vmax.f32 %v1905_v13, 0.0  ;;  %v2097_v18 = vmax.f32 %v1969_v14, 0.0 }
 0x1ae   : > { %v1355_v19 = vpop.f32.mrb[68].mxu0  ;;  %v1611_v20 = vpop.f32.mrb[68].mxu1 }
 0x1af   : > { %v3393_v21 = vpack.c.bf16 %v2033_v17, %v2032_v15  ;;  %v3553_v22 = vpack.c.bf16 %v2097_v18, %v2096_v16  ;;  %v1771_v23 = vmul.f32 %v4260_v63, %v1355_v19  ;;  %v1835_v24 = vmul.f32 %v4260_v63, %v1611_v20  ;;  %v1357_v25 = vpop.f32.mrb[69].mxu0  ;;  %v1613_v26 = vpop.f32.mrb[69].mxu1 }
 0x1b0   : > { %v1358_v27 = vpop.f32.mrb[70].mxu0  ;;  %v1614_v28 = vpop.f32.mrb[70].mxu1 }
 0x1b1   : > { %3645 = vst [vmem:[%s4282_s24 + $0x80] sm:$0xff] %v3393_v21   ;;  %3677 = vst [vmem:[%s4282_s24 + $0x180] sm:$0xff] %v3553_v22   ;;  %v1906_v29 = vadd.f32 %v4264_v1, %v1771_v23  ;;  %v1970_v30 = vadd.f32 %v4264_v1, %v1835_v24  ;;  %v1772_v31 = vmul.f32 %v4260_v63, %v1358_v27  ;;  %v1360_v33 = vpop.f32.mrb[71].mxu0  ;;  %v1616_v34 = vpop.f32.mrb[71].mxu1  ;;  %v4489_v27 = vld [vmem:[%s4251_s10] ss:$0 sm:$0xff] }
 0x1b2   : > { %v1836_v32 = vmul.f32 %v4260_v63, %v1614_v28 }
 0x1b3   : > { %v1907_v35 = vadd.f32 %v4264_v1, %v1772_v31  ;;  %v2034_v37 = vmax.f32 %v1906_v29, 0.0  ;;  %v2098_v38 = vmax.f32 %v1970_v30, 0.0 }
 0x1b4   : > { %v1971_v36 = vadd.f32 %v4264_v1, %v1836_v32  ;;  %v4496_v32 = vld [vmem:[%s4257_s13] ss:$0 sm:$0xff] }
 0x1b5   : > { %v2035_v39 = vmax.f32 %v1907_v35, 0.0 }
 0x1b6   : > { %v2099_v40 = vmax.f32 %v1971_v36, 0.0  ;;  %v1363_v41 = vpop.f32.mrb[72].mxu0  ;;  %v1619_v42 = vpop.f32.mrb[72].mxu1 }
 0x1b7   : > { %v3398_v43 = vpack.c.bf16 %v2035_v39, %v2034_v37  ;;  %v1773_v45 = vmul.f32 %v4260_v63, %v1363_v41  ;;  %v1837_v46 = vmul.f32 %v4260_v63, %v1619_v42  ;;  %v1365_v47 = vpop.f32.mrb[73].mxu0  ;;  %v1621_v48 = vpop.f32.mrb[73].mxu1 }
 0x1b8   : > { %v3558_v44 = vpack.c.bf16 %v2099_v40, %v2098_v38  ;;  %v1366_v49 = vpop.f32.mrb[74].mxu0  ;;  %v1622_v50 = vpop.f32.mrb[74].mxu1 }
 0x1b9   : > { %3646 = vst [vmem:[%s4282_s24 + $0x88] sm:$0xff] %v3398_v43   ;;  %v1908_v51 = vadd.f32 %v4264_v1, %v1773_v45  ;;  %v1972_v52 = vadd.f32 %v4264_v1, %v1837_v46  ;;  %v1774_v53 = vmul.f32 %v4260_v63, %v1366_v49  ;;  %v1838_v54 = vmul.f32 %v4260_v63, %v1622_v50  ;;  %v1368_v55 = vpop.f32.mrb[75].mxu0  ;;  %v1624_v56 = vpop.f32.mrb[75].mxu1 }
 0x1ba   : > { %3678 = vst [vmem:[%s4282_s24 + $0x188] sm:$0xff] %v3558_v44  }
 0x1bb   : > { %v1909_v57 = vadd.f32 %v4264_v1, %v1774_v53  ;;  %v1973_v58 = vadd.f32 %v4264_v1, %v1838_v54  ;;  %v2036_v59 = vmax.f32 %v1908_v51, 0.0  ;;  %v2100_v60 = vmax.f32 %v1972_v52, 0.0 }
 0x1bd   : > { %v2037_v61 = vmax.f32 %v1909_v57, 0.0  ;;  %v2101_v62 = vmax.f32 %v1973_v58, 0.0 }
 0x1be   : > { %v1371_v0 = vpop.f32.mrb[76].mxu0  ;;  %v1627_v2 = vpop.f32.mrb[76].mxu1 }
 0x1bf   : > { %v3403_v3 = vpack.c.bf16 %v2037_v61, %v2036_v59  ;;  %v3563_v4 = vpack.c.bf16 %v2101_v62, %v2100_v60  ;;  %v1775_v5 = vmul.f32 %v4260_v63, %v1371_v0  ;;  %v1839_v6 = vmul.f32 %v4260_v63, %v1627_v2  ;;  %v1373_v7 = vpop.f32.mrb[77].mxu0  ;;  %v1629_v8 = vpop.f32.mrb[77].mxu1 }
 0x1c0   : > { %v1374_v9 = vpop.f32.mrb[78].mxu0  ;;  %v1630_v10 = vpop.f32.mrb[78].mxu1 }
 0x1c1   : > { %3647 = vst [vmem:[%s4282_s24 + $0x90] sm:$0xff] %v3403_v3   ;;  %3679 = vst [vmem:[%s4282_s24 + $0x190] sm:$0xff] %v3563_v4   ;;  %v1910_v11 = vadd.f32 %v4264_v1, %v1775_v5  ;;  %v1974_v12 = vadd.f32 %v4264_v1, %v1839_v6  ;;  %v1776_v13 = vmul.f32 %v4260_v63, %v1374_v9  ;;  %v1376_v15 = vpop.f32.mrb[79].mxu0  ;;  %v1632_v16 = vpop.f32.mrb[79].mxu1 }
 0x1c2   : > { %v1840_v14 = vmul.f32 %v4260_v63, %v1630_v10 }
 0x1c3   : > { %v1911_v17 = vadd.f32 %v4264_v1, %v1776_v13  ;;  %v2038_v19 = vmax.f32 %v1910_v11, 0.0  ;;  %v2102_v20 = vmax.f32 %v1974_v12, 0.0 }
 0x1c4   : > { %v1975_v18 = vadd.f32 %v4264_v1, %v1840_v14 }
 0x1c5   : > { %v2039_v21 = vmax.f32 %v1911_v17, 0.0 }
 0x1c6   : > { %v2103_v22 = vmax.f32 %v1975_v18, 0.0  ;;  %v1379_v23 = vpop.f32.mrb[80].mxu0  ;;  %v1635_v24 = vpop.f32.mrb[80].mxu1 }
 0x1c7   : > { %v3408_v25 = vpack.c.bf16 %v2039_v21, %v2038_v19  ;;  %v1777_v63 = vmul.f32 %v4489_v27, %v1379_v23  ;;  %v1841_v28 = vmul.f32 %v4489_v27, %v1635_v24  ;;  %v1381_v29 = vpop.f32.mrb[81].mxu0  ;;  %v1637_v30 = vpop.f32.mrb[81].mxu1 }
 0x1c8   : > { %v3568_v26 = vpack.c.bf16 %v2103_v22, %v2102_v20  ;;  %v1382_v1 = vpop.f32.mrb[82].mxu0  ;;  %v1638_v31 = vpop.f32.mrb[82].mxu1 }
 0x1c9   : > { %3648 = vst [vmem:[%s4282_s24 + $0x98] sm:$0xff] %v3408_v25   ;;  %v1912_v33 = vadd.f32 %v4496_v32, %v1777_v63  ;;  %v1976_v34 = vadd.f32 %v4496_v32, %v1841_v28  ;;  %v1778_v35 = vmul.f32 %v4489_v27, %v1382_v1  ;;  %v1842_v36 = vmul.f32 %v4489_v27, %v1638_v31  ;;  %v1384_v37 = vpop.f32.mrb[83].mxu0  ;;  %v1640_v38 = vpop.f32.mrb[83].mxu1 }
 0x1ca   : > { %3680 = vst [vmem:[%s4282_s24 + $0x198] sm:$0xff] %v3568_v26  }
 0x1cb   : > { %v1913_v39 = vadd.f32 %v4496_v32, %v1778_v35  ;;  %v1977_v40 = vadd.f32 %v4496_v32, %v1842_v36  ;;  %v2040_v41 = vmax.f32 %v1912_v33, 0.0  ;;  %v2104_v42 = vmax.f32 %v1976_v34, 0.0 }
 0x1cd   : > { %v2041_v43 = vmax.f32 %v1913_v39, 0.0  ;;  %v2105_v44 = vmax.f32 %v1977_v40, 0.0 }
 0x1ce   : > { %v1387_v45 = vpop.f32.mrb[84].mxu0  ;;  %v1643_v46 = vpop.f32.mrb[84].mxu1 }
 0x1cf   : > { %v3413_v47 = vpack.c.bf16 %v2041_v43, %v2040_v41  ;;  %v3573_v48 = vpack.c.bf16 %v2105_v44, %v2104_v42  ;;  %v1779_v49 = vmul.f32 %v4489_v27, %v1387_v45  ;;  %v1843_v50 = vmul.f32 %v4489_v27, %v1643_v46  ;;  %v1389_v51 = vpop.f32.mrb[85].mxu0  ;;  %v1645_v52 = vpop.f32.mrb[85].mxu1 }
 0x1d0   : > { %v1390_v53 = vpop.f32.mrb[86].mxu0  ;;  %v1646_v54 = vpop.f32.mrb[86].mxu1 }
 0x1d1   : > { %3649 = vst [vmem:[%s4282_s24 + $0xa0] sm:$0xff] %v3413_v47   ;;  %3681 = vst [vmem:[%s4282_s24 + $0x1a0] sm:$0xff] %v3573_v48   ;;  %v1914_v55 = vadd.f32 %v4496_v32, %v1779_v49  ;;  %v1978_v56 = vadd.f32 %v4496_v32, %v1843_v50  ;;  %v1780_v57 = vmul.f32 %v4489_v27, %v1390_v53  ;;  %v1392_v59 = vpop.f32.mrb[87].mxu0  ;;  %v1648_v60 = vpop.f32.mrb[87].mxu1 }
 0x1d2   : > { %v1844_v58 = vmul.f32 %v4489_v27, %v1646_v54 }
 0x1d3   : > { %v1915_v61 = vadd.f32 %v4496_v32, %v1780_v57  ;;  %v2042_v0 = vmax.f32 %v1914_v55, 0.0  ;;  %v2106_v2 = vmax.f32 %v1978_v56, 0.0 }
 0x1d4   : > { %v1979_v62 = vadd.f32 %v4496_v32, %v1844_v58 }
 0x1d5   : > { %v2043_v3 = vmax.f32 %v1915_v61, 0.0 }
 0x1d6   : > { %v2107_v4 = vmax.f32 %v1979_v62, 0.0  ;;  %v1395_v5 = vpop.f32.mrb[88].mxu0  ;;  %v1651_v6 = vpop.f32.mrb[88].mxu1 }
 0x1d7   : > { %v3418_v7 = vpack.c.bf16 %v2043_v3, %v2042_v0  ;;  %v1781_v9 = vmul.f32 %v4489_v27, %v1395_v5  ;;  %v1845_v10 = vmul.f32 %v4489_v27, %v1651_v6  ;;  %v1397_v11 = vpop.f32.mrb[89].mxu0  ;;  %v1653_v12 = vpop.f32.mrb[89].mxu1 }
 0x1d8   : > { %v3578_v8 = vpack.c.bf16 %v2107_v4, %v2106_v2  ;;  %v1398_v13 = vpop.f32.mrb[90].mxu0  ;;  %v1654_v14 = vpop.f32.mrb[90].mxu1 }
 0x1d9   : > { %3650 = vst [vmem:[%s4282_s24 + $0xa8] sm:$0xff] %v3418_v7   ;;  %v1916_v15 = vadd.f32 %v4496_v32, %v1781_v9  ;;  %v1980_v16 = vadd.f32 %v4496_v32, %v1845_v10  ;;  %v1782_v17 = vmul.f32 %v4489_v27, %v1398_v13  ;;  %v1846_v18 = vmul.f32 %v4489_v27, %v1654_v14  ;;  %v1400_v19 = vpop.f32.mrb[91].mxu0  ;;  %v1656_v20 = vpop.f32.mrb[91].mxu1 }
 0x1da   : > { %3682 = vst [vmem:[%s4282_s24 + $0x1a8] sm:$0xff] %v3578_v8  }
 0x1db   : > { %v1917_v21 = vadd.f32 %v4496_v32, %v1782_v17  ;;  %v1981_v22 = vadd.f32 %v4496_v32, %v1846_v18  ;;  %v2044_v23 = vmax.f32 %v1916_v15, 0.0  ;;  %v2108_v24 = vmax.f32 %v1980_v16, 0.0 }
 0x1dd   : > { %v2045_v25 = vmax.f32 %v1917_v21, 0.0  ;;  %v2109_v26 = vmax.f32 %v1981_v22, 0.0 }
 0x1de   : > { %v1403_v63 = vpop.f32.mrb[92].mxu0  ;;  %v1659_v28 = vpop.f32.mrb[92].mxu1 }
 0x1df   : > { %v3423_v29 = vpack.c.bf16 %v2045_v25, %v2044_v23  ;;  %v3583_v30 = vpack.c.bf16 %v2109_v26, %v2108_v24  ;;  %v1783_v1 = vmul.f32 %v4489_v27, %v1403_v63  ;;  %v1847_v31 = vmul.f32 %v4489_v27, %v1659_v28  ;;  %v1405_v33 = vpop.f32.mrb[93].mxu0  ;;  %v1661_v34 = vpop.f32.mrb[93].mxu1 }
 0x1e0   : > { %v1406_v35 = vpop.f32.mrb[94].mxu0  ;;  %v1662_v36 = vpop.f32.mrb[94].mxu1 }
 0x1e1   : > { %3651 = vst [vmem:[%s4282_s24 + $0xb0] sm:$0xff] %v3423_v29   ;;  %3683 = vst [vmem:[%s4282_s24 + $0x1b0] sm:$0xff] %v3583_v30   ;;  %v1918_v37 = vadd.f32 %v4496_v32, %v1783_v1  ;;  %v1982_v38 = vadd.f32 %v4496_v32, %v1847_v31  ;;  %v1784_v39 = vmul.f32 %v4489_v27, %v1406_v35  ;;  %v1408_v41 = vpop.f32.mrb[95].mxu0  ;;  %v1664_v42 = vpop.f32.mrb[95].mxu1 }
 0x1e2   : > { %v1848_v40 = vmul.f32 %v4489_v27, %v1662_v36 }
 0x1e3   : > { %v1919_v43 = vadd.f32 %v4496_v32, %v1784_v39  ;;  %v2046_v45 = vmax.f32 %v1918_v37, 0.0  ;;  %v2110_v46 = vmax.f32 %v1982_v38, 0.0 }
 0x1e4   : > { %v1983_v44 = vadd.f32 %v4496_v32, %v1848_v40 }
 0x1e5   : > { %v2047_v47 = vmax.f32 %v1919_v43, 0.0 }
 0x1e6   : > { %v2111_v48 = vmax.f32 %v1983_v44, 0.0  ;;  %v1411_v49 = vpop.f32.mrb[96].mxu0  ;;  %v1667_v50 = vpop.f32.mrb[96].mxu1 }
 0x1e7   : > { %v3428_v51 = vpack.c.bf16 %v2047_v47, %v2046_v45  ;;  %v1785_v53 = vmul.f32 %v4489_v27, %v1411_v49  ;;  %v1849_v54 = vmul.f32 %v4489_v27, %v1667_v50  ;;  %v1413_v55 = vpop.f32.mrb[97].mxu0  ;;  %v1669_v56 = vpop.f32.mrb[97].mxu1 }
 0x1e8   : > { %v3588_v52 = vpack.c.bf16 %v2111_v48, %v2110_v46  ;;  %v1414_v57 = vpop.f32.mrb[98].mxu0  ;;  %v1670_v58 = vpop.f32.mrb[98].mxu1 }
 0x1e9   : > { %3652 = vst [vmem:[%s4282_s24 + $0xb8] sm:$0xff] %v3428_v51   ;;  %v1920_v59 = vadd.f32 %v4496_v32, %v1785_v53  ;;  %v1984_v60 = vadd.f32 %v4496_v32, %v1849_v54  ;;  %v1786_v61 = vmul.f32 %v4489_v27, %v1414_v57  ;;  %v1850_v62 = vmul.f32 %v4489_v27, %v1670_v58  ;;  %v1416_v0 = vpop.f32.mrb[99].mxu0  ;;  %v1672_v2 = vpop.f32.mrb[99].mxu1 }
 0x1ea   : > { %3684 = vst [vmem:[%s4282_s24 + $0x1b8] sm:$0xff] %v3588_v52  }
 0x1eb   : > { %v1921_v3 = vadd.f32 %v4496_v32, %v1786_v61  ;;  %v1985_v4 = vadd.f32 %v4496_v32, %v1850_v62  ;;  %v2048_v5 = vmax.f32 %v1920_v59, 0.0  ;;  %v2112_v6 = vmax.f32 %v1984_v60, 0.0 }
 0x1ed   : > { %v2049_v7 = vmax.f32 %v1921_v3, 0.0  ;;  %v2113_v8 = vmax.f32 %v1985_v4, 0.0 }
 0x1ee   : > { %v1419_v9 = vpop.f32.mrb[100].mxu0  ;;  %v1675_v10 = vpop.f32.mrb[100].mxu1 }
 0x1ef   : > { %v3433_v11 = vpack.c.bf16 %v2049_v7, %v2048_v5  ;;  %v3593_v12 = vpack.c.bf16 %v2113_v8, %v2112_v6  ;;  %v1787_v13 = vmul.f32 %v4489_v27, %v1419_v9  ;;  %v1851_v14 = vmul.f32 %v4489_v27, %v1675_v10  ;;  %v1421_v15 = vpop.f32.mrb[101].mxu0  ;;  %v1677_v16 = vpop.f32.mrb[101].mxu1 }
 0x1f0   : > { %v1422_v17 = vpop.f32.mrb[102].mxu0  ;;  %v1678_v18 = vpop.f32.mrb[102].mxu1 }
 0x1f1   : > { %3653 = vst [vmem:[%s4282_s24 + $0xc0] sm:$0xff] %v3433_v11   ;;  %3685 = vst [vmem:[%s4282_s24 + $0x1c0] sm:$0xff] %v3593_v12   ;;  %v1922_v19 = vadd.f32 %v4496_v32, %v1787_v13  ;;  %v1986_v20 = vadd.f32 %v4496_v32, %v1851_v14  ;;  %v1788_v21 = vmul.f32 %v4489_v27, %v1422_v17  ;;  %v1424_v23 = vpop.f32.mrb[103].mxu0  ;;  %v1680_v24 = vpop.f32.mrb[103].mxu1 }
 0x1f2   : > { %v1852_v22 = vmul.f32 %v4489_v27, %v1678_v18 }
 0x1f3   : > { %v1923_v25 = vadd.f32 %v4496_v32, %v1788_v21  ;;  %v2050_v63 = vmax.f32 %v1922_v19, 0.0  ;;  %v2114_v28 = vmax.f32 %v1986_v20, 0.0 }
 0x1f4   : > { %v1987_v26 = vadd.f32 %v4496_v32, %v1852_v22 }
 0x1f5   : > { %v2051_v29 = vmax.f32 %v1923_v25, 0.0 }
 0x1f6   : > { %v2115_v30 = vmax.f32 %v1987_v26, 0.0  ;;  %v1427_v1 = vpop.f32.mrb[104].mxu0  ;;  %v1683_v31 = vpop.f32.mrb[104].mxu1 }
 0x1f7   : > { %v3438_v33 = vpack.c.bf16 %v2051_v29, %v2050_v63  ;;  %v1789_v35 = vmul.f32 %v4489_v27, %v1427_v1  ;;  %v1853_v36 = vmul.f32 %v4489_v27, %v1683_v31  ;;  %v1429_v37 = vpop.f32.mrb[105].mxu0  ;;  %v1685_v38 = vpop.f32.mrb[105].mxu1 }
 0x1f8   : > { %v3598_v34 = vpack.c.bf16 %v2115_v30, %v2114_v28  ;;  %v1430_v39 = vpop.f32.mrb[106].mxu0  ;;  %v1686_v40 = vpop.f32.mrb[106].mxu1 }
 0x1f9   : > { %3654 = vst [vmem:[%s4282_s24 + $0xc8] sm:$0xff] %v3438_v33   ;;  %v1924_v41 = vadd.f32 %v4496_v32, %v1789_v35  ;;  %v1988_v42 = vadd.f32 %v4496_v32, %v1853_v36  ;;  %v1790_v43 = vmul.f32 %v4489_v27, %v1430_v39  ;;  %v1854_v44 = vmul.f32 %v4489_v27, %v1686_v40  ;;  %v1432_v45 = vpop.f32.mrb[107].mxu0  ;;  %v1688_v46 = vpop.f32.mrb[107].mxu1 }
 0x1fa   : > { %3686 = vst [vmem:[%s4282_s24 + $0x1c8] sm:$0xff] %v3598_v34  }
 0x1fb   : > { %v1925_v47 = vadd.f32 %v4496_v32, %v1790_v43  ;;  %v1989_v48 = vadd.f32 %v4496_v32, %v1854_v44  ;;  %v2052_v49 = vmax.f32 %v1924_v41, 0.0  ;;  %v2116_v50 = vmax.f32 %v1988_v42, 0.0 }
 0x1fd   : > { %v2053_v51 = vmax.f32 %v1925_v47, 0.0  ;;  %v2117_v52 = vmax.f32 %v1989_v48, 0.0 }
 0x1fe   : > { %v1435_v53 = vpop.f32.mrb[108].mxu0  ;;  %v1691_v54 = vpop.f32.mrb[108].mxu1 }
 0x1ff   : > { %v3443_v55 = vpack.c.bf16 %v2053_v51, %v2052_v49  ;;  %v3603_v56 = vpack.c.bf16 %v2117_v52, %v2116_v50  ;;  %v1791_v57 = vmul.f32 %v4489_v27, %v1435_v53  ;;  %v1855_v58 = vmul.f32 %v4489_v27, %v1691_v54  ;;  %v1437_v59 = vpop.f32.mrb[109].mxu0  ;;  %v1693_v60 = vpop.f32.mrb[109].mxu1 }
 0x200   : > { %v1438_v61 = vpop.f32.mrb[110].mxu0  ;;  %v1694_v62 = vpop.f32.mrb[110].mxu1 }
 0x201   : > { %3655 = vst [vmem:[%s4282_s24 + $0xd0] sm:$0xff] %v3443_v55   ;;  %3687 = vst [vmem:[%s4282_s24 + $0x1d0] sm:$0xff] %v3603_v56   ;;  %v1926_v0 = vadd.f32 %v4496_v32, %v1791_v57  ;;  %v1990_v2 = vadd.f32 %v4496_v32, %v1855_v58  ;;  %v1792_v3 = vmul.f32 %v4489_v27, %v1438_v61  ;;  %v1440_v5 = vpop.f32.mrb[111].mxu0  ;;  %v1696_v6 = vpop.f32.mrb[111].mxu1 }
 0x202   : > { %v1856_v4 = vmul.f32 %v4489_v27, %v1694_v62 }
 0x203   : > { %v1927_v7 = vadd.f32 %v4496_v32, %v1792_v3  ;;  %v2054_v9 = vmax.f32 %v1926_v0, 0.0  ;;  %v2118_v10 = vmax.f32 %v1990_v2, 0.0 }
 0x204   : > { %v1991_v8 = vadd.f32 %v4496_v32, %v1856_v4 }
 0x205   : > { %v2055_v11 = vmax.f32 %v1927_v7, 0.0 }
 0x206   : > { %v2119_v12 = vmax.f32 %v1991_v8, 0.0  ;;  %v1443_v13 = vpop.f32.mrb[112].mxu0  ;;  %v1699_v14 = vpop.f32.mrb[112].mxu1 }
 0x207   : > { %v3448_v15 = vpack.c.bf16 %v2055_v11, %v2054_v9  ;;  %v1793_v17 = vmul.f32 %v4489_v27, %v1443_v13  ;;  %v1857_v18 = vmul.f32 %v4489_v27, %v1699_v14  ;;  %v1445_v19 = vpop.f32.mrb[113].mxu0  ;;  %v1701_v20 = vpop.f32.mrb[113].mxu1 }
 0x208   : > { %v3608_v16 = vpack.c.bf16 %v2119_v12, %v2118_v10  ;;  %v1446_v21 = vpop.f32.mrb[114].mxu0  ;;  %v1702_v22 = vpop.f32.mrb[114].mxu1 }
 0x209   : > { %3656 = vst [vmem:[%s4282_s24 + $0xd8] sm:$0xff] %v3448_v15   ;;  %v1928_v23 = vadd.f32 %v4496_v32, %v1793_v17  ;;  %v1992_v24 = vadd.f32 %v4496_v32, %v1857_v18  ;;  %v1794_v25 = vmul.f32 %v4489_v27, %v1446_v21  ;;  %v1858_v26 = vmul.f32 %v4489_v27, %v1702_v22  ;;  %v1448_v63 = vpop.f32.mrb[115].mxu0  ;;  %v1704_v28 = vpop.f32.mrb[115].mxu1 }
 0x20a   : > { %3688 = vst [vmem:[%s4282_s24 + $0x1d8] sm:$0xff] %v3608_v16  }
 0x20b   : > { %v1929_v29 = vadd.f32 %v4496_v32, %v1794_v25  ;;  %v1993_v30 = vadd.f32 %v4496_v32, %v1858_v26  ;;  %v2056_v1 = vmax.f32 %v1928_v23, 0.0  ;;  %v2120_v31 = vmax.f32 %v1992_v24, 0.0 }
 0x20d   : > { %v2057_v33 = vmax.f32 %v1929_v29, 0.0  ;;  %v2121_v34 = vmax.f32 %v1993_v30, 0.0 }
 0x20e   : > { %v1451_v35 = vpop.f32.mrb[116].mxu0  ;;  %v1707_v36 = vpop.f32.mrb[116].mxu1 }
 0x20f   : > { %v3453_v37 = vpack.c.bf16 %v2057_v33, %v2056_v1  ;;  %v3613_v38 = vpack.c.bf16 %v2121_v34, %v2120_v31  ;;  %v1795_v39 = vmul.f32 %v4489_v27, %v1451_v35  ;;  %v1859_v40 = vmul.f32 %v4489_v27, %v1707_v36  ;;  %v1453_v41 = vpop.f32.mrb[117].mxu0  ;;  %v1709_v42 = vpop.f32.mrb[117].mxu1 }
 0x210   : > { %v1454_v43 = vpop.f32.mrb[118].mxu0  ;;  %v1710_v44 = vpop.f32.mrb[118].mxu1 }
 0x211   : > { %3657 = vst [vmem:[%s4282_s24 + $0xe0] sm:$0xff] %v3453_v37   ;;  %3689 = vst [vmem:[%s4282_s24 + $0x1e0] sm:$0xff] %v3613_v38   ;;  %v1930_v45 = vadd.f32 %v4496_v32, %v1795_v39  ;;  %v1994_v46 = vadd.f32 %v4496_v32, %v1859_v40  ;;  %v1796_v47 = vmul.f32 %v4489_v27, %v1454_v43  ;;  %v1456_v49 = vpop.f32.mrb[119].mxu0  ;;  %v1712_v50 = vpop.f32.mrb[119].mxu1 }
 0x212   : > { %v1860_v48 = vmul.f32 %v4489_v27, %v1710_v44 }
 0x213   : > { %v1931_v51 = vadd.f32 %v4496_v32, %v1796_v47  ;;  %v2058_v53 = vmax.f32 %v1930_v45, 0.0  ;;  %v2122_v54 = vmax.f32 %v1994_v46, 0.0 }
 0x214   : > { %v1995_v52 = vadd.f32 %v4496_v32, %v1860_v48 }
 0x215   : > { %v2059_v55 = vmax.f32 %v1931_v51, 0.0 }
 0x216   : > { %v2123_v56 = vmax.f32 %v1995_v52, 0.0  ;;  %v1459_v57 = vpop.f32.mrb[120].mxu0  ;;  %v1715_v58 = vpop.f32.mrb[120].mxu1 }
 0x217   : > { %v3458_v59 = vpack.c.bf16 %v2059_v55, %v2058_v53  ;;  %v1797_v61 = vmul.f32 %v4489_v27, %v1459_v57  ;;  %v1861_v62 = vmul.f32 %v4489_v27, %v1715_v58  ;;  %v1461_v0 = vpop.f32.mrb[121].mxu0  ;;  %v1717_v2 = vpop.f32.mrb[121].mxu1 }
 0x218   : > { %v3618_v60 = vpack.c.bf16 %v2123_v56, %v2122_v54  ;;  %v1462_v3 = vpop.f32.mrb[122].mxu0  ;;  %v1718_v4 = vpop.f32.mrb[122].mxu1 }
 0x219   : > { %3658 = vst [vmem:[%s4282_s24 + $0xe8] sm:$0xff] %v3458_v59   ;;  %v1932_v5 = vadd.f32 %v4496_v32, %v1797_v61  ;;  %v1996_v6 = vadd.f32 %v4496_v32, %v1861_v62  ;;  %v1798_v7 = vmul.f32 %v4489_v27, %v1462_v3  ;;  %v1862_v8 = vmul.f32 %v4489_v27, %v1718_v4  ;;  %v1464_v9 = vpop.f32.mrb[123].mxu0  ;;  %v1720_v10 = vpop.f32.mrb[123].mxu1 }
 0x21a   : > { %3690 = vst [vmem:[%s4282_s24 + $0x1e8] sm:$0xff] %v3618_v60  }
 0x21b   : > { %v1933_v11 = vadd.f32 %v4496_v32, %v1798_v7  ;;  %v1997_v12 = vadd.f32 %v4496_v32, %v1862_v8  ;;  %v2060_v13 = vmax.f32 %v1932_v5, 0.0  ;;  %v2124_v14 = vmax.f32 %v1996_v6, 0.0 }
 0x21d   : > { %v2061_v15 = vmax.f32 %v1933_v11, 0.0  ;;  %v2125_v16 = vmax.f32 %v1997_v12, 0.0 }
 0x21e   : > { %v1467_v17 = vpop.f32.mrb[124].mxu0  ;;  %v1723_v18 = vpop.f32.mrb[124].mxu1 }
 0x21f   : > { %v3463_v19 = vpack.c.bf16 %v2061_v15, %v2060_v13  ;;  %v3623_v20 = vpack.c.bf16 %v2125_v16, %v2124_v14  ;;  %v1799_v21 = vmul.f32 %v4489_v27, %v1467_v17  ;;  %v1863_v22 = vmul.f32 %v4489_v27, %v1723_v18  ;;  %v1469_v23 = vpop.f32.mrb[125].mxu0  ;;  %v1725_v24 = vpop.f32.mrb[125].mxu1 }
 0x220   : > { %v1470_v25 = vpop.f32.mrb[126].mxu0  ;;  %v1726_v26 = vpop.f32.mrb[126].mxu1 }
 0x221   : > { %3659 = vst [vmem:[%s4282_s24 + $0xf0] sm:$0xff] %v3463_v19   ;;  %3691 = vst [vmem:[%s4282_s24 + $0x1f0] sm:$0xff] %v3623_v20   ;;  %v1934_v63 = vadd.f32 %v4496_v32, %v1799_v21  ;;  %v1998_v28 = vadd.f32 %v4496_v32, %v1863_v22  ;;  %v1800_v29 = vmul.f32 %v4489_v27, %v1470_v25  ;;  %v1472_v1 = vpop.f32.mrb[127].mxu0  ;;  %v1728_v31 = vpop.f32.mrb[127].mxu1 }
 0x222   : > { %v1864_v30 = vmul.f32 %v4489_v27, %v1726_v26 }
 0x223   : > { %v1935_v33 = vadd.f32 %v4496_v32, %v1800_v29  ;;  %v2062_v35 = vmax.f32 %v1934_v63, 0.0  ;;  %v2126_v36 = vmax.f32 %v1998_v28, 0.0 }
 0x224   : > { %v1999_v34 = vadd.f32 %v4496_v32, %v1864_v30 }
 0x225   : > { %v2063_v37 = vmax.f32 %v1935_v33, 0.0 }
 0x226   : > { %v2127_v38 = vmax.f32 %v1999_v34, 0.0 }
 0x227   : > { %v3468_v39 = vpack.c.bf16 %v2063_v37, %v2062_v35 }
 0x228   : > { %v3628_v40 = vpack.c.bf16 %v2127_v38, %v2126_v36 }
 0x229   : > { %3660 = vst [vmem:[%s4282_s24 + $0xf8] sm:$0xff] %v3468_v39  }
 0x22a   : > { %3692 = vst [vmem:[%s4282_s24 + $0x1f8] sm:$0xff] %v3628_v40  }
 0x22b PF: > { %s14_s19 = sadd.s32 1, %s4014_s19   ;;  %s4636_s15 = smov %s4006_s17 }
 0x22c   : > { %p11_p7 = scmp.ge.s32.totalorder %s14_s19, 6   ;;  %s4637_s16 = smov %s4010_s18 }
 0x22d   : > { %s4638_s17 = smov %s4641_s20  ;;  %s4639_s18 = smov %s4645_s21 }
 0x22e   :  { %13 = sbr.rel (!%p11_p7) target bundleno = 3 (0x3), region = 75 }

// kernel: _lambda_.4
= control target key start
LH: loop header
LB: loop body
LE: loop exit
PB: predicated region body
PF: predicated region fallthrough
CT: control target
= control target key end

     0   :  { %s5757_s30 = smov 0   ;;  %s5759_s10 = smov 0   ;;  %s6382_s0 = inlined_call_operand.vmem [shape: bf16[2,128,1152], index: 0, kind: input, shape index: {}]   ;;  %s6383_s1 = inlined_call_operand.vmem [shape: bf16[2,1152,128], index: 1, kind: input, shape index: {}]   ;;  %s6384_s2 = inlined_call_operand.vmem [shape: f32[2,1,128], index: 2, kind: input, shape index: {}]   ;;  %s6385_s3 = inlined_call_operand.vmem [shape: bf16[9,32,128], index: 3, kind: input, shape index: {}]   ;;  %s6386_s4 = inlined_call_operand.vmem [shape: bf16[2,9,128,128], index: 4, kind: input, shape index: {}]   ;;  %s6387_s5 = inlined_call_operand.vmem [shape: f32[2,1,128], index: 5, kind: input, shape index: {}]   ;;  %s6388_s6 = inlined_call_operand.vmem [shape: f32[8,32], index: 6, kind: input, shape index: {}]   ;;  %s6389_s7 = inlined_call_operand.vmem [shape: bf16[2,128,128], index: 7, kind: input, shape index: {}]   ;;  %s6390_s8 = inlined_call_operand.vmem [shape: f32[2,1,128], index: 8, kind: input, shape index: {}]   ;;  %s6391_s9 = inlined_call_operand.vmem [shape: f32[2,8,128], index: 9, kind: output, shape index: {}]  }
   0x1   :  { %s5761_s11 = smov 0  }
   0x2 LB: > { %s31_s12 = sadd.s32 1, %s5698_s10  ;;  %p4031_p0 = scmp.ge.s32.totalorder %s5702_s11, 1  ;;  %s5702_s11 = sphi %s5761_s11, %s19_s11   ;;  %s5698_s10 = sphi %s5759_s10, %s6393_s10   ;;  %s5694_s30 = sphi %s5757_s30, %s6392_s30  }
   0x3   : > { %p33_p1 = scmp.ge.s32.totalorder %s31_s12, 2  ;;  %p363_p2 = scmp.lt.s32.totalorder %s5702_s11, 3 }
   0x5   : > { %s6395_s12 = smov (%p33_p1, %s31_s12), 0  ;;  %p364_p3 = pnand %p4031_p0, %p363_p2 }
   0x6   : > { %p431_p4 = scmp.lt.s32.totalorder (!%p364_p3), %s5694_s30, 1  ;;  %vm5705_vm0 = vmmov (!%p364_p3), 0   ;;  %vm3697_vm1 = vcmask (!%p364_p3), 261120  }
   0x7   : > { %367 = sbr.rel (%p364_p3) target bundleno = 1563 (0x61b), region = 56 }
   0xe   : > { %s6397_s30 = smov (!%p431_p4, %s5694_s30), 1 }
   0xf   : > { %s5778_s13 = smul.u32 576, %s6397_s30  ;;  %s448_s22 = scalar_lea.vmem %s6384_s2, %s6397_s30 }
  0x10   : > { %s456_s18 = scalar_lea.vmem %s6387_s5, %s6397_s30  ;;  %s4037_s24 = sshll.u32 %s6397_s30, 3 }
  0x11   : > { %s5784_s16 = scalar_lea.vmem %s6383_s1, %s5778_s13  ;;  %s5819_s19 = scalar_lea.vmem %s6382_s0, %s5778_s13 }
  0x12   : > { %v5406_v0 = vld [vmem:[%s5784_s16 + $0x40] sm:$0xff]   ;;  %v5410_v4 = vld [vmem:[%s5784_s16 + $0x48] sm:$0xff]   ;;  %v5414_v8 = vld [vmem:[%s5784_s16 + $0x50] sm:$0xff]   ;;  %s471_s27 = scalar_lea.vmem %s6391_s9, %s4037_s24 }
  0x13   : > { %v5407_v1 = vld [vmem:[%s5784_s16] sm:$0xff]   ;;  %4447 = vmatprep.subr.bf16.mxu0 %v5406_v0  ;;  %v5411_v5 = vld [vmem:[%s5784_s16 + $0x8] sm:$0xff]   ;;  %v5415_v9 = vld [vmem:[%s5784_s16 + $0x10] sm:$0xff]  }
  0x14   : > { %v5408_v2 = vld [vmem:[%s5784_s16 + $0xc0] sm:$0xff]   ;;  %4448 = vmatpush3.bf16.msra.mxu0 %v5407_v1  ;;  %v5412_v6 = vld [vmem:[%s5784_s16 + $0xc8] sm:$0xff]   ;;  %v5416_v10 = vld [vmem:[%s5784_s16 + $0xd0] sm:$0xff]  }
  0x15   : > { %v5409_v3 = vld [vmem:[%s5784_s16 + $0x80] sm:$0xff]   ;;  %4511 = vmatprep.subr.bf16.mxu1 %v5408_v2  ;;  %4449 = vmatprep.subr.bf16.mxu0 %v5410_v4  ;;  %v5413_v7 = vld [vmem:[%s5784_s16 + $0x88] sm:$0xff]   ;;  %v5417_v11 = vld [vmem:[%s5784_s16 + $0x90] sm:$0xff]  }
  0x16   : > { %4512 = vmatpush3.bf16.msra.mxu1 %v5409_v3  ;;  %v5418_v12 = vld [vmem:[%s5784_s16 + $0x58] sm:$0xff]   ;;  %v5422_v16 = vld [vmem:[%s5784_s16 + $0x60] sm:$0xff]   ;;  %v5426_v20 = vld [vmem:[%s5784_s16 + $0x68] sm:$0xff]  }
  0x17   : > { %4513 = vmatprep.subr.bf16.mxu1 %v5412_v6  ;;  %v5419_v13 = vld [vmem:[%s5784_s16 + $0x18] sm:$0xff]   ;;  %v5423_v17 = vld [vmem:[%s5784_s16 + $0x20] sm:$0xff]   ;;  %v5427_v21 = vld [vmem:[%s5784_s16 + $0x28] sm:$0xff]  }
  0x18   : > { %4450 = vmatpush3.bf16.msra.mxu0 %v5411_v5  ;;  %v5420_v14 = vld [vmem:[%s5784_s16 + $0xd8] sm:$0xff]   ;;  %v5424_v18 = vld [vmem:[%s5784_s16 + $0xe0] sm:$0xff]   ;;  %v5428_v22 = vld [vmem:[%s5784_s16 + $0xe8] sm:$0xff]  }
  0x19   : > { %4451 = vmatprep.subr.bf16.mxu0 %v5414_v8  ;;  %v5421_v15 = vld [vmem:[%s5784_s16 + $0x98] sm:$0xff]   ;;  %v5425_v19 = vld [vmem:[%s5784_s16 + $0xa0] sm:$0xff]   ;;  %v5429_v23 = vld [vmem:[%s5784_s16 + $0xa8] sm:$0xff]  }
  0x1a   : > { %4514 = vmatpush3.bf16.msra.mxu1 %v5413_v7  ;;  %v5430_v24 = vld [vmem:[%s5784_s16 + $0x70] sm:$0xff]   ;;  %v5434_v28 = vld [vmem:[%s5784_s16 + $0x78] sm:$0xff]   ;;  %v5437_v31 = vld [vmem:[%s5819_s19] ss:$36 sps:$4 sm:$0xff]  }
  0x1b   : > { %4515 = vmatprep.subr.bf16.mxu1 %v5416_v10  ;;  %v5431_v25 = vld [vmem:[%s5784_s16 + $0x30] sm:$0xff]   ;;  %v5435_v29 = vld [vmem:[%s5784_s16 + $0x38] sm:$0xff]   ;;  %v5439_v32 = vld [vmem:[%s5819_s19 + $0x4] ss:$36 sps:$4 sm:$0xff]  }
  0x1c   : > { %4452 = vmatpush3.bf16.msra.mxu0 %v5415_v9  ;;  %v5432_v26 = vld [vmem:[%s5784_s16 + $0xf0] sm:$0xff]   ;;  %v5436_v30 = vld [vmem:[%s5784_s16 + $0xf8] sm:$0xff]   ;;  %1536 = vmatprep.mubr.bf16.mxu0 %v5439_v32  ;;  %v5441_v34 = vld [vmem:[%s5819_s19 + $0x8] ss:$36 sps:$4 sm:$0xff]  }
  0x1d   : > { %4453 = vmatprep.subr.bf16.mxu0 %v5418_v12  ;;  %v5433_v27 = vld [vmem:[%s5784_s16 + $0xb0] sm:$0xff]   ;;  %v5440_v33 = vld [vmem:[%s5784_s16 + $0xb8] sm:$0xff]   ;;  %v5446_v38 = vld [vmem:[%s5819_s19 + $0x48] ss:$36 sps:$4 sm:$0xff]  }
  0x1e   : > { %4516 = vmatpush3.bf16.msra.mxu1 %v5417_v11  ;;  %v5443_v35 = vld [vmem:[%s5819_s19 + $0xc] ss:$36 sps:$4 sm:$0xff]   ;;  %v5447_v37 = vld [vmem:[%s5819_s19 + $0x54] ss:$36 sps:$4 sm:$0xff]   ;;  %v5453_v41 = vld [vmem:[%s5819_s19 + $0x9c] ss:$36 sps:$4 sm:$0xff]  }
  0x1f   : > { %4517 = vmatprep.subr.bf16.mxu1 %v5420_v14  ;;  %v5444_v36 = vld [vmem:[%s5819_s19 + $0x4c] ss:$36 sps:$4 sm:$0xff]   ;;  %1633 = vmatprep.mubr.bf16.mxu1 %v5443_v35  ;;  %v5450_v39 = vld [vmem:[%s5819_s19 + $0x94] ss:$36 sps:$4 sm:$0xff]   ;;  %v5464_v42 = vld [vmem:[%s5784_s16 + $0x140] sm:$0xff]  }
  0x20   : > { %4454 = vmatpush3.bf16.msra.mxu0 %v5419_v13  ;;  %v5449_v40 = vld [vmem:[%s5819_s19 + $0x50] ss:$36 sps:$4 sm:$0xff]   ;;  %v5466_v43 = vld [vmem:[%s5784_s16 + $0x100] sm:$0xff]   ;;  %v5455_v46 = vld [vmem:[%s5819_s19 + $0x98] ss:$36 sps:$4 sm:$0xff]  }
  0x21   : > { %4455 = vmatprep.subr.bf16.mxu0 %v5422_v16  ;;  %v5452_v44 = vld [vmem:[%s5819_s19 + $0x90] ss:$36 sps:$4 sm:$0xff]   ;;  %v5456_v45 = vld [vmem:[%s5819_s19 + $0xdc] ss:$36 sps:$4 sm:$0xff]   ;;  %v5459_v48 = vld [vmem:[%s5819_s19 + $0xe4] ss:$36 sps:$4 sm:$0xff]  }
  0x22   : > { %4518 = vmatpush3.bf16.msra.mxu1 %v5421_v15  ;;  %v5470_v47 = vld [vmem:[%s5784_s16 + $0x1c0] sm:$0xff]   ;;  %v5472_v50 = vld [vmem:[%s5784_s16 + $0x148] sm:$0xff]   ;;  %v5458_v53 = vld [vmem:[%s5819_s19 + $0xd8] ss:$36 sps:$4 sm:$0xff]  }
  0x23   : > { %4519 = vmatprep.subr.bf16.mxu1 %v5424_v18  ;;  %v5471_v49 = vld [vmem:[%s5784_s16 + $0x180] sm:$0xff]   ;;  %v5473_v51 = vld [vmem:[%s5784_s16 + $0x108] sm:$0xff]   ;;  %v5479_v55 = vld [vmem:[%s5784_s16 + $0x150] sm:$0xff]  }
  0x24   : > { %4456 = vmatpush3.bf16.msra.mxu0 %v5423_v17  ;;  %v5474_v52 = vld [vmem:[%s5784_s16 + $0x1c8] sm:$0xff]   ;;  %v5461_v56 = vld [vmem:[%s5819_s19 + $0xe0] ss:$36 sps:$4 sm:$0xff]   ;;  %v5482_v59 = vld [vmem:[%s5784_s16 + $0x110] sm:$0xff]  }
  0x25   : > { %4457 = vmatprep.subr.bf16.mxu0 %v5426_v20  ;;  %v5477_v54 = vld [vmem:[%s5784_s16 + $0x188] sm:$0xff]   ;;  %v5484_v60 = vld [vmem:[%s5784_s16 + $0x1d0] sm:$0xff]   ;;  %v5486_v62 = vld [vmem:[%s5784_s16 + $0x158] sm:$0xff]  }
  0x26   : > { %4520 = vmatpush3.bf16.msra.mxu1 %v5425_v19  ;;  %v5462_v57 = vld [vmem:[%s5819_s19 + $0x124] ss:$36 sps:$4 sm:$0xff]   ;;  %v5467_v58 = vld [vmem:[%s5819_s19 + $0x12c] ss:$36 sps:$4 sm:$0xff]   ;;  %v5487_v0 = vld [vmem:[%s5784_s16 + $0x118] sm:$0xff]  }
  0x27   : > { %4521 = vmatprep.subr.bf16.mxu1 %v5428_v22  ;;  %v5485_v61 = vld [vmem:[%s5784_s16 + $0x190] sm:$0xff]   ;;  %v5465_v63 = vld [vmem:[%s5819_s19 + $0x120] ss:$36 sps:$4 sm:$0xff]   ;;  %v5488_v1 = vld [vmem:[%s5784_s16 + $0x1d8] sm:$0xff]  }
  0x28   : > { %4458 = vmatpush3.bf16.msra.mxu0 %v5427_v21  ;;  %v5475_v2 = vld [vmem:[%s5819_s19 + $0x16c] ss:$36 sps:$4 sm:$0xff]   ;;  %v5491_v3 = vld [vmem:[%s5784_s16 + $0x198] sm:$0xff]   ;;  %v5493_v5 = vld [vmem:[%s5784_s16 + $0x160] sm:$0xff]  }
  0x29   : > { %4459 = vmatprep.subr.bf16.mxu0 %v5430_v24  ;;  %v5469_v4 = vld [vmem:[%s5819_s19 + $0x128] ss:$36 sps:$4 sm:$0xff]   ;;  %v5480_v6 = vld [vmem:[%s5819_s19 + $0x174] ss:$36 sps:$4 sm:$0xff]   ;;  %v5496_v7 = vld [vmem:[%s5784_s16 + $0x120] sm:$0xff]  }
  0x2a   : > { %4522 = vmatpush3.bf16.msra.mxu1 %v5429_v23  ;;  %v5478_v8 = vld [vmem:[%s5819_s19 + $0x168] ss:$36 sps:$4 sm:$0xff]   ;;  %v5498_v9 = vld [vmem:[%s5784_s16 + $0x1e0] sm:$0xff]   ;;  %v5489_v10 = vld [vmem:[%s5819_s19 + $0x1b4] ss:$36 sps:$4 sm:$0xff]  }
  0x2b   : > { %4523 = vmatprep.subr.bf16.mxu1 %v5432_v26  ;;  %v5499_v11 = vld [vmem:[%s5784_s16 + $0x1a0] sm:$0xff]   ;;  %v5500_v12 = vld [vmem:[%s5784_s16 + $0x168] sm:$0xff]   ;;  %v5483_v15 = vld [vmem:[%s5819_s19 + $0x170] ss:$36 sps:$4 sm:$0xff]  }
  0x2c   : > { %4460 = vmatpush3.bf16.msra.mxu0 %v5431_v25  ;;  %v5501_v13 = vld [vmem:[%s5784_s16 + $0x128] sm:$0xff]   ;;  %v5494_v16 = vld [vmem:[%s5819_s19 + $0x1bc] ss:$36 sps:$4 sm:$0xff]   ;;  %v5507_v18 = vld [vmem:[%s5784_s16 + $0x170] sm:$0xff]  }
  0x2d   : > { %4461 = vmatprep.subr.bf16.mxu0 %v5434_v28  ;;  %v5502_v14 = vld [vmem:[%s5784_s16 + $0x1e8] sm:$0xff]   ;;  %v5492_v19 = vld [vmem:[%s5819_s19 + $0x1b0] ss:$36 sps:$4 sm:$0xff]   ;;  %v5503_v21 = vld [vmem:[%s5819_s19 + $0x1fc] ss:$36 sps:$4 sm:$0xff]  }
  0x2e   : > { %4524 = vmatpush3.bf16.msra.mxu1 %v5433_v27  ;;  %v5505_v17 = vld [vmem:[%s5784_s16 + $0x1a8] sm:$0xff]   ;;  %v5510_v20 = vld [vmem:[%s5784_s16 + $0x130] sm:$0xff]   ;;  %v5497_v22 = vld [vmem:[%s5819_s19 + $0x1b8] ss:$36 sps:$4 sm:$0xff]  }
  0x2f   : > { %4525 = vmatprep.subr.bf16.mxu1 %v5436_v30  ;;  %v5512_v23 = vld [vmem:[%s5784_s16 + $0x1f0] sm:$0xff]   ;;  %v5508_v24 = vld [vmem:[%s5819_s19 + $0x204] ss:$36 sps:$4 sm:$0xff]   ;;  %v5514_v26 = vld [vmem:[%s5784_s16 + $0x178] sm:$0xff]  }
  0x30   : > { %4462 = vmatpush3.bf16.msra.mxu0 %v5435_v29  ;;  %v5513_v25 = vld [vmem:[%s5784_s16 + $0x1b0] sm:$0xff]   ;;  %v5515_v27 = vld [vmem:[%s5784_s16 + $0x138] sm:$0xff]   ;;  %v5511_v32 = vld [vmem:[%s5819_s19 + $0x200] ss:$36 sps:$4 sm:$0xff]  }
  0x31   : > { %4575 = vmatprep.subr.bf16.mxu0 %v5464_v42  ;;  %v5516_v28 = vld [vmem:[%s5784_s16 + $0x1f8] sm:$0xff]   ;;  %v5530_v42 = vld [vmem:[%s5819_s19 + $0xa4] ss:$36 sps:$4 sm:$0xff]  }
  0x32   : > { %4526 = vmatpush3.bf16.msra.mxu1 %v5440_v33  ;;  %v5520_v29 = vld [vmem:[%s5784_s16 + $0x1b8] sm:$0xff]  }
  0x33   : > { %1537 = vmatmul.mubr.bf16.vlgmr.msra.gmra.mrb[0].mxu0 %v5437_v31  ;;  %4639 = vmatprep.subr.bf16.mxu1 %v5470_v47  ;;  %v5506_v30 = vld [vmem:[%s5819_s19 + $0x1f8] ss:$36 sps:$4 sm:$0xff]   ;;  %v5532_v47 = vld [vmem:[%s5819_s19 + $0xa0] ss:$36 sps:$4 sm:$0xff]  }
  0x34   : > { %1544 = vmatprep.mubr.bf16.mxu0 %v5444_v36  ;;  %4576 = vmatpush3.bf16.msra.mxu0 %v5466_v43  ;;  %v5519_v31 = vld [vmem:[%s5819_s19 + $0x14] ss:$36 sps:$4 sm:$0xff]   ;;  %v5523_v33 = vld [vmem:[%s5819_s19 + $0x1c] ss:$36 sps:$4 sm:$0xff]  }
  0x35   : > { %1634 = vmatmul.mubr.bf16.vlgmr.msra.gmra.mrb[0].mxu1 %v5441_v34  ;;  %4577 = vmatprep.subr.bf16.mxu0 %v5472_v50  ;;  %v5517_v34 = vld [vmem:[%s5819_s19 + $0x10] ss:$36 sps:$4 sm:$0xff]   ;;  %v5524_v35 = vld [vmem:[%s5819_s19 + $0x5c] ss:$36 sps:$4 sm:$0xff]   ;;  %v5535_v50 = vld [vmem:[%s5819_s19 + $0xa8] ss:$36 sps:$4 sm:$0xff]  }
  0x36   : > { %1641 = vmatprep.mubr.bf16.mxu1 %v5447_v37  ;;  %4640 = vmatpush3.bf16.msra.mxu1 %v5471_v49  ;;  %v5544_v36 = vld [vmem:[%s5784_s16 + $0x200] sm:$0xff]   ;;  %v5521_v37 = vld [vmem:[%s5819_s19 + $0x18] ss:$36 sps:$4 sm:$0xff]   ;;  %v5565_v49 = vld [vmem:[%s5784_s16 + $0x228] sm:$0xff]  }
  0x37   : > { %4641 = vmatprep.subr.bf16.mxu1 %v5474_v52  ;;  %v5557_v43 = vld [vmem:[%s5784_s16 + $0x218] sm:$0xff]   ;;  %v5569_v52 = vld [vmem:[%s5784_s16 + $0x230] sm:$0xff]  }
  0x38   : > { %4578 = vmatpush3.bf16.msra.mxu0 %v5473_v51  ;;  %v5539_v51 = vld [vmem:[%s5819_s19 + $0xf4] ss:$36 sps:$4 sm:$0xff]  }
  0x39   : > { %4579 = vmatprep.subr.bf16.mxu0 %v5479_v55  ;;  %v5573_v55 = vld [vmem:[%s5784_s16 + $0x238] sm:$0xff]  }
  0x3a   : > { %4642 = vmatpush3.bf16.msra.mxu1 %v5477_v54  ;;  %v5542_v54 = vld [vmem:[%s5819_s19 + $0x134] ss:$36 sps:$4 sm:$0xff]  }
  0x3b   : > { %1545 = vmatmul.mubr.bf16.gmra.mrb[4].mxu0 %v5446_v38  ;;  %4643 = vmatprep.subr.bf16.mxu1 %v5484_v60  ;;  %v5527_v38 = vld [vmem:[%s5819_s19 + $0x64] ss:$36 sps:$4 sm:$0xff]   ;;  %v5548_v60 = vld [vmem:[%s5819_s19 + $0x138] ss:$36 sps:$4 sm:$0xff]  }
  0x3c   : > { %1552 = vmatprep.mubr.bf16.mxu0 %v5450_v39  ;;  %4580 = vmatpush3.bf16.msra.mxu0 %v5482_v59  ;;  %v5549_v39 = vld [vmem:[%s5784_s16 + $0x208] sm:$0xff]   ;;  %v5550_v59 = vld [vmem:[%s5819_s19 + $0x17c] ss:$36 sps:$4 sm:$0xff]  }
  0x3d   : > { %1642 = vmatmul.mubr.bf16.gmra.mrb[4].mxu1 %v5449_v40  ;;  %4581 = vmatprep.subr.bf16.mxu0 %v5486_v62  ;;  %v5553_v40 = vld [vmem:[%s5784_s16 + $0x210] sm:$0xff]   ;;  %v5552_v62 = vld [vmem:[%s5819_s19 + $0x178] ss:$36 sps:$4 sm:$0xff]  }
  0x3e   : > { %1649 = vmatprep.mubr.bf16.mxu1 %v5453_v41  ;;  %4644 = vmatpush3.bf16.msra.mxu1 %v5485_v61  ;;  %v5526_v41 = vld [vmem:[%s5819_s19 + $0x58] ss:$36 sps:$4 sm:$0xff]   ;;  %v5554_v61 = vld [vmem:[%s5819_s19 + $0x184] ss:$36 sps:$4 sm:$0xff]  }
  0x3f   : > { %4645 = vmatprep.subr.bf16.mxu1 %v5488_v1  ;;  %v5562_v1 = vld [vmem:[%s5819_s19 + $0x1cc] ss:$36 sps:$4 sm:$0xff]  }
  0x40   : > { %4582 = vmatpush3.bf16.msra.mxu0 %v5487_v0  ;;  %v5556_v0 = vld [vmem:[%s5819_s19 + $0x180] ss:$36 sps:$4 sm:$0xff]  }
  0x41   : > { %4583 = vmatprep.subr.bf16.mxu0 %v5493_v5  ;;  %v5570_v5 = vld [vmem:[%s5819_s19 + $0x214] ss:$36 sps:$4 sm:$0xff]  }
  0x42   : > { %4646 = vmatpush3.bf16.msra.mxu1 %v5491_v3  ;;  %v5566_v3 = vld [vmem:[%s5819_s19 + $0x20c] ss:$36 sps:$4 sm:$0xff]  }
  0x43   : > { %1553 = vmatmul.mubr.bf16.gmra.mrb[8].mxu0 %v5452_v44  ;;  %4647 = vmatprep.subr.bf16.mxu1 %v5498_v9  ;;  %v5529_v44 = vld [vmem:[%s5819_s19 + $0x60] ss:$36 sps:$4 sm:$0xff]   ;;  %v5575_v9 = vld [vmem:[%s5819_s19 + $0x68] ss:$36 sps:$4 sm:$0xff]  }
  0x44   : > { %1560 = vmatprep.mubr.bf16.mxu0 %v5456_v45  ;;  %4584 = vmatpush3.bf16.msra.mxu0 %v5496_v7  ;;  %v5533_v45 = vld [vmem:[%s5819_s19 + $0xac] ss:$36 sps:$4 sm:$0xff]   ;;  %v5574_v7 = vld [vmem:[%s5819_s19 + $0x20] ss:$36 sps:$4 sm:$0xff]  }
  0x45   : > { %1650 = vmatmul.mubr.bf16.gmra.mrb[8].mxu1 %v5455_v46  ;;  %4585 = vmatprep.subr.bf16.mxu0 %v5500_v12  ;;  %v5561_v46 = vld [vmem:[%s5784_s16 + $0x220] sm:$0xff]  }
  0x46   : > { %1657 = vmatprep.mubr.bf16.mxu1 %v5459_v48  ;;  %4648 = vmatpush3.bf16.msra.mxu1 %v5499_v11  ;;  %v5536_v48 = vld [vmem:[%s5819_s19 + $0xec] ss:$36 sps:$4 sm:$0xff]   ;;  %v5577_v11 = vld [vmem:[%s5819_s19 + $0xf8] ss:$36 sps:$4 sm:$0xff]   ;;  %v5578_v12 = vld [vmem:[%s5819_s19 + $0x140] ss:$36 sps:$4 sm:$0xff]  }
  0x47   : > { %4649 = vmatprep.subr.bf16.mxu1 %v5502_v14  ;;  %v5580_v14 = vld [vmem:[%s5819_s19 + $0x1d0] ss:$36 sps:$4 sm:$0xff]  }
  0x48   : > { %4586 = vmatpush3.bf16.msra.mxu0 %v5501_v13  ;;  %v5579_v13 = vld [vmem:[%s5819_s19 + $0x188] ss:$36 sps:$4 sm:$0xff]  }
  0x49   : > { %4587 = vmatprep.subr.bf16.mxu0 %v5507_v18 }
  0x4a   : > { %4650 = vmatpush3.bf16.msra.mxu1 %v5505_v17  ;;  %v5940_v17 = vld [vmem:[%s448_s22] ss:$0 sm:$0xff] }
  0x4b   : > { %1561 = vmatmul.mubr.bf16.gmra.mrb[12].mxu0 %v5458_v53  ;;  %4651 = vmatprep.subr.bf16.mxu1 %v5512_v23  ;;  %v5538_v53 = vld [vmem:[%s5819_s19 + $0xe8] ss:$36 sps:$4 sm:$0xff]  }
  0x4c   : > { %1568 = vmatprep.mubr.bf16.mxu0 %v5462_v57  ;;  %4588 = vmatpush3.bf16.msra.mxu0 %v5510_v20  ;;  %v5546_v57 = vld [vmem:[%s5819_s19 + $0x13c] ss:$36 sps:$4 sm:$0xff]  }
  0x4d   : > { %1658 = vmatmul.mubr.bf16.gmra.mrb[12].mxu1 %v5461_v56  ;;  %4589 = vmatprep.subr.bf16.mxu0 %v5514_v26  ;;  %v5541_v56 = vld [vmem:[%s5819_s19 + $0xf0] ss:$36 sps:$4 sm:$0xff]  }
  0x4e   : > { %1665 = vmatprep.mubr.bf16.mxu1 %v5467_v58  ;;  %4652 = vmatpush3.bf16.msra.mxu1 %v5513_v25  ;;  %v5545_v58 = vld [vmem:[%s5819_s19 + $0x130] ss:$36 sps:$4 sm:$0xff]  }
  0x4f   : > { %4653 = vmatprep.subr.bf16.mxu1 %v5516_v28 }
  0x50   : > { %4590 = vmatpush3.bf16.msra.mxu0 %v5515_v27 }
  0x51   : > { %4913 = vmatprep.subr.bf16.mxu0 %v5544_v36 }
  0x52   : > { %4654 = vmatpush3.bf16.msra.mxu1 %v5520_v29 }
  0x53   : > { %1569 = vmatmul.mubr.bf16.gmra.mrb[16].mxu0 %v5465_v63  ;;  %v5558_v63 = vld [vmem:[%s5819_s19 + $0x1c4] ss:$36 sps:$4 sm:$0xff]  }
  0x54   : > { %1576 = vmatprep.mubr.bf16.mxu0 %v5475_v2  ;;  %v5560_v2 = vld [vmem:[%s5819_s19 + $0x1c0] ss:$36 sps:$4 sm:$0xff]  }
  0x55   : > { %1666 = vmatmul.mubr.bf16.gmra.mrb[16].mxu1 %v5469_v4  ;;  %v5564_v4 = vld [vmem:[%s5819_s19 + $0x1c8] ss:$36 sps:$4 sm:$0xff]  }
  0x56   : > { %1673 = vmatprep.mubr.bf16.mxu1 %v5480_v6  ;;  %v5568_v6 = vld [vmem:[%s5819_s19 + $0x208] ss:$36 sps:$4 sm:$0xff]  }
  0x5b   : > { %1577 = vmatmul.mubr.bf16.gmra.mrb[20].mxu0 %v5478_v8  ;;  %v5572_v8 = vld [vmem:[%s5819_s19 + $0x210] ss:$36 sps:$4 sm:$0xff]  }
  0x5c   : > { %1584 = vmatprep.mubr.bf16.mxu0 %v5489_v10  ;;  %v5576_v10 = vld [vmem:[%s5819_s19 + $0xb0] ss:$36 sps:$4 sm:$0xff]  }
  0x5d   : > { %1674 = vmatmul.mubr.bf16.gmra.mrb[20].mxu1 %v5483_v15  ;;  %v5581_v15 = vld [vmem:[%s5819_s19 + $0x218] ss:$36 sps:$4 sm:$0xff]   ;;  %s6128_s19 = scalar_lea.vmem %s6386_s4, %s5778_s13  ;;  %s464_s13 = scalar_lea.vmem %s6390_s8, %s6397_s30 }
  0x5e   : > { %1681 = vmatprep.mubr.bf16.mxu1 %v5494_v16 }
  0x63   : > { %1585 = vmatmul.mubr.bf16.gmra.mrb[24].mxu0 %v5492_v19 }
  0x64   : > { %1592 = vmatprep.mubr.bf16.mxu0 %v5503_v21 }
  0x65   : > { %1682 = vmatmul.mubr.bf16.gmra.mrb[24].mxu1 %v5497_v22 }
  0x66   : > { %1689 = vmatprep.mubr.bf16.mxu1 %v5508_v24 }
  0x6b   : > { %1593 = vmatmul.mubr.bf16.gmra.mrb[28].mxu0 %v5506_v30 }
  0x6c   : > { %1730 = vmatprep.mubr.bf16.mxu0 %v5519_v31 }
  0x6d   : > { %1690 = vmatmul.mubr.bf16.gmra.mrb[28].mxu1 %v5511_v32 }
  0x6e   : > { %1827 = vmatprep.mubr.bf16.mxu1 %v5523_v33 }
  0x73   : > { %1731 = vmatmul.mubr.bf16.vlgmr.msra.gmra.mrb[32].mxu0 %v5517_v34 }
  0x74   : > { %1738 = vmatprep.mubr.bf16.mxu0 %v5524_v35  ;;  %4914 = vmatpush3.bf16.msra.mxu0 %v5544_v36 }
  0x75   : > { %1828 = vmatmul.mubr.bf16.vlgmr.msra.gmra.mrb[32].mxu1 %v5521_v37  ;;  %4915 = vmatprep.subr.bf16.mxu0 %v5549_v39 }
  0x76   : > { %1835 = vmatprep.mubr.bf16.mxu1 %v5527_v38 }
  0x78   : > { %4916 = vmatpush3.bf16.msra.mxu0 %v5549_v39 }
  0x79   : > { %4917 = vmatprep.subr.bf16.mxu0 %v5553_v40 }
  0x7b   : > { %1739 = vmatmul.mubr.bf16.gmra.mrb[36].mxu0 %v5526_v41 }
  0x7c   : > { %1746 = vmatprep.mubr.bf16.mxu0 %v5530_v42  ;;  %4918 = vmatpush3.bf16.msra.mxu0 %v5553_v40 }
  0x7d   : > { %4919 = vmatprep.subr.bf16.mxu0 %v5557_v43  ;;  %1836 = vmatmul.mubr.bf16.gmra.mrb[36].mxu1 %v5529_v44 }
  0x7e   : > { %1843 = vmatprep.mubr.bf16.mxu1 %v5533_v45 }
  0x80   : > { %4920 = vmatpush3.bf16.msra.mxu0 %v5557_v43 }
  0x81   : > { %4921 = vmatprep.subr.bf16.mxu0 %v5561_v46 }
  0x83   : > { %1747 = vmatmul.mubr.bf16.gmra.mrb[40].mxu0 %v5532_v47 }
  0x84   : > { %1754 = vmatprep.mubr.bf16.mxu0 %v5536_v48  ;;  %4922 = vmatpush3.bf16.msra.mxu0 %v5561_v46 }
  0x85   : > { %4923 = vmatprep.subr.bf16.mxu0 %v5565_v49  ;;  %1844 = vmatmul.mubr.bf16.gmra.mrb[40].mxu1 %v5535_v50 }
  0x86   : > { %1851 = vmatprep.mubr.bf16.mxu1 %v5539_v51 }
  0x88   : > { %4924 = vmatpush3.bf16.msra.mxu0 %v5565_v49 }
  0x89   : > { %4925 = vmatprep.subr.bf16.mxu0 %v5569_v52 }
  0x8b   : > { %1755 = vmatmul.mubr.bf16.gmra.mrb[44].mxu0 %v5538_v53 }
  0x8c   : > { %1762 = vmatprep.mubr.bf16.mxu0 %v5542_v54  ;;  %4926 = vmatpush3.bf16.msra.mxu0 %v5569_v52 }
  0x8d   : > { %4927 = vmatprep.subr.bf16.mxu0 %v5573_v55  ;;  %1852 = vmatmul.mubr.bf16.gmra.mrb[44].mxu1 %v5541_v56 }
  0x8e   : > { %1859 = vmatprep.mubr.bf16.mxu1 %v5546_v57 }
  0x90   : > { %4928 = vmatpush3.bf16.msra.mxu0 %v5573_v55 }
  0x93   : > { %1763 = vmatmul.mubr.bf16.gmra.mrb[48].mxu0 %v5545_v58 }
  0x94   : > { %1770 = vmatprep.mubr.bf16.mxu0 %v5550_v59 }
  0x95   : > { %1860 = vmatmul.mubr.bf16.gmra.mrb[48].mxu1 %v5548_v60 }
  0x96   : > { %1867 = vmatprep.mubr.bf16.mxu1 %v5554_v61 }
  0x9b   : > { %1771 = vmatmul.mubr.bf16.gmra.mrb[52].mxu0 %v5552_v62 }
  0x9c   : > { %1778 = vmatprep.mubr.bf16.mxu0 %v5558_v63 }
  0x9d   : > { %1868 = vmatmul.mubr.bf16.gmra.mrb[52].mxu1 %v5556_v0 }
  0x9e   : > { %1875 = vmatprep.mubr.bf16.mxu1 %v5562_v1 }
  0xa3   : > { %1779 = vmatmul.mubr.bf16.gmra.mrb[56].mxu0 %v5560_v2 }
  0xa4   : > { %1786 = vmatprep.mubr.bf16.mxu0 %v5566_v3 }
  0xa5   : > { %1876 = vmatmul.mubr.bf16.gmra.mrb[56].mxu1 %v5564_v4 }
  0xa6   : > { %1883 = vmatprep.mubr.bf16.mxu1 %v5570_v5 }
  0xab   : > { %1787 = vmatmul.mubr.bf16.gmra.mrb[60].mxu0 %v5568_v6 }
  0xac   : > { %4929 = vmatprep.mubr.bf16.mxu0 %v5574_v7 }
  0xad   : > { %1884 = vmatmul.mubr.bf16.gmra.mrb[60].mxu1 %v5572_v8 }
  0xb3   : > { %4930 = vmatmul.mubr.bf16.vlgmr.msra.gmra.mrb[64].mxu0 %v5575_v9 }
  0xb4   : > { %4933 = vmatprep.mubr.bf16.mxu0 %v5576_v10 }
  0xbb   : > { %4934 = vmatmul.mubr.bf16.gmra.mrb[68].mxu0 %v5577_v11 }
  0xbc   : > { %4937 = vmatprep.mubr.bf16.mxu0 %v5578_v12 }
  0xc3   : > { %4938 = vmatmul.mubr.bf16.gmra.mrb[72].mxu0 %v5579_v13 }
  0xc4   : > { %4941 = vmatprep.mubr.bf16.mxu0 %v5580_v14 }
  0xcb   : > { %4942 = vmatmul.mubr.bf16.gmra.mrb[76].mxu0 %v5581_v15 }
 0x106   : > { %v4463_v16 = vpop.f32.mrb[0].mxu0 }
 0x107   : > { %v4464_v18 = vpop.f32.mrb[1].mxu0 }
 0x108   : > { %v4465_v19 = vadd.f32 %v4464_v18, %v4463_v16  ;;  %v4466_v20 = vpop.f32.mrb[2].mxu0  ;;  %v4527_v21 = vpop.f32.mrb[0].mxu1 }
 0x109   : > { %v4467_v22 = vpop.f32.mrb[3].mxu0  ;;  %v4528_v25 = vpop.f32.mrb[1].mxu1 }
 0x10a   : > { %v1539_v23 = vadd.f32 %v4465_v19, %v5940_v17  ;;  %v4468_v24 = vadd.f32 %v4467_v22, %v4466_v20  ;;  %v4529_v26 = vadd.f32 %v4528_v25, %v4527_v21  ;;  %v4530_v27 = vpop.f32.mrb[2].mxu1 }
 0x10b   : > { %v4531_v29 = vpop.f32.mrb[3].mxu1 }
 0x10c   : > { %v1542_v28 = vadd.f32 %v4468_v24, %v5940_v17  ;;  %v5944_v30 = vadd.f32 %v4529_v26, %v1539_v23  ;;  %v4532_v31 = vadd.f32 %v4531_v29, %v4530_v27 }
 0x10e   : > { %v4469_v32 = vpop.f32.mrb[4].mxu0  ;;  %v5946_v33 = vadd.f32 %v4532_v31, %v1542_v28 }
 0x10f   : > { %v4470_v34 = vpop.f32.mrb[5].mxu0 }
 0x110   : > { %v4471_v35 = vadd.f32 %v4470_v34, %v4469_v32  ;;  %v4472_v36 = vpop.f32.mrb[6].mxu0  ;;  %v4533_v37 = vpop.f32.mrb[4].mxu1 }
 0x111   : > { %v4473_v38 = vpop.f32.mrb[7].mxu0  ;;  %v4534_v41 = vpop.f32.mrb[5].mxu1 }
 0x112   : > { %v1547_v39 = vadd.f32 %v4471_v35, %v5940_v17  ;;  %v4474_v40 = vadd.f32 %v4473_v38, %v4472_v36  ;;  %v4535_v42 = vadd.f32 %v4534_v41, %v4533_v37  ;;  %v4536_v43 = vpop.f32.mrb[6].mxu1  ;;  %v5582_v36 = vld [vmem:[%s6385_s3] sm:$0xff]  }
 0x113   : > { %v4537_v45 = vpop.f32.mrb[7].mxu1  ;;  %4961 = vmatprep.mubr.bf16.mxu1 %v5582_v36 }
 0x114   : > { %v1550_v44 = vadd.f32 %v4474_v40, %v5940_v17  ;;  %v5950_v46 = vadd.f32 %v4535_v42, %v1547_v39  ;;  %v4538_v47 = vadd.f32 %v4537_v45, %v4536_v43 }
 0x116   : > { %v4475_v48 = vpop.f32.mrb[8].mxu0  ;;  %v5952_v49 = vadd.f32 %v4538_v47, %v1550_v44 }
 0x117   : > { %v4476_v50 = vpop.f32.mrb[9].mxu0 }
 0x118   : > { %v4477_v51 = vadd.f32 %v4476_v50, %v4475_v48  ;;  %v4478_v52 = vpop.f32.mrb[10].mxu0  ;;  %v4539_v53 = vpop.f32.mrb[8].mxu1 }
 0x119   : > { %v4479_v54 = vpop.f32.mrb[11].mxu0  ;;  %v4540_v57 = vpop.f32.mrb[9].mxu1 }
 0x11a   : > { %v1555_v55 = vadd.f32 %v4477_v51, %v5940_v17  ;;  %v4480_v56 = vadd.f32 %v4479_v54, %v4478_v52  ;;  %v4541_v58 = vadd.f32 %v4540_v57, %v4539_v53  ;;  %v4542_v59 = vpop.f32.mrb[10].mxu1 }
 0x11b   : > { %v4543_v61 = vpop.f32.mrb[11].mxu1 }
 0x11c   : > { %v1558_v60 = vadd.f32 %v4480_v56, %v5940_v17  ;;  %v5956_v62 = vadd.f32 %v4541_v58, %v1555_v55  ;;  %v4544_v63 = vadd.f32 %v4543_v61, %v4542_v59 }
 0x11e   : > { %v4481_v0 = vpop.f32.mrb[12].mxu0  ;;  %v5958_v1 = vadd.f32 %v4544_v63, %v1558_v60 }
 0x11f   : > { %v4482_v2 = vpop.f32.mrb[13].mxu0 }
 0x120   : > { %v4483_v3 = vadd.f32 %v4482_v2, %v4481_v0  ;;  %v4484_v4 = vpop.f32.mrb[14].mxu0  ;;  %v4545_v5 = vpop.f32.mrb[12].mxu1 }
 0x121   : > { %v4485_v6 = vpop.f32.mrb[15].mxu0  ;;  %v4546_v9 = vpop.f32.mrb[13].mxu1 }
 0x122   : > { %v1563_v7 = vadd.f32 %v4483_v3, %v5940_v17  ;;  %v4486_v8 = vadd.f32 %v4485_v6, %v4484_v4  ;;  %v4547_v10 = vadd.f32 %v4546_v9, %v4545_v5  ;;  %v4548_v11 = vpop.f32.mrb[14].mxu1 }
 0x123   : > { %v4549_v13 = vpop.f32.mrb[15].mxu1 }
 0x124   : > { %v1566_v12 = vadd.f32 %v4486_v8, %v5940_v17  ;;  %v5962_v14 = vadd.f32 %v4547_v10, %v1563_v7  ;;  %v4550_v15 = vadd.f32 %v4549_v13, %v4548_v11 }
 0x126   : > { %v4487_v16 = vpop.f32.mrb[16].mxu0  ;;  %v5964_v18 = vadd.f32 %v4550_v15, %v1566_v12 }
 0x127   : > { %v4488_v19 = vpop.f32.mrb[17].mxu0 }
 0x128   : > { %v4489_v20 = vadd.f32 %v4488_v19, %v4487_v16  ;;  %v4490_v21 = vpop.f32.mrb[18].mxu0  ;;  %v4551_v22 = vpop.f32.mrb[16].mxu1 }
 0x129   : > { %v4491_v23 = vpop.f32.mrb[19].mxu0  ;;  %v4552_v26 = vpop.f32.mrb[17].mxu1 }
 0x12a   : > { %v1571_v24 = vadd.f32 %v4489_v20, %v5940_v17  ;;  %v4492_v25 = vadd.f32 %v4491_v23, %v4490_v21  ;;  %v4553_v27 = vadd.f32 %v4552_v26, %v4551_v22  ;;  %v4554_v28 = vpop.f32.mrb[18].mxu1 }
 0x12b   : > { %v4555_v31 = vpop.f32.mrb[19].mxu1 }
 0x12c   : > { %v1574_v29 = vadd.f32 %v4492_v25, %v5940_v17  ;;  %v5968_v32 = vadd.f32 %v4553_v27, %v1571_v24  ;;  %v4556_v34 = vadd.f32 %v4555_v31, %v4554_v28 }
 0x12e   : > { %v4493_v35 = vpop.f32.mrb[20].mxu0  ;;  %v5973_v37 = vadd.f32 %v4556_v34, %v1574_v29 }
 0x12f   : > { %v4494_v38 = vpop.f32.mrb[21].mxu0 }
 0x130   : > { %v4495_v39 = vadd.f32 %v4494_v38, %v4493_v35  ;;  %v4496_v40 = vpop.f32.mrb[22].mxu0  ;;  %v4557_v41 = vpop.f32.mrb[20].mxu1 }
 0x131   : > { %v4497_v42 = vpop.f32.mrb[23].mxu0  ;;  %v4558_v45 = vpop.f32.mrb[21].mxu1 }
 0x132   : > { %v1579_v43 = vadd.f32 %v4495_v39, %v5940_v17  ;;  %v4498_v44 = vadd.f32 %v4497_v42, %v4496_v40  ;;  %v4559_v47 = vadd.f32 %v4558_v45, %v4557_v41  ;;  %v4560_v48 = vpop.f32.mrb[22].mxu1 }
 0x133   : > { %v4561_v51 = vpop.f32.mrb[23].mxu1 }
 0x134   : > { %v1582_v50 = vadd.f32 %v4498_v44, %v5940_v17  ;;  %v5977_v52 = vadd.f32 %v4559_v47, %v1579_v43  ;;  %v4562_v53 = vadd.f32 %v4561_v51, %v4560_v48 }
 0x136   : > { %v4499_v54 = vpop.f32.mrb[24].mxu0  ;;  %v5979_v55 = vadd.f32 %v4562_v53, %v1582_v50 }
 0x137   : > { %v4500_v56 = vpop.f32.mrb[25].mxu0 }
 0x138   : > { %v4501_v57 = vadd.f32 %v4500_v56, %v4499_v54  ;;  %v4502_v58 = vpop.f32.mrb[26].mxu0  ;;  %v4563_v59 = vpop.f32.mrb[24].mxu1 }
 0x139   : > { %v4503_v60 = vpop.f32.mrb[27].mxu0  ;;  %v4564_v0 = vpop.f32.mrb[25].mxu1 }
 0x13a   : > { %v1587_v61 = vadd.f32 %v4501_v57, %v5940_v17  ;;  %v4504_v63 = vadd.f32 %v4503_v60, %v4502_v58  ;;  %v4565_v2 = vadd.f32 %v4564_v0, %v4563_v59  ;;  %v4566_v3 = vpop.f32.mrb[26].mxu1 }
 0x13b   : > { %v4567_v5 = vpop.f32.mrb[27].mxu1 }
 0x13c   : > { %v1590_v4 = vadd.f32 %v4504_v63, %v5940_v17  ;;  %v5983_v6 = vadd.f32 %v4565_v2, %v1587_v61  ;;  %v4568_v7 = vadd.f32 %v4567_v5, %v4566_v3 }
 0x13e   : > { %v4505_v8 = vpop.f32.mrb[28].mxu0  ;;  %v5985_v9 = vadd.f32 %v4568_v7, %v1590_v4 }
 0x13f   : > { %v4506_v10 = vpop.f32.mrb[29].mxu0 }
 0x140   : > { %v4507_v11 = vadd.f32 %v4506_v10, %v4505_v8  ;;  %v4508_v12 = vpop.f32.mrb[30].mxu0  ;;  %v4569_v13 = vpop.f32.mrb[28].mxu1 }
 0x141   : > { %v4509_v15 = vpop.f32.mrb[31].mxu0  ;;  %v4570_v20 = vpop.f32.mrb[29].mxu1 }
 0x142   : > { %v1595_v16 = vadd.f32 %v4507_v11, %v5940_v17  ;;  %v4510_v19 = vadd.f32 %v4509_v15, %v4508_v12  ;;  %v4571_v21 = vadd.f32 %v4570_v20, %v4569_v13  ;;  %v4572_v22 = vpop.f32.mrb[30].mxu1 }
 0x143   : > { %v4573_v24 = vpop.f32.mrb[31].mxu1 }
 0x144   : > { %v1598_v23 = vadd.f32 %v4510_v19, %v5940_v17  ;;  %v5989_v25 = vadd.f32 %v4571_v21, %v1595_v16  ;;  %v4574_v26 = vadd.f32 %v4573_v24, %v4572_v22 }
 0x146   : > { %v4591_v27 = vpop.f32.mrb[32].mxu0  ;;  %v5991_v28 = vadd.f32 %v4574_v26, %v1598_v23 }
 0x147   : > { %v4592_v29 = vpop.f32.mrb[33].mxu0 }
 0x148   : > { %v4593_v31 = vadd.f32 %v4592_v29, %v4591_v27  ;;  %v4594_v34 = vpop.f32.mrb[34].mxu0  ;;  %v4655_v35 = vpop.f32.mrb[32].mxu1 }
 0x149   : > { %v4595_v36 = vpop.f32.mrb[35].mxu0  ;;  %v4656_v40 = vpop.f32.mrb[33].mxu1 }
 0x14a   : > { %v1733_v38 = vadd.f32 %v4593_v31, %v5944_v30  ;;  %v4596_v39 = vadd.f32 %v4595_v36, %v4594_v34  ;;  %v4657_v41 = vadd.f32 %v4656_v40, %v4655_v35  ;;  %v4658_v42 = vpop.f32.mrb[34].mxu1 }
 0x14b   : > { %v4659_v43 = vpop.f32.mrb[35].mxu1 }
 0x14c   : > { %v1736_v17 = vadd.f32 %v4596_v39, %v5946_v33  ;;  %v4660_v44 = vadd.f32 %v4659_v43, %v4658_v42  ;;  %v5995_v45 = vadd.f32 %v4657_v41, %v1733_v38 }
 0x14e   : > { %v4597_v47 = vpop.f32.mrb[36].mxu0  ;;  %v5997_v50 = vadd.f32 %v4660_v44, %v1736_v17 }
 0x14f   : > { %v4598_v48 = vpop.f32.mrb[37].mxu0 }
 0x150   : > { %v4599_v51 = vadd.f32 %v4598_v48, %v4597_v47  ;;  %v4600_v53 = vpop.f32.mrb[38].mxu0  ;;  %v4661_v54 = vpop.f32.mrb[36].mxu1 }
 0x151   : > { %v4601_v56 = vpop.f32.mrb[39].mxu0  ;;  %v4662_v58 = vpop.f32.mrb[37].mxu1 }
 0x152   : > { %v1741_v30 = vadd.f32 %v4599_v51, %v5950_v46  ;;  %v4602_v57 = vadd.f32 %v4601_v56, %v4600_v53  ;;  %v4663_v59 = vadd.f32 %v4662_v58, %v4661_v54  ;;  %v4664_v60 = vpop.f32.mrb[38].mxu1 }
 0x153   : > { %v4665_v61 = vpop.f32.mrb[39].mxu1 }
 0x154   : > { %v1744_v33 = vadd.f32 %v4602_v57, %v5952_v49  ;;  %v4666_v63 = vadd.f32 %v4665_v61, %v4664_v60  ;;  %v6001_v0 = vadd.f32 %v4663_v59, %v1741_v30 }
 0x156   : > { %v4603_v2 = vpop.f32.mrb[40].mxu0  ;;  %v6003_v4 = vadd.f32 %v4666_v63, %v1744_v33 }
 0x157   : > { %v4604_v3 = vpop.f32.mrb[41].mxu0 }
 0x158   : > { %v4605_v5 = vadd.f32 %v4604_v3, %v4603_v2  ;;  %v4606_v7 = vpop.f32.mrb[42].mxu0  ;;  %v4667_v8 = vpop.f32.mrb[40].mxu1 }
 0x159   : > { %v4607_v10 = vpop.f32.mrb[43].mxu0  ;;  %v4668_v12 = vpop.f32.mrb[41].mxu1 }
 0x15a   : > { %v1749_v46 = vadd.f32 %v4605_v5, %v5956_v62  ;;  %v4608_v11 = vadd.f32 %v4607_v10, %v4606_v7  ;;  %v4669_v13 = vadd.f32 %v4668_v12, %v4667_v8  ;;  %v4670_v15 = vpop.f32.mrb[42].mxu1 }
 0x15b   : > { %v4671_v16 = vpop.f32.mrb[43].mxu1 }
 0x15c   : > { %v1752_v49 = vadd.f32 %v4608_v11, %v5958_v1  ;;  %v4672_v19 = vadd.f32 %v4671_v16, %v4670_v15  ;;  %v6007_v20 = vadd.f32 %v4669_v13, %v1749_v46 }
 0x15e   : > { %v4609_v21 = vpop.f32.mrb[44].mxu0  ;;  %v6009_v23 = vadd.f32 %v4672_v19, %v1752_v49 }
 0x15f   : > { %v4610_v22 = vpop.f32.mrb[45].mxu0 }
 0x160   : > { %v4611_v24 = vadd.f32 %v4610_v22, %v4609_v21  ;;  %v4612_v26 = vpop.f32.mrb[46].mxu0  ;;  %v4673_v27 = vpop.f32.mrb[44].mxu1 }
 0x161   : > { %v4613_v29 = vpop.f32.mrb[47].mxu0  ;;  %v4674_v34 = vpop.f32.mrb[45].mxu1 }
 0x162   : > { %v1757_v62 = vadd.f32 %v4611_v24, %v5962_v14  ;;  %v4614_v31 = vadd.f32 %v4613_v29, %v4612_v26  ;;  %v4675_v35 = vadd.f32 %v4674_v34, %v4673_v27  ;;  %v4676_v36 = vpop.f32.mrb[46].mxu1 }
 0x163   : > { %v4677_v38 = vpop.f32.mrb[47].mxu1 }
 0x164   : > { %v1760_v1 = vadd.f32 %v4614_v31, %v5964_v18  ;;  %v4678_v39 = vadd.f32 %v4677_v38, %v4676_v36  ;;  %v6013_v40 = vadd.f32 %v4675_v35, %v1757_v62 }
 0x166   : > { %v4615_v41 = vpop.f32.mrb[48].mxu0  ;;  %v6015_v17 = vadd.f32 %v4678_v39, %v1760_v1 }
 0x167   : > { %v4616_v42 = vpop.f32.mrb[49].mxu0 }
 0x168   : > { %v4617_v43 = vadd.f32 %v4616_v42, %v4615_v41  ;;  %v4618_v44 = vpop.f32.mrb[50].mxu0  ;;  %v4679_v47 = vpop.f32.mrb[48].mxu1 }
 0x169   : > { %v4619_v48 = vpop.f32.mrb[51].mxu0  ;;  %v4680_v53 = vpop.f32.mrb[49].mxu1 }
 0x16a   : > { %v1765_v14 = vadd.f32 %v4617_v43, %v5968_v32  ;;  %v4620_v51 = vadd.f32 %v4619_v48, %v4618_v44  ;;  %v4681_v54 = vadd.f32 %v4680_v53, %v4679_v47  ;;  %v4682_v56 = vpop.f32.mrb[50].mxu1 }
 0x16b   : > { %v4683_v30 = vpop.f32.mrb[51].mxu1 }
 0x16c   : > { %v1768_v18 = vadd.f32 %v4620_v51, %v5973_v37  ;;  %v4684_v57 = vadd.f32 %v4683_v30, %v4682_v56  ;;  %v6019_v58 = vadd.f32 %v4681_v54, %v1765_v14 }
 0x16e   : > { %v4621_v59 = vpop.f32.mrb[52].mxu0  ;;  %v6021_v33 = vadd.f32 %v4684_v57, %v1768_v18 }
 0x16f   : > { %v4622_v60 = vpop.f32.mrb[53].mxu0 }
 0x170   : > { %v4623_v61 = vadd.f32 %v4622_v60, %v4621_v59  ;;  %v4624_v63 = vpop.f32.mrb[54].mxu0  ;;  %v4685_v2 = vpop.f32.mrb[52].mxu1 }
 0x171   : > { %v4625_v3 = vpop.f32.mrb[55].mxu0  ;;  %v4686_v7 = vpop.f32.mrb[53].mxu1 }
 0x172   : > { %v1773_v32 = vadd.f32 %v4623_v61, %v5977_v52  ;;  %v4626_v5 = vadd.f32 %v4625_v3, %v4624_v63  ;;  %v4687_v8 = vadd.f32 %v4686_v7, %v4685_v2  ;;  %v4688_v10 = vpop.f32.mrb[54].mxu1 }
 0x173   : > { %v4689_v46 = vpop.f32.mrb[55].mxu1 }
 0x174   : > { %v1776_v37 = vadd.f32 %v4626_v5, %v5979_v55  ;;  %v4690_v11 = vadd.f32 %v4689_v46, %v4688_v10  ;;  %v6025_v12 = vadd.f32 %v4687_v8, %v1773_v32 }
 0x176   : > { %v4627_v13 = vpop.f32.mrb[56].mxu0  ;;  %v6027_v49 = vadd.f32 %v4690_v11, %v1776_v37 }
 0x177   : > { %v4628_v15 = vpop.f32.mrb[57].mxu0 }
 0x178   : > { %v4629_v16 = vadd.f32 %v4628_v15, %v4627_v13  ;;  %v4630_v19 = vpop.f32.mrb[58].mxu0  ;;  %v4691_v21 = vpop.f32.mrb[56].mxu1 }
 0x179   : > { %v4631_v22 = vpop.f32.mrb[59].mxu0  ;;  %v4692_v26 = vpop.f32.mrb[57].mxu1 }
 0x17a   : > { %v1781_v52 = vadd.f32 %v4629_v16, %v5983_v6  ;;  %v4632_v24 = vadd.f32 %v4631_v22, %v4630_v19  ;;  %v4693_v27 = vadd.f32 %v4692_v26, %v4691_v21  ;;  %v4694_v29 = vpop.f32.mrb[58].mxu1 }
 0x17b   : > { %v4695_v62 = vpop.f32.mrb[59].mxu1 }
 0x17c   : > { %v1784_v55 = vadd.f32 %v4632_v24, %v5985_v9  ;;  %v4696_v31 = vadd.f32 %v4695_v62, %v4694_v29  ;;  %v6031_v34 = vadd.f32 %v4693_v27, %v1781_v52 }
 0x17e   : > { %v4633_v35 = vpop.f32.mrb[60].mxu0  ;;  %v6033_v1 = vadd.f32 %v4696_v31, %v1784_v55 }
 0x17f   : > { %v4634_v36 = vpop.f32.mrb[61].mxu0 }
 0x180   : > { %v4635_v38 = vadd.f32 %v4634_v36, %v4633_v35  ;;  %v4636_v39 = vpop.f32.mrb[62].mxu0  ;;  %v4697_v41 = vpop.f32.mrb[60].mxu1 }
 0x181   : > { %v4637_v42 = vpop.f32.mrb[63].mxu0  ;;  %v4698_v44 = vpop.f32.mrb[61].mxu1 }
 0x182   : > { %v1789_v6 = vadd.f32 %v4635_v38, %v5989_v25  ;;  %v4638_v43 = vadd.f32 %v4637_v42, %v4636_v39  ;;  %v4699_v47 = vadd.f32 %v4698_v44, %v4697_v41  ;;  %v4700_v48 = vpop.f32.mrb[62].mxu1 }
 0x183   : > { %v4701_v14 = vpop.f32.mrb[63].mxu1 }
 0x184   : > { %v1792_v9 = vadd.f32 %v4638_v43, %v5991_v28  ;;  %v4702_v51 = vadd.f32 %v4701_v14, %v4700_v48  ;;  %v1886_v53 = vadd.f32 %v4699_v47, %v1789_v6  ;;  %v5584_v47 = vld [vmem:[%s6385_s3 + $0x10] sm:$0xff]   ;;  %v5585_v48 = vld [vmem:[%s6385_s3 + $0x18] sm:$0xff]   ;;  %v5594_v14 = vld [vmem:[%s6128_s19] sm:$0xff]  }
 0x185   : > { %4965 = vmatprep.subr.bf16.mxu0 %v5594_v14 }
 0x186   : > { %v4931_v54 = vpop.f32.mrb[64].mxu0  ;;  %v1889_v30 = vadd.f32 %v4702_v51, %v1792_v9  ;;  %v5586_v9 = vld [vmem:[%s6385_s3 + $0x20] sm:$0xff]   ;;  %v5587_v51 = vld [vmem:[%s6385_s3 + $0x28] sm:$0xff]   ;;  %4966 = vmatpush3.bf16.msra.mxu0 %v5594_v14 }
 0x187   : > { %v1935_v56 = vadd.f32 %v4931_v54, %v6001_v0  ;;  %v1926_v18 = vpop.f32.mrb[65].mxu0  ;;  %v5595_v54 = vld [vmem:[%s6128_s19 + $0x8] sm:$0xff]  }
 0x188   : > { %v1927_v57 = vadd.f32 %v1926_v18, %v5995_v45  ;;  %v4932_v59 = vpop.f32.mrb[66].mxu0  ;;  %4967 = vmatprep.subr.bf16.mxu0 %v5595_v54  ;;  %v5599_v18 = vld [vmem:[%s6128_s19 + $0x18] sm:$0xff]  }
 0x189   : > { %v1938_v60 = vadd.f32 %v4932_v59, %v6003_v4  ;;  %v1929_v25 = vpop.f32.mrb[67].mxu0  ;;  %v1991_v63 = vmax.f32 %v1935_v56, 0.0  ;;  %v5598_v56 = vld [vmem:[%s6128_s19 + $0x10] sm:$0xff]  }
 0x18a   : > { %v1930_v61 = vadd.f32 %v1929_v25, %v5997_v50  ;;  %v1989_v3 = vmax.f32 %v1927_v57, 0.0  ;;  %4968 = vmatpush3.bf16.msra.mxu0 %v5595_v54  ;;  %v5601_v57 = vld [vmem:[%s6128_s19 + $0x28] sm:$0xff]   ;;  %v5602_v59 = vld [vmem:[%s6128_s19 + $0x30] sm:$0xff]   ;;  %v6162_v25 = vld [vmem:[%s6128_s19 + $0x40] sm:$0xff]  }
 0x18b   : > { %v1992_v2 = vmax.f32 %v1938_v60, 0.0  ;;  %4969 = vmatprep.subr.bf16.mxu0 %v5598_v56  ;;  %v5603_v60 = vld [vmem:[%s6128_s19 + $0x38] sm:$0xff]  }
 0x18c   : > { %v1990_v28 = vmax.f32 %v1930_v61, 0.0  ;;  %v5589_v61 = vld [vmem:[%s6385_s3 + $0x38] sm:$0xff]  }
 0x18d   : > { %v6041_v32 = vpack.c.bf16 %v1992_v2, %v1991_v63  ;;  %v5590_v63 = vld [vmem:[%s6385_s3 + $0x40] sm:$0xff]   ;;  %v5591_v2 = vld [vmem:[%s6385_s3 + $0x48] sm:$0xff]  }
 0x18e   : > { %v6043_v5 = vpack.c.bf16 %v1990_v28, %v1989_v3  ;;  %v4935_v7 = vpop.f32.mrb[68].mxu0  ;;  %4970 = vmatpush3.bf16.msra.mxu0 %v5598_v56  ;;  %v5592_v3 = vld [vmem:[%s6385_s3 + $0x50] sm:$0xff]   ;;  %v5593_v28 = vld [vmem:[%s6385_s3 + $0x58] sm:$0xff]  }
 0x18f   : > { %v1951_v0 = vadd.f32 %v4935_v7, %v6013_v40  ;;  %v1942_v8 = vpop.f32.mrb[69].mxu0  ;;  %4971 = vmatprep.subr.bf16.mxu0 %v5599_v18  ;;  %v5596_v7 = vld [vmem:[%s6385_s3 + $0x60] sm:$0xff]  }
 0x190   : > { %v1943_v45 = vadd.f32 %v1942_v8, %v6007_v20  ;;  %v4936_v10 = vpop.f32.mrb[70].mxu0  ;;  %4945 = vmatprep.subr.bf16.mxu1 %v6043_v5  ;;  %v5606_v8 = vld [vmem:[%s6385_s3 + $0x70] sm:$0xff]  }
 0x191   : > { %v1954_v4 = vadd.f32 %v4936_v10, %v6015_v17  ;;  %v1945_v50 = vpop.f32.mrb[71].mxu0  ;;  %4946 = vmatpush3.bf16.msra.mxu1 %v6043_v5  ;;  %v1995_v46 = vmax.f32 %v1951_v0, 0.0  ;;  %v5597_v0 = vld [vmem:[%s6385_s3 + $0x68] sm:$0xff]  }
 0x192   : > { %v1946_v37 = vadd.f32 %v1945_v50, %v6009_v23  ;;  %4947 = vmatprep.subr.bf16.mxu1 %v6041_v32  ;;  %v1993_v13 = vmax.f32 %v1943_v45, 0.0  ;;  %4972 = vmatpush3.bf16.msra.mxu0 %v5599_v18 }
 0x193   : > { %v1996_v11 = vmax.f32 %v1954_v4, 0.0 }
 0x194   : > { %v1994_v15 = vmax.f32 %v1946_v37, 0.0 }
 0x195   : > { %v6052_v40 = vpack.c.bf16 %v1996_v11, %v1995_v46  ;;  %4948 = vmatpush3.bf16.msra.mxu1 %v6041_v32  ;;  %v5605_v11 = vld [vmem:[%s6128_s19 + $0x48] sm:$0xff]  }
 0x196   : > { %v6055_v20 = vpack.c.bf16 %v1994_v15, %v1993_v13  ;;  %v4939_v16 = vpop.f32.mrb[72].mxu0  ;;  %v5607_v13 = vld [vmem:[%s6385_s3 + $0x78] sm:$0xff]   ;;  %v5608_v15 = vld [vmem:[%s6128_s19 + $0x50] sm:$0xff]  }
 0x197   : > { %v1967_v17 = vadd.f32 %v4939_v16, %v6025_v12  ;;  %v1958_v19 = vpop.f32.mrb[73].mxu0  ;;  %v5616_v16 = vld [vmem:[%s6385_s3 + $0x80] sm:$0xff]  }
 0x198   : > { %v1959_v21 = vadd.f32 %v1958_v19, %v6019_v58  ;;  %v4940_v22 = vpop.f32.mrb[74].mxu0  ;;  %4949 = vmatprep.subr.bf16.mxu1 %v6055_v20  ;;  %v5610_v19 = vld [vmem:[%s6128_s19 + $0x60] sm:$0xff]  }
 0x199   : > { %v1970_v23 = vadd.f32 %v4940_v22, %v6027_v49  ;;  %v1961_v52 = vpop.f32.mrb[75].mxu0  ;;  %4950 = vmatpush3.bf16.msra.mxu1 %v6055_v20  ;;  %v1999_v26 = vmax.f32 %v1967_v17, 0.0  ;;  %v5609_v17 = vld [vmem:[%s6128_s19 + $0x58] sm:$0xff]  }
 0x19a   : > { %v1962_v24 = vadd.f32 %v1961_v52, %v6021_v33  ;;  %4951 = vmatprep.subr.bf16.mxu1 %v6052_v40  ;;  %v1997_v29 = vmax.f32 %v1959_v21, 0.0  ;;  %v5611_v21 = vld [vmem:[%s6128_s19 + $0x68] sm:$0xff]  }
 0x19b   : > { %v2000_v27 = vmax.f32 %v1970_v23, 0.0  ;;  %v5614_v23 = vld [vmem:[%s6128_s19 + $0x80] sm:$0xff]  }
 0x19c   : > { %v1998_v55 = vmax.f32 %v1962_v24, 0.0 }
 0x19d   : > { %v6064_v12 = vpack.c.bf16 %v2000_v27, %v1999_v26  ;;  %4952 = vmatpush3.bf16.msra.mxu1 %v6052_v40  ;;  %v5615_v27 = vld [vmem:[%s6128_s19 + $0x88] sm:$0xff]  }
 0x19e   : > { %v6067_v58 = vpack.c.bf16 %v1998_v55, %v1997_v29  ;;  %v4943_v62 = vpop.f32.mrb[76].mxu0  ;;  %v5617_v29 = vld [vmem:[%s6385_s3 + $0x88] sm:$0xff]   ;;  %v5618_v55 = vld [vmem:[%s6128_s19 + $0x90] sm:$0xff]  }
 0x19f   : > { %v1983_v31 = vadd.f32 %v4943_v62, %v1886_v53  ;;  %v1974_v49 = vpop.f32.mrb[77].mxu0  ;;  %v5588_v53 = vld [vmem:[%s6385_s3 + $0x30] sm:$0xff]   ;;  %v5621_v62 = vld [vmem:[%s6128_s19 + $0xa8] sm:$0xff]  }
 0x1a0   : > { %v1975_v35 = vadd.f32 %v1974_v49, %v6031_v34  ;;  %v4944_v36 = vpop.f32.mrb[78].mxu0  ;;  %4953 = vmatprep.subr.bf16.mxu1 %v6067_v58  ;;  %v5623_v49 = vld [vmem:[%s6128_s19 + $0xb8] sm:$0xff]  }
 0x1a1   : > { %v1986_v33 = vadd.f32 %v4944_v36, %v1889_v30  ;;  %v1977_v38 = vpop.f32.mrb[79].mxu0  ;;  %4954 = vmatpush3.bf16.msra.mxu1 %v6067_v58  ;;  %v2003_v41 = vmax.f32 %v1983_v31, 0.0  ;;  %v5600_v30 = vld [vmem:[%s6128_s19 + $0x20] sm:$0xff]   ;;  %v5622_v31 = vld [vmem:[%s6128_s19 + $0xb0] sm:$0xff]  }
 0x1a2   : > { %v1978_v39 = vadd.f32 %v1977_v38, %v6033_v1  ;;  %4955 = vmatprep.subr.bf16.mxu1 %v6064_v12  ;;  %v2001_v6 = vmax.f32 %v1975_v35, 0.0  ;;  %v5583_v1 = vld [vmem:[%s6385_s3 + $0x8] sm:$0xff]   ;;  %4973 = vmatprep.subr.bf16.mxu0 %v5600_v30 }
 0x1a3   : > { %v2004_v42 = vmax.f32 %v1986_v33, 0.0  ;;  %4974 = vmatpush3.bf16.msra.mxu0 %v5600_v30  ;;  %v5624_v33 = vld [vmem:[%s6128_s19 + $0xc0] sm:$0xff]   ;;  %v5633_v30 = vld [vmem:[%s6128_s19 + $0x108] sm:$0xff]  }
 0x1a4   : > { %v2002_v43 = vmax.f32 %v1978_v39, 0.0  ;;  %4975 = vmatprep.subr.bf16.mxu0 %v5601_v57 }
 0x1a5   : > { %v6074_v44 = vpack.c.bf16 %v2004_v42, %v2003_v41  ;;  %4956 = vmatpush3.bf16.msra.mxu1 %v6064_v12 }
 0x1a6   : > { %v6077_v34 = vpack.c.bf16 %v2002_v43, %v2001_v6  ;;  %v5625_v6 = vld [vmem:[%s6128_s19 + $0xc8] sm:$0xff]   ;;  %v5626_v43 = vld [vmem:[%s6128_s19 + $0xd0] sm:$0xff]  }
 0x1a7   : > { %4976 = vmatpush3.bf16.msra.mxu0 %v5601_v57  ;;  %v5634_v57 = vld [vmem:[%s6128_s19 + $0x110] sm:$0xff]  }
 0x1a8   : > { %4957 = vmatprep.subr.bf16.mxu1 %v6077_v34  ;;  %4977 = vmatprep.subr.bf16.mxu0 %v5602_v59 }
 0x1a9   : > { %4958 = vmatpush3.bf16.msra.mxu1 %v6077_v34 }
 0x1aa   : > { %4959 = vmatprep.subr.bf16.mxu1 %v6074_v44 }
 0x1ab   : > { %4978 = vmatpush3.bf16.msra.mxu0 %v5602_v59  ;;  %v5635_v59 = vld [vmem:[%s6128_s19 + $0x118] sm:$0xff]  }
 0x1ac   : > { %4979 = vmatprep.subr.bf16.mxu0 %v5603_v60 }
 0x1ad   : > { %4960 = vmatpush3.bf16.msra.mxu1 %v6074_v44 }
 0x1ae   : > { %4985 = vmatprep.subr.bf16.mxu1 %v6043_v5 }
 0x1af   : > { %4980 = vmatpush3.bf16.msra.mxu0 %v5603_v60  ;;  %v5636_v60 = vld [vmem:[%s6128_s19 + $0x120] sm:$0xff]  }
 0x1b0   : > { %4962 = vmatmul.mubr.bf16.vlgmr.msra.gmra.mrb[64].mxu1 %v5583_v1  ;;  %5005 = vmatprep.subr.bf16.mxu0 %v6162_v25  ;;  %v5629_v1 = vld [vmem:[%s6128_s19 + $0xe8] sm:$0xff]  }
 0x1b1   : > { %4986 = vmatpush3.bf16.msra.mxu1 %v6043_v5  ;;  %5001 = vmatprep.mubr.bf16.mxu1 %v5584_v47  ;;  %v5630_v47 = vld [vmem:[%s6128_s19 + $0xf0] sm:$0xff]  }
 0x1b2   : > { %4987 = vmatprep.subr.bf16.mxu1 %v6041_v32 }
 0x1b5   : > { %4988 = vmatpush3.bf16.msra.mxu1 %v6041_v32 }
 0x1b6   : > { %4989 = vmatprep.subr.bf16.mxu1 %v6055_v20 }
 0x1b9   : > { %4990 = vmatpush3.bf16.msra.mxu1 %v6055_v20 }
 0x1ba   : > { %4991 = vmatprep.subr.bf16.mxu1 %v6052_v40 }
 0x1bd   : > { %4992 = vmatpush3.bf16.msra.mxu1 %v6052_v40 }
 0x1be   : > { %4993 = vmatprep.subr.bf16.mxu1 %v6067_v58 }
 0x1c1   : > { %4994 = vmatpush3.bf16.msra.mxu1 %v6067_v58 }
 0x1c2   : > { %4995 = vmatprep.subr.bf16.mxu1 %v6064_v12 }
 0x1c5   : > { %4996 = vmatpush3.bf16.msra.mxu1 %v6064_v12 }
 0x1c6   : > { %4997 = vmatprep.subr.bf16.mxu1 %v6077_v34 }
 0x1c9   : > { %4998 = vmatpush3.bf16.msra.mxu1 %v6077_v34 }
 0x1ca   : > { %4999 = vmatprep.subr.bf16.mxu1 %v6074_v44 }
 0x1cd   : > { %5000 = vmatpush3.bf16.msra.mxu1 %v6074_v44 }
 0x1ce   : > { %5025 = vmatprep.subr.bf16.mxu1 %v6043_v5 }
 0x1d0   : > { %5002 = vmatmul.mubr.bf16.vlgmr.msra.gmra.mrb[68].mxu1 %v5585_v48  ;;  %v5631_v48 = vld [vmem:[%s6128_s19 + $0xf8] sm:$0xff]  }
 0x1d1   : > { %5026 = vmatpush3.bf16.msra.mxu1 %v6043_v5  ;;  %5041 = vmatprep.mubr.bf16.mxu1 %v5586_v9 }
 0x1d2   : > { %5027 = vmatprep.subr.bf16.mxu1 %v6041_v32 }
 0x1d5   : > { %5028 = vmatpush3.bf16.msra.mxu1 %v6041_v32 }
 0x1d6   : > { %5029 = vmatprep.subr.bf16.mxu1 %v6055_v20 }
 0x1d9   : > { %5030 = vmatpush3.bf16.msra.mxu1 %v6055_v20 }
 0x1da   : > { %5031 = vmatprep.subr.bf16.mxu1 %v6052_v40 }
 0x1dd   : > { %5032 = vmatpush3.bf16.msra.mxu1 %v6052_v40 }
 0x1de   : > { %5033 = vmatprep.subr.bf16.mxu1 %v6067_v58 }
 0x1e1   : > { %5034 = vmatpush3.bf16.msra.mxu1 %v6067_v58 }
 0x1e2   : > { %5035 = vmatprep.subr.bf16.mxu1 %v6064_v12 }
 0x1e5   : > { %5036 = vmatpush3.bf16.msra.mxu1 %v6064_v12 }
 0x1e6   : > { %5037 = vmatprep.subr.bf16.mxu1 %v6077_v34 }
 0x1e9   : > { %5038 = vmatpush3.bf16.msra.mxu1 %v6077_v34 }
 0x1ea   : > { %5039 = vmatprep.subr.bf16.mxu1 %v6074_v44 }
 0x1ed   : > { %5040 = vmatpush3.bf16.msra.mxu1 %v6074_v44 }
 0x1ee   : > { %5065 = vmatprep.subr.bf16.mxu1 %v6043_v5 }
 0x1f0   : > { %5042 = vmatmul.mubr.bf16.vlgmr.msra.gmra.mrb[72].mxu1 %v5587_v51  ;;  %v5632_v51 = vld [vmem:[%s6128_s19 + $0x100] sm:$0xff]  }
 0x1f1   : > { %5066 = vmatpush3.bf16.msra.mxu1 %v6043_v5  ;;  %5081 = vmatprep.mubr.bf16.mxu1 %v5588_v53 }
 0x1f2   : > { %5067 = vmatprep.subr.bf16.mxu1 %v6041_v32 }
 0x1f5   : > { %5068 = vmatpush3.bf16.msra.mxu1 %v6041_v32 }
 0x1f6   : > { %5069 = vmatprep.subr.bf16.mxu1 %v6055_v20 }
 0x1f9   : > { %5070 = vmatpush3.bf16.msra.mxu1 %v6055_v20 }
 0x1fa   : > { %5071 = vmatprep.subr.bf16.mxu1 %v6052_v40 }
 0x1fd   : > { %5072 = vmatpush3.bf16.msra.mxu1 %v6052_v40 }
 0x1fe   : > { %5073 = vmatprep.subr.bf16.mxu1 %v6067_v58 }
 0x201   : > { %5074 = vmatpush3.bf16.msra.mxu1 %v6067_v58 }
 0x202   : > { %5075 = vmatprep.subr.bf16.mxu1 %v6064_v12 }
 0x205   : > { %5076 = vmatpush3.bf16.msra.mxu1 %v6064_v12 }
 0x206   : > { %5077 = vmatprep.subr.bf16.mxu1 %v6077_v34 }
 0x209   : > { %5078 = vmatpush3.bf16.msra.mxu1 %v6077_v34 }
 0x20a   : > { %5079 = vmatprep.subr.bf16.mxu1 %v6074_v44 }
 0x20d   : > { %5080 = vmatpush3.bf16.msra.mxu1 %v6074_v44 }
 0x20e   : > { %5105 = vmatprep.subr.bf16.mxu1 %v6043_v5 }
 0x210   : > { %5082 = vmatmul.mubr.bf16.vlgmr.msra.gmra.mrb[76].mxu1 %v5589_v61  ;;  %v5638_v61 = vld [vmem:[%s6128_s19 + $0x130] sm:$0xff]  }
 0x211   : > { %5106 = vmatpush3.bf16.msra.mxu1 %v6043_v5  ;;  %5121 = vmatprep.mubr.bf16.mxu1 %v5590_v63  ;;  %v5639_v63 = vld [vmem:[%s6128_s19 + $0x138] sm:$0xff]  }
 0x212   : > { %5107 = vmatprep.subr.bf16.mxu1 %v6041_v32 }
 0x215   : > { %5108 = vmatpush3.bf16.msra.mxu1 %v6041_v32 }
 0x216   : > { %5109 = vmatprep.subr.bf16.mxu1 %v6055_v20 }
 0x219   : > { %5110 = vmatpush3.bf16.msra.mxu1 %v6055_v20 }
 0x21a   : > { %5111 = vmatprep.subr.bf16.mxu1 %v6052_v40 }
 0x21d   : > { %5112 = vmatpush3.bf16.msra.mxu1 %v6052_v40 }
 0x21e   : > { %5113 = vmatprep.subr.bf16.mxu1 %v6067_v58 }
 0x221   : > { %5114 = vmatpush3.bf16.msra.mxu1 %v6067_v58 }
 0x222   : > { %5115 = vmatprep.subr.bf16.mxu1 %v6064_v12 }
 0x225   : > { %5116 = vmatpush3.bf16.msra.mxu1 %v6064_v12 }
 0x226   : > { %5117 = vmatprep.subr.bf16.mxu1 %v6077_v34 }
 0x229   : > { %5118 = vmatpush3.bf16.msra.mxu1 %v6077_v34 }
 0x22a   : > { %5119 = vmatprep.subr.bf16.mxu1 %v6074_v44 }
 0x22d   : > { %5120 = vmatpush3.bf16.msra.mxu1 %v6074_v44 }
 0x22e   : > { %5145 = vmatprep.subr.bf16.mxu1 %v6043_v5 }
 0x230   : > { %5122 = vmatmul.mubr.bf16.vlgmr.msra.gmra.mrb[80].mxu1 %v5591_v2 }
 0x231   : > { %5146 = vmatpush3.bf16.msra.mxu1 %v6043_v5  ;;  %5161 = vmatprep.mubr.bf16.mxu1 %v5592_v3 }
 0x232   : > { %5147 = vmatprep.subr.bf16.mxu1 %v6041_v32 }
 0x235   : > { %5148 = vmatpush3.bf16.msra.mxu1 %v6041_v32 }
 0x236   : > { %5149 = vmatprep.subr.bf16.mxu1 %v6055_v20 }
 0x239   : > { %5150 = vmatpush3.bf16.msra.mxu1 %v6055_v20 }
 0x23a   : > { %5151 = vmatprep.subr.bf16.mxu1 %v6052_v40 }
 0x23d   : > { %5152 = vmatpush3.bf16.msra.mxu1 %v6052_v40 }
 0x23e   : > { %5153 = vmatprep.subr.bf16.mxu1 %v6067_v58 }
 0x241   : > { %5154 = vmatpush3.bf16.msra.mxu1 %v6067_v58 }
 0x242   : > { %5155 = vmatprep.subr.bf16.mxu1 %v6064_v12 }
 0x245   : > { %5156 = vmatpush3.bf16.msra.mxu1 %v6064_v12 }
 0x246   : > { %5157 = vmatprep.subr.bf16.mxu1 %v6077_v34 }
 0x249   : > { %5158 = vmatpush3.bf16.msra.mxu1 %v6077_v34 }
 0x24a   : > { %5159 = vmatprep.subr.bf16.mxu1 %v6074_v44 }
 0x24d   : > { %5160 = vmatpush3.bf16.msra.mxu1 %v6074_v44 }
 0x24e   : > { %5185 = vmatprep.subr.bf16.mxu1 %v6043_v5 }
 0x250   : > { %5162 = vmatmul.mubr.bf16.vlgmr.msra.gmra.mrb[84].mxu1 %v5593_v28  ;;  %v5640_v28 = vld [vmem:[%s6128_s19 + $0x140] sm:$0xff]  }
 0x251   : > { %5186 = vmatpush3.bf16.msra.mxu1 %v6043_v5  ;;  %5201 = vmatprep.mubr.bf16.mxu1 %v5596_v7 }
 0x252   : > { %5187 = vmatprep.subr.bf16.mxu1 %v6041_v32 }
 0x255   : > { %5188 = vmatpush3.bf16.msra.mxu1 %v6041_v32 }
 0x256   : > { %5189 = vmatprep.subr.bf16.mxu1 %v6055_v20 }
 0x259   : > { %5190 = vmatpush3.bf16.msra.mxu1 %v6055_v20 }
 0x25a   : > { %5191 = vmatprep.subr.bf16.mxu1 %v6052_v40 }
 0x25d   : > { %5192 = vmatpush3.bf16.msra.mxu1 %v6052_v40 }
 0x25e   : > { %5193 = vmatprep.subr.bf16.mxu1 %v6067_v58 }
 0x261   : > { %5194 = vmatpush3.bf16.msra.mxu1 %v6067_v58 }
 0x262   : > { %5195 = vmatprep.subr.bf16.mxu1 %v6064_v12 }
 0x265   : > { %5196 = vmatpush3.bf16.msra.mxu1 %v6064_v12 }
 0x266   : > { %5197 = vmatprep.subr.bf16.mxu1 %v6077_v34 }
 0x269   : > { %5198 = vmatpush3.bf16.msra.mxu1 %v6077_v34 }
 0x26a   : > { %5199 = vmatprep.subr.bf16.mxu1 %v6074_v44 }
 0x26d   : > { %5200 = vmatpush3.bf16.msra.mxu1 %v6074_v44 }
 0x26e   : > { %5225 = vmatprep.subr.bf16.mxu1 %v6043_v5 }
 0x270   : > { %5202 = vmatmul.mubr.bf16.vlgmr.msra.gmra.mrb[88].mxu1 %v5597_v0 }
 0x271   : > { %5226 = vmatpush3.bf16.msra.mxu1 %v6043_v5  ;;  %5241 = vmatprep.mubr.bf16.mxu1 %v5606_v8 }
 0x272   : > { %5227 = vmatprep.subr.bf16.mxu1 %v6041_v32 }
 0x275   : > { %5228 = vmatpush3.bf16.msra.mxu1 %v6041_v32 }
 0x276   : > { %5229 = vmatprep.subr.bf16.mxu1 %v6055_v20 }
 0x279   : > { %5230 = vmatpush3.bf16.msra.mxu1 %v6055_v20 }
 0x27a   : > { %5231 = vmatprep.subr.bf16.mxu1 %v6052_v40 }
 0x27d   : > { %5232 = vmatpush3.bf16.msra.mxu1 %v6052_v40 }
 0x27e   : > { %5233 = vmatprep.subr.bf16.mxu1 %v6067_v58 }
 0x281   : > { %5234 = vmatpush3.bf16.msra.mxu1 %v6067_v58 }
 0x282   : > { %5235 = vmatprep.subr.bf16.mxu1 %v6064_v12 }
 0x283   : > { %v4963_v45 = vpop.f32.mrb[64].mxu1 }
 0x284   : > { %v2064_v10 = vpop.f32.mrb[65].mxu1 }
 0x285   : > { %5236 = vmatpush3.bf16.msra.mxu1 %v6064_v12  ;;  %v4964_v4 = vpop.f32.mrb[66].mxu1 }
 0x286   : > { %v2080_v50 = vpack.c.bf16 %v4964_v4, %v4963_v45  ;;  %5237 = vmatprep.subr.bf16.mxu1 %v6077_v34  ;;  %v2067_v37 = vpop.f32.mrb[67].mxu1  ;;  %v5642_v4 = vld [vmem:[%s6128_s19 + $0x150] sm:$0xff]  }
 0x287   : > { %v2079_v46 = vpack.c.bf16 %v2067_v37, %v2064_v10  ;;  %v5641_v10 = vld [vmem:[%s6128_s19 + $0x148] sm:$0xff]   ;;  %v5644_v37 = vld [vmem:[%s6128_s19 + $0x160] sm:$0xff]  }
 0x289   : > { %5238 = vmatpush3.bf16.msra.mxu1 %v6077_v34  ;;  %4981 = vmatprep.mubr.bf16.mxu0 %v2079_v46  ;;  %v5645_v46 = vld [vmem:[%s6128_s19 + $0x168] sm:$0xff]  }
 0x28a   : > { %5239 = vmatprep.subr.bf16.mxu1 %v6074_v44  ;;  %4982 = vmatmul.mubr.bf16.vlgmr.msra.gmra.mrb[80].mxu0 %v2080_v50  ;;  %v5643_v50 = vld [vmem:[%s6128_s19 + $0x158] sm:$0xff]  }
 0x28b   : > { %5006 = vmatpush3.bf16.msra.mxu0 %v6162_v25  ;;  %v5637_v25 = vld [vmem:[%s6128_s19 + $0x128] sm:$0xff]  }
 0x28c   : > { %5007 = vmatprep.subr.bf16.mxu0 %v5605_v11 }
 0x28d   : > { %5240 = vmatpush3.bf16.msra.mxu1 %v6074_v44 }
 0x28e   : > { %5265 = vmatprep.subr.bf16.mxu1 %v6043_v5 }
 0x28f   : > { %5008 = vmatpush3.bf16.msra.mxu0 %v5605_v11  ;;  %v5646_v11 = vld [vmem:[%s6128_s19 + $0x170] sm:$0xff]  }
 0x290   : > { %5242 = vmatmul.mubr.bf16.vlgmr.msra.gmra.mrb[92].mxu1 %v5607_v13  ;;  %5009 = vmatprep.subr.bf16.mxu0 %v5608_v15  ;;  %v5647_v13 = vld [vmem:[%s6128_s19 + $0x178] sm:$0xff]  }
 0x291   : > { %5266 = vmatpush3.bf16.msra.mxu1 %v6043_v5  ;;  %5281 = vmatprep.mubr.bf16.mxu1 %v5616_v16  ;;  %v5612_v5 = vld [vmem:[%s6128_s19 + $0x70] sm:$0xff]  }
 0x292   : > { %5267 = vmatprep.subr.bf16.mxu1 %v6041_v32 }
 0x293   : > { %5010 = vmatpush3.bf16.msra.mxu0 %v5608_v15 }
 0x294   : > { %5011 = vmatprep.subr.bf16.mxu0 %v5609_v17 }
 0x295   : > { %5268 = vmatpush3.bf16.msra.mxu1 %v6041_v32  ;;  %v5613_v32 = vld [vmem:[%s6128_s19 + $0x78] sm:$0xff]  }
 0x296   : > { %5269 = vmatprep.subr.bf16.mxu1 %v6055_v20 }
 0x297   : > { %5012 = vmatpush3.bf16.msra.mxu0 %v5609_v17  ;;  %v5648_v17 = vld [vmem:[%s6128_s19 + $0x180] sm:$0xff]  }
 0x298   : > { %5013 = vmatprep.subr.bf16.mxu0 %v5610_v19 }
 0x299   : > { %5270 = vmatpush3.bf16.msra.mxu1 %v6055_v20 }
 0x29a   : > { %5271 = vmatprep.subr.bf16.mxu1 %v6052_v40 }
 0x29b   : > { %5014 = vmatpush3.bf16.msra.mxu0 %v5610_v19 }
 0x29c   : > { %5015 = vmatprep.subr.bf16.mxu0 %v5611_v21 }
 0x29d   : > { %5272 = vmatpush3.bf16.msra.mxu1 %v6052_v40 }
 0x29e   : > { %5273 = vmatprep.subr.bf16.mxu1 %v6067_v58 }
 0x29f   : > { %5016 = vmatpush3.bf16.msra.mxu0 %v5611_v21 }
 0x2a0   : > { %5017 = vmatprep.subr.bf16.mxu0 %v5612_v5 }
 0x2a1   : > { %5274 = vmatpush3.bf16.msra.mxu1 %v6067_v58  ;;  %v5620_v58 = vld [vmem:[%s6128_s19 + $0xa0] sm:$0xff]  }
 0x2a2   : > { %5275 = vmatprep.subr.bf16.mxu1 %v6064_v12 }
 0x2a3   : > { %5018 = vmatpush3.bf16.msra.mxu0 %v5612_v5  ;;  %v5003_v20 = vpop.f32.mrb[68].mxu1 }
 0x2a4   : > { %v2255_v22 = vpop.f32.mrb[69].mxu1  ;;  %5019 = vmatprep.subr.bf16.mxu0 %v5613_v32 }
 0x2a5   : > { %5276 = vmatpush3.bf16.msra.mxu1 %v6064_v12  ;;  %v5004_v52 = vpop.f32.mrb[70].mxu1  ;;  %v5619_v12 = vld [vmem:[%s6128_s19 + $0x98] sm:$0xff]  }
 0x2a6   : > { %v2271_v40 = vpack.c.bf16 %v5004_v52, %v5003_v20  ;;  %5277 = vmatprep.subr.bf16.mxu1 %v6077_v34  ;;  %v2258_v24 = vpop.f32.mrb[71].mxu1  ;;  %v5649_v20 = vld [vmem:[%s6128_s19 + $0x188] sm:$0xff]   ;;  %v5652_v52 = vld [vmem:[%s6128_s19 + $0x1a0] sm:$0xff]  }
 0x2a7   : > { %v2270_v26 = vpack.c.bf16 %v2258_v24, %v2255_v22  ;;  %5020 = vmatpush3.bf16.msra.mxu0 %v5613_v32  ;;  %v5650_v22 = vld [vmem:[%s6128_s19 + $0x190] sm:$0xff]  }
 0x2a8   : > { %5045 = vmatprep.subr.bf16.mxu0 %v5614_v23  ;;  %v5654_v24 = vld [vmem:[%s6128_s19 + $0x1b0] sm:$0xff]  }
 0x2a9   : > { %5278 = vmatpush3.bf16.msra.mxu1 %v6077_v34  ;;  %5021 = vmatprep.mubr.bf16.mxu0 %v2270_v26  ;;  %v5628_v34 = vld [vmem:[%s6128_s19 + $0xe0] sm:$0xff]   ;;  %v5655_v26 = vld [vmem:[%s6128_s19 + $0x1b8] sm:$0xff]  }
 0x2aa   : > { %5279 = vmatprep.subr.bf16.mxu1 %v6074_v44  ;;  %5022 = vmatmul.mubr.bf16.vlgmr.msra.gmra.mrb[80].mxu0 %v2271_v40  ;;  %v5653_v40 = vld [vmem:[%s6128_s19 + $0x1a8] sm:$0xff]  }
 0x2ab   : > { %5046 = vmatpush3.bf16.msra.mxu0 %v5614_v23  ;;  %v5651_v23 = vld [vmem:[%s6128_s19 + $0x198] sm:$0xff]  }
 0x2ac   : > { %5047 = vmatprep.subr.bf16.mxu0 %v5615_v27 }
 0x2ad   : > { %5280 = vmatpush3.bf16.msra.mxu1 %v6074_v44  ;;  %v5627_v44 = vld [vmem:[%s6128_s19 + $0xd8] sm:$0xff]  }
 0x2af   : > { %5048 = vmatpush3.bf16.msra.mxu0 %v5615_v27 }
 0x2b0   : > { %5282 = vmatmul.mubr.bf16.vlgmr.msra.gmra.mrb[96].mxu1 %v5617_v29  ;;  %5049 = vmatprep.subr.bf16.mxu0 %v5618_v55 }
 0x2b3   : > { %5050 = vmatpush3.bf16.msra.mxu0 %v5618_v55  ;;  %v5656_v55 = vld [vmem:[%s6128_s19 + $0x1c0] sm:$0xff]  }
 0x2b4   : > { %5051 = vmatprep.subr.bf16.mxu0 %v5619_v12 }
 0x2b7   : > { %5052 = vmatpush3.bf16.msra.mxu0 %v5619_v12 }
 0x2b8   : > { %5053 = vmatprep.subr.bf16.mxu0 %v5620_v58 }
 0x2bb   : > { %5054 = vmatpush3.bf16.msra.mxu0 %v5620_v58 }
 0x2bc   : > { %5055 = vmatprep.subr.bf16.mxu0 %v5621_v62 }
 0x2bf   : > { %5056 = vmatpush3.bf16.msra.mxu0 %v5621_v62 }
 0x2c0   : > { %5057 = vmatprep.subr.bf16.mxu0 %v5622_v31 }
 0x2c3   : > { %5058 = vmatpush3.bf16.msra.mxu0 %v5622_v31  ;;  %v5043_v35 = vpop.f32.mrb[72].mxu1 }
 0x2c4   : > { %v2441_v36 = vpop.f32.mrb[73].mxu1  ;;  %5059 = vmatprep.subr.bf16.mxu0 %v5623_v49 }
 0x2c5   : > { %v5044_v38 = vpop.f32.mrb[74].mxu1 }
 0x2c6   : > { %v2457_v39 = vpack.c.bf16 %v5044_v38, %v5043_v35  ;;  %v2444_v41 = vpop.f32.mrb[75].mxu1  ;;  %v5658_v35 = vld [vmem:[%s6128_s19 + $0x1d0] sm:$0xff]   ;;  %v5661_v38 = vld [vmem:[%s6128_s19 + $0x1e8] sm:$0xff]  }
 0x2c7   : > { %v2456_v42 = vpack.c.bf16 %v2444_v41, %v2441_v36  ;;  %5060 = vmatpush3.bf16.msra.mxu0 %v5623_v49  ;;  %v5657_v49 = vld [vmem:[%s6128_s19 + $0x1c8] sm:$0xff]   ;;  %v5659_v36 = vld [vmem:[%s6128_s19 + $0x1d8] sm:$0xff]  }
 0x2c8   : > { %5085 = vmatprep.subr.bf16.mxu0 %v5624_v33  ;;  %v5663_v41 = vld [vmem:[%s6128_s19 + $0x1f8] sm:$0xff]  }
 0x2c9   : > { %5061 = vmatprep.mubr.bf16.mxu0 %v2456_v42 }
 0x2ca   : > { %5062 = vmatmul.mubr.bf16.vlgmr.msra.gmra.mrb[80].mxu0 %v2457_v39  ;;  %v5662_v39 = vld [vmem:[%s6128_s19 + $0x1f0] sm:$0xff]  }
 0x2cb   : > { %5086 = vmatpush3.bf16.msra.mxu0 %v5624_v33  ;;  %v5660_v33 = vld [vmem:[%s6128_s19 + $0x1e0] sm:$0xff]  }
 0x2cc   : > { %5087 = vmatprep.subr.bf16.mxu0 %v5625_v6 }
 0x2cf   : > { %5088 = vmatpush3.bf16.msra.mxu0 %v5625_v6 }
 0x2d0   : > { %5089 = vmatprep.subr.bf16.mxu0 %v5626_v43 }
 0x2d3   : > { %5090 = vmatpush3.bf16.msra.mxu0 %v5626_v43  ;;  %v5664_v43 = vld [vmem:[%s6128_s19 + $0x200] sm:$0xff]  }
 0x2d4   : > { %5091 = vmatprep.subr.bf16.mxu0 %v5627_v44 }
 0x2d7   : > { %5092 = vmatpush3.bf16.msra.mxu0 %v5627_v44 }
 0x2d8   : > { %5093 = vmatprep.subr.bf16.mxu0 %v5628_v34 }
 0x2db   : > { %5094 = vmatpush3.bf16.msra.mxu0 %v5628_v34 }
 0x2dc   : > { %5095 = vmatprep.subr.bf16.mxu0 %v5629_v1 }
 0x2df   : > { %5096 = vmatpush3.bf16.msra.mxu0 %v5629_v1 }
 0x2e0   : > { %5097 = vmatprep.subr.bf16.mxu0 %v5630_v47 }
 0x2e3   : > { %5098 = vmatpush3.bf16.msra.mxu0 %v5630_v47  ;;  %v5083_v9 = vpop.f32.mrb[76].mxu1 }
 0x2e4   : > { %v2627_v14 = vpop.f32.mrb[77].mxu1  ;;  %5099 = vmatprep.subr.bf16.mxu0 %v5631_v48 }
 0x2e5   : > { %v5084_v53 = vpop.f32.mrb[78].mxu1 }
 0x2e6   : > { %v2643_v54 = vpack.c.bf16 %v5084_v53, %v5083_v9  ;;  %v2630_v56 = vpop.f32.mrb[79].mxu1  ;;  %v5666_v9 = vld [vmem:[%s6128_s19 + $0x210] sm:$0xff]   ;;  %v5669_v53 = vld [vmem:[%s6128_s19 + $0x228] sm:$0xff]  }
 0x2e7   : > { %v2642_v18 = vpack.c.bf16 %v2630_v56, %v2627_v14  ;;  %5100 = vmatpush3.bf16.msra.mxu0 %v5631_v48  ;;  %v5665_v48 = vld [vmem:[%s6128_s19 + $0x208] sm:$0xff]   ;;  %v5667_v14 = vld [vmem:[%s6128_s19 + $0x218] sm:$0xff]  }
 0x2e8   : > { %5125 = vmatprep.subr.bf16.mxu0 %v5632_v51  ;;  %v5671_v56 = vld [vmem:[%s6128_s19 + $0x238] sm:$0xff]  }
 0x2e9   : > { %5101 = vmatprep.mubr.bf16.mxu0 %v2642_v18 }
 0x2ea   : > { %5102 = vmatmul.mubr.bf16.vlgmr.msra.gmra.mrb[80].mxu0 %v2643_v54  ;;  %v5670_v54 = vld [vmem:[%s6128_s19 + $0x230] sm:$0xff]  }
 0x2eb   : > { %5126 = vmatpush3.bf16.msra.mxu0 %v5632_v51  ;;  %v5668_v51 = vld [vmem:[%s6128_s19 + $0x220] sm:$0xff]   ;;  %s4446_s19 = sshll.u32 %s6397_s30, 6 }
 0x2ec   : > { %5127 = vmatprep.subr.bf16.mxu0 %v5633_v30  ;;  %s6348_s15 = scalar_lea.vmem %s6389_s7, %s4446_s19 }
 0x2ef   : > { %5128 = vmatpush3.bf16.msra.mxu0 %v5633_v30 }
 0x2f0   : > { %5129 = vmatprep.subr.bf16.mxu0 %v5634_v57 }
 0x2f3   : > { %5130 = vmatpush3.bf16.msra.mxu0 %v5634_v57 }
 0x2f4   : > { %5131 = vmatprep.subr.bf16.mxu0 %v5635_v59 }
 0x2f7   : > { %5132 = vmatpush3.bf16.msra.mxu0 %v5635_v59 }
 0x2f8   : > { %5133 = vmatprep.subr.bf16.mxu0 %v5636_v60 }
 0x2fb   : > { %5134 = vmatpush3.bf16.msra.mxu0 %v5636_v60 }
 0x2fc   : > { %5135 = vmatprep.subr.bf16.mxu0 %v5637_v25 }
 0x2ff   : > { %5136 = vmatpush3.bf16.msra.mxu0 %v5637_v25 }
 0x300   : > { %5137 = vmatprep.subr.bf16.mxu0 %v5638_v61 }
 0x303   : > { %5138 = vmatpush3.bf16.msra.mxu0 %v5638_v61  ;;  %v5123_v2 = vpop.f32.mrb[80].mxu1  ;;  %v5704_v61 = vmov 0.0|0.0  }
 0x304   : > { %v2813_v3 = vpop.f32.mrb[81].mxu1  ;;  %5139 = vmatprep.subr.bf16.mxu0 %v5639_v63 }
 0x305   : > { %v5124_v7 = vpop.f32.mrb[82].mxu1 }
 0x306   : > { %v2829_v0 = vpack.c.bf16 %v5124_v7, %v5123_v2  ;;  %v2816_v8 = vpop.f32.mrb[83].mxu1  ;;  %v5672_v2 = vld [vmem:[%s6348_s15] sm:$0xff]   ;;  %v5675_v7 = vld [vmem:[%s6348_s15 + $0x18] sm:$0xff]  }
 0x307   : > { %v2828_v45 = vpack.c.bf16 %v2816_v8, %v2813_v3  ;;  %5140 = vmatpush3.bf16.msra.mxu0 %v5639_v63  ;;  %v5706_v63 = vmov 0.0   ;;  %v5673_v3 = vld [vmem:[%s6348_s15 + $0x8] sm:$0xff]  }
 0x308   : > { %5165 = vmatprep.subr.bf16.mxu0 %v5640_v28  ;;  %5316 = vmatprep.subr.bf16.mxu1 %v5706_v63  ;;  %v5677_v8 = vld [vmem:[%s6348_s15 + $0x28] sm:$0xff]  }
 0x309   : > { %5141 = vmatprep.mubr.bf16.mxu0 %v2828_v45  ;;  %5332 = vmatprep.mubr.msk.bf16.mxu1 %vm5705_vm0, %v5706_v63  ;;  %v5678_v45 = vld [vmem:[%s6348_s15 + $0x30] sm:$0xff]  }
 0x30a   : > { %5142 = vmatmul.mubr.bf16.vlgmr.msra.gmra.mrb[80].mxu0 %v2829_v0  ;;  %5317 = vmatpush3.bf16.msra.mxu1 %v5672_v2  ;;  %v5676_v0 = vld [vmem:[%s6348_s15 + $0x20] sm:$0xff]  }
 0x30b   : > { %5166 = vmatpush3.bf16.msra.mxu0 %v5640_v28  ;;  %5318 = vmatprep.subr.bf16.mxu1 %v5706_v63  ;;  %v5674_v28 = vld [vmem:[%s6348_s15 + $0x10] sm:$0xff]  }
 0x30c   : > { %5167 = vmatprep.subr.bf16.mxu0 %v5641_v10 }
 0x30e   : > { %5319 = vmatpush3.bf16.msra.mxu1 %v5673_v3 }
 0x30f   : > { %5168 = vmatpush3.bf16.msra.mxu0 %v5641_v10  ;;  %5320 = vmatprep.subr.bf16.mxu1 %v5706_v63  ;;  %v4193_v10 = vld [vmem:[%s456_s18] ss:$0 sm:$0xff] }
 0x310   : > { %5169 = vmatprep.subr.bf16.mxu0 %v5642_v4 }
 0x312   : > { %5321 = vmatpush3.bf16.msra.mxu1 %v5674_v28 }
 0x313   : > { %5170 = vmatpush3.bf16.msra.mxu0 %v5642_v4  ;;  %5322 = vmatprep.subr.bf16.mxu1 %v5706_v63 }
 0x314   : > { %5171 = vmatprep.subr.bf16.mxu0 %v5643_v50 }
 0x316   : > { %5323 = vmatpush3.bf16.msra.mxu1 %v5675_v7 }
 0x317   : > { %5172 = vmatpush3.bf16.msra.mxu0 %v5643_v50  ;;  %5324 = vmatprep.subr.bf16.mxu1 %v5706_v63 }
 0x318   : > { %5173 = vmatprep.subr.bf16.mxu0 %v5644_v37 }
 0x31a   : > { %5325 = vmatpush3.bf16.msra.mxu1 %v5676_v0 }
 0x31b   : > { %5174 = vmatpush3.bf16.msra.mxu0 %v5644_v37  ;;  %5326 = vmatprep.subr.bf16.mxu1 %v5706_v63 }
 0x31c   : > { %5175 = vmatprep.subr.bf16.mxu0 %v5645_v46 }
 0x31e   : > { %5327 = vmatpush3.bf16.msra.mxu1 %v5677_v8 }
 0x31f   : > { %5176 = vmatpush3.bf16.msra.mxu0 %v5645_v46  ;;  %5328 = vmatprep.subr.bf16.mxu1 %v5706_v63 }
 0x320   : > { %5177 = vmatprep.subr.bf16.mxu0 %v5646_v11 }
 0x322   : > { %5329 = vmatpush3.bf16.msra.mxu1 %v5678_v45 }
 0x323   : > { %5178 = vmatpush3.bf16.msra.mxu0 %v5646_v11  ;;  %v5163_v15 = vpop.f32.mrb[84].mxu1  ;;  %5330 = vmatprep.subr.bf16.mxu1 %v5706_v63 }
 0x324   : > { %v2999_v16 = vpop.f32.mrb[85].mxu1  ;;  %5179 = vmatprep.subr.bf16.mxu0 %v5647_v13 }
 0x325   : > { %v5164_v19 = vpop.f32.mrb[86].mxu1 }
 0x326   : > { %v3015_v21 = vpack.c.bf16 %v5164_v19, %v5163_v15  ;;  %v3002_v5 = vpop.f32.mrb[87].mxu1 }
 0x327   : > { %v3014_v32 = vpack.c.bf16 %v3002_v5, %v2999_v16  ;;  %5180 = vmatpush3.bf16.msra.mxu0 %v5647_v13 }
 0x328   : > { %5205 = vmatprep.subr.bf16.mxu0 %v5648_v17 }
 0x329   : > { %5181 = vmatprep.mubr.bf16.mxu0 %v3014_v32 }
 0x32a   : > { %5182 = vmatmul.mubr.bf16.vlgmr.msra.gmra.mrb[80].mxu0 %v3015_v21 }
 0x32b   : > { %5206 = vmatpush3.bf16.msra.mxu0 %v5648_v17 }
 0x32c   : > { %5207 = vmatprep.subr.bf16.mxu0 %v5649_v20 }
 0x32f   : > { %5208 = vmatpush3.bf16.msra.mxu0 %v5649_v20 }
 0x330   : > { %5209 = vmatprep.subr.bf16.mxu0 %v5650_v22 }
 0x333   : > { %5210 = vmatpush3.bf16.msra.mxu0 %v5650_v22  ;;  %v3696_v22 = vld [vmem:[%s6388_s6] sm:$0xff] }
 0x334   : > { %5211 = vmatprep.subr.bf16.mxu0 %v5651_v23 }
 0x337   : > { %5212 = vmatpush3.bf16.msra.mxu0 %v5651_v23  ;;  %v5679_v23 = vld [vmem:[%s6348_s15 + $0x38] sm:$0xff]  }
 0x338   : > { %5213 = vmatprep.subr.bf16.mxu0 %v5652_v52  ;;  %5331 = vmatpush3.bf16.msra.mxu1 %v5679_v23 }
 0x33b   : > { %5214 = vmatpush3.bf16.msra.mxu0 %v5652_v52 }
 0x33c   : > { %5215 = vmatprep.subr.bf16.mxu0 %v5653_v40 }
 0x33f   : > { %5216 = vmatpush3.bf16.msra.mxu0 %v5653_v40 }
 0x340   : > { %5217 = vmatprep.subr.bf16.mxu0 %v5654_v24 }
 0x343   : > { %5218 = vmatpush3.bf16.msra.mxu0 %v5654_v24  ;;  %v5203_v27 = vpop.f32.mrb[88].mxu1 }
 0x344   : > { %v3185_v29 = vpop.f32.mrb[89].mxu1  ;;  %5219 = vmatprep.subr.bf16.mxu0 %v5655_v26 }
 0x345   : > { %v5204_v12 = vpop.f32.mrb[90].mxu1 }
 0x346   : > { %v3201_v58 = vpack.c.bf16 %v5204_v12, %v5203_v27  ;;  %v3188_v62 = vpop.f32.mrb[91].mxu1 }
 0x347   : > { %v3200_v31 = vpack.c.bf16 %v3188_v62, %v3185_v29  ;;  %5220 = vmatpush3.bf16.msra.mxu0 %v5655_v26  ;;  %v4435_v26 = vld [vmem:[%s464_s13] ss:$0 sm:$0xff] }
 0x348   : > { %5245 = vmatprep.subr.bf16.mxu0 %v5656_v55 }
 0x349   : > { %5221 = vmatprep.mubr.bf16.mxu0 %v3200_v31 }
 0x34a   : > { %5222 = vmatmul.mubr.bf16.vlgmr.msra.gmra.mrb[80].mxu0 %v3201_v58 }
 0x34b   : > { %5246 = vmatpush3.bf16.msra.mxu0 %v5656_v55 }
 0x34c   : > { %5247 = vmatprep.subr.bf16.mxu0 %v5657_v49 }
 0x34f   : > { %5248 = vmatpush3.bf16.msra.mxu0 %v5657_v49 }
 0x350   : > { %5249 = vmatprep.subr.bf16.mxu0 %v5658_v35 }
 0x353   : > { %5250 = vmatpush3.bf16.msra.mxu0 %v5658_v35 }
 0x354   : > { %5251 = vmatprep.subr.bf16.mxu0 %v5659_v36 }
 0x357   : > { %5252 = vmatpush3.bf16.msra.mxu0 %v5659_v36 }
 0x358   : > { %5253 = vmatprep.subr.bf16.mxu0 %v5660_v33 }
 0x35b   : > { %5254 = vmatpush3.bf16.msra.mxu0 %v5660_v33 }
 0x35c   : > { %5255 = vmatprep.subr.bf16.mxu0 %v5661_v38 }
 0x35f   : > { %5256 = vmatpush3.bf16.msra.mxu0 %v5661_v38 }
 0x360   : > { %5257 = vmatprep.subr.bf16.mxu0 %v5662_v39 }
 0x363   : > { %5258 = vmatpush3.bf16.msra.mxu0 %v5662_v39  ;;  %v5243_v42 = vpop.f32.mrb[92].mxu1 }
 0x364   : > { %v3371_v6 = vpop.f32.mrb[93].mxu1  ;;  %5259 = vmatprep.subr.bf16.mxu0 %v5663_v41 }
 0x365   : > { %v5244_v44 = vpop.f32.mrb[94].mxu1 }
 0x366   : > { %v3387_v34 = vpack.c.bf16 %v5244_v44, %v5243_v42  ;;  %v3374_v1 = vpop.f32.mrb[95].mxu1 }
 0x367   : > { %v3386_v47 = vpack.c.bf16 %v3374_v1, %v3371_v6  ;;  %5260 = vmatpush3.bf16.msra.mxu0 %v5663_v41 }
 0x368   : > { %5285 = vmatprep.subr.bf16.mxu0 %v5664_v43 }
 0x369   : > { %5261 = vmatprep.mubr.bf16.mxu0 %v3386_v47 }
 0x36a   : > { %5262 = vmatmul.mubr.bf16.vlgmr.msra.gmra.mrb[80].mxu0 %v3387_v34 }
 0x36b   : > { %5286 = vmatpush3.bf16.msra.mxu0 %v5664_v43 }
 0x36c   : > { %5287 = vmatprep.subr.bf16.mxu0 %v5665_v48 }
 0x36f   : > { %5288 = vmatpush3.bf16.msra.mxu0 %v5665_v48 }
 0x370   : > { %5289 = vmatprep.subr.bf16.mxu0 %v5666_v9 }
 0x373   : > { %5290 = vmatpush3.bf16.msra.mxu0 %v5666_v9 }
 0x374   : > { %5291 = vmatprep.subr.bf16.mxu0 %v5667_v14 }
 0x377   : > { %5292 = vmatpush3.bf16.msra.mxu0 %v5667_v14 }
 0x378   : > { %5293 = vmatprep.subr.bf16.mxu0 %v5668_v51 }
 0x37b   : > { %5294 = vmatpush3.bf16.msra.mxu0 %v5668_v51 }
 0x37c   : > { %5295 = vmatprep.subr.bf16.mxu0 %v5669_v53 }
 0x37f   : > { %5296 = vmatpush3.bf16.msra.mxu0 %v5669_v53 }
 0x380   : > { %5297 = vmatprep.subr.bf16.mxu0 %v5670_v54 }
 0x383   : > { %v5283_v18 = vpop.f32.mrb[96].mxu1  ;;  %5298 = vmatpush3.bf16.msra.mxu0 %v5670_v54 }
 0x384   : > { %v3557_v30 = vpop.f32.mrb[97].mxu1  ;;  %5299 = vmatprep.subr.bf16.mxu0 %v5671_v56 }
 0x385   : > { %v5284_v57 = vpop.f32.mrb[98].mxu1 }
 0x386   : > { %v3573_v59 = vpack.c.bf16 %v5284_v57, %v5283_v18  ;;  %v3560_v60 = vpop.f32.mrb[99].mxu1 }
 0x387   : > { %v3572_v25 = vpack.c.bf16 %v3560_v60, %v3557_v30  ;;  %5300 = vmatpush3.bf16.msra.mxu0 %v5671_v56 }
 0x388   : > { %5336 = vmatprep.subr.bf16.mxu0 %v5704_v61 }
 0x389   : > { %5301 = vmatprep.mubr.bf16.mxu0 %v3572_v25 }
 0x38a   : > { %5302 = vmatmul.mubr.bf16.vlgmr.msra.gmra.mrb[80].mxu0 %v3573_v59 }
 0x38b   : > { %5313 = vmatprep.mubr.msk.f32.mxu0 %vm5705_vm0, %v5706_v63 }
 0x45d   : > { %v5303_v4 = vpop.f32.mrb[80].mxu0 }
 0x45e   : > { %v5342_v50 = vadd.f32 %v5303_v4, %v4193_v10  ;;  %v3673_v37 = vpop.f32.mrb[81].mxu0 }
 0x45f   : > { %v5343_v46 = vadd.f32 %v4193_v10, %v3673_v37  ;;  %v5304_v11 = vpop.f32.mrb[82].mxu0 }
 0x460   : > { %v5344_v13 = vadd.f32 %v5304_v11, %v4193_v10  ;;  %v3676_v15 = vpop.f32.mrb[83].mxu0  ;;  %v3694_v17 = vmax.f32 %v5342_v50, 0.0 }
 0x461   : > { %v5345_v16 = vadd.f32 %v4193_v10, %v3676_v15  ;;  %v3692_v21 = vmax.f32 %v5343_v46, 0.0 }
 0x462   : > { %v3695_v19 = vmax.f32 %v5344_v13, 0.0 }
 0x463   : > { %v3693_v5 = vmax.f32 %v5345_v16, 0.0 }
 0x464   : > { %v5340_v32 = vpack.c.bf16 %v3695_v19, %v3694_v17 }
 0x465   : > { %v5337_v20 = vpack.c.bf16 %v3693_v5, %v3692_v21 }
 0x467   : > { %5338 = vmatpush3.bf16.msra.mxu0 %v5337_v20 }
 0x468   : > { %5339 = vmatprep.subr.bf16.mxu0 %v5704_v61 }
 0x46b   : > { %5341 = vmatpush3.bf16.msra.mxu0 %v5340_v32 }
 0x46e   : > { %5314 = vmatmul.mubr.msk.f32.vlgmr.msra.gmra.mrb[84].mxu0 %vm3697_vm1, %v3696_v22 }
 0x541   : > { %v3767_v52 = vpop.f32.mrb[84].mxu0 }
 0x542   : > { %v3771_v40 = vpack.c.bf16 %v3767_v52, %v3767_v52  ;;  %v5315_v24 = vpop.f32.mrb[85].mxu0 }
 0x544   : > { %5333 = vmatmul.mubr.bf16.vlgmr.msra.gmra.mrb[100].mxu1 %v3771_v40 }
 0x617   : > { %v3877_v27 = vpop.f32.mrb[100].mxu1 }
 0x618   : > { %v3878_v29 = vadd.f32 %v4435_v26, %v3877_v27  ;;  %v5334_v55 = vpop.f32.mrb[101].mxu1 }
 0x619   : > { %v3880_v12 = vpop.f32.mrb[102].mxu1 }
 0x61a   : > { %3883 = vst [vmem:[%s471_s27] sm:$0xff] %v3878_v29  ;;  %v5335_v58 = vpop.f32.mrb[103].mxu1 }
 0x61b PF: > { %s19_s11 = sadd.s32 1, %s5702_s11   ;;  %s6392_s30 = smov %s5698_s10 }
 0x61c   : > { %p16_p5 = scmp.ge.s32.totalorder %s19_s11, 4   ;;  %s6393_s10 = smov %s6395_s12 }
 0x61e   :  { %18 = sbr.rel (!%p16_p5) target bundleno = 2 (0x2), region = 120 }

// kernel: _lambda_.5
= control target key start
LH: loop header
LB: loop body
LE: loop exit
PB: predicated region body
PF: predicated region fallthrough
CT: control target
= control target key end

     0   :  { %s12735_s6 = smov 1   ;;  %s12736_s10 = smov 2   ;;  %s14239_s0 = inlined_call_operand.smem [shape: u32[31], index: -1, kind: input, shape index: {}] }
   0x1   :  { %s12776_s5 = sld [smem:[%s14239_s0]]   ;;  %s12737_s14 = smov 3  }
   0x2   :  { %s12781_s9 = sld [smem:[%s14239_s0 + %s12735_s6]]   ;;  %s12738_s18 = smov 4  }
   0x3   :  { %s12786_s13 = sld [smem:[%s14239_s0 + %s12736_s10]]   ;;  %s12739_s22 = smov 5  }
   0x4   :  { %s12791_s17 = sld [smem:[%s14239_s0 + %s12737_s14]]   ;;  %s12740_s26 = smov 6  }
   0x5   :  { %s12796_s21 = sld [smem:[%s14239_s0 + %s12738_s18]]   ;;  %s12741_s30 = smov 7  }
   0x6   :  { %s12801_s25 = sld [smem:[%s14239_s0 + %s12739_s22]]   ;;  %s12742_s4 = smov 8  }
   0x7   :  { %s12806_s29 = sld [smem:[%s14239_s0 + %s12740_s26]]   ;;  %s12743_s10 = smov 9  }
   0x8   :  { %s12811_s3 = sld [smem:[%s14239_s0 + %s12741_s30]]   ;;  %s12744_s15 = smov 10  }
   0x9   :  { %s12816_s8 = sld [smem:[%s14239_s0 + %s12742_s4]]   ;;  %s12745_s20 = smov 11  }
   0xa   :  { %s12821_s14 = sld [smem:[%s14239_s0 + %s12743_s10]]   ;;  %s12746_s26 = smov 12  }
   0xb   :  { %s12826_s19 = sld [smem:[%s14239_s0 + %s12744_s15]]   ;;  %s12747_s1 = smov 13  }
   0xc   :  { %s12831_s24 = sld [smem:[%s14239_s0 + %s12745_s20]]   ;;  %s12748_s7 = smov 14  }
   0xd   :  { %s12836_s30 = sld [smem:[%s14239_s0 + %s12746_s26]]   ;;  %s12749_s15 = smov 15  }
   0xe   :  { %s12841_s6 = sld [smem:[%s14239_s0 + %s12747_s1]]   ;;  %s12750_s22 = smov 16  }
   0xf   :  { %s12846_s12 = sld [smem:[%s14239_s0 + %s12748_s7]]   ;;  %s12751_s28 = smov 17  }
  0x10   :  { %s12851_s20 = sld [smem:[%s14239_s0 + %s12749_s15]]   ;;  %s12752_s7 = smov 18  }
  0x11   :  { %s12856_s27 = sld [smem:[%s14239_s0 + %s12750_s22]]   ;;  %s12753_s15 = smov 19  }
  0x12   :  { %14247 = sst [smem:[#allocation3_spill]] %s12831_s24  ;;  %s12754_s22 = smov 20  }
  0x13   :  { %s12861_s4 = sld [smem:[%s14239_s0 + %s12751_s28]]   ;;  %s12755_s28 = smov 21  }
  0x14   :  { %s12764_s10 = smov 30  }
  0x15   :  { %14248 = sst [smem:[#allocation4_spill]] %s12846_s12 }
  0x16   :  { %14249 = sst [smem:[#allocation5_spill]] %s12851_s20 }
  0x17   :  { %14250 = sst [smem:[#allocation6_spill]] %s12856_s27 }
  0x18   :  { %s12866_s12 = sld [smem:[%s14239_s0 + %s12752_s7]]   ;;  %s12756_s7 = smov 22  }
  0x19   :  { %14251 = sst [smem:[#allocation7_spill]] %s12861_s4 }
  0x1a   :  { %s12871_s20 = sld [smem:[%s14239_s0 + %s12753_s15]]   ;;  %s12757_s15 = smov 23  }
  0x1b   :  { %s12876_s27 = sld [smem:[%s14239_s0 + %s12754_s22]]   ;;  %s12758_s22 = smov 24  }
  0x1c   :  { %s12881_s4 = sld [smem:[%s14239_s0 + %s12755_s28]]   ;;  %s12759_s28 = smov 25  }
  0x1d   :  { %s12891_s24 = sld [smem:[%s14239_s0 + %s12757_s15]]   ;;  %s12761_s15 = smov 27  }
  0x1e   :  { %14252 = sst [smem:[#allocation8_spill]] %s12866_s12 }
  0x1f   :  { %s12886_s12 = sld [smem:[%s14239_s0 + %s12756_s7]]   ;;  %s12760_s7 = smov 26  }
  0x21   :  { %14253 = sst [smem:[#allocation9_spill]] %s12876_s27 }
  0x22   :  { %14254 = sst [smem:[#allocation10_spill]] %s12881_s4 }
  0x23   :  { %14256 = sst [smem:[#allocation12_spill]] %s12891_s24 }
  0x24   :  { %s12896_s27 = sld [smem:[%s14239_s0 + %s12758_s22]]   ;;  %s12762_s22 = smov 28  }
  0x25   :  { %14255 = sst [smem:[#allocation11_spill]] %s12886_s12 }
  0x26   :  { %s12901_s4 = sld [smem:[%s14239_s0 + %s12759_s28]]   ;;  %s12763_s28 = smov 29  }
  0x27   :  { %s12906_s12 = sld [smem:[%s14239_s0 + %s12760_s7]]  }
  0x28   :  { %s12911_s24 = sld [smem:[%s14239_s0 + %s12761_s15]]   ;;  %s12926_s15 = smov 0  }
  0x2a   :  { %14257 = sst [smem:[#allocation13_spill]] %s12896_s27 }
  0x2b   :  { %s12916_s27 = sld [smem:[%s14239_s0 + %s12762_s22]]  }
  0x2c   :  { %14258 = sst [smem:[#allocation14_spill]] %s12901_s4 }
  0x2d   :  { %14259 = sst [smem:[#allocation15_spill]] %s12906_s12 }
  0x2e   :  { %s9188_s4 = sld [smem:[%s14239_s0 + %s12763_s28]]  }
  0x2f   :  { %s12924_s12 = sld [smem:[%s14239_s0 + %s12764_s10]]  }
  0x34   :  { %v66_v0 = vstv %s9188_s4 }
  0x35   :  { %67 = vst [vmem:[#allocation2] sm:$0x1] %v66_v0 }
  0x36 LB: > { %s9190_s16 = sadd.s32 4294967295, %s12733_s15   ;;  %p9194_p0 = scmp.ge.s32.totalorder %s12733_s15, 1  ;;  %s12733_s15 = sphi %s12926_s15, %s73_s15  }
  0x37   : > { %p845_p1 = scmp.lt.s32.totalorder %s12733_s15, 3 }
  0x39   : > { %p846_p2 = pnand %p9194_p0, %p845_p1 }
  0x3a   : > { %v11392_v1 = vld [vmem:[%s12781_s9 + $0x40] sm:$0xff] (!%p846_p2)   ;;  %p922_p3 = scmp.lt.s32.totalorder (!%p846_p2), %s9190_s16, 1  ;;  %v11394_v3 = vld [vmem:[%s12781_s9 + $0x48] sm:$0xff] (!%p846_p2)   ;;  %v12765_v4 = vmov (!%p846_p2), 0.0   ;;  %v11396_v6 = vld [vmem:[%s12781_s9 + $0x50] sm:$0xff] (!%p846_p2)   ;;  %vm12766_vm0 = vmmov (!%p846_p2), 0   ;;  %v1226_v51 = vlaneseq (!%p846_p2) }
  0x3b   : > { %849 = sbr.rel (%p846_p2) target bundleno = 3858 (0xf12), region = 140  ;;  %v11393_v2 = vld [vmem:[%s12781_s9] sm:$0xff] (!%p846_p2)   ;;  %10802 = vmatprep.subr.bf16.mxu1 (!%p846_p2), %v11392_v1  ;;  %10978 = vmatprep.subr.bf16.mxu0 (!%p846_p2), %v12765_v4  ;;  %v11395_v5 = vld [vmem:[%s12781_s9 + $0x8] sm:$0xff] (!%p846_p2)   ;;  %v11397_v7 = vld [vmem:[%s12781_s9 + $0x10] sm:$0xff] (!%p846_p2)   ;;  %vm1898_vm5 = vcmask (!%p846_p2), 1043456   ;;  %vm1894_vm6 = vcmask (!%p846_p2), 64512  }
  0x3c   : > { %10803 = vmatpush3.bf16.msra.mxu1 (!%p846_p2), %v11393_v2  ;;  %10994 = vmatprep.mubr.msk.bf16.mxu0 (!%p846_p2), %vm12766_vm0, %v12765_v4  ;;  %v11398_v8 = vld [vmem:[%s12781_s9 + $0x58] sm:$0xff] (!%p846_p2)   ;;  %v11400_v10 = vld [vmem:[%s12781_s9 + $0x60] sm:$0xff] (!%p846_p2)   ;;  %v11402_v12 = vld [vmem:[%s12781_s9 + $0x68] sm:$0xff] (!%p846_p2)   ;;  %v13014_v52 = vshrl.u32 (!%p846_p2), %v1226_v51, 7  ;;  %vm1990_vm7 = vcmask (!%p846_p2), 1040384   ;;  %vm2436_vm10 = vcmask (!%p846_p2), 1042432  }
  0x3d   : > { %10804 = vmatprep.subr.bf16.mxu1 (!%p846_p2), %v11394_v3  ;;  %v11399_v9 = vld [vmem:[%s12781_s9 + $0x18] sm:$0xff] (!%p846_p2)   ;;  %v11401_v11 = vld [vmem:[%s12781_s9 + $0x20] sm:$0xff] (!%p846_p2)   ;;  %v11403_v15 = vld [vmem:[%s12781_s9 + $0x28] sm:$0xff] (!%p846_p2)   ;;  %s14266_s18 = sld [smem:[#allocation3_spill]] (!%p846_p2)  ;;  %s14267_s22 = sld [smem:[#allocation4_spill]] (!%p846_p2)  ;;  %vm2772_vm12 = vcmask (!%p846_p2), 1041408  }
  0x3e   : > { %v11404_v16 = vld [vmem:[%s12781_s9 + $0x70] sm:$0xff] (!%p846_p2)   ;;  %v11406_v18 = vld [vmem:[%s12781_s9 + $0x78] sm:$0xff] (!%p846_p2)   ;;  %v11411_v20 = vld [vmem:[%s12781_s9 + $0x80] sm:$0xff] (!%p846_p2)   ;;  %vm1228_vm1 = vcmp.ge.s32.totalorder (!%p846_p2), %v13014_v52, 1  ;;  %vm1231_vm3 = vcmp.le.s32.totalorder (!%p846_p2), %v13014_v52, 6  ;;  %s14268_s23 = sld [smem:[#allocation5_spill]] (!%p846_p2) }
  0x3f   : > { %v11405_v17 = vld [vmem:[%s12781_s9 + $0x30] sm:$0xff] (!%p846_p2)   ;;  %v11407_v19 = vld [vmem:[%s12781_s9 + $0x38] sm:$0xff] (!%p846_p2)   ;;  %v11412_v22 = vld [vmem:[%s12781_s9 + $0x88] sm:$0xff] (!%p846_p2)   ;;  %vm2768_vm13 = vcmask (!%p846_p2), 31744   ;;  %s14269_s26 = sld [smem:[#allocation7_spill]] (!%p846_p2)  ;;  %s14270_s28 = sld [smem:[#allocation6_spill]] (!%p846_p2) }
  0x40   : > { %10805 = vmatpush3.bf16.msra.mxu1 (!%p846_p2), %v11395_v5  ;;  %v11413_v23 = vld [vmem:[%s12781_s9 + $0x90] sm:$0xff] (!%p846_p2)   ;;  %v11414_v24 = vld [vmem:[%s12781_s9 + $0x98] sm:$0xff] (!%p846_p2)   ;;  %v11415_v25 = vld [vmem:[%s12781_s9 + $0xa0] sm:$0xff] (!%p846_p2)   ;;  %s14273_s1 = sld [smem:[#allocation11_spill]] (!%p846_p2)  ;;  %s14274_s2 = sld [smem:[#allocation9_spill]] (!%p846_p2)  ;;  %vm4192_vm15 = vcmask (!%p846_p2), 15360  }
  0x41   : > { %10806 = vmatprep.subr.bf16.mxu1 (!%p846_p2), %v11396_v6  ;;  %v11416_v26 = vld [vmem:[%s12781_s9 + $0xa8] sm:$0xff] (!%p846_p2)   ;;  %v11417_v27 = vld [vmem:[%s12781_s9 + $0xb0] sm:$0xff] (!%p846_p2)   ;;  %v11418_v28 = vld [vmem:[%s12781_s9 + $0xb8] sm:$0xff] (!%p846_p2)   ;;  %s14275_s10 = sld [smem:[#allocation8_spill]] (!%p846_p2)  ;;  %s14276_s7 = sld [smem:[#allocation10_spill]] (!%p846_p2) }
  0x42   : > { %s14282_s16 = smov (!%p922_p3, %s9190_s16), 1  ;;  %v11419_v30 = vld [vmem:[%s12791_s17 + $0x40] sm:$0xff]   ;;  %v11421_v32 = vld [vmem:[%s12791_s17 + $0x48] sm:$0xff]   ;;  %v11423_v34 = vld [vmem:[%s12791_s17 + $0x50] sm:$0xff]   ;;  %s14277_s11 = sld [smem:[#allocation15_spill]] }
  0x43   : > { %s11348_s0 = smul.u32 12, %s14282_s16  ;;  %v11420_v31 = vld [vmem:[%s12791_s17] sm:$0xff]   ;;  %10979 = vmatpush3.bf16.msra.mxu0 %v11419_v30  ;;  %v11422_v33 = vld [vmem:[%s12791_s17 + $0x8] sm:$0xff]   ;;  %v11424_v35 = vld [vmem:[%s12791_s17 + $0x10] sm:$0xff]  }
  0x44   : > { %10807 = vmatpush3.bf16.msra.mxu1 %v11397_v7  ;;  %10980 = vmatprep.subr.bf16.mxu0 %v12765_v4  ;;  %v11425_v36 = vld [vmem:[%s12791_s17 + $0x58] sm:$0xff]   ;;  %v11427_v38 = vld [vmem:[%s12791_s17 + $0x60] sm:$0xff]   ;;  %v11429_v40 = vld [vmem:[%s12791_s17 + $0x68] sm:$0xff]  }
  0x45   : > { %10808 = vmatprep.subr.bf16.mxu1 %v11398_v8  ;;  %s12950_s4 = scalar_lea.vmem %s12776_s5, %s11348_s0  ;;  %v11426_v37 = vld [vmem:[%s12791_s17 + $0x18] sm:$0xff]   ;;  %v11428_v39 = vld [vmem:[%s12791_s17 + $0x20] sm:$0xff]   ;;  %v11430_v41 = vld [vmem:[%s12791_s17 + $0x28] sm:$0xff]   ;;  %s14278_s0 = sld [smem:[#allocation13_spill]] }
  0x46   : > { %v932_v13 = vld [vmem:[%s12950_s4] sm:$0xff]  ;;  %v11410_v29 = vld [vmem:[%s12950_s4 + $0x8] ss:$0 sps:$4 sm:$0xff]   ;;  %v11431_v42 = vld [vmem:[%s12791_s17 + $0x70] sm:$0xff]   ;;  %s14279_s4 = sld [smem:[#allocation12_spill]] }
  0x47   : > { %v9199_v14 = vcombine.high %v932_v13, %v932_v13  ;;  %v9198_v21 = vcombine.low %v932_v13, %v932_v13  ;;  %10981 = vmatpush3.bf16.msra.mxu0 %v11421_v32  ;;  %v11432_v43 = vld [vmem:[%s12791_s17 + $0x30] sm:$0xff]   ;;  %v11433_v44 = vld [vmem:[%s12791_s17 + $0x78] sm:$0xff]   ;;  %v9197_v53 = vld [vmem:[%s12786_s13] ss:$0 sm:$0xff] }
  0x48   : > { %10809 = vmatpush3.bf16.msra.mxu1 %v11399_v9  ;;  %10982 = vmatprep.subr.bf16.mxu0 %v12765_v4  ;;  %v11434_v45 = vld [vmem:[%s12791_s17 + $0x38] sm:$0xff]   ;;  %vm13018_vm2 = vmpackc.low %vm1228_vm1, %vm1228_vm1  ;;  %v11435_v60 = vld [vmem:[%s12791_s17 + $0x80] sm:$0xff]  }
  0x49   : > { %10810 = vmatprep.subr.bf16.mxu1 %v11400_v10  ;;  %1176 = vmatprep.mubr.bf16.mxu1 %v9199_v14  ;;  %v11436_v1 = vld [vmem:[%s12791_s17 + $0x88] sm:$0xff]   ;;  %v11437_v3 = vld [vmem:[%s12791_s17 + $0x90] sm:$0xff]   ;;  %v11438_v5 = vld [vmem:[%s12791_s17 + $0x98] sm:$0xff]  }
  0x4a   : > { %v11439_v6 = vld [vmem:[%s12791_s17 + $0xa0] sm:$0xff]   ;;  %v11440_v7 = vld [vmem:[%s12791_s17 + $0xa8] sm:$0xff]   ;;  %v11441_v8 = vld [vmem:[%s12791_s17 + $0xb0] sm:$0xff]  }
  0x4b   : > { %10983 = vmatpush3.bf16.msra.mxu0 %v11423_v34  ;;  %vm13046_vm4 = vmpackc.low %vm1231_vm3, %vm1231_vm3  ;;  %v11442_v10 = vld [vmem:[%s12791_s17 + $0xb8] sm:$0xff]   ;;  %v11443_v13 = vld [vmem:[%s12801_s25 + $0x40] sm:$0xff]  }
  0x4c   : > { %10811 = vmatpush3.bf16.msra.mxu1 %v11401_v11  ;;  %10984 = vmatprep.subr.bf16.mxu0 %v12765_v4  ;;  %v11444_v14 = vld [vmem:[%s12801_s25] sm:$0xff]   ;;  %v11461_v51 = vld [vmem:[%s12801_s25 + $0x90] sm:$0xff]   ;;  %v11464_v54 = vld [vmem:[%s12801_s25 + $0xa8] sm:$0xff]  }
  0x4d   : > { %10812 = vmatprep.subr.bf16.mxu1 %v11402_v12  ;;  %vm9386_vm8 = vmneg %vm1990_vm7 }
  0x4e   : > { %vm13167_vm9 = vmpackc.low %vm9386_vm8, %vm9386_vm8 }
  0x4f   : > { %10985 = vmatpush3.bf16.msra.mxu0 %v11425_v36  ;;  %vm9486_vm11 = vmpackc.low %vm2436_vm10, %vm2436_vm10 }
  0x50   : > { %10813 = vmatpush3.bf16.msra.mxu1 %v11403_v15  ;;  %10986 = vmatprep.subr.bf16.mxu0 %v12765_v4  ;;  %v11445_v15 = vld [vmem:[%s12801_s25 + $0x48] sm:$0xff]   ;;  %vm13443_vm14 = vmpackc.low %vm1990_vm7, %vm1990_vm7 }
  0x51   : > { %10814 = vmatprep.subr.bf16.mxu1 %v11404_v16  ;;  %v11446_v16 = vld [vmem:[%s12801_s25 + $0x8] sm:$0xff]  }
  0x53   : > { %10987 = vmatpush3.bf16.msra.mxu0 %v11427_v38 }
  0x54   : > { %10815 = vmatpush3.bf16.msra.mxu1 %v11405_v17  ;;  %10988 = vmatprep.subr.bf16.mxu0 %v12765_v4  ;;  %v11447_v17 = vld [vmem:[%s12801_s25 + $0x50] sm:$0xff]  }
  0x55   : > { %10816 = vmatprep.subr.bf16.mxu1 %v11406_v18  ;;  %v11448_v18 = vld [vmem:[%s12801_s25 + $0x10] sm:$0xff]  }
  0x57   : > { %10989 = vmatpush3.bf16.msra.mxu0 %v11429_v40 }
  0x58   : > { %10817 = vmatpush3.bf16.msra.mxu1 %v11407_v19  ;;  %10990 = vmatprep.subr.bf16.mxu0 %v12765_v4  ;;  %v11449_v19 = vld [vmem:[%s12801_s25 + $0x58] sm:$0xff]  }
  0x59   : > { %10958 = vmatprep.subr.bf16.mxu1 %v12765_v4 }
  0x5b   : > { %1177 = vmatmul.mubr.bf16.vlgmr.msra.gmra.mrb[0].mxu1 %v9198_v21  ;;  %10991 = vmatpush3.bf16.msra.mxu0 %v11431_v42  ;;  %v11451_v21 = vld [vmem:[%s12801_s25 + $0x60] sm:$0xff]  }
  0x5c   : > { %10959 = vmatpush3.bf16.msra.mxu1 %v11411_v20  ;;  %10974 = vmatprep.mubr.msk.bf16.mxu1 %vm12766_vm0, %v12765_v4  ;;  %v11450_v20 = vld [vmem:[%s12801_s25 + $0x18] sm:$0xff]  }
  0x5d   : > { %10960 = vmatprep.subr.bf16.mxu1 %v12765_v4  ;;  %10992 = vmatprep.subr.bf16.mxu0 %v12765_v4 }
  0x5f   : > { %10993 = vmatpush3.bf16.msra.mxu0 %v11433_v44 }
  0x60   : > { %10961 = vmatpush3.bf16.msra.mxu1 %v11412_v22  ;;  %11018 = vmatprep.subr.bf16.mxu0 %v12765_v4  ;;  %v11452_v22 = vld [vmem:[%s12801_s25 + $0x20] sm:$0xff]  }
  0x61   : > { %10962 = vmatprep.subr.bf16.mxu1 %v12765_v4 }
  0x64   : > { %10963 = vmatpush3.bf16.msra.mxu1 %v11413_v23  ;;  %v11453_v23 = vld [vmem:[%s12801_s25 + $0x68] sm:$0xff]  }
  0x65   : > { %10964 = vmatprep.subr.bf16.mxu1 %v12765_v4 }
  0x68   : > { %10965 = vmatpush3.bf16.msra.mxu1 %v11414_v24  ;;  %v11454_v24 = vld [vmem:[%s12801_s25 + $0x28] sm:$0xff]  }
  0x69   : > { %10966 = vmatprep.subr.bf16.mxu1 %v12765_v4 }
  0x6c   : > { %10967 = vmatpush3.bf16.msra.mxu1 %v11415_v25  ;;  %v11455_v25 = vld [vmem:[%s12801_s25 + $0x70] sm:$0xff]  }
  0x6d   : > { %10968 = vmatprep.subr.bf16.mxu1 %v12765_v4 }
  0x70   : > { %10969 = vmatpush3.bf16.msra.mxu1 %v11416_v26  ;;  %v11456_v26 = vld [vmem:[%s12801_s25 + $0x30] sm:$0xff]  }
  0x71   : > { %10970 = vmatprep.subr.bf16.mxu1 %v12765_v4 }
  0x74   : > { %10971 = vmatpush3.bf16.msra.mxu1 %v11417_v27  ;;  %v11457_v27 = vld [vmem:[%s12801_s25 + $0x78] sm:$0xff]  }
  0x75   : > { %10972 = vmatprep.subr.bf16.mxu1 %v12765_v4 }
  0x78   : > { %10973 = vmatpush3.bf16.msra.mxu1 %v11418_v28  ;;  %v11458_v28 = vld [vmem:[%s12801_s25 + $0x38] sm:$0xff]  }
  0x79   : > { %10998 = vmatprep.subr.bf16.mxu1 %v12765_v4 }
  0x7b   : > { %10975 = vmatmul.mubr.bf16.vlgmr.msra.gmra.mrb[4].mxu1 %v11410_v29 }
  0x7c   : > { %11014 = vmatprep.mubr.msk.bf16.mxu1 %vm12766_vm0, %v12765_v4  ;;  %10999 = vmatpush3.bf16.msra.mxu1 %v11420_v31 }
  0x7d   : > { %11000 = vmatprep.subr.bf16.mxu1 %v12765_v4 }
  0x80   : > { %11001 = vmatpush3.bf16.msra.mxu1 %v11422_v33 }
  0x81   : > { %11002 = vmatprep.subr.bf16.mxu1 %v12765_v4 }
  0x84   : > { %11003 = vmatpush3.bf16.msra.mxu1 %v11424_v35 }
  0x85   : > { %11004 = vmatprep.subr.bf16.mxu1 %v12765_v4 }
  0x88   : > { %11005 = vmatpush3.bf16.msra.mxu1 %v11426_v37 }
  0x89   : > { %11006 = vmatprep.subr.bf16.mxu1 %v12765_v4 }
  0x8c   : > { %11007 = vmatpush3.bf16.msra.mxu1 %v11428_v39  ;;  %v9287_v39 = vld [vmem:[%s12796_s21] ss:$0 sm:$0xff] }
  0x8d   : > { %11008 = vmatprep.subr.bf16.mxu1 %v12765_v4 }
  0x90   : > { %11009 = vmatpush3.bf16.msra.mxu1 %v11430_v41 }
  0x91   : > { %11010 = vmatprep.subr.bf16.mxu1 %v12765_v4 }
  0x94   : > { %11011 = vmatpush3.bf16.msra.mxu1 %v11432_v43 }
  0x95   : > { %11012 = vmatprep.subr.bf16.mxu1 %v12765_v4 }
  0x98   : > { %11013 = vmatpush3.bf16.msra.mxu1 %v11434_v45 }
  0x99   : > { %11038 = vmatprep.subr.bf16.mxu1 %v12765_v4 }
 0x12e   : > { %v10818_v46 = vpop.f32.mrb[0].mxu1 }
 0x12f   : > { %v10819_v47 = vpop.f32.mrb[1].mxu1 }
 0x130   : > { %v10820_v48 = vadd.f32 %v10819_v47, %v10818_v46  ;;  %v10821_v49 = vpop.f32.mrb[2].mxu1  ;;  %v11459_v46 = vld [vmem:[%s12801_s25 + $0x80] sm:$0xff]  }
 0x131   : > { %v10822_v50 = vpop.f32.mrb[3].mxu1 }
 0x132   : > { %v1179_v55 = vadd.f32 %v10820_v48, %v9197_v53  ;;  %v11460_v50 = vld [vmem:[%s12801_s25 + $0x88] sm:$0xff]   ;;  %v11462_v53 = vld [vmem:[%s12801_s25 + $0x98] sm:$0xff]  }
 0x14e   : > { %v1218_v56 = vpop.f32.mrb[4].mxu1 }
 0x14f   : > { %v1219_v57 = vadd.f32 %v1218_v56, %v1179_v55  ;;  %v10976_v58 = vpop.f32.mrb[5].mxu1  ;;  %v11463_v55 = vld [vmem:[%s12801_s25 + $0xa0] sm:$0xff]   ;;  %v11465_v56 = vld [vmem:[%s12801_s25 + $0xb0] sm:$0xff]  }
 0x150   : > { %v1221_v59 = vpop.f32.mrb[6].mxu1 }
 0x151   : > { %v13023_v61 = vmax.f32 %v1219_v57, 0.0  ;;  %v10977_v62 = vpop.f32.mrb[7].mxu1  ;;  %v11466_v57 = vld [vmem:[%s12801_s25 + $0xb8] sm:$0xff]  }
 0x153   : > { %v1225_v63 = vrot.slane %v13023_v61, 7  ;;  %v1250_v0 = vpack.c.bf16 %v13023_v61, %v13023_v61  ;;  %v1230_v11 = vrot.slane %v13023_v61, 1 }
 0x155   : > { %v9258_v2 = vpack.c.bf16 %v1225_v63, %v1225_v63  ;;  %10995 = vmatmul.mubr.bf16.vlgmr.msra.gmra.mrb[0].mxu0 %v1250_v0  ;;  %v9285_v12 = vpack.c.bf16 %v1230_v11, %v1230_v11 }
 0x156   : > { %11019 = vmatpush3.bf16.msra.mxu0 %v11435_v60  ;;  %11034 = vmatprep.mubr.msk.bf16.mxu0 %vm12766_vm0, %v12765_v4 }
 0x157   : > { %11015 = vmatmul.mubr.msk.bf16.vlgmr.msra.gmra.mrb[8].mxu1 %vm13018_vm2, %v9258_v2  ;;  %11020 = vmatprep.subr.bf16.mxu0 %v12765_v4 }
 0x158   : > { %11054 = vmatprep.mubr.msk.bf16.mxu1 %vm12766_vm0, %v12765_v4  ;;  %11039 = vmatpush3.bf16.msra.mxu1 %v11443_v13 }
 0x159   : > { %11040 = vmatprep.subr.bf16.mxu1 %v12765_v4 }
 0x15a   : > { %11021 = vmatpush3.bf16.msra.mxu0 %v11436_v1 }
 0x15b   : > { %11022 = vmatprep.subr.bf16.mxu0 %v12765_v4 }
 0x15c   : > { %11041 = vmatpush3.bf16.msra.mxu1 %v11445_v15 }
 0x15d   : > { %11042 = vmatprep.subr.bf16.mxu1 %v12765_v4 }
 0x15e   : > { %11023 = vmatpush3.bf16.msra.mxu0 %v11437_v3 }
 0x15f   : > { %11024 = vmatprep.subr.bf16.mxu0 %v12765_v4 }
 0x160   : > { %11043 = vmatpush3.bf16.msra.mxu1 %v11447_v17 }
 0x161   : > { %11044 = vmatprep.subr.bf16.mxu1 %v12765_v4 }
 0x162   : > { %11025 = vmatpush3.bf16.msra.mxu0 %v11438_v5 }
 0x163   : > { %11026 = vmatprep.subr.bf16.mxu0 %v12765_v4 }
 0x164   : > { %11045 = vmatpush3.bf16.msra.mxu1 %v11449_v19  ;;  %v9352_v19 = vld [vmem:[%s12811_s3 + $0x2] sm:$0x3] }
 0x165   : > { %11046 = vmatprep.subr.bf16.mxu1 %v12765_v4 }
 0x166   : > { %11027 = vmatpush3.bf16.msra.mxu0 %v11439_v6 }
 0x167   : > { %11028 = vmatprep.subr.bf16.mxu0 %v12765_v4 }
 0x168   : > { %11047 = vmatpush3.bf16.msra.mxu1 %v11451_v21  ;;  %v11468_v21 = vld [vmem:[%s12816_s8] sm:$0xff]  }
 0x169   : > { %11048 = vmatprep.subr.bf16.mxu1 %v12765_v4 }
 0x16a   : > { %11029 = vmatpush3.bf16.msra.mxu0 %v11440_v7 }
 0x16b   : > { %11030 = vmatprep.subr.bf16.mxu0 %v12765_v4 }
 0x16c   : > { %11049 = vmatpush3.bf16.msra.mxu1 %v11453_v23  ;;  %v11471_v23 = vld [vmem:[%s12816_s8 + $0x50] sm:$0xff]  }
 0x16d   : > { %11050 = vmatprep.subr.bf16.mxu1 %v12765_v4 }
 0x16e   : > { %11031 = vmatpush3.bf16.msra.mxu0 %v11441_v8  ;;  %v9350_v8 = vld [vmem:[%s12806_s29] ss:$0 sm:$0xff] }
 0x16f   : > { %11032 = vmatprep.subr.bf16.mxu0 %v12765_v4 }
 0x170   : > { %11051 = vmatpush3.bf16.msra.mxu1 %v11455_v25  ;;  %v11473_v25 = vld [vmem:[%s12816_s8 + $0x58] sm:$0xff]  }
 0x171   : > { %11052 = vmatprep.subr.bf16.mxu1 %v12765_v4 }
 0x172   : > { %11033 = vmatpush3.bf16.msra.mxu0 %v11442_v10 }
 0x173   : > { %11058 = vmatprep.subr.bf16.mxu0 %v12765_v4 }
 0x174   : > { %11053 = vmatpush3.bf16.msra.mxu1 %v11457_v27  ;;  %v11475_v27 = vld [vmem:[%s12816_s8 + $0x60] sm:$0xff]  }
 0x175   : > { %11035 = vmatmul.mubr.msk.bf16.vlgmr.msra.gmra.mrb[4].mxu0 %vm13046_vm4, %v9285_v12  ;;  %11078 = vmatprep.subr.bf16.mxu1 %v12765_v4 }
 0x176   : > { %11074 = vmatprep.mubr.msk.bf16.mxu0 %vm12766_vm0, %v12765_v4  ;;  %11059 = vmatpush3.bf16.msra.mxu0 %v11444_v14 }
 0x177   : > { %11060 = vmatprep.subr.bf16.mxu0 %v12765_v4 }
 0x17a   : > { %11061 = vmatpush3.bf16.msra.mxu0 %v11446_v16 }
 0x17b   : > { %11062 = vmatprep.subr.bf16.mxu0 %v12765_v4 }
 0x17e   : > { %11063 = vmatpush3.bf16.msra.mxu0 %v11448_v18  ;;  %v1893_v18 = vld [vmem:[%s12811_s3] sm:$0x3] }
 0x17f   : > { %11064 = vmatprep.subr.bf16.mxu0 %v12765_v4 }
 0x182   : > { %11065 = vmatpush3.bf16.msra.mxu0 %v11450_v20  ;;  %v11467_v20 = vld [vmem:[%s12816_s8 + $0x40] sm:$0xff]  }
 0x183   : > { %11066 = vmatprep.subr.bf16.mxu0 %v12765_v4 }
 0x186   : > { %11067 = vmatpush3.bf16.msra.mxu0 %v11452_v22  ;;  %v11470_v22 = vld [vmem:[%s12816_s8 + $0x8] sm:$0xff]  }
 0x187   : > { %11068 = vmatprep.subr.bf16.mxu0 %v12765_v4 }
 0x18a   : > { %11069 = vmatpush3.bf16.msra.mxu0 %v11454_v24  ;;  %v11472_v24 = vld [vmem:[%s12816_s8 + $0x10] sm:$0xff]  }
 0x18b   : > { %11070 = vmatprep.subr.bf16.mxu0 %v12765_v4 }
 0x18e   : > { %11071 = vmatpush3.bf16.msra.mxu0 %v11456_v26  ;;  %v11474_v26 = vld [vmem:[%s12816_s8 + $0x18] sm:$0xff]  }
 0x18f   : > { %11072 = vmatprep.subr.bf16.mxu0 %v12765_v4 }
 0x192   : > { %11073 = vmatpush3.bf16.msra.mxu0 %v11458_v28  ;;  %v11476_v28 = vld [vmem:[%s12816_s8 + $0x20] sm:$0xff]  }
 0x193   : > { %11098 = vmatprep.subr.bf16.mxu0 %v12765_v4 }
 0x228   : > { %v1350_v29 = vpop.f32.mrb[0].mxu0 }
 0x229   : > { %v10996_v30 = vpop.f32.mrb[1].mxu0 }
 0x22a   : > { %v1353_v31 = vpop.f32.mrb[2].mxu0  ;;  %v1438_v32 = vpop.f32.mrb[8].mxu1  ;;  %v11478_v30 = vld [vmem:[%s12816_s8 + $0x28] sm:$0xff]  }
 0x22b   : > { %v1439_v33 = vadd.f32 %v1438_v32, %v1350_v29  ;;  %v10997_v34 = vpop.f32.mrb[3].mxu0  ;;  %v11016_v35 = vpop.f32.mrb[9].mxu1  ;;  %v11477_v29 = vld [vmem:[%s12816_s8 + $0x68] sm:$0xff]   ;;  %v11479_v31 = vld [vmem:[%s12816_s8 + $0x70] sm:$0xff]  }
 0x22c   : > { %v1441_v36 = vpop.f32.mrb[10].mxu1  ;;  %v11480_v32 = vld [vmem:[%s12816_s8 + $0x30] sm:$0xff]   ;;  %v11482_v34 = vld [vmem:[%s12816_s8 + $0x38] sm:$0xff]  }
 0x22d   : > { %v11017_v37 = vpop.f32.mrb[11].mxu1 }
 0x22e   : > { %v11483_v37 = vld [vmem:[%s12816_s8 + $0x80] sm:$0xff]  }
 0x248   : > { %v1544_v38 = vpop.f32.mrb[4].mxu0 }
 0x249   : > { %v1550_v40 = vadd.f32 %v1544_v38, %v1439_v33  ;;  %v11036_v41 = vpop.f32.mrb[5].mxu0  ;;  %v11481_v33 = vld [vmem:[%s12816_s8 + $0x78] sm:$0xff]  }
 0x24a   : > { %v1547_v42 = vpop.f32.mrb[6].mxu0 }
 0x24b   : > { %v1558_v43 = vadd.f32 %v9287_v39, %v1550_v40  ;;  %v11037_v44 = vpop.f32.mrb[7].mxu0 }
 0x24c   : > { %v11484_v44 = vld [vmem:[%s12836_s30] sm:$0xff]  }
 0x24d   : > { %v1559_v45 = vmax.f32 %v1558_v43, 0.0  ;;  %v11724_v43 = vld [vmem:[%s14269_s26 + $0x230] ss:$8 sps:$4 sm:$0xff]  }
 0x24f   : > { %v1560_v47 = vrot.slane %v1559_v45, 7  ;;  %v1581_v48 = vpack.c.bf16 %v1559_v45, %v1559_v45  ;;  %v1562_v58 = vrot.slane %v1559_v45, 1 }
 0x251   : > { %v9321_v49 = vpack.c.bf16 %v1560_v47, %v1560_v47  ;;  %11055 = vmatmul.mubr.bf16.vlgmr.msra.gmra.mrb[12].mxu1 %v1581_v48  ;;  %v9348_v59 = vpack.c.bf16 %v1562_v58, %v1562_v58  ;;  %v11493_v58 = vld [vmem:[%s12816_s8 + $0xa8] sm:$0xff]  }
 0x252   : > { %11079 = vmatpush3.bf16.msra.mxu1 %v11459_v46  ;;  %11094 = vmatprep.mubr.msk.bf16.mxu1 %vm12766_vm0, %v12765_v4 }
 0x253   : > { %11075 = vmatmul.mubr.msk.bf16.vlgmr.msra.gmra.mrb[8].mxu0 %vm13018_vm2, %v9321_v49  ;;  %11080 = vmatprep.subr.bf16.mxu1 %v12765_v4  ;;  %v11485_v49 = vld [vmem:[%s12816_s8 + $0x88] sm:$0xff]  }
 0x254   : > { %11100 = vmatprep.mubr.msk.bf16.mxu0 %vm12766_vm0, %v12765_v4 }
 0x256   : > { %11081 = vmatpush3.bf16.msra.mxu1 %v11460_v50  ;;  %v11486_v50 = vld [vmem:[%s12836_s30 + $0x8] sm:$0xff]  }
 0x257   : > { %11082 = vmatprep.subr.bf16.mxu1 %v12765_v4 }
 0x25a   : > { %11083 = vmatpush3.bf16.msra.mxu1 %v11461_v51  ;;  %v11487_v51 = vld [vmem:[%s12816_s8 + $0x90] sm:$0xff]  }
 0x25b   : > { %11084 = vmatprep.subr.bf16.mxu1 %v12765_v4 }
 0x25e   : > { %11085 = vmatpush3.bf16.msra.mxu1 %v11462_v53  ;;  %v11488_v53 = vld [vmem:[%s12836_s30 + $0x10] sm:$0xff]  }
 0x25f   : > { %11086 = vmatprep.subr.bf16.mxu1 %v12765_v4 }
 0x262   : > { %11087 = vmatpush3.bf16.msra.mxu1 %v11463_v55  ;;  %v11489_v55 = vld [vmem:[%s12816_s8 + $0x98] sm:$0xff]  }
 0x263   : > { %11088 = vmatprep.subr.bf16.mxu1 %v12765_v4 }
 0x266   : > { %11089 = vmatpush3.bf16.msra.mxu1 %v11464_v54  ;;  %v11490_v54 = vld [vmem:[%s12836_s30 + $0x18] sm:$0xff]  }
 0x267   : > { %11090 = vmatprep.subr.bf16.mxu1 %v12765_v4 }
 0x26a   : > { %11091 = vmatpush3.bf16.msra.mxu1 %v11465_v56  ;;  %v11491_v56 = vld [vmem:[%s12816_s8 + $0xa0] sm:$0xff]  }
 0x26b   : > { %11092 = vmatprep.subr.bf16.mxu1 %v12765_v4 }
 0x26e   : > { %11093 = vmatpush3.bf16.msra.mxu1 %v11466_v57  ;;  %v11492_v57 = vld [vmem:[%s12836_s30 + $0x20] sm:$0xff]  }
 0x26f   : > { %11104 = vmatprep.subr.bf16.mxu1 %v12765_v4 }
 0x271   : > { %11095 = vmatmul.mubr.msk.bf16.vlgmr.msra.gmra.mrb[16].mxu1 %vm13046_vm4, %v9348_v59  ;;  %v11494_v59 = vld [vmem:[%s12836_s30 + $0x28] sm:$0xff]  }
 0x272   : > { %11106 = vmatprep.mubr.msk.bf16.mxu1 %vm12766_vm0, %v12765_v4 }
 0x324   : > { %v1681_v60 = vpop.f32.mrb[12].mxu1 }
 0x325   : > { %v11056_v62 = vpop.f32.mrb[13].mxu1 }
 0x326   : > { %v1684_v63 = vpop.f32.mrb[14].mxu1  ;;  %v1769_v0 = vpop.f32.mrb[8].mxu0  ;;  %v11496_v62 = vld [vmem:[%s12836_s30 + $0x30] sm:$0xff]  }
 0x327   : > { %v1770_v1 = vadd.f32 %v1769_v0, %v1681_v60  ;;  %v11057_v2 = vpop.f32.mrb[15].mxu1  ;;  %v11076_v3 = vpop.f32.mrb[9].mxu0  ;;  %v11495_v60 = vld [vmem:[%s12816_s8 + $0xb0] sm:$0xff]   ;;  %v11497_v63 = vld [vmem:[%s12816_s8 + $0xb8] sm:$0xff]  }
 0x328   : > { %v1772_v5 = vpop.f32.mrb[10].mxu0  ;;  %v11498_v0 = vld [vmem:[%s12836_s30 + $0x38] sm:$0xff]   ;;  %v11499_v2 = vld [vmem:[%s12826_s19 + $0x40] sm:$0xff]   ;;  %v11500_v3 = vld [vmem:[%s12826_s19 + $0x48] sm:$0xff]  }
 0x329   : > { %v11077_v6 = vpop.f32.mrb[11].mxu0  ;;  %v11501_v5 = vld [vmem:[%s12826_s19 + $0x50] sm:$0xff]  }
 0x32a   : > { %v11502_v6 = vld [vmem:[%s12826_s19 + $0x58] sm:$0xff]  }
 0x344   : > { %v1875_v7 = vpop.f32.mrb[16].mxu1 }
 0x345   : > { %v1881_v10 = vadd.f32 %v1875_v7, %v1770_v1  ;;  %v11096_v9 = vpop.f32.mrb[17].mxu1  ;;  %v11503_v7 = vld [vmem:[%s12826_s19 + $0x60] sm:$0xff]  }
 0x346   : > { %v1878_v11 = vpop.f32.mrb[18].mxu1  ;;  %v11506_v9 = vld [vmem:[%s12826_s19 + $0x78] sm:$0xff]  }
 0x347   : > { %v1889_v12 = vadd.f32 %v9350_v8, %v1881_v10  ;;  %v11097_v13 = vpop.f32.mrb[19].mxu1  ;;  %v11504_v8 = vld [vmem:[%s12826_s19 + $0x68] sm:$0xff]   ;;  %v11505_v10 = vld [vmem:[%s12826_s19 + $0x70] sm:$0xff]  }
 0x349   : > { %v1890_v14 = vadd.f32 %v1889_v12, %v13023_v61  ;;  %v11469_v61 = vld [vmem:[%s12816_s8 + $0x48] sm:$0xff]  }
 0x34b   : > { %v1891_v15 = vmax.f32 %v1890_v14, 0.0 }
 0x34d   : > { %v1892_v16 = vpack.c.bf16 %v1891_v15, %v1891_v15 }
 0x34f   : > { %v1900_v17 = vsel %vm1898_vm5, %v1892_v16, 0 }
 0x350   : > { %11099 = vmatpush3.bf16.msra.mxu0 %v1900_v17  ;;  %11105 = vmatpush3.bf16.msra.mxu1 %v1900_v17 }
 0x351   : > { %11110 = vmatprep.subr.bf16.mxu0 %v12765_v4  ;;  %11130 = vmatprep.subr.bf16.mxu1 %v12765_v4 }
 0x353   : > { %11101 = vmatmul.mubr.msk.bf16.vlgmr.msra.gmra.mrb[12].mxu0 %vm1894_vm6, %v1893_v18  ;;  %11107 = vmatmul.mubr.msk.bf16.vlgmr.msra.gmra.mrb[20].mxu1 %vm1894_vm6, %v9352_v19 }
 0x354   : > { %11111 = vmatpush3.bf16.msra.mxu0 %v11467_v20  ;;  %11131 = vmatpush3.bf16.msra.mxu1 %v11468_v21  ;;  %v9415_v21 = vld [vmem:[%s12821_s14] ss:$0 sm:$0xff] }
 0x355   : > { %11112 = vmatprep.subr.bf16.mxu0 %v12765_v4  ;;  %11132 = vmatprep.subr.bf16.mxu1 %v12765_v4 }
 0x356   : > { %11126 = vmatprep.mubr.msk.bf16.mxu0 %vm12766_vm0, %v12765_v4  ;;  %11146 = vmatprep.mubr.msk.bf16.mxu1 %vm12766_vm0, %v12765_v4 }
 0x358   : > { %11113 = vmatpush3.bf16.msra.mxu0 %v11469_v61  ;;  %11133 = vmatpush3.bf16.msra.mxu1 %v11470_v22 }
 0x359   : > { %11114 = vmatprep.subr.bf16.mxu0 %v12765_v4  ;;  %11134 = vmatprep.subr.bf16.mxu1 %v12765_v4 }
 0x35c   : > { %11115 = vmatpush3.bf16.msra.mxu0 %v11471_v23  ;;  %11135 = vmatpush3.bf16.msra.mxu1 %v11472_v24 }
 0x35d   : > { %11116 = vmatprep.subr.bf16.mxu0 %v12765_v4  ;;  %11136 = vmatprep.subr.bf16.mxu1 %v12765_v4 }
 0x360   : > { %11117 = vmatpush3.bf16.msra.mxu0 %v11473_v25  ;;  %11137 = vmatpush3.bf16.msra.mxu1 %v11474_v26 }
 0x361   : > { %11118 = vmatprep.subr.bf16.mxu0 %v12765_v4  ;;  %11138 = vmatprep.subr.bf16.mxu1 %v12765_v4 }
 0x364   : > { %11119 = vmatpush3.bf16.msra.mxu0 %v11475_v27  ;;  %11139 = vmatpush3.bf16.msra.mxu1 %v11476_v28  ;;  %v11507_v27 = vld [vmem:[%s12826_s19] sm:$0xff]  }
 0x365   : > { %11120 = vmatprep.subr.bf16.mxu0 %v12765_v4  ;;  %11140 = vmatprep.subr.bf16.mxu1 %v12765_v4 }
 0x368   : > { %11121 = vmatpush3.bf16.msra.mxu0 %v11477_v29  ;;  %11141 = vmatpush3.bf16.msra.mxu1 %v11478_v30  ;;  %v11508_v29 = vld [vmem:[%s12826_s19 + $0x8] sm:$0xff]   ;;  %v11509_v30 = vld [vmem:[%s12826_s19 + $0x10] sm:$0xff]  }
 0x369   : > { %11122 = vmatprep.subr.bf16.mxu0 %v12765_v4  ;;  %11142 = vmatprep.subr.bf16.mxu1 %v12765_v4 }
 0x36c   : > { %11123 = vmatpush3.bf16.msra.mxu0 %v11479_v31  ;;  %11143 = vmatpush3.bf16.msra.mxu1 %v11480_v32  ;;  %v11510_v31 = vld [vmem:[%s12826_s19 + $0x18] sm:$0xff]   ;;  %v11511_v32 = vld [vmem:[%s12826_s19 + $0x20] sm:$0xff]  }
 0x36d   : > { %11124 = vmatprep.subr.bf16.mxu0 %v12765_v4  ;;  %11144 = vmatprep.subr.bf16.mxu1 %v12765_v4 }
 0x370   : > { %11125 = vmatpush3.bf16.msra.mxu0 %v11481_v33  ;;  %11145 = vmatpush3.bf16.msra.mxu1 %v11482_v34  ;;  %v11512_v33 = vld [vmem:[%s12826_s19 + $0x28] sm:$0xff]   ;;  %v11513_v34 = vld [vmem:[%s12826_s19 + $0x30] sm:$0xff]  }
 0x371   : > { %11150 = vmatprep.subr.bf16.mxu0 %v12765_v4  ;;  %11170 = vmatprep.subr.bf16.mxu1 %v12765_v4 }
 0x426   : > { %v1936_v35 = vpop.f32.mrb[12].mxu0  ;;  %v13161_v36 = vpop.f32.mrb[20].mxu1 }
 0x427   : > { %v13164_v38 = vpack.c.bf16 %v1936_v35, %v1936_v35  ;;  %v1988_v39 = vrot.slane %v13161_v36, 7  ;;  %v11102_v40 = vpop.f32.mrb[13].mxu0  ;;  %v11108_v41 = vpop.f32.mrb[21].mxu1  ;;  %v2203_v1 = vpack.c.bf16 %v13161_v36, %v13161_v36  ;;  %v11514_v35 = vld [vmem:[%s12826_s19 + $0x38] sm:$0xff]  }
 0x428   : > { %v1939_v42 = vpop.f32.mrb[14].mxu0  ;;  %v1984_v45 = vpop.f32.mrb[22].mxu1  ;;  %v11517_v40 = vld [vmem:[%s12826_s19 + $0x90] sm:$0xff]   ;;  %v11518_v41 = vld [vmem:[%s12826_s19 + $0x98] sm:$0xff]  }
 0x429   : > { %v9389_v46 = vpack.c.bf16 %v1988_v39, %v1988_v39  ;;  %v11103_v47 = vpop.f32.mrb[15].mxu0  ;;  %11127 = vmatmul.mubr.bf16.vlgmr.msra.gmra.mrb[16].mxu0 %v13164_v38  ;;  %v11109_v48 = vpop.f32.mrb[23].mxu1  ;;  %v11516_v39 = vld [vmem:[%s12826_s19 + $0x88] sm:$0xff]   ;;  %v11519_v42 = vld [vmem:[%s12826_s19 + $0xa0] sm:$0xff]   ;;  %v11521_v45 = vld [vmem:[%s12826_s19 + $0xb0] sm:$0xff]  }
 0x42a   : > { %11151 = vmatpush3.bf16.msra.mxu0 %v11483_v37  ;;  %11166 = vmatprep.mubr.msk.bf16.mxu0 %vm12766_vm0, %v12765_v4  ;;  %v11515_v37 = vld [vmem:[%s12826_s19 + $0x80] sm:$0xff]  }
 0x42b   : > { %11147 = vmatmul.mubr.msk.bf16.vlgmr.msra.gmra.mrb[24].mxu1 %vm13167_vm9, %v9389_v46  ;;  %11152 = vmatprep.subr.bf16.mxu0 %v12765_v4  ;;  %v11522_v46 = vld [vmem:[%s12826_s19 + $0xb8] sm:$0xff]  }
 0x42c   : > { %11171 = vmatpush3.bf16.msra.mxu1 %v11484_v44  ;;  %11186 = vmatprep.mubr.msk.bf16.mxu1 %vm12766_vm0, %v12765_v4  ;;  %v11520_v44 = vld [vmem:[%s12826_s19 + $0xa8] sm:$0xff]  }
 0x42d   : > { %11172 = vmatprep.subr.bf16.mxu1 %v12765_v4 }
 0x42e   : > { %11153 = vmatpush3.bf16.msra.mxu0 %v11485_v49  ;;  %v11526_v49 = vld [vmem:[%s12871_s20] ss:$8 sps:$4 sm:$0xff]  }
 0x42f   : > { %11154 = vmatprep.subr.bf16.mxu0 %v12765_v4 }
 0x430   : > { %11173 = vmatpush3.bf16.msra.mxu1 %v11486_v50  ;;  %v11528_v50 = vld [vmem:[%s12871_s20 + $0x4] ss:$8 sps:$4 sm:$0xff]  }
 0x431   : > { %11174 = vmatprep.subr.bf16.mxu1 %v12765_v4 }
 0x432   : > { %11155 = vmatpush3.bf16.msra.mxu0 %v11487_v51  ;;  %v11532_v51 = vld [vmem:[%s12871_s20 + $0x10] ss:$8 sps:$4 sm:$0xff]  }
 0x433   : > { %11156 = vmatprep.subr.bf16.mxu0 %v12765_v4 }
 0x434   : > { %11175 = vmatpush3.bf16.msra.mxu1 %v11488_v53  ;;  %v11534_v53 = vld [vmem:[%s12871_s20 + $0x14] ss:$8 sps:$4 sm:$0xff]  }
 0x435   : > { %11176 = vmatprep.subr.bf16.mxu1 %v12765_v4 }
 0x436   : > { %11157 = vmatpush3.bf16.msra.mxu0 %v11489_v55  ;;  %v11538_v55 = vld [vmem:[%s12871_s20 + $0x20] ss:$8 sps:$4 sm:$0xff]  }
 0x437   : > { %11158 = vmatprep.subr.bf16.mxu0 %v12765_v4 }
 0x438   : > { %11177 = vmatpush3.bf16.msra.mxu1 %v11490_v54  ;;  %v11540_v54 = vld [vmem:[%s12871_s20 + $0x24] ss:$8 sps:$4 sm:$0xff]  }
 0x439   : > { %11178 = vmatprep.subr.bf16.mxu1 %v12765_v4 }
 0x43a   : > { %11159 = vmatpush3.bf16.msra.mxu0 %v11491_v56  ;;  %v11544_v56 = vld [vmem:[%s12871_s20 + $0x30] ss:$8 sps:$4 sm:$0xff]  }
 0x43b   : > { %11160 = vmatprep.subr.bf16.mxu0 %v12765_v4 }
 0x43c   : > { %11179 = vmatpush3.bf16.msra.mxu1 %v11492_v57  ;;  %v11546_v57 = vld [vmem:[%s12871_s20 + $0x34] ss:$8 sps:$4 sm:$0xff]  }
 0x43d   : > { %11180 = vmatprep.subr.bf16.mxu1 %v12765_v4 }
 0x43e   : > { %11161 = vmatpush3.bf16.msra.mxu0 %v11493_v58  ;;  %v11550_v58 = vld [vmem:[%s12871_s20 + $0x40] ss:$8 sps:$4 sm:$0xff]  }
 0x43f   : > { %11162 = vmatprep.subr.bf16.mxu0 %v12765_v4 }
 0x440   : > { %11181 = vmatpush3.bf16.msra.mxu1 %v11494_v59  ;;  %v11552_v59 = vld [vmem:[%s12871_s20 + $0x44] ss:$8 sps:$4 sm:$0xff]  }
 0x441   : > { %11182 = vmatprep.subr.bf16.mxu1 %v12765_v4 }
 0x442   : > { %11163 = vmatpush3.bf16.msra.mxu0 %v11495_v60  ;;  %v11556_v60 = vld [vmem:[%s12871_s20 + $0x50] ss:$8 sps:$4 sm:$0xff]  }
 0x443   : > { %11164 = vmatprep.subr.bf16.mxu0 %v12765_v4 }
 0x444   : > { %11183 = vmatpush3.bf16.msra.mxu1 %v11496_v62  ;;  %v11558_v62 = vld [vmem:[%s12871_s20 + $0x54] ss:$8 sps:$4 sm:$0xff]  }
 0x445   : > { %11184 = vmatprep.subr.bf16.mxu1 %v12765_v4 }
 0x446   : > { %11165 = vmatpush3.bf16.msra.mxu0 %v11497_v63  ;;  %v11562_v63 = vld [vmem:[%s12871_s20 + $0x60] ss:$8 sps:$4 sm:$0xff]  }
 0x447   : > { %11250 = vmatprep.subr.bf16.mxu0 %v12765_v4 }
 0x448   : > { %11185 = vmatpush3.bf16.msra.mxu1 %v11498_v0  ;;  %v11564_v0 = vld [vmem:[%s12871_s20 + $0x64] ss:$8 sps:$4 sm:$0xff]  }
 0x449   : > { %11167 = vmatmul.mubr.bf16.vlgmr.msra.gmra.mrb[20].mxu0 %v2203_v1  ;;  %11190 = vmatprep.subr.bf16.mxu1 %v12765_v4  ;;  %v11568_v1 = vld [vmem:[%s12871_s20 + $0x70] ss:$8 sps:$4 sm:$0xff]  }
 0x44a   : > { %11252 = vmatprep.mubr.msk.bf16.mxu0 %vm12766_vm0, %v12765_v4 }
 0x44b   : > { %11187 = vmatmul.mubr.bf16.vlgmr.msra.gmra.mrb[28].mxu1 %v13164_v38 }
 0x44c   : > { %11206 = vmatprep.mubr.msk.bf16.mxu1 %vm12766_vm0, %v12765_v4  ;;  %11191 = vmatpush3.bf16.msra.mxu1 %v11499_v2  ;;  %v11570_v2 = vld [vmem:[%s12871_s20 + $0x74] ss:$8 sps:$4 sm:$0xff]  }
 0x44d   : > { %11192 = vmatprep.subr.bf16.mxu1 %v12765_v4 }
 0x450   : > { %11193 = vmatpush3.bf16.msra.mxu1 %v11500_v3  ;;  %v9416_v3 = vld [vmem:[%s12841_s6] ss:$0 sm:$0xff] }
 0x451   : > { %11194 = vmatprep.subr.bf16.mxu1 %v12765_v4 }
 0x454   : > { %11195 = vmatpush3.bf16.msra.mxu1 %v11501_v5 }
 0x455   : > { %11196 = vmatprep.subr.bf16.mxu1 %v12765_v4 }
 0x458   : > { %11197 = vmatpush3.bf16.msra.mxu1 %v11502_v6  ;;  %v9489_v6 = vld [vmem:[%s14266_s18] ss:$0 sm:$0xff]  ;;  %s14280_s18 = sld [smem:[#allocation14_spill]] }
 0x459   : > { %11198 = vmatprep.subr.bf16.mxu1 %v12765_v4 }
 0x45c   : > { %11199 = vmatpush3.bf16.msra.mxu1 %v11503_v7 }
 0x45d   : > { %11200 = vmatprep.subr.bf16.mxu1 %v12765_v4 }
 0x460   : > { %11201 = vmatpush3.bf16.msra.mxu1 %v11504_v8 }
 0x461   : > { %11202 = vmatprep.subr.bf16.mxu1 %v12765_v4 }
 0x464   : > { %11203 = vmatpush3.bf16.msra.mxu1 %v11505_v10 }
 0x465   : > { %11204 = vmatprep.subr.bf16.mxu1 %v12765_v4 }
 0x468   : > { %11205 = vmatpush3.bf16.msra.mxu1 %v11506_v9 }
 0x469   : > { %11210 = vmatprep.subr.bf16.mxu1 %v12765_v4 }
 0x4fc   : > { %v2109_v11 = vpop.f32.mrb[16].mxu0 }
 0x4fd   : > { %v11128_v12 = vpop.f32.mrb[17].mxu0 }
 0x4fe   : > { %v2112_v13 = vpop.f32.mrb[18].mxu0  ;;  %v2197_v14 = vpop.f32.mrb[24].mxu1 }
 0x4ff   : > { %v2198_v15 = vadd.f32 %v2197_v14, %v2109_v11  ;;  %v11129_v16 = vpop.f32.mrb[19].mxu0  ;;  %v11148_v17 = vpop.f32.mrb[25].mxu1 }
 0x500   : > { %v2200_v18 = vpop.f32.mrb[26].mxu1  ;;  %v11525_v16 = vld [vmem:[%s14268_s23 + $0x84] ss:$8 sps:$4 sm:$0xff]   ;;  %v9491_v17 = vld [vmem:[%s14267_s22 + $0x1] sm:$0x1] }
 0x501   : > { %v11149_v19 = vpop.f32.mrb[27].mxu1  ;;  %v11523_v18 = vld [vmem:[%s14268_s23 + $0x80] ss:$8 sps:$4 sm:$0xff]  }
 0x502   : > { %v11531_v19 = vld [vmem:[%s14268_s23 + $0x94] ss:$8 sps:$4 sm:$0xff]  }
 0x51c   : > { %v2303_v20 = vpop.f32.mrb[20].mxu0 }
 0x51d   : > { %v2309_v61 = vadd.f32 %v2303_v20, %v2198_v15  ;;  %v11168_v22 = vpop.f32.mrb[21].mxu0  ;;  %v2767_v15 = vld [vmem:[%s14267_s22] sm:$0x1]  ;;  %v11529_v20 = vld [vmem:[%s14268_s23 + $0x90] ss:$8 sps:$4 sm:$0xff]  }
 0x51e   : > { %v2306_v23 = vpop.f32.mrb[22].mxu0  ;;  %v11543_v22 = vld [vmem:[%s14268_s23 + $0xb4] ss:$8 sps:$4 sm:$0xff]  }
 0x51f   : > { %v2317_v24 = vadd.f32 %v9415_v21, %v2309_v61  ;;  %v11169_v25 = vpop.f32.mrb[23].mxu0  ;;  %v11537_v21 = vld [vmem:[%s14268_s23 + $0xa4] ss:$8 sps:$4 sm:$0xff]   ;;  %v11535_v61 = vld [vmem:[%s14268_s23 + $0xa0] ss:$8 sps:$4 sm:$0xff]  }
 0x520   : > { %v11549_v23 = vld [vmem:[%s14268_s23 + $0xc4] ss:$8 sps:$4 sm:$0xff]   ;;  %v11555_v25 = vld [vmem:[%s14268_s23 + $0xd4] ss:$8 sps:$4 sm:$0xff]  }
 0x521   : > { %v2429_v26 = vmax.f32 %v2317_v24, 0.0  ;;  %v11547_v24 = vld [vmem:[%s14268_s23 + $0xc0] ss:$8 sps:$4 sm:$0xff]  }
 0x523   : > { %v2455_v28 = vpack.c.bf16 %v2429_v26, %v2429_v26  ;;  %v2431_v36 = vrot.slane %v2429_v26, 7  ;;  %v2434_v47 = vrot.slane %v2429_v26, 1  ;;  %v11553_v26 = vld [vmem:[%s14268_s23 + $0xd0] ss:$8 sps:$4 sm:$0xff]  }
 0x525   : > { %11207 = vmatmul.mubr.bf16.vlgmr.msra.gmra.mrb[28].mxu1 %v2455_v28  ;;  %v9460_v38 = vpack.c.bf16 %v2431_v36, %v2431_v36  ;;  %v9487_v48 = vpack.c.bf16 %v2434_v47, %v2434_v47  ;;  %v11559_v28 = vld [vmem:[%s14268_s23 + $0xe0] ss:$8 sps:$4 sm:$0xff]  }
 0x526   : > { %11211 = vmatpush3.bf16.msra.mxu1 %v11507_v27  ;;  %11226 = vmatprep.mubr.msk.bf16.mxu1 %vm12766_vm0, %v12765_v4  ;;  %v11561_v27 = vld [vmem:[%s14268_s23 + $0xe4] ss:$8 sps:$4 sm:$0xff]  }
 0x527   : > { %11212 = vmatprep.subr.bf16.mxu1 %v12765_v4 }
 0x52a   : > { %11213 = vmatpush3.bf16.msra.mxu1 %v11508_v29  ;;  %v11567_v29 = vld [vmem:[%s14268_s23 + $0xf4] ss:$8 sps:$4 sm:$0xff]  }
 0x52b   : > { %11214 = vmatprep.subr.bf16.mxu1 %v12765_v4 }
 0x52e   : > { %11215 = vmatpush3.bf16.msra.mxu1 %v11509_v30  ;;  %v11565_v30 = vld [vmem:[%s14268_s23 + $0xf0] ss:$8 sps:$4 sm:$0xff]  }
 0x52f   : > { %11216 = vmatprep.subr.bf16.mxu1 %v12765_v4 }
 0x532   : > { %11217 = vmatpush3.bf16.msra.mxu1 %v11510_v31  ;;  %v11573_v31 = vld [vmem:[%s14268_s23 + $0x4] ss:$8 sps:$4 sm:$0xff]  }
 0x533   : > { %11218 = vmatprep.subr.bf16.mxu1 %v12765_v4 }
 0x536   : > { %11219 = vmatpush3.bf16.msra.mxu1 %v11511_v32  ;;  %v12767_v32 = vmov 0  }
 0x537   : > { %11220 = vmatprep.subr.bf16.mxu1 %v12765_v4 }
 0x53a   : > { %11221 = vmatpush3.bf16.msra.mxu1 %v11512_v33 }
 0x53b   : > { %11222 = vmatprep.subr.bf16.mxu1 %v12765_v4 }
 0x53e   : > { %11223 = vmatpush3.bf16.msra.mxu1 %v11513_v34  ;;  %v11571_v34 = vld [vmem:[%s14268_s23] ss:$8 sps:$4 sm:$0xff]  }
 0x53f   : > { %11224 = vmatprep.subr.bf16.mxu1 %v12765_v4 }
 0x542   : > { %11225 = vmatpush3.bf16.msra.mxu1 %v11514_v35 }
 0x543   : > { %11230 = vmatprep.subr.bf16.mxu1 %v12765_v4 }
 0x545   : > { %11227 = vmatmul.mubr.msk.bf16.vlgmr.msra.gmra.mrb[28].mxu1 %vm13167_vm9, %v9460_v38 }
 0x546   : > { %11231 = vmatpush3.bf16.msra.mxu1 %v11515_v37  ;;  %11246 = vmatprep.mubr.msk.bf16.mxu1 %vm12766_vm0, %v12765_v4  ;;  %v11576_v37 = vld [vmem:[%s14268_s23 + $0x14] ss:$8 sps:$4 sm:$0xff]  }
 0x547   : > { %11232 = vmatprep.subr.bf16.mxu1 %v12765_v4 }
 0x54a   : > { %11233 = vmatpush3.bf16.msra.mxu1 %v11516_v39 }
 0x54b   : > { %11234 = vmatprep.subr.bf16.mxu1 %v12765_v4 }
 0x54e   : > { %11235 = vmatpush3.bf16.msra.mxu1 %v11517_v40  ;;  %v11574_v40 = vld [vmem:[%s14268_s23 + $0x10] ss:$8 sps:$4 sm:$0xff]  }
 0x54f   : > { %11236 = vmatprep.subr.bf16.mxu1 %v12765_v4 }
 0x552   : > { %11237 = vmatpush3.bf16.msra.mxu1 %v11518_v41  ;;  %v11579_v41 = vld [vmem:[%s14268_s23 + $0x24] ss:$8 sps:$4 sm:$0xff]  }
 0x553   : > { %11238 = vmatprep.subr.bf16.mxu1 %v12765_v4 }
 0x556   : > { %11239 = vmatpush3.bf16.msra.mxu1 %v11519_v42  ;;  %v11577_v42 = vld [vmem:[%s14268_s23 + $0x20] ss:$8 sps:$4 sm:$0xff]  }
 0x557   : > { %11240 = vmatprep.subr.bf16.mxu1 %v12765_v4 }
 0x55a   : > { %11241 = vmatpush3.bf16.msra.mxu1 %v11520_v44 }
 0x55b   : > { %11242 = vmatprep.subr.bf16.mxu1 %v12765_v4 }
 0x55e   : > { %11243 = vmatpush3.bf16.msra.mxu1 %v11521_v45  ;;  %v11582_v45 = vld [vmem:[%s14268_s23 + $0x34] ss:$8 sps:$4 sm:$0xff]  }
 0x55f   : > { %11244 = vmatprep.subr.bf16.mxu1 %v12765_v4 }
 0x562   : > { %11245 = vmatpush3.bf16.msra.mxu1 %v11522_v46 }
 0x563   : > { %3405 = vmatprep.subr.bf16.mxu1 %v11528_v50  ;;  %v11585_v50 = vld [vmem:[%s14268_s23 + $0x44] ss:$8 sps:$4 sm:$0xff]  }
 0x565   : > { %11247 = vmatmul.mubr.msk.bf16.vlgmr.msra.gmra.mrb[28].mxu1 %vm9486_vm11, %v9487_v48 }
 0x566   : > { %3406 = vmatpush1.bf16.msra.mxu1 %v11526_v49  ;;  %3437 = vmatprep.mubr.bf16.mxu1 %v12767_v32  ;;  %v11580_v49 = vld [vmem:[%s14268_s23 + $0x30] ss:$8 sps:$4 sm:$0xff]  }
 0x567   : > { %3407 = vmatprep.subr.bf16.mxu1 %v11534_v53  ;;  %v11588_v53 = vld [vmem:[%s14268_s23 + $0x54] ss:$8 sps:$4 sm:$0xff]  }
 0x56a   : > { %3408 = vmatpush1.bf16.msra.mxu1 %v11532_v51  ;;  %v11583_v51 = vld [vmem:[%s14268_s23 + $0x40] ss:$8 sps:$4 sm:$0xff]  }
 0x56b   : > { %3409 = vmatprep.subr.bf16.mxu1 %v11540_v54  ;;  %v11591_v54 = vld [vmem:[%s14268_s23 + $0x64] ss:$8 sps:$4 sm:$0xff]  }
 0x56e   : > { %3410 = vmatpush1.bf16.msra.mxu1 %v11538_v55  ;;  %v11586_v55 = vld [vmem:[%s14268_s23 + $0x50] ss:$8 sps:$4 sm:$0xff]  }
 0x56f   : > { %3411 = vmatprep.subr.bf16.mxu1 %v11546_v57  ;;  %v11594_v57 = vld [vmem:[%s14268_s23 + $0x74] ss:$8 sps:$4 sm:$0xff]  }
 0x572   : > { %3412 = vmatpush1.bf16.msra.mxu1 %v11544_v56  ;;  %v11589_v56 = vld [vmem:[%s14268_s23 + $0x60] ss:$8 sps:$4 sm:$0xff]  }
 0x573   : > { %3413 = vmatprep.subr.bf16.mxu1 %v11552_v59  ;;  %v11592_v59 = vld [vmem:[%s14268_s23 + $0x70] ss:$8 sps:$4 sm:$0xff]  }
 0x576   : > { %3414 = vmatpush1.bf16.msra.mxu1 %v11550_v58 }
 0x577   : > { %3415 = vmatprep.subr.bf16.mxu1 %v11558_v62 }
 0x57a   : > { %3416 = vmatpush1.bf16.msra.mxu1 %v11556_v60  ;;  %v11597_v60 = vld [vmem:[%s14268_s23 + $0x104] ss:$8 sps:$4 sm:$0xff]  }
 0x57b   : > { %3417 = vmatprep.subr.bf16.mxu1 %v11564_v0  ;;  %v11600_v0 = vld [vmem:[%s14268_s23 + $0x114] ss:$8 sps:$4 sm:$0xff]  }
 0x57e   : > { %3418 = vmatpush1.bf16.msra.mxu1 %v11562_v63  ;;  %v11595_v63 = vld [vmem:[%s14268_s23 + $0x100] ss:$8 sps:$4 sm:$0xff]  }
 0x57f   : > { %3419 = vmatprep.subr.bf16.mxu1 %v11570_v2  ;;  %v11603_v2 = vld [vmem:[%s14268_s23 + $0x124] ss:$8 sps:$4 sm:$0xff]  }
 0x582   : > { %3420 = vmatpush1.bf16.msra.mxu1 %v11568_v1  ;;  %v11598_v1 = vld [vmem:[%s14268_s23 + $0x110] ss:$8 sps:$4 sm:$0xff]  }
 0x638   : > { %v2749_v5 = vpop.f32.mrb[28].mxu1 }
 0x639   : > { %v11262_v7 = vadd.f32 %v9416_v3, %v2749_v5  ;;  %v11248_v8 = vpop.f32.mrb[29].mxu1  ;;  %v11601_v3 = vld [vmem:[%s14268_s23 + $0x120] ss:$8 sps:$4 sm:$0xff]   ;;  %v11606_v5 = vld [vmem:[%s14268_s23 + $0x134] ss:$8 sps:$4 sm:$0xff]  }
 0x63a   : > { %v2752_v10 = vpop.f32.mrb[30].mxu1  ;;  %v11607_v8 = vld [vmem:[%s14268_s23 + $0x140] ss:$8 sps:$4 sm:$0xff]  }
 0x63b   : > { %v11263_v9 = vadd.f32 %v11262_v7, %v9489_v6  ;;  %v11249_v11 = vpop.f32.mrb[31].mxu1  ;;  %v11604_v6 = vld [vmem:[%s14268_s23 + $0x130] ss:$8 sps:$4 sm:$0xff]   ;;  %v11609_v7 = vld [vmem:[%s14268_s23 + $0x144] ss:$8 sps:$4 sm:$0xff]  }
 0x63c   : > { %v11612_v10 = vld [vmem:[%s14268_s23 + $0x154] ss:$8 sps:$4 sm:$0xff]   ;;  %v11615_v11 = vld [vmem:[%s14268_s23 + $0x164] ss:$8 sps:$4 sm:$0xff]  }
 0x63d   : > { %v2765_v12 = vmax.f32 %v11263_v9, 0.0  ;;  %v11610_v9 = vld [vmem:[%s14268_s23 + $0x150] ss:$8 sps:$4 sm:$0xff]  }
 0x63f   : > { %v2766_v13 = vpack.c.bf16 %v2765_v12, %v2765_v12  ;;  %v11613_v12 = vld [vmem:[%s14268_s23 + $0x160] ss:$8 sps:$4 sm:$0xff]  }
 0x641   : > { %v2774_v14 = vsel %vm2772_vm12, %v2766_v13, 0  ;;  %v11618_v13 = vld [vmem:[%s14268_s23 + $0x174] ss:$8 sps:$4 sm:$0xff]  }
 0x642   : > { %11251 = vmatpush3.bf16.msra.mxu0 %v2774_v14 }
 0x643   : > { %11256 = vmatprep.subr.bf16.mxu0 %v12765_v4 }
 0x645   : > { %11253 = vmatmul.mubr.msk.bf16.vlgmr.msra.gmra.mrb[24].mxu0 %vm2768_vm13, %v2767_v15 }
 0x646   : > { %11257 = vmatpush3.bf16.msra.mxu0 %v2774_v14  ;;  %11258 = vmatprep.mubr.msk.bf16.mxu0 %vm12766_vm0, %v12765_v4  ;;  %v11541_v4 = vld [vmem:[%s14268_s23 + $0xb0] ss:$8 sps:$4 sm:$0xff]  }
 0x647   : > { %2980 = vmatprep.subr.bf16.mxu0 %v11525_v16  ;;  %v11616_v14 = vld [vmem:[%s14268_s23 + $0x170] ss:$8 sps:$4 sm:$0xff]   ;;  %v11619_v16 = vld [vmem:[%s14269_s26 + $0x100] ss:$8 sps:$4 sm:$0xff]  }
 0x64d   : > { %11259 = vmatmul.mubr.msk.bf16.vlgmr.msra.gmra.mrb[28].mxu0 %vm2768_vm13, %v9491_v17  ;;  %v11621_v17 = vld [vmem:[%s14269_s26 + $0x104] ss:$8 sps:$4 sm:$0xff]  }
 0x64e   : > { %2981 = vmatpush1.bf16.msra.mxu0 %v11523_v18  ;;  %3012 = vmatprep.mubr.bf16.mxu0 %v12767_v32  ;;  %v11624_v18 = vld [vmem:[%s14269_s26 + $0x114] ss:$8 sps:$4 sm:$0xff]  }
 0x64f   : > { %2982 = vmatprep.subr.bf16.mxu0 %v11531_v19  ;;  %3691 = vmatprep.subr.bf16.mxu1 %v11621_v17  ;;  %v11622_v19 = vld [vmem:[%s14269_s26 + $0x110] ss:$8 sps:$4 sm:$0xff]   ;;  %v11672_v17 = vld [vmem:[%s14269_s26 + $0x14] ss:$8 sps:$4 sm:$0xff]  }
 0x652   : > { %2983 = vmatpush1.bf16.msra.mxu0 %v11529_v20  ;;  %v11627_v20 = vld [vmem:[%s14269_s26 + $0x124] ss:$8 sps:$4 sm:$0xff]  }
 0x653   : > { %2984 = vmatprep.subr.bf16.mxu0 %v11537_v21  ;;  %v11625_v21 = vld [vmem:[%s14269_s26 + $0x120] ss:$8 sps:$4 sm:$0xff]  }
 0x656   : > { %2985 = vmatpush1.bf16.msra.mxu0 %v11535_v61  ;;  %v11630_v61 = vld [vmem:[%s14269_s26 + $0x134] ss:$8 sps:$4 sm:$0xff]  }
 0x657   : > { %2986 = vmatprep.subr.bf16.mxu0 %v11543_v22  ;;  %v11628_v22 = vld [vmem:[%s14269_s26 + $0x130] ss:$8 sps:$4 sm:$0xff]  }
 0x65a   : > { %2987 = vmatpush1.bf16.msra.mxu0 %v11541_v4  ;;  %v11633_v4 = vld [vmem:[%s14269_s26 + $0x144] ss:$8 sps:$4 sm:$0xff]  }
 0x65b   : > { %2988 = vmatprep.subr.bf16.mxu0 %v11549_v23  ;;  %v11631_v23 = vld [vmem:[%s14269_s26 + $0x140] ss:$8 sps:$4 sm:$0xff]  }
 0x65e   : > { %2989 = vmatpush1.bf16.msra.mxu0 %v11547_v24  ;;  %v11636_v24 = vld [vmem:[%s14269_s26 + $0x154] ss:$8 sps:$4 sm:$0xff]  }
 0x65f   : > { %2990 = vmatprep.subr.bf16.mxu0 %v11555_v25  ;;  %v11634_v25 = vld [vmem:[%s14269_s26 + $0x150] ss:$8 sps:$4 sm:$0xff]  }
 0x662   : > { %2991 = vmatpush1.bf16.msra.mxu0 %v11553_v26  ;;  %v11639_v26 = vld [vmem:[%s14269_s26 + $0x164] ss:$8 sps:$4 sm:$0xff]  }
 0x663   : > { %2992 = vmatprep.subr.bf16.mxu0 %v11561_v27  ;;  %v11637_v27 = vld [vmem:[%s14269_s26 + $0x160] ss:$8 sps:$4 sm:$0xff]  }
 0x666   : > { %2993 = vmatpush1.bf16.msra.mxu0 %v11559_v28  ;;  %v11640_v28 = vld [vmem:[%s14269_s26 + $0x170] ss:$8 sps:$4 sm:$0xff]  }
 0x667   : > { %2994 = vmatprep.subr.bf16.mxu0 %v11567_v29  ;;  %v11642_v29 = vld [vmem:[%s14269_s26 + $0x174] ss:$8 sps:$4 sm:$0xff]  }
 0x66a   : > { %2995 = vmatpush1.bf16.msra.mxu0 %v11565_v30  ;;  %v11645_v30 = vld [vmem:[%s14269_s26 + $0x184] ss:$8 sps:$4 sm:$0xff]  }
 0x66b   : > { %3101 = vmatprep.subr.bf16.mxu0 %v11573_v31  ;;  %v11643_v31 = vld [vmem:[%s14269_s26 + $0x180] ss:$8 sps:$4 sm:$0xff]  }
 0x718   : > { %v2810_v33 = vpop.f32.mrb[24].mxu0 }
 0x719   : > { %v2882_v35 = vpack.c.bf16 %v2810_v33, %v2810_v33  ;;  %v11254_v36 = vpop.f32.mrb[25].mxu0  ;;  %v11648_v33 = vld [vmem:[%s14269_s26 + $0x194] ss:$8 sps:$4 sm:$0xff]  }
 0x71a   : > { %v2813_v38 = vpop.f32.mrb[26].mxu0  ;;  %v11649_v36 = vld [vmem:[%s14269_s26 + $0x1a0] ss:$8 sps:$4 sm:$0xff]  }
 0x71b   : > { %v11255_v39 = vpop.f32.mrb[27].mxu0  ;;  %3013 = vmatmul.mubr.bf16.vlgmr.msra.gmra.mrb[32].mxu0 %v2882_v35  ;;  %3438 = vmatmul.mubr.bf16.vlgmr.msra.gmra.mrb[32].mxu1 %v2882_v35  ;;  %v11651_v35 = vld [vmem:[%s14269_s26 + $0x1a4] ss:$8 sps:$4 sm:$0xff]   ;;  %v11652_v38 = vld [vmem:[%s14269_s26 + $0x1b0] ss:$8 sps:$4 sm:$0xff]  }
 0x71c   : > { %3102 = vmatpush1.bf16.msra.mxu0 %v11571_v34  ;;  %3133 = vmatprep.mubr.bf16.mxu0 %v12767_v32  ;;  %v11646_v34 = vld [vmem:[%s14269_s26 + $0x190] ss:$8 sps:$4 sm:$0xff]   ;;  %v11657_v39 = vld [vmem:[%s14269_s26 + $0x1c4] ss:$8 sps:$4 sm:$0xff]  }
 0x71d   : > { %3103 = vmatprep.subr.bf16.mxu0 %v11576_v37  ;;  %3692 = vmatpush1.bf16.msra.mxu1 %v11619_v16  ;;  %v11654_v37 = vld [vmem:[%s14269_s26 + $0x1b4] ss:$8 sps:$4 sm:$0xff]  }
 0x71e   : > { %3693 = vmatprep.subr.bf16.mxu1 %v11624_v18 }
 0x720   : > { %3104 = vmatpush1.bf16.msra.mxu0 %v11574_v40  ;;  %v13318_v44 = vpop.f32.mrb[28].mxu0  ;;  %v11655_v40 = vld [vmem:[%s14269_s26 + $0x1c0] ss:$8 sps:$4 sm:$0xff]  }
 0x721   : > { %3105 = vmatprep.subr.bf16.mxu0 %v11579_v41  ;;  %v11260_v46 = vpop.f32.mrb[29].mxu0  ;;  %v2862_v58 = vrot.slane %v13318_v44, 7  ;;  %v3142_v15 = vpack.c.bf16 %v13318_v44, %v13318_v44  ;;  %3694 = vmatpush1.bf16.msra.mxu1 %v11622_v19  ;;  %v11660_v41 = vld [vmem:[%s14269_s26 + $0x1d4] ss:$8 sps:$4 sm:$0xff]   ;;  %v11663_v44 = vld [vmem:[%s14269_s26 + $0x1e4] ss:$8 sps:$4 sm:$0xff]  }
 0x722   : > { %v2858_v47 = vpop.f32.mrb[30].mxu0  ;;  %3695 = vmatprep.subr.bf16.mxu1 %v11627_v20  ;;  %v11666_v46 = vld [vmem:[%s14269_s26 + $0x1f4] ss:$8 sps:$4 sm:$0xff]   ;;  %v11670_v19 = vld [vmem:[%s14269_s26 + $0x10] ss:$8 sps:$4 sm:$0xff]  }
 0x723   : > { %v11261_v48 = vpop.f32.mrb[31].mxu0  ;;  %v9544_v62 = vpack.c.bf16 %v2862_v58, %v2862_v58  ;;  %v11664_v47 = vld [vmem:[%s14269_s26 + $0x1f0] ss:$8 sps:$4 sm:$0xff]   ;;  %v11675_v20 = vld [vmem:[%s14269_s26 + $0x24] ss:$8 sps:$4 sm:$0xff]  }
 0x724   : > { %3106 = vmatpush1.bf16.msra.mxu0 %v11577_v42  ;;  %v11658_v42 = vld [vmem:[%s14269_s26 + $0x1d0] ss:$8 sps:$4 sm:$0xff]   ;;  %v11669_v48 = vld [vmem:[%s14269_s26 + $0x4] ss:$8 sps:$4 sm:$0xff]  }
 0x725   : > { %3107 = vmatprep.subr.bf16.mxu0 %v11582_v45  ;;  %3696 = vmatpush1.bf16.msra.mxu1 %v11625_v21  ;;  %v11661_v45 = vld [vmem:[%s14269_s26 + $0x1e0] ss:$8 sps:$4 sm:$0xff]  }
 0x726   : > { %3697 = vmatprep.subr.bf16.mxu1 %v11630_v61  ;;  %v11673_v21 = vld [vmem:[%s14269_s26 + $0x20] ss:$8 sps:$4 sm:$0xff]   ;;  %v11678_v61 = vld [vmem:[%s14269_s26 + $0x34] ss:$8 sps:$4 sm:$0xff]  }
 0x728   : > { %3108 = vmatpush1.bf16.msra.mxu0 %v11580_v49 }
 0x729   : > { %3109 = vmatprep.subr.bf16.mxu0 %v11585_v50  ;;  %3698 = vmatpush1.bf16.msra.mxu1 %v11628_v22  ;;  %v11676_v22 = vld [vmem:[%s14269_s26 + $0x30] ss:$8 sps:$4 sm:$0xff]  }
 0x72a   : > { %3699 = vmatprep.subr.bf16.mxu1 %v11633_v4  ;;  %v11681_v4 = vld [vmem:[%s14269_s26 + $0x44] ss:$8 sps:$4 sm:$0xff]  }
 0x72c   : > { %3110 = vmatpush1.bf16.msra.mxu0 %v11583_v51 }
 0x72d   : > { %3111 = vmatprep.subr.bf16.mxu0 %v11588_v53  ;;  %3700 = vmatpush1.bf16.msra.mxu1 %v11631_v23  ;;  %v11679_v23 = vld [vmem:[%s14269_s26 + $0x40] ss:$8 sps:$4 sm:$0xff]  }
 0x72e   : > { %3701 = vmatprep.subr.bf16.mxu1 %v11636_v24  ;;  %v11684_v24 = vld [vmem:[%s14269_s26 + $0x54] ss:$8 sps:$4 sm:$0xff]  }
 0x730   : > { %3112 = vmatpush1.bf16.msra.mxu0 %v11586_v55 }
 0x731   : > { %3113 = vmatprep.subr.bf16.mxu0 %v11591_v54  ;;  %3702 = vmatpush1.bf16.msra.mxu1 %v11634_v25  ;;  %v11682_v25 = vld [vmem:[%s14269_s26 + $0x50] ss:$8 sps:$4 sm:$0xff]  }
 0x732   : > { %3703 = vmatprep.subr.bf16.mxu1 %v11639_v26  ;;  %v11687_v26 = vld [vmem:[%s14269_s26 + $0x64] ss:$8 sps:$4 sm:$0xff]  }
 0x734   : > { %3114 = vmatpush1.bf16.msra.mxu0 %v11589_v56 }
 0x735   : > { %3115 = vmatprep.subr.bf16.mxu0 %v11594_v57  ;;  %3704 = vmatpush1.bf16.msra.mxu1 %v11637_v27  ;;  %v11685_v27 = vld [vmem:[%s14269_s26 + $0x60] ss:$8 sps:$4 sm:$0xff]  }
 0x736   : > { %3705 = vmatprep.subr.bf16.mxu1 %v11642_v29  ;;  %v11688_v29 = vld [vmem:[%s14269_s26 + $0x70] ss:$8 sps:$4 sm:$0xff]  }
 0x738   : > { %3116 = vmatpush1.bf16.msra.mxu0 %v11592_v59 }
 0x739   : > { %3240 = vmatprep.subr.bf16.mxu0 %v11597_v60  ;;  %3706 = vmatpush1.bf16.msra.mxu1 %v11640_v28  ;;  %v13387_v60 = vsub.s32 0, %v13014_v52  ;;  %v11690_v28 = vld [vmem:[%s14269_s26 + $0x74] ss:$8 sps:$4 sm:$0xff]  }
 0x73a   : > { %3707 = vmatprep.subr.bf16.mxu1 %v11645_v30  ;;  %v11693_v30 = vld [vmem:[%s14269_s26 + $0x84] ss:$8 sps:$4 sm:$0xff]  }
 0x73b   : > { %9545 = vmatmul.mubr.msk.bf16.vlgmr.msra.gmra.mrb[36].mxu0 %vm13167_vm9, %v9544_v62  ;;  %v3283_v62 = vld [vmem:[%s14270_s28] sm:$0x3]  ;;  %s9196_s28 = sshll.u32 %s14282_s16, 3 }
 0x73c   : > { %3241 = vmatpush1.bf16.msra.mxu0 %v11595_v63  ;;  %3272 = vmatprep.mubr.bf16.mxu0 %v12767_v32  ;;  %v13391_v63 = vsub.s32 1, %v13014_v52 }
 0x73d   : > { %3242 = vmatprep.subr.bf16.mxu0 %v11600_v0  ;;  %3708 = vmatpush1.bf16.msra.mxu1 %v11643_v31  ;;  %v3288_v0 = vrot.slane %v3283_v62, %v13387_v60  ;;  %v11691_v31 = vld [vmem:[%s14269_s26 + $0x80] ss:$8 sps:$4 sm:$0xff]  }
 0x73e   : > { %3709 = vmatprep.subr.bf16.mxu1 %v11648_v33  ;;  %v11696_v33 = vld [vmem:[%s14269_s26 + $0x94] ss:$8 sps:$4 sm:$0xff]  }
 0x740   : > { %3243 = vmatpush1.bf16.msra.mxu0 %v11598_v1 }
 0x741   : > { %3244 = vmatprep.subr.bf16.mxu0 %v11603_v2  ;;  %3710 = vmatpush1.bf16.msra.mxu1 %v11646_v34  ;;  %v3292_v2 = vrot.slane %v3283_v62, %v13391_v63  ;;  %v11694_v34 = vld [vmem:[%s14269_s26 + $0x90] ss:$8 sps:$4 sm:$0xff]   ;;  %v11726_v62 = vld [vmem:[%s14269_s26 + $0x234] ss:$8 sps:$4 sm:$0xff]  }
 0x742   : > { %3711 = vmatprep.subr.bf16.mxu1 %v11651_v35  ;;  %v11699_v35 = vld [vmem:[%s14269_s26 + $0xa4] ss:$8 sps:$4 sm:$0xff]  }
 0x744   : > { %3245 = vmatpush1.bf16.msra.mxu0 %v11601_v3 }
 0x745   : > { %3246 = vmatprep.subr.bf16.mxu0 %v11606_v5  ;;  %3712 = vmatpush1.bf16.msra.mxu1 %v11649_v36  ;;  %v11697_v36 = vld [vmem:[%s14269_s26 + $0xa0] ss:$8 sps:$4 sm:$0xff]  }
 0x746   : > { %3713 = vmatprep.subr.bf16.mxu1 %v11654_v37  ;;  %v11702_v37 = vld [vmem:[%s14269_s26 + $0xb4] ss:$8 sps:$4 sm:$0xff]  }
 0x748   : > { %3247 = vmatpush1.bf16.msra.mxu0 %v11604_v6 }
 0x749   : > { %3248 = vmatprep.subr.bf16.mxu0 %v11609_v7  ;;  %3714 = vmatpush1.bf16.msra.mxu1 %v11652_v38  ;;  %v11700_v38 = vld [vmem:[%s14269_s26 + $0xb0] ss:$8 sps:$4 sm:$0xff]  }
 0x74a   : > { %3715 = vmatprep.subr.bf16.mxu1 %v11657_v39  ;;  %v11705_v39 = vld [vmem:[%s14269_s26 + $0xc4] ss:$8 sps:$4 sm:$0xff]  }
 0x74c   : > { %3249 = vmatpush1.bf16.msra.mxu0 %v11607_v8 }
 0x74d   : > { %3250 = vmatprep.subr.bf16.mxu0 %v11612_v10  ;;  %3716 = vmatpush1.bf16.msra.mxu1 %v11655_v40  ;;  %v11703_v40 = vld [vmem:[%s14269_s26 + $0xc0] ss:$8 sps:$4 sm:$0xff]  }
 0x74e   : > { %3717 = vmatprep.subr.bf16.mxu1 %v11660_v41  ;;  %v11708_v41 = vld [vmem:[%s14269_s26 + $0xd4] ss:$8 sps:$4 sm:$0xff]  }
 0x750   : > { %3251 = vmatpush1.bf16.msra.mxu0 %v11610_v9 }
 0x751   : > { %3252 = vmatprep.subr.bf16.mxu0 %v11615_v11  ;;  %3718 = vmatpush1.bf16.msra.mxu1 %v11658_v42  ;;  %v11706_v42 = vld [vmem:[%s14269_s26 + $0xd0] ss:$8 sps:$4 sm:$0xff]  }
 0x752   : > { %3719 = vmatprep.subr.bf16.mxu1 %v11663_v44  ;;  %v11711_v44 = vld [vmem:[%s14269_s26 + $0xe4] ss:$8 sps:$4 sm:$0xff]  }
 0x754   : > { %3253 = vmatpush1.bf16.msra.mxu0 %v11613_v12 }
 0x755   : > { %3254 = vmatprep.subr.bf16.mxu0 %v11618_v13  ;;  %3720 = vmatpush1.bf16.msra.mxu1 %v11661_v45  ;;  %v11709_v45 = vld [vmem:[%s14269_s26 + $0xe0] ss:$8 sps:$4 sm:$0xff]  }
 0x756   : > { %3721 = vmatprep.subr.bf16.mxu1 %v11666_v46  ;;  %v11714_v46 = vld [vmem:[%s14269_s26 + $0xf4] ss:$8 sps:$4 sm:$0xff]  }
 0x758   : > { %3255 = vmatpush1.bf16.msra.mxu0 %v11616_v14 }
 0x759   : > { %3722 = vmatpush1.bf16.msra.mxu1 %v11664_v47  ;;  %v11712_v47 = vld [vmem:[%s14269_s26 + $0xf0] ss:$8 sps:$4 sm:$0xff]  }
 0x75a   : > { %3892 = vmatprep.subr.bf16.mxu1 %v11669_v48 }
 0x75b   : > { %3273 = vmatmul.mubr.bf16.vlgmr.msra.gmra.mrb[40].mxu0 %v3142_v15  ;;  %v11667_v15 = vld [vmem:[%s14269_s26] ss:$8 sps:$4 sm:$0xff]  }
 0x75c   : > { %4234 = vmatprep.mubr.bf16.mxu0 %v12767_v32 }
 0x7ee   : > { %v3014_v49 = vpop.f32.mrb[32].mxu0 }
 0x7ef   : > { %v3016_v50 = vpop.f32.mrb[33].mxu0 }
 0x7f0   : > { %v3018_v51 = vpop.f32.mrb[34].mxu0 }
 0x7f1   : > { %v3019_v53 = vpop.f32.mrb[35].mxu0  ;;  %v11715_v51 = vld [vmem:[%s14269_s26 + $0x200] ss:$8 sps:$4 sm:$0xff]  }
 0x80e   : > { %v3135_v55 = vpop.f32.mrb[36].mxu0 }
 0x80f   : > { %v3136_v54 = vadd.f32 %v3135_v55, %v3014_v49  ;;  %v3137_v56 = vpop.f32.mrb[37].mxu0  ;;  %v11717_v49 = vld [vmem:[%s14269_s26 + $0x204] ss:$8 sps:$4 sm:$0xff]   ;;  %v3313_v55 = vld [vmem:[%s14274_s2] sm:$0x3]  ;;  %s930_s2 = scalar_lea.vmem %s12924_s12, %s9196_s28 }
 0x810   : > { %v3138_v57 = vadd.f32 %v3137_v56, %v3016_v50  ;;  %v3139_v58 = vpop.f32.mrb[38].mxu0 }
 0x811   : > { %v3140_v59 = vpop.f32.mrb[39].mxu0  ;;  %v11723_v58 = vld [vmem:[%s14269_s26 + $0x224] ss:$8 sps:$4 sm:$0xff]  }
 0x812   : > { %v11721_v59 = vld [vmem:[%s14269_s26 + $0x220] ss:$8 sps:$4 sm:$0xff]  }
 0x82e   : > { %v3274_v1 = vpop.f32.mrb[40].mxu0 }
 0x82f   : > { %v3281_v3 = vadd.f32 %v3274_v1, %v3136_v54  ;;  %v3276_v5 = vpop.f32.mrb[41].mxu0  ;;  %v11720_v54 = vld [vmem:[%s14269_s26 + $0x214] ss:$8 sps:$4 sm:$0xff]   ;;  %v11727_v1 = vld [vmem:[%s14269_s26 + $0x240] ss:$8 sps:$4 sm:$0xff]  }
 0x830   : > { %v3282_v6 = vadd.f32 %v3276_v5, %v3138_v57  ;;  %v3278_v7 = vpop.f32.mrb[42].mxu0  ;;  %v11718_v57 = vld [vmem:[%s14269_s26 + $0x210] ss:$8 sps:$4 sm:$0xff]   ;;  %v11735_v5 = vld [vmem:[%s14269_s26 + $0x264] ss:$8 sps:$4 sm:$0xff]  }
 0x831   : > { %v3295_v8 = vadd.f32 %v3288_v0, %v3281_v3  ;;  %v3279_v10 = vpop.f32.mrb[43].mxu0  ;;  %v11729_v0 = vld [vmem:[%s14269_s26 + $0x244] ss:$8 sps:$4 sm:$0xff]   ;;  %v11730_v3 = vld [vmem:[%s14269_s26 + $0x250] ss:$8 sps:$4 sm:$0xff]  }
 0x832   : > { %v3296_v9 = vadd.f32 %v3292_v2, %v3282_v6  ;;  %v11732_v2 = vld [vmem:[%s14269_s26 + $0x254] ss:$8 sps:$4 sm:$0xff]   ;;  %v11733_v6 = vld [vmem:[%s14269_s26 + $0x260] ss:$8 sps:$4 sm:$0xff]   ;;  %v11741_v10 = vld [vmem:[%s14269_s26 + $0x284] ss:$8 sps:$4 sm:$0xff]  }
 0x833   : > { %v13395_v11 = vmax.f32 %v3295_v8, 0.0  ;;  %v11738_v7 = vld [vmem:[%s14269_s26 + $0x274] ss:$8 sps:$4 sm:$0xff]   ;;  %v11736_v8 = vld [vmem:[%s14269_s26 + $0x270] ss:$8 sps:$4 sm:$0xff]  }
 0x834   : > { %v13397_v12 = vmax.f32 %v3296_v9, 0.0  ;;  %v11739_v9 = vld [vmem:[%s14269_s26 + $0x280] ss:$8 sps:$4 sm:$0xff]  }
 0x835   : > { %v3496_v16 = vpack.c.bf16 %v13395_v11, %v13395_v11  ;;  %v3450_v48 = vrot.slane %v13395_v11, 7 }
 0x836   : > { %v3451_v13 = vrot.slane %v13397_v12, 7  ;;  %v3497_v14 = vpack.c.bf16 %v13397_v12, %v13397_v12  ;;  %v3457_v50 = vrot.slane %v13397_v12, 1  ;;  %v11744_v12 = vld [vmem:[%s14269_s26 + $0x294] ss:$8 sps:$4 sm:$0xff]  }
 0x837   : > { %v9698_v53 = vpack.c.bf16 %v3450_v48, %v3450_v48  ;;  %v11834_v48 = vld [vmem:[%s14273_s1 + $0x544] ss:$16 sps:$4 sm:$0xff]  }
 0x838   : > { %3723 = vmatprep.mubr.bf16.mxu1 %v3497_v14  ;;  %v9693_v18 = vpack.c.bf16 %v3451_v13, %v3451_v13  ;;  %v9765_v56 = vpack.c.bf16 %v3457_v50, %v3457_v50  ;;  %v11742_v13 = vld [vmem:[%s14269_s26 + $0x290] ss:$8 sps:$4 sm:$0xff]   ;;  %v11747_v14 = vld [vmem:[%s14269_s26 + $0x2a4] ss:$8 sps:$4 sm:$0xff]  }
 0x839   : > { %3724 = vmatmul.mubr.bf16.vlgmr.msra.gmra.mrb[32].mxu1 %v3496_v16  ;;  %v11750_v16 = vld [vmem:[%s14269_s26 + $0x2b4] ss:$8 sps:$4 sm:$0xff]  }
 0x83a   : > { %3893 = vmatpush1.bf16.msra.mxu1 %v11667_v15  ;;  %9694 = vmatprep.mubr.msk.bf16.mxu1 %vm13167_vm9, %v9693_v18  ;;  %v11745_v15 = vld [vmem:[%s14269_s26 + $0x2a0] ss:$8 sps:$4 sm:$0xff]   ;;  %v11753_v18 = vld [vmem:[%s14269_s26 + $0x2c4] ss:$8 sps:$4 sm:$0xff]  }
 0x83b   : > { %3894 = vmatprep.subr.bf16.mxu1 %v11672_v17  ;;  %v11748_v17 = vld [vmem:[%s14269_s26 + $0x2b0] ss:$8 sps:$4 sm:$0xff]   ;;  %v11840_v50 = vld [vmem:[%s14273_s1 + $0x564] ss:$16 sps:$4 sm:$0xff]  }
 0x83e   : > { %3895 = vmatpush1.bf16.msra.mxu1 %v11670_v19  ;;  %v11751_v19 = vld [vmem:[%s14269_s26 + $0x2c0] ss:$8 sps:$4 sm:$0xff]  }
 0x83f   : > { %3896 = vmatprep.subr.bf16.mxu1 %v11675_v20  ;;  %v11756_v20 = vld [vmem:[%s14269_s26 + $0x2d4] ss:$8 sps:$4 sm:$0xff]  }
 0x842   : > { %3897 = vmatpush1.bf16.msra.mxu1 %v11673_v21  ;;  %v11754_v21 = vld [vmem:[%s14269_s26 + $0x2d0] ss:$8 sps:$4 sm:$0xff]  }
 0x843   : > { %3898 = vmatprep.subr.bf16.mxu1 %v11678_v61  ;;  %v11759_v61 = vld [vmem:[%s14269_s26 + $0x2e4] ss:$8 sps:$4 sm:$0xff]  }
 0x846   : > { %3899 = vmatpush1.bf16.msra.mxu1 %v11676_v22  ;;  %v11757_v22 = vld [vmem:[%s14269_s26 + $0x2e0] ss:$8 sps:$4 sm:$0xff]  }
 0x847   : > { %3900 = vmatprep.subr.bf16.mxu1 %v11681_v4  ;;  %v11762_v4 = vld [vmem:[%s14269_s26 + $0x2f4] ss:$8 sps:$4 sm:$0xff]  }
 0x84a   : > { %3901 = vmatpush1.bf16.msra.mxu1 %v11679_v23  ;;  %v11760_v23 = vld [vmem:[%s14269_s26 + $0x2f0] ss:$8 sps:$4 sm:$0xff]  }
 0x84b   : > { %3902 = vmatprep.subr.bf16.mxu1 %v11684_v24  ;;  %v3456_v24 = vrot.slane %v13395_v11, 1  ;;  %v11784_v11 = vld [vmem:[%s14273_s1 + $0x440] ss:$16 sps:$4 sm:$0xff]  }
 0x84e   : > { %3903 = vmatpush1.bf16.msra.mxu1 %v11682_v25  ;;  %v9768_v25 = vpack.c.bf16 %v3456_v24, %v3456_v24  ;;  %v11787_v24 = vld [vmem:[%s14273_s1 + $0x2a0] ss:$16 sps:$4 sm:$0xff]  }
 0x84f   : > { %3904 = vmatprep.subr.bf16.mxu1 %v11687_v26  ;;  %v11772_v26 = vld [vmem:[%s14273_s1 + $0x400] ss:$16 sps:$4 sm:$0xff]  }
 0x852   : > { %3905 = vmatpush1.bf16.msra.mxu1 %v11685_v27  ;;  %v11774_v27 = vld [vmem:[%s14273_s1 + $0x404] ss:$16 sps:$4 sm:$0xff]  }
 0x853   : > { %3906 = vmatprep.subr.bf16.mxu1 %v11690_v28  ;;  %v11778_v28 = vld [vmem:[%s14273_s1 + $0x420] ss:$16 sps:$4 sm:$0xff]  }
 0x856   : > { %3907 = vmatpush1.bf16.msra.mxu1 %v11688_v29  ;;  %v11780_v29 = vld [vmem:[%s14273_s1 + $0x424] ss:$16 sps:$4 sm:$0xff]  }
 0x857   : > { %3908 = vmatprep.subr.bf16.mxu1 %v11693_v30  ;;  %v11786_v30 = vld [vmem:[%s14273_s1 + $0x444] ss:$16 sps:$4 sm:$0xff]  }
 0x85a   : > { %3909 = vmatpush1.bf16.msra.mxu1 %v11691_v31  ;;  %v11790_v31 = vld [vmem:[%s14273_s1 + $0x460] ss:$16 sps:$4 sm:$0xff]  }
 0x85b   : > { %3910 = vmatprep.subr.bf16.mxu1 %v11696_v33  ;;  %v11792_v33 = vld [vmem:[%s14273_s1 + $0x464] ss:$16 sps:$4 sm:$0xff]  }
 0x85e   : > { %3911 = vmatpush1.bf16.msra.mxu1 %v11694_v34  ;;  %v11796_v34 = vld [vmem:[%s14273_s1 + $0x480] ss:$16 sps:$4 sm:$0xff]  }
 0x85f   : > { %3912 = vmatprep.subr.bf16.mxu1 %v11699_v35  ;;  %v11798_v35 = vld [vmem:[%s14273_s1 + $0x484] ss:$16 sps:$4 sm:$0xff]  }
 0x862   : > { %3913 = vmatpush1.bf16.msra.mxu1 %v11697_v36  ;;  %v11802_v36 = vld [vmem:[%s14273_s1 + $0x4a0] ss:$16 sps:$4 sm:$0xff]  }
 0x863   : > { %3914 = vmatprep.subr.bf16.mxu1 %v11702_v37  ;;  %v11804_v37 = vld [vmem:[%s14273_s1 + $0x4a4] ss:$16 sps:$4 sm:$0xff]  }
 0x866   : > { %3915 = vmatpush1.bf16.msra.mxu1 %v11700_v38  ;;  %v11808_v38 = vld [vmem:[%s14273_s1 + $0x4c0] ss:$16 sps:$4 sm:$0xff]  }
 0x867   : > { %3916 = vmatprep.subr.bf16.mxu1 %v11705_v39  ;;  %v11810_v39 = vld [vmem:[%s14273_s1 + $0x4c4] ss:$16 sps:$4 sm:$0xff]  }
 0x86a   : > { %3917 = vmatpush1.bf16.msra.mxu1 %v11703_v40  ;;  %v11814_v40 = vld [vmem:[%s14273_s1 + $0x4e0] ss:$16 sps:$4 sm:$0xff]  }
 0x86b   : > { %3918 = vmatprep.subr.bf16.mxu1 %v11708_v41  ;;  %v11816_v41 = vld [vmem:[%s14273_s1 + $0x4e4] ss:$16 sps:$4 sm:$0xff]  }
 0x86e   : > { %3919 = vmatpush1.bf16.msra.mxu1 %v11706_v42  ;;  %v11820_v42 = vld [vmem:[%s14273_s1 + $0x500] ss:$16 sps:$4 sm:$0xff]  }
 0x86f   : > { %3920 = vmatprep.subr.bf16.mxu1 %v11711_v44  ;;  %v11822_v44 = vld [vmem:[%s14273_s1 + $0x504] ss:$16 sps:$4 sm:$0xff]  }
 0x872   : > { %3921 = vmatpush1.bf16.msra.mxu1 %v11709_v45  ;;  %v11826_v45 = vld [vmem:[%s14273_s1 + $0x520] ss:$16 sps:$4 sm:$0xff]  }
 0x873   : > { %3922 = vmatprep.subr.bf16.mxu1 %v11714_v46  ;;  %v11828_v46 = vld [vmem:[%s14273_s1 + $0x524] ss:$16 sps:$4 sm:$0xff]  }
 0x876   : > { %3923 = vmatpush1.bf16.msra.mxu1 %v11712_v47  ;;  %v11832_v47 = vld [vmem:[%s14273_s1 + $0x540] ss:$16 sps:$4 sm:$0xff]  }
 0x877   : > { %4128 = vmatprep.subr.bf16.mxu1 %v11717_v49  ;;  %v11838_v49 = vld [vmem:[%s14273_s1 + $0x560] ss:$16 sps:$4 sm:$0xff]  }
 0x879   : > { %9699 = vmatmul.mubr.msk.bf16.vlgmr.msra.gmra.mrb[32].mxu1 %vm13167_vm9, %v9698_v53  ;;  %v11846_v53 = vld [vmem:[%s14273_s1 + $0x584] ss:$16 sps:$4 sm:$0xff]  }
 0x87a   : > { %4129 = vmatpush1.bf16.msra.mxu1 %v11715_v51  ;;  %9766 = vmatprep.mubr.msk.bf16.mxu1 %vm13443_vm14, %v9765_v56  ;;  %v11844_v51 = vld [vmem:[%s14273_s1 + $0x580] ss:$16 sps:$4 sm:$0xff]   ;;  %v3318_v56 = vrot.slane %v3313_v55, %v13387_v60 }
 0x87b   : > { %4130 = vmatprep.subr.bf16.mxu1 %v11720_v54  ;;  %v4171_v54 = vld [vmem:[%s14275_s10] sm:$0x3] }
 0x87e   : > { %4131 = vmatpush1.bf16.msra.mxu1 %v11718_v57  ;;  %v3322_v57 = vrot.slane %v3313_v55, %v13391_v63  ;;  %v11870_v55 = vld [vmem:[%s14277_s11 + $0x4] ss:$16 sps:$4 sm:$0xff]  }
 0x87f   : > { %4132 = vmatprep.subr.bf16.mxu1 %v11723_v58  ;;  %v4176_v58 = vrot.slane %v4171_v54, %v13387_v60 }
 0x882   : > { %4133 = vmatpush1.bf16.msra.mxu1 %v11721_v59 }
 0x883   : > { %4134 = vmatprep.subr.bf16.mxu1 %v11726_v62  ;;  %v4180_v62 = vrot.slane %v4171_v54, %v13391_v63 }
 0x886   : > { %4135 = vmatpush1.bf16.msra.mxu1 %v11724_v43 }
 0x887   : > { %4136 = vmatprep.subr.bf16.mxu1 %v11729_v0 }
 0x88a   : > { %4137 = vmatpush1.bf16.msra.mxu1 %v11727_v1 }
 0x88b   : > { %4138 = vmatprep.subr.bf16.mxu1 %v11732_v2 }
 0x88e   : > { %4139 = vmatpush1.bf16.msra.mxu1 %v11730_v3 }
 0x88f   : > { %4140 = vmatprep.subr.bf16.mxu1 %v11735_v5 }
 0x892   : > { %4141 = vmatpush1.bf16.msra.mxu1 %v11733_v6 }
 0x893   : > { %4142 = vmatprep.subr.bf16.mxu1 %v11738_v7 }
 0x896   : > { %4143 = vmatpush1.bf16.msra.mxu1 %v11736_v8 }
 0x897   : > { %4144 = vmatprep.subr.bf16.mxu1 %v11741_v10 }
 0x89a   : > { %4145 = vmatpush1.bf16.msra.mxu1 %v11739_v9 }
 0x89b   : > { %4146 = vmatprep.subr.bf16.mxu1 %v11744_v12 }
 0x89e   : > { %4147 = vmatpush1.bf16.msra.mxu1 %v11742_v13  ;;  %v4191_v13 = vld [vmem:[%s14276_s7] sm:$0x1] }
 0x89f   : > { %4148 = vmatprep.subr.bf16.mxu1 %v11747_v14  ;;  %v11765_v14 = vld [vmem:[%s14273_s1 + $0x204] ss:$16 sps:$4 sm:$0xff]  }
 0x8a2   : > { %4149 = vmatpush1.bf16.msra.mxu1 %v11745_v15  ;;  %v9772_v15 = vld [vmem:[%s14276_s7 + $0x1] sm:$0x1] }
 0x8a3   : > { %4150 = vmatprep.subr.bf16.mxu1 %v11750_v16  ;;  %v11763_v16 = vld [vmem:[%s14273_s1 + $0x200] ss:$16 sps:$4 sm:$0xff]  }
 0x8a6   : > { %4151 = vmatpush1.bf16.msra.mxu1 %v11748_v17  ;;  %v11768_v17 = vld [vmem:[%s14273_s1 + $0x224] ss:$16 sps:$4 sm:$0xff]  }
 0x8a7   : > { %4152 = vmatprep.subr.bf16.mxu1 %v11753_v18  ;;  %v11766_v18 = vld [vmem:[%s14273_s1 + $0x220] ss:$16 sps:$4 sm:$0xff]  }
 0x8aa   : > { %4153 = vmatpush1.bf16.msra.mxu1 %v11751_v19  ;;  %v11771_v19 = vld [vmem:[%s14273_s1 + $0x244] ss:$16 sps:$4 sm:$0xff]  }
 0x8ab   : > { %4154 = vmatprep.subr.bf16.mxu1 %v11756_v20  ;;  %v11769_v20 = vld [vmem:[%s14273_s1 + $0x240] ss:$16 sps:$4 sm:$0xff]  }
 0x8ae   : > { %4155 = vmatpush1.bf16.msra.mxu1 %v11754_v21  ;;  %v11777_v21 = vld [vmem:[%s14273_s1 + $0x264] ss:$16 sps:$4 sm:$0xff]  }
 0x8af   : > { %4156 = vmatprep.subr.bf16.mxu1 %v11759_v61  ;;  %v11775_v61 = vld [vmem:[%s14273_s1 + $0x260] ss:$16 sps:$4 sm:$0xff]  }
 0x8b2   : > { %4157 = vmatpush1.bf16.msra.mxu1 %v11757_v22  ;;  %v11783_v22 = vld [vmem:[%s14273_s1 + $0x284] ss:$16 sps:$4 sm:$0xff]  }
 0x8b3   : > { %4158 = vmatprep.subr.bf16.mxu1 %v11762_v4  ;;  %v11781_v4 = vld [vmem:[%s14273_s1 + $0x280] ss:$16 sps:$4 sm:$0xff]  }
 0x8b6   : > { %4159 = vmatpush1.bf16.msra.mxu1 %v11760_v23  ;;  %v11789_v23 = vld [vmem:[%s14273_s1 + $0x2a4] ss:$16 sps:$4 sm:$0xff]  }
 0x8b7   : > { %5611 = vmatprep.subr.bf16.mxu1 %v11774_v27  ;;  %v11801_v27 = vld [vmem:[%s14273_s1 + $0x2e4] ss:$16 sps:$4 sm:$0xff]  }
 0x8b9   : > { %9769 = vmatmul.mubr.msk.bf16.vlgmr.msra.gmra.mrb[32].mxu1 %vm13443_vm14, %v9768_v25  ;;  %v11795_v25 = vld [vmem:[%s14273_s1 + $0x2c4] ss:$16 sps:$4 sm:$0xff]  }
 0x8ba   : > { %5612 = vmatpush1.bf16.msra.mxu1 %v11772_v26  ;;  %v11793_v26 = vld [vmem:[%s14273_s1 + $0x2c0] ss:$16 sps:$4 sm:$0xff]  }
 0x8bb   : > { %5613 = vmatprep.subr.bf16.mxu1 %v11780_v29  ;;  %v11807_v29 = vld [vmem:[%s14273_s1 + $0x304] ss:$16 sps:$4 sm:$0xff]  }
 0x8be   : > { %5614 = vmatpush1.bf16.msra.mxu1 %v11778_v28  ;;  %v11799_v28 = vld [vmem:[%s14273_s1 + $0x2e0] ss:$16 sps:$4 sm:$0xff]  }
 0x8bf   : > { %5615 = vmatprep.subr.bf16.mxu1 %v11786_v30  ;;  %v11813_v30 = vld [vmem:[%s14273_s1 + $0x324] ss:$16 sps:$4 sm:$0xff]  }
 0x8c2   : > { %5616 = vmatpush1.bf16.msra.mxu1 %v11784_v11  ;;  %v11805_v11 = vld [vmem:[%s14273_s1 + $0x300] ss:$16 sps:$4 sm:$0xff]  }
 0x8c3   : > { %5617 = vmatprep.subr.bf16.mxu1 %v11792_v33  ;;  %v11819_v33 = vld [vmem:[%s14273_s1 + $0x344] ss:$16 sps:$4 sm:$0xff]  }
 0x8c6   : > { %5618 = vmatpush1.bf16.msra.mxu1 %v11790_v31  ;;  %v11811_v31 = vld [vmem:[%s14273_s1 + $0x320] ss:$16 sps:$4 sm:$0xff]  }
 0x8c7   : > { %5619 = vmatprep.subr.bf16.mxu1 %v11798_v35  ;;  %v11825_v35 = vld [vmem:[%s14273_s1 + $0x364] ss:$16 sps:$4 sm:$0xff]  }
 0x8ca   : > { %5620 = vmatpush1.bf16.msra.mxu1 %v11796_v34  ;;  %v11817_v34 = vld [vmem:[%s14273_s1 + $0x340] ss:$16 sps:$4 sm:$0xff]  }
 0x8cb   : > { %5621 = vmatprep.subr.bf16.mxu1 %v11804_v37  ;;  %v11831_v37 = vld [vmem:[%s14273_s1 + $0x384] ss:$16 sps:$4 sm:$0xff]  }
 0x8ce   : > { %5622 = vmatpush1.bf16.msra.mxu1 %v11802_v36  ;;  %v11823_v36 = vld [vmem:[%s14273_s1 + $0x360] ss:$16 sps:$4 sm:$0xff]  }
 0x8cf   : > { %5623 = vmatprep.subr.bf16.mxu1 %v11810_v39  ;;  %v11837_v39 = vld [vmem:[%s14273_s1 + $0x3a4] ss:$16 sps:$4 sm:$0xff]  }
 0x8d2   : > { %5624 = vmatpush1.bf16.msra.mxu1 %v11808_v38  ;;  %v11829_v38 = vld [vmem:[%s14273_s1 + $0x380] ss:$16 sps:$4 sm:$0xff]  }
 0x8d3   : > { %5625 = vmatprep.subr.bf16.mxu1 %v11816_v41  ;;  %v11843_v41 = vld [vmem:[%s14273_s1 + $0x3c4] ss:$16 sps:$4 sm:$0xff]  }
 0x8d6   : > { %5626 = vmatpush1.bf16.msra.mxu1 %v11814_v40  ;;  %v11835_v40 = vld [vmem:[%s14273_s1 + $0x3a0] ss:$16 sps:$4 sm:$0xff]  }
 0x8d7   : > { %5627 = vmatprep.subr.bf16.mxu1 %v11822_v44  ;;  %v11849_v44 = vld [vmem:[%s14273_s1 + $0x3e4] ss:$16 sps:$4 sm:$0xff]  }
 0x8da   : > { %5628 = vmatpush1.bf16.msra.mxu1 %v11820_v42  ;;  %v11841_v42 = vld [vmem:[%s14273_s1 + $0x3c0] ss:$16 sps:$4 sm:$0xff]  }
 0x8db   : > { %5629 = vmatprep.subr.bf16.mxu1 %v11828_v46  ;;  %v11847_v46 = vld [vmem:[%s14273_s1 + $0x3e0] ss:$16 sps:$4 sm:$0xff]  }
 0x8de   : > { %5630 = vmatpush1.bf16.msra.mxu1 %v11826_v45  ;;  %v11852_v45 = vld [vmem:[%s14273_s1 + $0x5a4] ss:$16 sps:$4 sm:$0xff]  }
 0x8df   : > { %5631 = vmatprep.subr.bf16.mxu1 %v11834_v48  ;;  %v11855_v48 = vld [vmem:[%s14273_s1 + $0x20c] ss:$16 sps:$4 sm:$0xff]  }
 0x8e2   : > { %5632 = vmatpush1.bf16.msra.mxu1 %v11832_v47  ;;  %v11850_v47 = vld [vmem:[%s14273_s1 + $0x5a0] ss:$16 sps:$4 sm:$0xff]  }
 0x8e3   : > { %5633 = vmatprep.subr.bf16.mxu1 %v11840_v50  ;;  %v11856_v50 = vld [vmem:[%s14273_s1 + $0x5c0] ss:$16 sps:$4 sm:$0xff]  }
 0x8e6   : > { %5634 = vmatpush1.bf16.msra.mxu1 %v11838_v49  ;;  %v11858_v49 = vld [vmem:[%s14273_s1 + $0x5c4] ss:$16 sps:$4 sm:$0xff]  }
 0x8e7   : > { %5635 = vmatprep.subr.bf16.mxu1 %v11846_v53  ;;  %v11862_v53 = vld [vmem:[%s14273_s1 + $0x5e0] ss:$16 sps:$4 sm:$0xff]  }
 0x8ea   : > { %5636 = vmatpush1.bf16.msra.mxu1 %v11844_v51  ;;  %v11864_v51 = vld [vmem:[%s14273_s1 + $0x5e4] ss:$16 sps:$4 sm:$0xff]  }
 0x8eb   : > { %5637 = vmatprep.subr.bf16.mxu1 %v11852_v45  ;;  %v11924_v45 = vld [vmem:[%s14277_s11 + $0x124] ss:$16 sps:$4 sm:$0xff]  }
 0x8ee   : > { %5638 = vmatpush1.bf16.msra.mxu1 %v11850_v47  ;;  %v11922_v47 = vld [vmem:[%s14277_s11 + $0x120] ss:$16 sps:$4 sm:$0xff]  }
 0x8ef   : > { %5639 = vmatprep.subr.bf16.mxu1 %v11858_v49  ;;  %v11930_v49 = vld [vmem:[%s14277_s11 + $0x144] ss:$16 sps:$4 sm:$0xff]  }
 0x8f2   : > { %5640 = vmatpush1.bf16.msra.mxu1 %v11856_v50  ;;  %v11925_v50 = vld [vmem:[%s14273_s1 + $0x388] ss:$16 sps:$4 sm:$0xff]  }
 0x8f3   : > { %5641 = vmatprep.subr.bf16.mxu1 %v11864_v51  ;;  %v11928_v51 = vld [vmem:[%s14277_s11 + $0x140] ss:$16 sps:$4 sm:$0xff]  }
 0x8f6   : > { %5642 = vmatpush1.bf16.msra.mxu1 %v11862_v53  ;;  %v11933_v53 = vld [vmem:[%s14273_s1 + $0x3ac] ss:$16 sps:$4 sm:$0xff]  }
 0x8f7   : > { %6129 = vmatprep.subr.bf16.mxu1 %v11870_v55  ;;  %v11936_v55 = vld [vmem:[%s14277_s11 + $0x164] ss:$16 sps:$4 sm:$0xff]  }
 0x98c   : > { %v4162_v59 = vpop.f32.mrb[32].mxu1 }
 0x98d   : > { %v11264_v43 = vadd.f32 %v4162_v59, %v3318_v56  ;;  %v4164_v0 = vpop.f32.mrb[33].mxu1  ;;  %v11853_v59 = vld [vmem:[%s14273_s1 + $0x208] ss:$16 sps:$4 sm:$0xff]  }
 0x98e   : > { %v11266_v1 = vadd.f32 %v4164_v0, %v3322_v57  ;;  %v4166_v2 = vpop.f32.mrb[34].mxu1  ;;  %v11861_v0 = vld [vmem:[%s14273_s1 + $0x22c] ss:$16 sps:$4 sm:$0xff]  }
 0x98f   : > { %v11265_v3 = vadd.f32 %v11264_v43, %v4176_v58  ;;  %v4167_v5 = vpop.f32.mrb[35].mxu1  ;;  %v11867_v2 = vld [vmem:[%s14273_s1 + $0x24c] ss:$16 sps:$4 sm:$0xff]  }
 0x990   : > { %v11267_v6 = vadd.f32 %v11266_v1, %v4180_v62  ;;  %v11859_v1 = vld [vmem:[%s14273_s1 + $0x228] ss:$16 sps:$4 sm:$0xff]  }
 0x991   : > { %v4187_v7 = vmax.f32 %v11265_v3, 0.0 }
 0x992   : > { %v4188_v8 = vmax.f32 %v11267_v6, 0.0 }
 0x993   : > { %v4189_v10 = vpack.c.bf16 %v4187_v7, %v4187_v7 }
 0x994   : > { %v4190_v9 = vpack.c.bf16 %v4188_v8, %v4188_v8  ;;  %v11865_v8 = vld [vmem:[%s14273_s1 + $0x248] ss:$16 sps:$4 sm:$0xff]  }
 0x995   : > { %v4197_v12 = vsel %vm1990_vm7, %v4189_v10, 0  ;;  %v11868_v10 = vld [vmem:[%s14277_s11] ss:$16 sps:$4 sm:$0xff]  }
 0x996   : > { %9770 = vmatprep.subr.msk.bf16.mxu0 %vm1990_vm7, %v4190_v9 }
 0x997   : > { %4203 = vmatpush1.bf16.msra.mxu0 %v4197_v12 }
 0x998   : > { %9773 = vmatprep.subr.msk.bf16.mxu0 %vm1990_vm7, %v4190_v9 }
 0x99a   : > { %9771 = vmatmul.mubr.msk.bf16.vlgmr.msra.gmra.mrb[44].mxu0 %vm4192_vm15, %v4191_v13 }
 0x99b   : > { %4249 = vmatpush1.bf16.msra.mxu0 %v4197_v12  ;;  %4280 = vmatprep.mubr.bf16.mxu0 %v12767_v32  ;;  %v11873_v12 = vld [vmem:[%s14273_s1 + $0x26c] ss:$16 sps:$4 sm:$0xff]  }
 0x99c   : > { %4740 = vmatprep.subr.bf16.mxu0 %v11765_v14  ;;  %v11876_v14 = vld [vmem:[%s14277_s11 + $0x24] ss:$16 sps:$4 sm:$0xff]  }
 0x9a2   : > { %9774 = vmatmul.mubr.msk.bf16.vlgmr.msra.gmra.mrb[48].mxu0 %vm4192_vm15, %v9772_v15  ;;  %v11871_v15 = vld [vmem:[%s14273_s1 + $0x268] ss:$16 sps:$4 sm:$0xff]  }
 0x9a3   : > { %4741 = vmatpush1.bf16.msra.mxu0 %v11763_v16  ;;  %v11874_v16 = vld [vmem:[%s14277_s11 + $0x20] ss:$16 sps:$4 sm:$0xff]  }
 0x9a4   : > { %4742 = vmatprep.subr.bf16.mxu0 %v11768_v17  ;;  %v11879_v17 = vld [vmem:[%s14273_s1 + $0x28c] ss:$16 sps:$4 sm:$0xff]  }
 0x9a7   : > { %4743 = vmatpush1.bf16.msra.mxu0 %v11766_v18  ;;  %v11882_v18 = vld [vmem:[%s14277_s11 + $0x44] ss:$16 sps:$4 sm:$0xff]  }
 0x9a8   : > { %4744 = vmatprep.subr.bf16.mxu0 %v11771_v19  ;;  %v11877_v19 = vld [vmem:[%s14273_s1 + $0x288] ss:$16 sps:$4 sm:$0xff]  }
 0x9ab   : > { %4745 = vmatpush1.bf16.msra.mxu0 %v11769_v20  ;;  %v11880_v20 = vld [vmem:[%s14277_s11 + $0x40] ss:$16 sps:$4 sm:$0xff]  }
 0x9ac   : > { %4746 = vmatprep.subr.bf16.mxu0 %v11777_v21  ;;  %v11885_v21 = vld [vmem:[%s14273_s1 + $0x2ac] ss:$16 sps:$4 sm:$0xff]  }
 0x9af   : > { %4747 = vmatpush1.bf16.msra.mxu0 %v11775_v61  ;;  %v11888_v61 = vld [vmem:[%s14277_s11 + $0x64] ss:$16 sps:$4 sm:$0xff]  }
 0x9b0   : > { %4748 = vmatprep.subr.bf16.mxu0 %v11783_v22  ;;  %v11883_v22 = vld [vmem:[%s14273_s1 + $0x2a8] ss:$16 sps:$4 sm:$0xff]  }
 0x9b3   : > { %4749 = vmatpush1.bf16.msra.mxu0 %v11781_v4  ;;  %v11886_v4 = vld [vmem:[%s14277_s11 + $0x60] ss:$16 sps:$4 sm:$0xff]  }
 0x9b4   : > { %4750 = vmatprep.subr.bf16.mxu0 %v11789_v23  ;;  %v11891_v23 = vld [vmem:[%s14273_s1 + $0x2cc] ss:$16 sps:$4 sm:$0xff]  }
 0x9b7   : > { %4751 = vmatpush1.bf16.msra.mxu0 %v11787_v24  ;;  %v11894_v24 = vld [vmem:[%s14277_s11 + $0x84] ss:$16 sps:$4 sm:$0xff]  }
 0x9b8   : > { %4752 = vmatprep.subr.bf16.mxu0 %v11795_v25  ;;  %v11889_v25 = vld [vmem:[%s14273_s1 + $0x2c8] ss:$16 sps:$4 sm:$0xff]  }
 0x9bb   : > { %4753 = vmatpush1.bf16.msra.mxu0 %v11793_v26  ;;  %v11892_v26 = vld [vmem:[%s14277_s11 + $0x80] ss:$16 sps:$4 sm:$0xff]  }
 0x9bc   : > { %4754 = vmatprep.subr.bf16.mxu0 %v11801_v27  ;;  %v11897_v27 = vld [vmem:[%s14273_s1 + $0x2ec] ss:$16 sps:$4 sm:$0xff]  }
 0x9bf   : > { %4755 = vmatpush1.bf16.msra.mxu0 %v11799_v28  ;;  %v11900_v28 = vld [vmem:[%s14277_s11 + $0xa4] ss:$16 sps:$4 sm:$0xff]  }
 0x9c0   : > { %4756 = vmatprep.subr.bf16.mxu0 %v11807_v29  ;;  %v11895_v29 = vld [vmem:[%s14273_s1 + $0x2e8] ss:$16 sps:$4 sm:$0xff]  }
 0x9c3   : > { %4757 = vmatpush1.bf16.msra.mxu0 %v11805_v11  ;;  %v11898_v11 = vld [vmem:[%s14277_s11 + $0xa0] ss:$16 sps:$4 sm:$0xff]  }
 0x9c4   : > { %4758 = vmatprep.subr.bf16.mxu0 %v11813_v30  ;;  %v11903_v30 = vld [vmem:[%s14273_s1 + $0x30c] ss:$16 sps:$4 sm:$0xff]  }
 0x9c7   : > { %4759 = vmatpush1.bf16.msra.mxu0 %v11811_v31  ;;  %v11906_v31 = vld [vmem:[%s14277_s11 + $0xc4] ss:$16 sps:$4 sm:$0xff]  }
 0x9c8   : > { %4760 = vmatprep.subr.bf16.mxu0 %v11819_v33  ;;  %v11901_v33 = vld [vmem:[%s14273_s1 + $0x308] ss:$16 sps:$4 sm:$0xff]  }
 0x9cb   : > { %4761 = vmatpush1.bf16.msra.mxu0 %v11817_v34  ;;  %v11904_v34 = vld [vmem:[%s14277_s11 + $0xc0] ss:$16 sps:$4 sm:$0xff]  }
 0x9cc   : > { %4762 = vmatprep.subr.bf16.mxu0 %v11825_v35  ;;  %v11909_v35 = vld [vmem:[%s14273_s1 + $0x32c] ss:$16 sps:$4 sm:$0xff]  }
 0x9cf   : > { %4763 = vmatpush1.bf16.msra.mxu0 %v11823_v36  ;;  %v11912_v36 = vld [vmem:[%s14277_s11 + $0xe4] ss:$16 sps:$4 sm:$0xff]  }
 0x9d0   : > { %4764 = vmatprep.subr.bf16.mxu0 %v11831_v37  ;;  %v11907_v37 = vld [vmem:[%s14273_s1 + $0x328] ss:$16 sps:$4 sm:$0xff]  }
 0x9d3   : > { %4765 = vmatpush1.bf16.msra.mxu0 %v11829_v38  ;;  %v11910_v38 = vld [vmem:[%s14277_s11 + $0xe0] ss:$16 sps:$4 sm:$0xff]  }
 0x9d4   : > { %4766 = vmatprep.subr.bf16.mxu0 %v11837_v39  ;;  %v11915_v39 = vld [vmem:[%s14273_s1 + $0x34c] ss:$16 sps:$4 sm:$0xff]  }
 0x9d7   : > { %4767 = vmatpush1.bf16.msra.mxu0 %v11835_v40  ;;  %v11918_v40 = vld [vmem:[%s14277_s11 + $0x104] ss:$16 sps:$4 sm:$0xff]  }
 0x9d8   : > { %4768 = vmatprep.subr.bf16.mxu0 %v11843_v41  ;;  %v11913_v41 = vld [vmem:[%s14273_s1 + $0x348] ss:$16 sps:$4 sm:$0xff]  }
 0x9db   : > { %4769 = vmatpush1.bf16.msra.mxu0 %v11841_v42  ;;  %v11916_v42 = vld [vmem:[%s14277_s11 + $0x100] ss:$16 sps:$4 sm:$0xff]  }
 0x9dc   : > { %4770 = vmatprep.subr.bf16.mxu0 %v11849_v44  ;;  %v11921_v44 = vld [vmem:[%s14273_s1 + $0x36c] ss:$16 sps:$4 sm:$0xff]  }
 0x9df   : > { %4771 = vmatpush1.bf16.msra.mxu0 %v11847_v46  ;;  %v11919_v46 = vld [vmem:[%s14273_s1 + $0x368] ss:$16 sps:$4 sm:$0xff]  }
 0x9e0   : > { %4781 = vmatprep.subr.bf16.mxu0 %v11855_v48  ;;  %v11927_v48 = vld [vmem:[%s14273_s1 + $0x38c] ss:$16 sps:$4 sm:$0xff]  }
 0xa6d   : > { %v4236_v54 = vpop.f32.mrb[44].mxu0 }
 0xa6e   : > { %v4238_v56 = vpop.f32.mrb[45].mxu0  ;;  %v13565_v62 = vpack.c.bf16 %v4236_v54, %v4236_v54  ;;  %v11931_v54 = vld [vmem:[%s14273_s1 + $0x3a8] ss:$16 sps:$4 sm:$0xff]  }
 0xa6f   : > { %v13562_v57 = vpack.c.bf16 %v4238_v56, %v4238_v56  ;;  %v4240_v58 = vpop.f32.mrb[46].mxu0  ;;  %v11934_v56 = vld [vmem:[%s14277_s11 + $0x160] ss:$16 sps:$4 sm:$0xff]  }
 0xa70   : > { %v4241_v43 = vpop.f32.mrb[47].mxu0  ;;  %v11939_v58 = vld [vmem:[%s14273_s1 + $0x3cc] ss:$16 sps:$4 sm:$0xff]  }
 0xa71   : > { %4772 = vmatprep.mubr.bf16.mxu0 %v13562_v57  ;;  %v11937_v43 = vld [vmem:[%s14273_s1 + $0x3c8] ss:$16 sps:$4 sm:$0xff]  }
 0xa72   : > { %4773 = vmatmul.mubr.bf16.vlgmr.msra.gmra.mrb[52].mxu0 %v13565_v62 }
 0xa73   : > { %4782 = vmatpush1.bf16.msra.mxu0 %v11853_v59  ;;  %4813 = vmatprep.mubr.bf16.mxu0 %v13562_v57  ;;  %v11942_v59 = vld [vmem:[%s14277_s11 + $0x184] ss:$16 sps:$4 sm:$0xff]  }
 0xa74   : > { %4783 = vmatprep.subr.bf16.mxu0 %v11861_v0  ;;  %v11940_v0 = vld [vmem:[%s14277_s11 + $0x180] ss:$16 sps:$4 sm:$0xff]  }
 0xa75   : > { %v4282_v3 = vpop.f32.mrb[48].mxu0 }
 0xa76   : > { %v13573_v5 = vpack.c.bf16 %v4282_v3, %v4282_v3  ;;  %v4284_v6 = vpop.f32.mrb[49].mxu0  ;;  %v11943_v3 = vld [vmem:[%s14273_s1 + $0x3e8] ss:$16 sps:$4 sm:$0xff]  }
 0xa77   : > { %v13575_v7 = vpack.c.bf16 %v4284_v6, %v4284_v6  ;;  %4784 = vmatpush1.bf16.msra.mxu0 %v11859_v1  ;;  %v4286_v9 = vpop.f32.mrb[50].mxu0  ;;  %v11945_v1 = vld [vmem:[%s14273_s1 + $0x3ec] ss:$16 sps:$4 sm:$0xff]   ;;  %v11946_v6 = vld [vmem:[%s14277_s11 + $0x1a0] ss:$16 sps:$4 sm:$0xff]  }
 0xa78   : > { %4785 = vmatprep.subr.bf16.mxu0 %v11867_v2  ;;  %v4287_v13 = vpop.f32.mrb[51].mxu0  ;;  %v11948_v2 = vld [vmem:[%s14277_s11 + $0x1a4] ss:$16 sps:$4 sm:$0xff]   ;;  %v11949_v9 = vld [vmem:[%s14273_s1] ss:$16 sps:$4 sm:$0xff]  }
 0xa79   : > { %5643 = vmatprep.mubr.bf16.mxu1 %v13575_v7  ;;  %v11957_v13 = vld [vmem:[%s14273_s1 + $0x24] ss:$16 sps:$4 sm:$0xff]  }
 0xa7a   : > { %5644 = vmatmul.mubr.bf16.vlgmr.msra.gmra.mrb[36].mxu1 %v13573_v5 }
 0xa7b   : > { %4786 = vmatpush1.bf16.msra.mxu0 %v11865_v8  ;;  %6130 = vmatpush1.bf16.msra.mxu1 %v11868_v10  ;;  %v11951_v8 = vld [vmem:[%s14273_s1 + $0x4] ss:$16 sps:$4 sm:$0xff]  }
 0xa7c   : > { %6161 = vmatprep.mubr.bf16.mxu1 %v13562_v57  ;;  %4787 = vmatprep.subr.bf16.mxu0 %v11873_v12  ;;  %v11954_v10 = vld [vmem:[%s14277_s11 + $0x1c4] ss:$16 sps:$4 sm:$0xff]   ;;  %v11952_v12 = vld [vmem:[%s14277_s11 + $0x1c0] ss:$16 sps:$4 sm:$0xff]  }
 0xa7d   : > { %6131 = vmatprep.subr.bf16.mxu1 %v11876_v14  ;;  %v11960_v14 = vld [vmem:[%s14277_s11 + $0x1e4] ss:$16 sps:$4 sm:$0xff]  }
 0xa7f   : > { %4788 = vmatpush1.bf16.msra.mxu0 %v11871_v15  ;;  %6132 = vmatpush1.bf16.msra.mxu1 %v11874_v16  ;;  %v11955_v15 = vld [vmem:[%s14273_s1 + $0x20] ss:$16 sps:$4 sm:$0xff]  }
 0xa80   : > { %4789 = vmatprep.subr.bf16.mxu0 %v11879_v17  ;;  %6133 = vmatprep.subr.bf16.mxu1 %v11882_v18  ;;  %v11958_v16 = vld [vmem:[%s14277_s11 + $0x1e0] ss:$16 sps:$4 sm:$0xff]   ;;  %v11963_v17 = vld [vmem:[%s14273_s1 + $0x44] ss:$16 sps:$4 sm:$0xff]  }
 0xa81   : > { %v11961_v18 = vld [vmem:[%s14273_s1 + $0x40] ss:$16 sps:$4 sm:$0xff]  }
 0xa83   : > { %4790 = vmatpush1.bf16.msra.mxu0 %v11877_v19  ;;  %6134 = vmatpush1.bf16.msra.mxu1 %v11880_v20  ;;  %v11966_v19 = vld [vmem:[%s14273_s1 + $0x64] ss:$16 sps:$4 sm:$0xff]   ;;  %v11964_v20 = vld [vmem:[%s14273_s1 + $0x60] ss:$16 sps:$4 sm:$0xff]  }
 0xa84   : > { %4791 = vmatprep.subr.bf16.mxu0 %v11885_v21  ;;  %6135 = vmatprep.subr.bf16.mxu1 %v11888_v61  ;;  %v11969_v21 = vld [vmem:[%s14273_s1 + $0x84] ss:$16 sps:$4 sm:$0xff]   ;;  %v11967_v61 = vld [vmem:[%s14273_s1 + $0x80] ss:$16 sps:$4 sm:$0xff]  }
 0xa87   : > { %4792 = vmatpush1.bf16.msra.mxu0 %v11883_v22  ;;  %6136 = vmatpush1.bf16.msra.mxu1 %v11886_v4  ;;  %v11972_v22 = vld [vmem:[%s14273_s1 + $0xa4] ss:$16 sps:$4 sm:$0xff]   ;;  %v11970_v4 = vld [vmem:[%s14273_s1 + $0xa0] ss:$16 sps:$4 sm:$0xff]  }
 0xa88   : > { %4793 = vmatprep.subr.bf16.mxu0 %v11891_v23  ;;  %6137 = vmatprep.subr.bf16.mxu1 %v11894_v24  ;;  %v11975_v23 = vld [vmem:[%s14273_s1 + $0xc4] ss:$16 sps:$4 sm:$0xff]   ;;  %v11973_v24 = vld [vmem:[%s14273_s1 + $0xc0] ss:$16 sps:$4 sm:$0xff]  }
 0xa8b   : > { %4794 = vmatpush1.bf16.msra.mxu0 %v11889_v25  ;;  %6138 = vmatpush1.bf16.msra.mxu1 %v11892_v26  ;;  %v11978_v25 = vld [vmem:[%s14273_s1 + $0xe4] ss:$16 sps:$4 sm:$0xff]   ;;  %v11976_v26 = vld [vmem:[%s14273_s1 + $0xe0] ss:$16 sps:$4 sm:$0xff]  }
 0xa8c   : > { %4795 = vmatprep.subr.bf16.mxu0 %v11897_v27  ;;  %6139 = vmatprep.subr.bf16.mxu1 %v11900_v28  ;;  %v11981_v27 = vld [vmem:[%s14273_s1 + $0x104] ss:$16 sps:$4 sm:$0xff]   ;;  %v11979_v28 = vld [vmem:[%s14273_s1 + $0x100] ss:$16 sps:$4 sm:$0xff]  }
 0xa8f   : > { %4796 = vmatpush1.bf16.msra.mxu0 %v11895_v29  ;;  %6140 = vmatpush1.bf16.msra.mxu1 %v11898_v11  ;;  %v11984_v29 = vld [vmem:[%s14273_s1 + $0x124] ss:$16 sps:$4 sm:$0xff]   ;;  %v11982_v11 = vld [vmem:[%s14273_s1 + $0x120] ss:$16 sps:$4 sm:$0xff]  }
 0xa90   : > { %4797 = vmatprep.subr.bf16.mxu0 %v11903_v30  ;;  %6141 = vmatprep.subr.bf16.mxu1 %v11906_v31  ;;  %v11987_v30 = vld [vmem:[%s14273_s1 + $0x144] ss:$16 sps:$4 sm:$0xff]   ;;  %v11985_v31 = vld [vmem:[%s14273_s1 + $0x140] ss:$16 sps:$4 sm:$0xff]  }
 0xa93   : > { %4798 = vmatpush1.bf16.msra.mxu0 %v11901_v33  ;;  %6142 = vmatpush1.bf16.msra.mxu1 %v11904_v34  ;;  %v11990_v33 = vld [vmem:[%s14273_s1 + $0x164] ss:$16 sps:$4 sm:$0xff]   ;;  %v11988_v34 = vld [vmem:[%s14273_s1 + $0x160] ss:$16 sps:$4 sm:$0xff]  }
 0xa94   : > { %4799 = vmatprep.subr.bf16.mxu0 %v11909_v35  ;;  %6143 = vmatprep.subr.bf16.mxu1 %v11912_v36  ;;  %v11993_v35 = vld [vmem:[%s14273_s1 + $0x184] ss:$16 sps:$4 sm:$0xff]   ;;  %v11991_v36 = vld [vmem:[%s14273_s1 + $0x180] ss:$16 sps:$4 sm:$0xff]  }
 0xa97   : > { %4800 = vmatpush1.bf16.msra.mxu0 %v11907_v37  ;;  %6144 = vmatpush1.bf16.msra.mxu1 %v11910_v38  ;;  %v11996_v37 = vld [vmem:[%s14273_s1 + $0x1a4] ss:$16 sps:$4 sm:$0xff]   ;;  %v11994_v38 = vld [vmem:[%s14273_s1 + $0x1a0] ss:$16 sps:$4 sm:$0xff]  }
 0xa98   : > { %4801 = vmatprep.subr.bf16.mxu0 %v11915_v39  ;;  %6145 = vmatprep.subr.bf16.mxu1 %v11918_v40  ;;  %v11999_v39 = vld [vmem:[%s14273_s1 + $0x1c4] ss:$16 sps:$4 sm:$0xff]   ;;  %v11997_v40 = vld [vmem:[%s14273_s1 + $0x1c0] ss:$16 sps:$4 sm:$0xff]  }
 0xa9b   : > { %4802 = vmatpush1.bf16.msra.mxu0 %v11913_v41  ;;  %6146 = vmatpush1.bf16.msra.mxu1 %v11916_v42  ;;  %v12002_v41 = vld [vmem:[%s14273_s1 + $0x1e4] ss:$16 sps:$4 sm:$0xff]   ;;  %v12000_v42 = vld [vmem:[%s14273_s1 + $0x1e0] ss:$16 sps:$4 sm:$0xff]  }
 0xa9c   : > { %4803 = vmatprep.subr.bf16.mxu0 %v11921_v44  ;;  %6147 = vmatprep.subr.bf16.mxu1 %v11924_v45  ;;  %v12005_v44 = vld [vmem:[%s14273_s1 + $0xc] ss:$16 sps:$4 sm:$0xff]   ;;  %v12003_v45 = vld [vmem:[%s14273_s1 + $0x8] ss:$16 sps:$4 sm:$0xff]  }
 0xa9f   : > { %4804 = vmatpush1.bf16.msra.mxu0 %v11919_v46  ;;  %6148 = vmatpush1.bf16.msra.mxu1 %v11922_v47  ;;  %v12008_v46 = vld [vmem:[%s14273_s1 + $0x2c] ss:$16 sps:$4 sm:$0xff]   ;;  %v12006_v47 = vld [vmem:[%s14273_s1 + $0x28] ss:$16 sps:$4 sm:$0xff]  }
 0xaa0   : > { %4805 = vmatprep.subr.bf16.mxu0 %v11927_v48  ;;  %6149 = vmatprep.subr.bf16.mxu1 %v11930_v49  ;;  %v12011_v48 = vld [vmem:[%s14273_s1 + $0x4c] ss:$16 sps:$4 sm:$0xff]   ;;  %v12009_v49 = vld [vmem:[%s14273_s1 + $0x48] ss:$16 sps:$4 sm:$0xff]  }
 0xaa3   : > { %4806 = vmatpush1.bf16.msra.mxu0 %v11925_v50  ;;  %6150 = vmatpush1.bf16.msra.mxu1 %v11928_v51  ;;  %v12014_v50 = vld [vmem:[%s14273_s1 + $0x6c] ss:$16 sps:$4 sm:$0xff]   ;;  %v12012_v51 = vld [vmem:[%s14273_s1 + $0x68] ss:$16 sps:$4 sm:$0xff]  }
 0xaa4   : > { %4807 = vmatprep.subr.bf16.mxu0 %v11933_v53  ;;  %6151 = vmatprep.subr.bf16.mxu1 %v11936_v55  ;;  %v12017_v53 = vld [vmem:[%s14273_s1 + $0x8c] ss:$16 sps:$4 sm:$0xff]   ;;  %v12015_v55 = vld [vmem:[%s14273_s1 + $0x88] ss:$16 sps:$4 sm:$0xff]  }
 0xaa7   : > { %4808 = vmatpush1.bf16.msra.mxu0 %v11931_v54  ;;  %6152 = vmatpush1.bf16.msra.mxu1 %v11934_v56  ;;  %v12020_v54 = vld [vmem:[%s14273_s1 + $0xac] ss:$16 sps:$4 sm:$0xff]   ;;  %v12018_v56 = vld [vmem:[%s14273_s1 + $0xa8] ss:$16 sps:$4 sm:$0xff]  }
 0xaa8   : > { %4809 = vmatprep.subr.bf16.mxu0 %v11939_v58  ;;  %6153 = vmatprep.subr.bf16.mxu1 %v11942_v59  ;;  %v12023_v58 = vld [vmem:[%s14273_s1 + $0xcc] ss:$16 sps:$4 sm:$0xff]   ;;  %v12021_v59 = vld [vmem:[%s14273_s1 + $0xc8] ss:$16 sps:$4 sm:$0xff]  }
 0xaab   : > { %4810 = vmatpush1.bf16.msra.mxu0 %v11937_v43  ;;  %6154 = vmatpush1.bf16.msra.mxu1 %v11940_v0  ;;  %v12026_v43 = vld [vmem:[%s14273_s1 + $0xec] ss:$16 sps:$4 sm:$0xff]   ;;  %v12024_v0 = vld [vmem:[%s14273_s1 + $0xe8] ss:$16 sps:$4 sm:$0xff]  }
 0xaac   : > { %4811 = vmatprep.subr.bf16.mxu0 %v11945_v1  ;;  %6155 = vmatprep.subr.bf16.mxu1 %v11948_v2  ;;  %v12029_v1 = vld [vmem:[%s14273_s1 + $0x10c] ss:$16 sps:$4 sm:$0xff]   ;;  %v12027_v2 = vld [vmem:[%s14273_s1 + $0x108] ss:$16 sps:$4 sm:$0xff]  }
 0xaaf   : > { %4812 = vmatpush1.bf16.msra.mxu0 %v11943_v3  ;;  %6156 = vmatpush1.bf16.msra.mxu1 %v11946_v6  ;;  %v12032_v3 = vld [vmem:[%s14273_s1 + $0x12c] ss:$16 sps:$4 sm:$0xff]   ;;  %v12126_v6 = vld [vmem:[%s14278_s0 + $0x400] ss:$16 sps:$4 sm:$0xff]  }
 0xab0   : > { %5142 = vmatprep.subr.bf16.mxu0 %v11951_v8  ;;  %6157 = vmatprep.subr.bf16.mxu1 %v11954_v10  ;;  %v12128_v8 = vld [vmem:[%s14278_s0 + $0x404] ss:$16 sps:$4 sm:$0xff]   ;;  %v12030_v10 = vld [vmem:[%s14273_s1 + $0x128] ss:$16 sps:$4 sm:$0xff]  }
 0xab2   : > { %4814 = vmatmul.mubr.bf16.vlgmr.msra.gmra.mrb[56].mxu0 %v13565_v62 }
 0xab3   : > { %5143 = vmatpush1.bf16.msra.mxu0 %v11949_v9  ;;  %6158 = vmatpush1.bf16.msra.mxu1 %v11952_v12  ;;  %v12035_v9 = vld [vmem:[%s14273_s1 + $0x14c] ss:$16 sps:$4 sm:$0xff]   ;;  %v12132_v12 = vld [vmem:[%s14278_s0 + $0x420] ss:$16 sps:$4 sm:$0xff]  }
 0xab4   : > { %5144 = vmatprep.subr.bf16.mxu0 %v11957_v13  ;;  %6159 = vmatprep.subr.bf16.mxu1 %v11960_v14  ;;  %v12134_v13 = vld [vmem:[%s14278_s0 + $0x424] ss:$16 sps:$4 sm:$0xff]   ;;  %v12033_v14 = vld [vmem:[%s14273_s1 + $0x148] ss:$16 sps:$4 sm:$0xff]  }
 0xab5   : > { %5174 = vmatprep.mubr.bf16.mxu0 %v12767_v32 }
 0xab7   : > { %5145 = vmatpush1.bf16.msra.mxu0 %v11955_v15  ;;  %6160 = vmatpush1.bf16.msra.mxu1 %v11958_v16  ;;  %v12038_v15 = vld [vmem:[%s14273_s1 + $0x16c] ss:$16 sps:$4 sm:$0xff]   ;;  %v12138_v16 = vld [vmem:[%s14278_s0 + $0x440] ss:$16 sps:$4 sm:$0xff]  }
 0xab8   : > { %5146 = vmatprep.subr.bf16.mxu0 %v11963_v17  ;;  %7116 = vmatprep.subr.bf16.mxu1 %v12128_v8  ;;  %v12140_v17 = vld [vmem:[%s14278_s0 + $0x444] ss:$16 sps:$4 sm:$0xff]  }
 0xaba   : > { %6162 = vmatmul.mubr.bf16.vlgmr.msra.gmra.mrb[40].mxu1 %v13565_v62 }
 0xabb   : > { %5147 = vmatpush1.bf16.msra.mxu0 %v11961_v18  ;;  %7117 = vmatpush1.bf16.msra.mxu1 %v12126_v6  ;;  %v12036_v18 = vld [vmem:[%s14273_s1 + $0x168] ss:$16 sps:$4 sm:$0xff]  }
 0xabc   : > { %5148 = vmatprep.subr.bf16.mxu0 %v11966_v19  ;;  %7118 = vmatprep.subr.bf16.mxu1 %v12134_v13  ;;  %v12041_v19 = vld [vmem:[%s14273_s1 + $0x18c] ss:$16 sps:$4 sm:$0xff]   ;;  %v12069_v6 = vld [vmem:[%s14273_s1 + $0x4c8] ss:$16 sps:$4 sm:$0xff]  }
 0xabd   : > { %v12072_v13 = vld [vmem:[%s14273_s1 + $0x4e8] ss:$16 sps:$4 sm:$0xff]  }
 0xabf   : > { %5149 = vmatpush1.bf16.msra.mxu0 %v11964_v20  ;;  %7119 = vmatpush1.bf16.msra.mxu1 %v12132_v12  ;;  %v12144_v20 = vld [vmem:[%s14278_s0 + $0x460] ss:$16 sps:$4 sm:$0xff]  }
 0xac0   : > { %5150 = vmatprep.subr.bf16.mxu0 %v11969_v21  ;;  %7120 = vmatprep.subr.bf16.mxu1 %v12140_v17  ;;  %v12146_v21 = vld [vmem:[%s14278_s0 + $0x464] ss:$16 sps:$4 sm:$0xff]   ;;  %v12207_v12 = vld [vmem:[%s14278_s0 + $0x5c0] ss:$16 sps:$4 sm:$0xff]  }
 0xac1   : > { %v12213_v17 = vld [vmem:[%s14278_s0 + $0x5e0] ss:$16 sps:$4 sm:$0xff]  }
 0xac3   : > { %5151 = vmatpush1.bf16.msra.mxu0 %v11967_v61  ;;  %7121 = vmatpush1.bf16.msra.mxu1 %v12138_v16  ;;  %v12039_v61 = vld [vmem:[%s14273_s1 + $0x188] ss:$16 sps:$4 sm:$0xff]  }
 0xac4   : > { %5152 = vmatprep.subr.bf16.mxu0 %v11972_v22  ;;  %7122 = vmatprep.subr.bf16.mxu1 %v12146_v21  ;;  %v12044_v22 = vld [vmem:[%s14273_s1 + $0x1ac] ss:$16 sps:$4 sm:$0xff]  }
 0xac5   : > { %v12080_v21 = vld [vmem:[%s14273_s1 + $0x52c] ss:$16 sps:$4 sm:$0xff]  }
 0xac7   : > { %5153 = vmatpush1.bf16.msra.mxu0 %v11970_v4  ;;  %7123 = vmatpush1.bf16.msra.mxu1 %v12144_v20  ;;  %v12150_v4 = vld [vmem:[%s14278_s0 + $0x480] ss:$16 sps:$4 sm:$0xff]  }
 0xac8   : > { %5154 = vmatprep.subr.bf16.mxu0 %v11975_v23  ;;  %v12152_v23 = vld [vmem:[%s14278_s0 + $0x484] ss:$16 sps:$4 sm:$0xff]  }
 0xac9   : > { %7124 = vmatprep.subr.bf16.mxu1 %v12152_v23  ;;  %v12081_v23 = vld [vmem:[%s14273_s1 + $0x548] ss:$16 sps:$4 sm:$0xff]  }
 0xacb   : > { %5155 = vmatpush1.bf16.msra.mxu0 %v11973_v24  ;;  %v12042_v24 = vld [vmem:[%s14273_s1 + $0x1a8] ss:$16 sps:$4 sm:$0xff]   ;;  %7125 = vmatpush1.bf16.msra.mxu1 %v12150_v4  ;;  %v12083_v4 = vld [vmem:[%s14273_s1 + $0x54c] ss:$16 sps:$4 sm:$0xff]  }
 0xacc   : > { %5156 = vmatprep.subr.bf16.mxu0 %v11978_v25  ;;  %v12047_v25 = vld [vmem:[%s14273_s1 + $0x1cc] ss:$16 sps:$4 sm:$0xff]  }
 0xacf   : > { %5157 = vmatpush1.bf16.msra.mxu0 %v11976_v26  ;;  %v12156_v26 = vld [vmem:[%s14278_s0 + $0x4a0] ss:$16 sps:$4 sm:$0xff]  }
 0xad0   : > { %5158 = vmatprep.subr.bf16.mxu0 %v11981_v27  ;;  %v12158_v27 = vld [vmem:[%s14278_s0 + $0x4a4] ss:$16 sps:$4 sm:$0xff]  }
 0xad1   : > { %7126 = vmatprep.subr.bf16.mxu1 %v12158_v27  ;;  %v12087_v27 = vld [vmem:[%s14273_s1 + $0x588] ss:$16 sps:$4 sm:$0xff]  }
 0xad2   : > { %7127 = vmatpush1.bf16.msra.mxu1 %v12156_v26  ;;  %v12089_v26 = vld [vmem:[%s14273_s1 + $0x58c] ss:$16 sps:$4 sm:$0xff]  }
 0xad3   : > { %5159 = vmatpush1.bf16.msra.mxu0 %v11979_v28  ;;  %v12045_v28 = vld [vmem:[%s14273_s1 + $0x1c8] ss:$16 sps:$4 sm:$0xff]  }
 0xad4   : > { %5160 = vmatprep.subr.bf16.mxu0 %v11984_v29  ;;  %v12050_v29 = vld [vmem:[%s14273_s1 + $0x1ec] ss:$16 sps:$4 sm:$0xff]  }
 0xad7   : > { %5161 = vmatpush1.bf16.msra.mxu0 %v11982_v11  ;;  %v12162_v11 = vld [vmem:[%s14278_s0 + $0x4c0] ss:$16 sps:$4 sm:$0xff]  }
 0xad8   : > { %5162 = vmatprep.subr.bf16.mxu0 %v11987_v30  ;;  %v12164_v30 = vld [vmem:[%s14278_s0 + $0x4c4] ss:$16 sps:$4 sm:$0xff]  }
 0xad9   : > { %7128 = vmatprep.subr.bf16.mxu1 %v12164_v30  ;;  %v12093_v30 = vld [vmem:[%s14273_s1 + $0x5c8] ss:$16 sps:$4 sm:$0xff]  }
 0xada   : > { %7129 = vmatpush1.bf16.msra.mxu1 %v12162_v11  ;;  %v12095_v11 = vld [vmem:[%s14273_s1 + $0x5cc] ss:$16 sps:$4 sm:$0xff]  }
 0xadb   : > { %5163 = vmatpush1.bf16.msra.mxu0 %v11985_v31  ;;  %v12048_v31 = vld [vmem:[%s14273_s1 + $0x1e8] ss:$16 sps:$4 sm:$0xff]  }
 0xadc   : > { %5164 = vmatprep.subr.bf16.mxu0 %v11990_v33  ;;  %v12053_v33 = vld [vmem:[%s14273_s1 + $0x40c] ss:$16 sps:$4 sm:$0xff]  }
 0xadf   : > { %5165 = vmatpush1.bf16.msra.mxu0 %v11988_v34  ;;  %v12168_v34 = vld [vmem:[%s14278_s0 + $0x4e0] ss:$16 sps:$4 sm:$0xff]  }
 0xae0   : > { %5166 = vmatprep.subr.bf16.mxu0 %v11993_v35  ;;  %v12170_v35 = vld [vmem:[%s14278_s0 + $0x4e4] ss:$16 sps:$4 sm:$0xff]  }
 0xae1   : > { %7130 = vmatprep.subr.bf16.mxu1 %v12170_v35  ;;  %v12099_v35 = vld [vmem:[%s14277_s11 + $0x8] ss:$16 sps:$4 sm:$0xff]  }
 0xae2   : > { %7131 = vmatpush1.bf16.msra.mxu1 %v12168_v34  ;;  %v12101_v34 = vld [vmem:[%s14277_s11 + $0xc] ss:$16 sps:$4 sm:$0xff]  }
 0xae3   : > { %5167 = vmatpush1.bf16.msra.mxu0 %v11991_v36  ;;  %v12051_v36 = vld [vmem:[%s14273_s1 + $0x408] ss:$16 sps:$4 sm:$0xff]  }
 0xae4   : > { %5168 = vmatprep.subr.bf16.mxu0 %v11996_v37  ;;  %v12056_v37 = vld [vmem:[%s14273_s1 + $0x42c] ss:$16 sps:$4 sm:$0xff]  }
 0xae7   : > { %5169 = vmatpush1.bf16.msra.mxu0 %v11994_v38  ;;  %v12173_v38 = vld [vmem:[%s14278_s0 + $0x504] ss:$16 sps:$4 sm:$0xff]  }
 0xae8   : > { %5170 = vmatprep.subr.bf16.mxu0 %v11999_v39  ;;  %v12171_v39 = vld [vmem:[%s14278_s0 + $0x500] ss:$16 sps:$4 sm:$0xff]   ;;  %7132 = vmatprep.subr.bf16.mxu1 %v12173_v38  ;;  %v12107_v38 = vld [vmem:[%s14277_s11 + $0x4c] ss:$16 sps:$4 sm:$0xff]  }
 0xae9   : > { %7133 = vmatpush1.bf16.msra.mxu1 %v12171_v39  ;;  %v12105_v39 = vld [vmem:[%s14277_s11 + $0x48] ss:$16 sps:$4 sm:$0xff]  }
 0xaeb   : > { %5171 = vmatpush1.bf16.msra.mxu0 %v11997_v40  ;;  %v12054_v40 = vld [vmem:[%s14273_s1 + $0x428] ss:$16 sps:$4 sm:$0xff]  }
 0xaec   : > { %5172 = vmatprep.subr.bf16.mxu0 %v12002_v41  ;;  %v12179_v41 = vld [vmem:[%s14278_s0 + $0x524] ss:$16 sps:$4 sm:$0xff]  }
 0xaed   : > { %7134 = vmatprep.subr.bf16.mxu1 %v12179_v41  ;;  %v12108_v41 = vld [vmem:[%s14277_s11 + $0x68] ss:$16 sps:$4 sm:$0xff]  }
 0xaef   : > { %5173 = vmatpush1.bf16.msra.mxu0 %v12000_v42  ;;  %v12059_v42 = vld [vmem:[%s14273_s1 + $0x44c] ss:$16 sps:$4 sm:$0xff]  }
 0xaf0   : > { %5183 = vmatprep.subr.bf16.mxu0 %v12005_v44  ;;  %v12177_v44 = vld [vmem:[%s14278_s0 + $0x520] ss:$16 sps:$4 sm:$0xff]  }
 0xaf1   : > { %7135 = vmatpush1.bf16.msra.mxu1 %v12177_v44  ;;  %v12114_v44 = vld [vmem:[%s14277_s11 + $0xa8] ss:$16 sps:$4 sm:$0xff]  }
 0xaf2   : > { %5175 = vmatmul.mubr.bf16.vlgmr.msra.gmra.mrb[60].mxu0 %v12767_v32 }
 0xaf3   : > { %5184 = vmatpush1.bf16.msra.mxu0 %v12003_v45  ;;  %5215 = vmatprep.mubr.bf16.mxu0 %v12767_v32  ;;  %v12057_v45 = vld [vmem:[%s14273_s1 + $0x448] ss:$16 sps:$4 sm:$0xff]  }
 0xaf4   : > { %5185 = vmatprep.subr.bf16.mxu0 %v12008_v46  ;;  %v12185_v46 = vld [vmem:[%s14278_s0 + $0x544] ss:$16 sps:$4 sm:$0xff]  }
 0xaf5   : > { %7136 = vmatprep.subr.bf16.mxu1 %v12185_v46 }
 0xaf7   : > { %5186 = vmatpush1.bf16.msra.mxu0 %v12006_v47  ;;  %v12062_v47 = vld [vmem:[%s14273_s1 + $0x46c] ss:$16 sps:$4 sm:$0xff]  }
 0xaf8   : > { %5187 = vmatprep.subr.bf16.mxu0 %v12011_v48  ;;  %v12060_v48 = vld [vmem:[%s14273_s1 + $0x468] ss:$16 sps:$4 sm:$0xff]  }
 0xafb   : > { %5188 = vmatpush1.bf16.msra.mxu0 %v12009_v49  ;;  %v12191_v49 = vld [vmem:[%s14278_s0 + $0x564] ss:$16 sps:$4 sm:$0xff]  }
 0xafc   : > { %5189 = vmatprep.subr.bf16.mxu0 %v12014_v50  ;;  %v12065_v50 = vld [vmem:[%s14273_s1 + $0x48c] ss:$16 sps:$4 sm:$0xff]  }
 0xaff   : > { %5190 = vmatpush1.bf16.msra.mxu0 %v12012_v51  ;;  %v12189_v51 = vld [vmem:[%s14278_s0 + $0x560] ss:$16 sps:$4 sm:$0xff]  }
 0xb00   : > { %5191 = vmatprep.subr.bf16.mxu0 %v12017_v53  ;;  %v12063_v53 = vld [vmem:[%s14273_s1 + $0x488] ss:$16 sps:$4 sm:$0xff]  }
 0xb03   : > { %5192 = vmatpush1.bf16.msra.mxu0 %v12015_v55  ;;  %v12197_v55 = vld [vmem:[%s14278_s0 + $0x584] ss:$16 sps:$4 sm:$0xff]  }
 0xb04   : > { %5193 = vmatprep.subr.bf16.mxu0 %v12020_v54  ;;  %v12068_v54 = vld [vmem:[%s14273_s1 + $0x4ac] ss:$16 sps:$4 sm:$0xff]  }
 0xb07   : > { %5194 = vmatpush1.bf16.msra.mxu0 %v12018_v56  ;;  %v12195_v56 = vld [vmem:[%s14278_s0 + $0x580] ss:$16 sps:$4 sm:$0xff]  }
 0xb08   : > { %5195 = vmatprep.subr.bf16.mxu0 %v12023_v58  ;;  %v12066_v58 = vld [vmem:[%s14273_s1 + $0x4a8] ss:$16 sps:$4 sm:$0xff]  }
 0xb0b   : > { %5196 = vmatpush1.bf16.msra.mxu0 %v12021_v59  ;;  %v12071_v59 = vld [vmem:[%s14273_s1 + $0x4cc] ss:$16 sps:$4 sm:$0xff]  }
 0xb0c   : > { %5197 = vmatprep.subr.bf16.mxu0 %v12026_v43  ;;  %v12203_v43 = vld [vmem:[%s14278_s0 + $0x5a4] ss:$16 sps:$4 sm:$0xff]  }
 0xb0f   : > { %5198 = vmatpush1.bf16.msra.mxu0 %v12024_v0 }
 0xb10   : > { %5199 = vmatprep.subr.bf16.mxu0 %v12029_v1  ;;  %v12201_v1 = vld [vmem:[%s14278_s0 + $0x5a0] ss:$16 sps:$4 sm:$0xff]  }
 0xb13   : > { %5200 = vmatpush1.bf16.msra.mxu0 %v12027_v2 }
 0xb14   : > { %5201 = vmatprep.subr.bf16.mxu0 %v12032_v3 }
 0xb17   : > { %5202 = vmatpush1.bf16.msra.mxu0 %v12030_v10  ;;  %v12074_v10 = vld [vmem:[%s14273_s1 + $0x4ec] ss:$16 sps:$4 sm:$0xff]  }
 0xb18   : > { %5203 = vmatprep.subr.bf16.mxu0 %v12035_v9  ;;  %v12209_v9 = vld [vmem:[%s14278_s0 + $0x5c4] ss:$16 sps:$4 sm:$0xff]  }
 0xb1b   : > { %5204 = vmatpush1.bf16.msra.mxu0 %v12033_v14  ;;  %v12077_v14 = vld [vmem:[%s14273_s1 + $0x50c] ss:$16 sps:$4 sm:$0xff]  }
 0xb1c   : > { %5205 = vmatprep.subr.bf16.mxu0 %v12038_v15  ;;  %v12215_v15 = vld [vmem:[%s14278_s0 + $0x5e4] ss:$16 sps:$4 sm:$0xff]  }
 0xb1f   : > { %5206 = vmatpush1.bf16.msra.mxu0 %v12036_v18 }
 0xb20   : > { %5207 = vmatprep.subr.bf16.mxu0 %v12041_v19  ;;  %v12075_v19 = vld [vmem:[%s14273_s1 + $0x508] ss:$16 sps:$4 sm:$0xff]  }
 0xb23   : > { %5208 = vmatpush1.bf16.msra.mxu0 %v12039_v61 }
 0xb24   : > { %5209 = vmatprep.subr.bf16.mxu0 %v12044_v22  ;;  %v12078_v22 = vld [vmem:[%s14273_s1 + $0x528] ss:$16 sps:$4 sm:$0xff]  }
 0xb27   : > { %5210 = vmatpush1.bf16.msra.mxu0 %v12042_v24  ;;  %v12086_v24 = vld [vmem:[%s14273_s1 + $0x56c] ss:$16 sps:$4 sm:$0xff]  }
 0xb28   : > { %5211 = vmatprep.subr.bf16.mxu0 %v12047_v25  ;;  %v12084_v25 = vld [vmem:[%s14273_s1 + $0x568] ss:$16 sps:$4 sm:$0xff]  }
 0xb2b   : > { %5212 = vmatpush1.bf16.msra.mxu0 %v12045_v28  ;;  %v12092_v28 = vld [vmem:[%s14273_s1 + $0x5ac] ss:$16 sps:$4 sm:$0xff]  }
 0xb2c   : > { %5213 = vmatprep.subr.bf16.mxu0 %v12050_v29  ;;  %v12090_v29 = vld [vmem:[%s14273_s1 + $0x5a8] ss:$16 sps:$4 sm:$0xff]  }
 0xb2f   : > { %5214 = vmatpush1.bf16.msra.mxu0 %v12048_v31  ;;  %v12098_v31 = vld [vmem:[%s14273_s1 + $0x5ec] ss:$16 sps:$4 sm:$0xff]  }
 0xb30   : > { %5652 = vmatprep.subr.bf16.mxu0 %v12053_v33  ;;  %v12096_v33 = vld [vmem:[%s14273_s1 + $0x5e8] ss:$16 sps:$4 sm:$0xff]  }
 0xb32   : > { %5216 = vmatmul.mubr.bf16.vlgmr.msra.gmra.mrb[64].mxu0 %v12767_v32 }
 0xb33   : > { %5653 = vmatpush1.bf16.msra.mxu0 %v12051_v36  ;;  %5684 = vmatprep.mubr.bf16.mxu0 %v13575_v7  ;;  %v12183_v7 = vld [vmem:[%s14278_s0 + $0x540] ss:$16 sps:$4 sm:$0xff]   ;;  %v12104_v36 = vld [vmem:[%s14277_s11 + $0x2c] ss:$16 sps:$4 sm:$0xff]  }
 0xb34   : > { %5654 = vmatprep.subr.bf16.mxu0 %v12056_v37  ;;  %7137 = vmatpush1.bf16.msra.mxu1 %v12183_v7  ;;  %v12102_v37 = vld [vmem:[%s14277_s11 + $0x28] ss:$16 sps:$4 sm:$0xff]  }
 0xb35   : > { %7138 = vmatprep.subr.bf16.mxu1 %v12191_v49 }
 0xb37   : > { %5655 = vmatpush1.bf16.msra.mxu0 %v12054_v40  ;;  %v12110_v40 = vld [vmem:[%s14277_s11 + $0x6c] ss:$16 sps:$4 sm:$0xff]  }
 0xb38   : > { %5656 = vmatprep.subr.bf16.mxu0 %v12059_v42  ;;  %7139 = vmatpush1.bf16.msra.mxu1 %v12189_v51  ;;  %v12113_v42 = vld [vmem:[%s14277_s11 + $0x8c] ss:$16 sps:$4 sm:$0xff]   ;;  %v12245_v51 = vld [vmem:[%s14278_s0 + $0x604] ss:$16 sps:$4 sm:$0xff]  }
 0xb39   : > { %7140 = vmatprep.subr.bf16.mxu1 %v12197_v55  ;;  %v12125_v55 = vld [vmem:[%s14277_s11 + $0x10c] ss:$16 sps:$4 sm:$0xff]  }
 0xb3b   : > { %5657 = vmatpush1.bf16.msra.mxu0 %v12057_v45  ;;  %v12119_v45 = vld [vmem:[%s14277_s11 + $0xcc] ss:$16 sps:$4 sm:$0xff]  }
 0xb3c   : > { %5658 = vmatprep.subr.bf16.mxu0 %v12062_v47  ;;  %7141 = vmatpush1.bf16.msra.mxu1 %v12195_v56  ;;  %v12131_v56 = vld [vmem:[%s14277_s11 + $0x12c] ss:$16 sps:$4 sm:$0xff]  }
 0xb3d   : > { %7142 = vmatprep.subr.bf16.mxu1 %v12203_v43  ;;  %v12135_v43 = vld [vmem:[%s14277_s11 + $0x148] ss:$16 sps:$4 sm:$0xff]  }
 0xb3f   : > { %5659 = vmatpush1.bf16.msra.mxu0 %v12060_v48  ;;  %v12117_v48 = vld [vmem:[%s14277_s11 + $0xc8] ss:$16 sps:$4 sm:$0xff]  }
 0xb40   : > { %5660 = vmatprep.subr.bf16.mxu0 %v12065_v50  ;;  %7143 = vmatpush1.bf16.msra.mxu1 %v12201_v1  ;;  %v12122_v50 = vld [vmem:[%s14277_s11 + $0xec] ss:$16 sps:$4 sm:$0xff]  }
 0xb41   : > { %7144 = vmatprep.subr.bf16.mxu1 %v12209_v9  ;;  %v12143_v1 = vld [vmem:[%s14277_s11 + $0x16c] ss:$16 sps:$4 sm:$0xff]   ;;  %v12153_v9 = vld [vmem:[%s14277_s11 + $0x1a8] ss:$16 sps:$4 sm:$0xff]  }
 0xb43   : > { %5661 = vmatpush1.bf16.msra.mxu0 %v12063_v53  ;;  %v12120_v53 = vld [vmem:[%s14277_s11 + $0xe8] ss:$16 sps:$4 sm:$0xff]  }
 0xb44   : > { %5662 = vmatprep.subr.bf16.mxu0 %v12068_v54  ;;  %7145 = vmatpush1.bf16.msra.mxu1 %v12207_v12  ;;  %v12123_v54 = vld [vmem:[%s14277_s11 + $0x108] ss:$16 sps:$4 sm:$0xff]   ;;  %v12161_v12 = vld [vmem:[%s14277_s11 + $0x1cc] ss:$16 sps:$4 sm:$0xff]  }
 0xb45   : > { %v13749_v0 = vpop.f32.mrb[52].mxu0  ;;  %7146 = vmatprep.subr.bf16.mxu1 %v12215_v15  ;;  %v12165_v15 = vld [vmem:[%s14277_s11 + $0x1e8] ss:$16 sps:$4 sm:$0xff]  }
 0xb46   : > { %v13752_v2 = vpop.f32.mrb[53].mxu0 }
 0xb47   : > { %5663 = vmatpush1.bf16.msra.mxu0 %v12066_v58  ;;  %v4778_v3 = vpop.f32.mrb[54].mxu0  ;;  %v12129_v58 = vld [vmem:[%s14277_s11 + $0x128] ss:$16 sps:$4 sm:$0xff]  }
 0xb48   : > { %v4779_v8 = vpop.f32.mrb[55].mxu0  ;;  %5664 = vmatprep.subr.bf16.mxu0 %v12071_v59  ;;  %7147 = vmatpush1.bf16.msra.mxu1 %v12213_v17  ;;  %v12137_v59 = vld [vmem:[%s14277_s11 + $0x14c] ss:$16 sps:$4 sm:$0xff]   ;;  %v12141_v3 = vld [vmem:[%s14277_s11 + $0x168] ss:$16 sps:$4 sm:$0xff]  }
 0xb49   : > { %7157 = vmatprep.subr.bf16.mxu1 %v12245_v51  ;;  %v12147_v8 = vld [vmem:[%s14277_s11 + $0x188] ss:$16 sps:$4 sm:$0xff]   ;;  %v12176_v17 = vld [vmem:[%s14278_s0 + $0x40c] ss:$16 sps:$4 sm:$0xff]  }
 0xb4a   : > { %v12227_v51 = vld [vmem:[%s14278_s0 + $0x54c] ss:$16 sps:$4 sm:$0xff]  }
 0xb4b   : > { %5665 = vmatpush1.bf16.msra.mxu0 %v12069_v6  ;;  %v12149_v6 = vld [vmem:[%s14277_s11 + $0x18c] ss:$16 sps:$4 sm:$0xff]  }
 0xb4c   : > { %5666 = vmatprep.subr.bf16.mxu0 %v12074_v10  ;;  %v12155_v10 = vld [vmem:[%s14277_s11 + $0x1ac] ss:$16 sps:$4 sm:$0xff]  }
 0xb4d   : > { %v13761_v16 = vpop.f32.mrb[36].mxu1 }
 0xb4e   : > { %v13764_v18 = vpop.f32.mrb[37].mxu1 }
 0xb4f   : > { %5667 = vmatpush1.bf16.msra.mxu0 %v12072_v13  ;;  %v5649_v20 = vpop.f32.mrb[38].mxu1  ;;  %v12159_v13 = vld [vmem:[%s14277_s11 + $0x1c8] ss:$16 sps:$4 sm:$0xff]  }
 0xb50   : > { %5668 = vmatprep.subr.bf16.mxu0 %v12077_v14  ;;  %v5650_v61 = vpop.f32.mrb[39].mxu1  ;;  %v12167_v14 = vld [vmem:[%s14277_s11 + $0x1ec] ss:$16 sps:$4 sm:$0xff]  }
 0xb51   : > { %v12182_v20 = vld [vmem:[%s14278_s0 + $0x42c] ss:$16 sps:$4 sm:$0xff]  }
 0xb52   : > { %v12188_v61 = vld [vmem:[%s14278_s0 + $0x44c] ss:$16 sps:$4 sm:$0xff]  }
 0xb53   : > { %5669 = vmatpush1.bf16.msra.mxu0 %v12075_v19  ;;  %v12174_v19 = vld [vmem:[%s14278_s0 + $0x408] ss:$16 sps:$4 sm:$0xff]  }
 0xb54   : > { %5670 = vmatprep.subr.bf16.mxu0 %v12080_v21  ;;  %v12180_v21 = vld [vmem:[%s14278_s0 + $0x428] ss:$16 sps:$4 sm:$0xff]  }
 0xb57   : > { %5671 = vmatpush1.bf16.msra.mxu0 %v12078_v22  ;;  %v12186_v22 = vld [vmem:[%s14278_s0 + $0x448] ss:$16 sps:$4 sm:$0xff]  }
 0xb58   : > { %5672 = vmatprep.subr.bf16.mxu0 %v12083_v4  ;;  %v12194_v4 = vld [vmem:[%s14278_s0 + $0x46c] ss:$16 sps:$4 sm:$0xff]  }
 0xb5b   : > { %5673 = vmatpush1.bf16.msra.mxu0 %v12081_v23  ;;  %v12192_v23 = vld [vmem:[%s14278_s0 + $0x468] ss:$16 sps:$4 sm:$0xff]  }
 0xb5c   : > { %5674 = vmatprep.subr.bf16.mxu0 %v12086_v24  ;;  %v12200_v24 = vld [vmem:[%s14278_s0 + $0x48c] ss:$16 sps:$4 sm:$0xff]  }
 0xb5f   : > { %5675 = vmatpush1.bf16.msra.mxu0 %v12084_v25  ;;  %v12198_v25 = vld [vmem:[%s14278_s0 + $0x488] ss:$16 sps:$4 sm:$0xff]  }
 0xb60   : > { %5676 = vmatprep.subr.bf16.mxu0 %v12089_v26  ;;  %v12204_v26 = vld [vmem:[%s14278_s0 + $0x4a8] ss:$16 sps:$4 sm:$0xff]  }
 0xb63   : > { %5677 = vmatpush1.bf16.msra.mxu0 %v12087_v27  ;;  %v13834_v27 = vld [vmem:[%s14279_s4] sm:$0xf] }
 0xb64   : > { %5678 = vmatprep.subr.bf16.mxu0 %v12092_v28  ;;  %v12212_v28 = vld [vmem:[%s14278_s0 + $0x4cc] ss:$16 sps:$4 sm:$0xff]  }
 0xb67   : > { %5679 = vmatpush1.bf16.msra.mxu0 %v12090_v29 }
 0xb68   : > { %5680 = vmatprep.subr.bf16.mxu0 %v12095_v11 }
 0xb6b   : > { %5681 = vmatpush1.bf16.msra.mxu0 %v12093_v30 }
 0xb6c   : > { %5682 = vmatprep.subr.bf16.mxu0 %v12098_v31  ;;  %v5702_v31 = vrot.slane %v13834_v27, %v13387_v60 }
 0xb6f   : > { %5683 = vmatpush1.bf16.msra.mxu0 %v12096_v33 }
 0xb70   : > { %6170 = vmatprep.subr.bf16.mxu0 %v12101_v34  ;;  %v5706_v34 = vrot.slane %v13834_v27, %v13391_v63 }
 0xb72   : > { %5685 = vmatmul.mubr.bf16.vlgmr.msra.gmra.mrb[68].mxu0 %v13573_v5  ;;  %v12111_v5 = vld [vmem:[%s14277_s11 + $0x88] ss:$16 sps:$4 sm:$0xff]  }
 0xb73   : > { %6171 = vmatpush1.bf16.msra.mxu0 %v12099_v35  ;;  %6202 = vmatprep.mubr.bf16.mxu0 %v13562_v57  ;;  %v12116_v57 = vld [vmem:[%s14277_s11 + $0xac] ss:$16 sps:$4 sm:$0xff]  }
 0xb74   : > { %6172 = vmatprep.subr.bf16.mxu0 %v12104_v36  ;;  %v12210_v36 = vld [vmem:[%s14278_s0 + $0x4c8] ss:$16 sps:$4 sm:$0xff]  }
 0xb77   : > { %6173 = vmatpush1.bf16.msra.mxu0 %v12102_v37 }
 0xb78   : > { %6174 = vmatprep.subr.bf16.mxu0 %v12107_v38  ;;  %v12218_v38 = vld [vmem:[%s14278_s0 + $0x4ec] ss:$16 sps:$4 sm:$0xff]  }
 0xb7b   : > { %6175 = vmatpush1.bf16.msra.mxu0 %v12105_v39 }
 0xb7c   : > { %6176 = vmatprep.subr.bf16.mxu0 %v12110_v40 }
 0xb7f   : > { %6177 = vmatpush1.bf16.msra.mxu0 %v12108_v41  ;;  %v12216_v41 = vld [vmem:[%s14278_s0 + $0x4e8] ss:$16 sps:$4 sm:$0xff]  }
 0xb80   : > { %6178 = vmatprep.subr.bf16.mxu0 %v12113_v42 }
 0xb83   : > { %6179 = vmatpush1.bf16.msra.mxu0 %v12111_v5  ;;  %v12221_v5 = vld [vmem:[%s14278_s0 + $0x50c] ss:$16 sps:$4 sm:$0xff]  }
 0xb84   : > { %6180 = vmatprep.subr.bf16.mxu0 %v12116_v57 }
 0xb85   : > { %v13796_v46 = vpop.f32.mrb[56].mxu0 }
 0xb86   : > { %v13798_v47 = vpop.f32.mrb[57].mxu0 }
 0xb87   : > { %v4819_v7 = vpop.f32.mrb[58].mxu0  ;;  %6181 = vmatpush1.bf16.msra.mxu0 %v12114_v44 }
 0xb88   : > { %v4820_v49 = vpop.f32.mrb[59].mxu0  ;;  %6182 = vmatprep.subr.bf16.mxu0 %v12119_v45  ;;  %v12243_v45 = vld [vmem:[%s14278_s0 + $0x600] ss:$16 sps:$4 sm:$0xff]  }
 0xb89   : > { %v12222_v49 = vld [vmem:[%s14278_s0 + $0x528] ss:$16 sps:$4 sm:$0xff]  }
 0xb8b   : > { %6183 = vmatpush1.bf16.msra.mxu0 %v12117_v48  ;;  %v12251_v48 = vld [vmem:[%s14278_s0 + $0x624] ss:$16 sps:$4 sm:$0xff]  }
 0xb8c   : > { %6184 = vmatprep.subr.bf16.mxu0 %v12122_v50  ;;  %v12249_v50 = vld [vmem:[%s14278_s0 + $0x620] ss:$16 sps:$4 sm:$0xff]  }
 0xb8f   : > { %6185 = vmatpush1.bf16.msra.mxu0 %v12120_v53  ;;  %v12257_v53 = vld [vmem:[%s14278_s0 + $0x644] ss:$16 sps:$4 sm:$0xff]  }
 0xb90   : > { %6186 = vmatprep.subr.bf16.mxu0 %v12125_v55  ;;  %v12225_v55 = vld [vmem:[%s14278_s0 + $0x548] ss:$16 sps:$4 sm:$0xff]  }
 0xb93   : > { %6187 = vmatpush1.bf16.msra.mxu0 %v12123_v54  ;;  %v12255_v54 = vld [vmem:[%s14278_s0 + $0x640] ss:$16 sps:$4 sm:$0xff]  }
 0xb94   : > { %6188 = vmatprep.subr.bf16.mxu0 %v12131_v56  ;;  %v12230_v56 = vld [vmem:[%s14278_s0 + $0x56c] ss:$16 sps:$4 sm:$0xff]  }
 0xb97   : > { %6189 = vmatpush1.bf16.msra.mxu0 %v12129_v58  ;;  %v12263_v58 = vld [vmem:[%s14278_s0 + $0x664] ss:$16 sps:$4 sm:$0xff]  }
 0xb98   : > { %6190 = vmatprep.subr.bf16.mxu0 %v12137_v59  ;;  %v12228_v59 = vld [vmem:[%s14278_s0 + $0x568] ss:$16 sps:$4 sm:$0xff]  }
 0xb9b   : > { %6191 = vmatpush1.bf16.msra.mxu0 %v12135_v43  ;;  %v12261_v43 = vld [vmem:[%s14278_s0 + $0x660] ss:$16 sps:$4 sm:$0xff]  }
 0xb9c   : > { %6192 = vmatprep.subr.bf16.mxu0 %v12143_v1  ;;  %v12233_v1 = vld [vmem:[%s14278_s0 + $0x58c] ss:$16 sps:$4 sm:$0xff]  }
 0xb9f   : > { %6193 = vmatpush1.bf16.msra.mxu0 %v12141_v3  ;;  %v12269_v3 = vld [vmem:[%s14278_s0 + $0x684] ss:$16 sps:$4 sm:$0xff]  }
 0xba0   : > { %6194 = vmatprep.subr.bf16.mxu0 %v12149_v6  ;;  %v12231_v6 = vld [vmem:[%s14278_s0 + $0x588] ss:$16 sps:$4 sm:$0xff]  }
 0xba3   : > { %6195 = vmatpush1.bf16.msra.mxu0 %v12147_v8  ;;  %v12267_v8 = vld [vmem:[%s14278_s0 + $0x680] ss:$16 sps:$4 sm:$0xff]  }
 0xba4   : > { %6196 = vmatprep.subr.bf16.mxu0 %v12155_v10  ;;  %v12236_v10 = vld [vmem:[%s14278_s0 + $0x5ac] ss:$16 sps:$4 sm:$0xff]  }
 0xba7   : > { %6197 = vmatpush1.bf16.msra.mxu0 %v12153_v9  ;;  %v12275_v9 = vld [vmem:[%s14278_s0 + $0x6a4] ss:$16 sps:$4 sm:$0xff]  }
 0xba8   : > { %6198 = vmatprep.subr.bf16.mxu0 %v12161_v12  ;;  %v12234_v12 = vld [vmem:[%s14278_s0 + $0x5a8] ss:$16 sps:$4 sm:$0xff]  }
 0xbab   : > { %6199 = vmatpush1.bf16.msra.mxu0 %v12159_v13  ;;  %v12273_v13 = vld [vmem:[%s14278_s0 + $0x6a0] ss:$16 sps:$4 sm:$0xff]  }
 0xbac   : > { %6200 = vmatprep.subr.bf16.mxu0 %v12167_v14  ;;  %v12239_v14 = vld [vmem:[%s14278_s0 + $0x5cc] ss:$16 sps:$4 sm:$0xff]  }
 0xbaf   : > { %6201 = vmatpush1.bf16.msra.mxu0 %v12165_v15  ;;  %v12281_v15 = vld [vmem:[%s14278_s0 + $0x6c4] ss:$16 sps:$4 sm:$0xff]  }
 0xbb0   : > { %7198 = vmatprep.subr.bf16.mxu0 %v12176_v17  ;;  %v12237_v17 = vld [vmem:[%s14278_s0 + $0x5c8] ss:$16 sps:$4 sm:$0xff]  }
 0xbb2   : > { %6203 = vmatmul.mubr.bf16.vlgmr.msra.gmra.mrb[72].mxu0 %v13565_v62  ;;  %v12206_v62 = vld [vmem:[%s14278_s0 + $0x4ac] ss:$16 sps:$4 sm:$0xff]  }
 0xbb3   : > { %7199 = vmatpush1.bf16.msra.mxu0 %v12174_v19  ;;  %v12279_v19 = vld [vmem:[%s14278_s0 + $0x6c0] ss:$16 sps:$4 sm:$0xff]  }
 0xbb4   : > { %7200 = vmatprep.subr.bf16.mxu0 %v12182_v20  ;;  %v12242_v20 = vld [vmem:[%s14278_s0 + $0x5ec] ss:$16 sps:$4 sm:$0xff]  }
 0xbb7   : > { %7201 = vmatpush1.bf16.msra.mxu0 %v12180_v21  ;;  %v12287_v21 = vld [vmem:[%s14278_s0 + $0x6e4] ss:$16 sps:$4 sm:$0xff]  }
 0xbb8   : > { %7202 = vmatprep.subr.bf16.mxu0 %v12188_v61  ;;  %v12240_v61 = vld [vmem:[%s14278_s0 + $0x5e8] ss:$16 sps:$4 sm:$0xff]  }
 0xbbb   : > { %7203 = vmatpush1.bf16.msra.mxu0 %v12186_v22  ;;  %v12285_v22 = vld [vmem:[%s14278_s0 + $0x6e0] ss:$16 sps:$4 sm:$0xff]  }
 0xbbc   : > { %7204 = vmatprep.subr.bf16.mxu0 %v12194_v4  ;;  %v12248_v4 = vld [vmem:[%s14278_s0 + $0x60c] ss:$16 sps:$4 sm:$0xff]  }
 0xbbf   : > { %7205 = vmatpush1.bf16.msra.mxu0 %v12192_v23  ;;  %v12293_v23 = vld [vmem:[%s14278_s0 + $0x704] ss:$16 sps:$4 sm:$0xff]  }
 0xbc0   : > { %7206 = vmatprep.subr.bf16.mxu0 %v12200_v24  ;;  %v12246_v24 = vld [vmem:[%s14278_s0 + $0x608] ss:$16 sps:$4 sm:$0xff]  }
 0xbc3   : > { %7207 = vmatpush1.bf16.msra.mxu0 %v12198_v25  ;;  %v12291_v25 = vld [vmem:[%s14278_s0 + $0x700] ss:$16 sps:$4 sm:$0xff]  }
 0xbc4   : > { %7208 = vmatprep.subr.bf16.mxu0 %v12206_v62  ;;  %v12254_v62 = vld [vmem:[%s14278_s0 + $0x62c] ss:$16 sps:$4 sm:$0xff]  }
 0xbc5   : > { %v5176_v29 = vpop.f32.mrb[60].mxu0 }
 0xbc6   : > { %v5177_v11 = vadd.f32 %v5176_v29, %v13749_v0  ;;  %v5178_v30 = vpop.f32.mrb[61].mxu0  ;;  %v12297_v29 = vld [vmem:[%s14278_s0 + $0x720] ss:$16 sps:$4 sm:$0xff]  }
 0xbc7   : > { %v5179_v33 = vadd.f32 %v5178_v30, %v13752_v2  ;;  %7209 = vmatpush1.bf16.msra.mxu0 %v12204_v26  ;;  %v5180_v35 = vpop.f32.mrb[62].mxu0  ;;  %v12299_v26 = vld [vmem:[%s14278_s0 + $0x724] ss:$16 sps:$4 sm:$0xff]  }
 0xbc8   : > { %v5693_v37 = vadd.f32 %v13761_v16, %v5177_v11  ;;  %7210 = vmatprep.subr.bf16.mxu0 %v12212_v28  ;;  %v5181_v0 = vpop.f32.mrb[63].mxu0  ;;  %v12219_v16 = vld [vmem:[%s14278_s0 + $0x508] ss:$16 sps:$4 sm:$0xff]   ;;  %v12260_v11 = vld [vmem:[%s14278_s0 + $0x64c] ss:$16 sps:$4 sm:$0xff]  }
 0xbc9   : > { %v5694_v39 = vadd.f32 %v13764_v18, %v5179_v33  ;;  %v12224_v18 = vld [vmem:[%s14278_s0 + $0x52c] ss:$16 sps:$4 sm:$0xff]   ;;  %v12252_v28 = vld [vmem:[%s14278_s0 + $0x628] ss:$16 sps:$4 sm:$0xff]   ;;  %v12305_v30 = vld [vmem:[%s14278_s0 + $0x744] ss:$16 sps:$4 sm:$0xff]  }
 0xbca   : > { %v5719_v40 = vadd.f32 %v5702_v31, %v5693_v37  ;;  %v12258_v31 = vld [vmem:[%s14278_s0 + $0x648] ss:$16 sps:$4 sm:$0xff]   ;;  %v12303_v33 = vld [vmem:[%s14278_s0 + $0x740] ss:$16 sps:$4 sm:$0xff]   ;;  %v12311_v35 = vld [vmem:[%s14278_s0 + $0x764] ss:$16 sps:$4 sm:$0xff]  }
 0xbcb   : > { %v5720_v2 = vadd.f32 %v5706_v34, %v5694_v39  ;;  %7211 = vmatpush1.bf16.msra.mxu0 %v12210_v36  ;;  %v12266_v34 = vld [vmem:[%s14278_s0 + $0x66c] ss:$16 sps:$4 sm:$0xff]   ;;  %v12264_v36 = vld [vmem:[%s14278_s0 + $0x668] ss:$16 sps:$4 sm:$0xff]   ;;  %v12309_v37 = vld [vmem:[%s14278_s0 + $0x760] ss:$16 sps:$4 sm:$0xff]  }
 0xbcc   : > { %v6211_v42 = vmax.f32 %v5719_v40, 0.0  ;;  %7212 = vmatprep.subr.bf16.mxu0 %v12218_v38  ;;  %v12272_v0 = vld [vmem:[%s14278_s0 + $0x68c] ss:$16 sps:$4 sm:$0xff]   ;;  %v12317_v38 = vld [vmem:[%s14278_s0 + $0x784] ss:$16 sps:$4 sm:$0xff]  }
 0xbcd   : > { %v6212_v57 = vmax.f32 %v5720_v2, 0.0  ;;  %v12270_v39 = vld [vmem:[%s14278_s0 + $0x688] ss:$16 sps:$4 sm:$0xff]   ;;  %v12315_v40 = vld [vmem:[%s14278_s0 + $0x780] ss:$16 sps:$4 sm:$0xff]  }
 0xbce   : > { %v13851_v7 = vpack.c.bf16 %v6211_v42, %v6211_v42  ;;  %v12278_v2 = vld [vmem:[%s14278_s0 + $0x6ac] ss:$16 sps:$4 sm:$0xff]   ;;  %v12276_v42 = vld [vmem:[%s14278_s0 + $0x6a8] ss:$16 sps:$4 sm:$0xff]  }
 0xbcf   : > { %v6344_v44 = vpack.c.bf16 %v6212_v57, %v6212_v57  ;;  %7213 = vmatpush1.bf16.msra.mxu0 %v12216_v41  ;;  %v12323_v41 = vld [vmem:[%s14278_s0 + $0x7a4] ss:$16 sps:$4 sm:$0xff]   ;;  %v12284_v57 = vld [vmem:[%s14278_s0 + $0x6cc] ss:$16 sps:$4 sm:$0xff]  }
 0xbd0   : > { %7214 = vmatprep.subr.bf16.mxu0 %v12221_v5  ;;  %v12321_v5 = vld [vmem:[%s14278_s0 + $0x7a0] ss:$16 sps:$4 sm:$0xff]  }
 0xbd1   : > { %7148 = vmatprep.mubr.bf16.mxu1 %v6344_v44  ;;  %7230 = vmatprep.mubr.bf16.mxu0 %v6344_v44  ;;  %v12329_v44 = vld [vmem:[%s14278_s0 + $0x7c4] ss:$16 sps:$4 sm:$0xff]  }
 0xbd2   : > { %7149 = vmatmul.mubr.bf16.vlgmr.msra.gmra.mrb[40].mxu1 %v13851_v7 }
 0xbd3   : > { %7215 = vmatpush1.bf16.msra.mxu0 %v12219_v16  ;;  %7158 = vmatpush1.bf16.msra.mxu1 %v12243_v45 }
 0xbd4   : > { %7216 = vmatprep.subr.bf16.mxu0 %v12224_v18  ;;  %7159 = vmatprep.subr.bf16.mxu1 %v12251_v48 }
 0xbd7   : > { %7217 = vmatpush1.bf16.msra.mxu0 %v12222_v49  ;;  %7160 = vmatpush1.bf16.msra.mxu1 %v12249_v50  ;;  %v12282_v49 = vld [vmem:[%s14278_s0 + $0x6c8] ss:$16 sps:$4 sm:$0xff]   ;;  %v12327_v50 = vld [vmem:[%s14278_s0 + $0x7c0] ss:$16 sps:$4 sm:$0xff]  }
 0xbd8   : > { %7218 = vmatprep.subr.bf16.mxu0 %v12227_v51  ;;  %7161 = vmatprep.subr.bf16.mxu1 %v12257_v53  ;;  %v12290_v53 = vld [vmem:[%s14278_s0 + $0x6ec] ss:$16 sps:$4 sm:$0xff]  }
 0xbdb   : > { %7219 = vmatpush1.bf16.msra.mxu0 %v12225_v55  ;;  %7162 = vmatpush1.bf16.msra.mxu1 %v12255_v54  ;;  %v12335_v55 = vld [vmem:[%s14278_s0 + $0x7e4] ss:$16 sps:$4 sm:$0xff]   ;;  %v12296_v54 = vld [vmem:[%s14278_s0 + $0x70c] ss:$16 sps:$4 sm:$0xff]  }
 0xbdc   : > { %7220 = vmatprep.subr.bf16.mxu0 %v12230_v56  ;;  %7163 = vmatprep.subr.bf16.mxu1 %v12263_v58  ;;  %v12341_v56 = vld [vmem:[%s14278_s0 + $0x4] ss:$16 sps:$4 sm:$0xff]   ;;  %v12294_v58 = vld [vmem:[%s14278_s0 + $0x708] ss:$16 sps:$4 sm:$0xff]  }
 0xbdf   : > { %7221 = vmatpush1.bf16.msra.mxu0 %v12228_v59  ;;  %7164 = vmatpush1.bf16.msra.mxu1 %v12261_v43  ;;  %v12302_v59 = vld [vmem:[%s14278_s0 + $0x72c] ss:$16 sps:$4 sm:$0xff]   ;;  %v12300_v43 = vld [vmem:[%s14278_s0 + $0x728] ss:$16 sps:$4 sm:$0xff]  }
 0xbe0   : > { %7222 = vmatprep.subr.bf16.mxu0 %v12233_v1  ;;  %7165 = vmatprep.subr.bf16.mxu1 %v12269_v3  ;;  %v12308_v1 = vld [vmem:[%s14278_s0 + $0x74c] ss:$16 sps:$4 sm:$0xff]   ;;  %v12306_v3 = vld [vmem:[%s14278_s0 + $0x748] ss:$16 sps:$4 sm:$0xff]  }
 0xbe3   : > { %7223 = vmatpush1.bf16.msra.mxu0 %v12231_v6  ;;  %7166 = vmatpush1.bf16.msra.mxu1 %v12267_v8  ;;  %v12314_v6 = vld [vmem:[%s14278_s0 + $0x76c] ss:$16 sps:$4 sm:$0xff]   ;;  %v12312_v8 = vld [vmem:[%s14278_s0 + $0x768] ss:$16 sps:$4 sm:$0xff]  }
 0xbe4   : > { %7224 = vmatprep.subr.bf16.mxu0 %v12236_v10  ;;  %7167 = vmatprep.subr.bf16.mxu1 %v12275_v9  ;;  %v12320_v10 = vld [vmem:[%s14278_s0 + $0x78c] ss:$16 sps:$4 sm:$0xff]   ;;  %v12318_v9 = vld [vmem:[%s14278_s0 + $0x788] ss:$16 sps:$4 sm:$0xff]  }
 0xbe7   : > { %7225 = vmatpush1.bf16.msra.mxu0 %v12234_v12  ;;  %7168 = vmatpush1.bf16.msra.mxu1 %v12273_v13  ;;  %v12326_v12 = vld [vmem:[%s14278_s0 + $0x7ac] ss:$16 sps:$4 sm:$0xff]   ;;  %v12324_v13 = vld [vmem:[%s14278_s0 + $0x7a8] ss:$16 sps:$4 sm:$0xff]  }
 0xbe8   : > { %7226 = vmatprep.subr.bf16.mxu0 %v12239_v14  ;;  %7169 = vmatprep.subr.bf16.mxu1 %v12281_v15  ;;  %v12332_v14 = vld [vmem:[%s14278_s0 + $0x7cc] ss:$16 sps:$4 sm:$0xff]   ;;  %v12330_v15 = vld [vmem:[%s14278_s0 + $0x7c8] ss:$16 sps:$4 sm:$0xff]  }
 0xbeb   : > { %7227 = vmatpush1.bf16.msra.mxu0 %v12237_v17  ;;  %7170 = vmatpush1.bf16.msra.mxu1 %v12279_v19  ;;  %v12338_v17 = vld [vmem:[%s14278_s0 + $0x7ec] ss:$16 sps:$4 sm:$0xff]   ;;  %v12336_v19 = vld [vmem:[%s14278_s0 + $0x7e8] ss:$16 sps:$4 sm:$0xff]  }
 0xbec   : > { %7228 = vmatprep.subr.bf16.mxu0 %v12242_v20  ;;  %7171 = vmatprep.subr.bf16.mxu1 %v12287_v21  ;;  %v12344_v20 = vld [vmem:[%s14278_s0 + $0xc] ss:$16 sps:$4 sm:$0xff]   ;;  %v13936_v21 = vsub.s32 2, %v13014_v52 }
 0xbef   : > { %7229 = vmatpush1.bf16.msra.mxu0 %v12240_v61  ;;  %7172 = vmatpush1.bf16.msra.mxu1 %v12285_v22  ;;  %v13939_v61 = vsub.s32 3, %v13014_v52  ;;  %v5710_v22 = vrot.slane %v13834_v27, %v13936_v21 }
 0xbf0   : > { %7239 = vmatprep.subr.bf16.mxu0 %v12248_v4  ;;  %7173 = vmatprep.subr.bf16.mxu1 %v12293_v23 }
 0xbf1   : > { %v5714_v23 = vrot.slane %v13834_v27, %v13939_v61  ;;  %v12345_v27 = vld [vmem:[%s14278_s0 + $0x20] ss:$16 sps:$4 sm:$0xff]  }
 0xbf2   : > { %7231 = vmatmul.mubr.bf16.vlgmr.msra.gmra.mrb[72].mxu0 %v13851_v7 }
 0xbf3   : > { %7240 = vmatpush1.bf16.msra.mxu0 %v12246_v24  ;;  %7174 = vmatpush1.bf16.msra.mxu1 %v12291_v25 }
 0xbf4   : > { %7241 = vmatprep.subr.bf16.mxu0 %v12254_v62  ;;  %7175 = vmatprep.subr.bf16.mxu1 %v12299_v26 }
 0xbf7   : > { %7242 = vmatpush1.bf16.msra.mxu0 %v12252_v28  ;;  %7176 = vmatpush1.bf16.msra.mxu1 %v12297_v29 }
 0xbf8   : > { %7243 = vmatprep.subr.bf16.mxu0 %v12260_v11  ;;  %7177 = vmatprep.subr.bf16.mxu1 %v12305_v30 }
 0xbfb   : > { %7244 = vmatpush1.bf16.msra.mxu0 %v12258_v31  ;;  %7178 = vmatpush1.bf16.msra.mxu1 %v12303_v33  ;;  %v12339_v33 = vld [vmem:[%s14278_s0] ss:$16 sps:$4 sm:$0xff]  }
 0xbfc   : > { %7245 = vmatprep.subr.bf16.mxu0 %v12266_v34  ;;  %7179 = vmatprep.subr.bf16.mxu1 %v12311_v35  ;;  %v12342_v34 = vld [vmem:[%s14278_s0 + $0x8] ss:$16 sps:$4 sm:$0xff]  }
 0xbff   : > { %7246 = vmatpush1.bf16.msra.mxu0 %v12264_v36  ;;  %7180 = vmatpush1.bf16.msra.mxu1 %v12309_v37  ;;  %v12347_v36 = vld [vmem:[%s14278_s0 + $0x24] ss:$16 sps:$4 sm:$0xff]   ;;  %v12350_v37 = vld [vmem:[%s14278_s0 + $0x2c] ss:$16 sps:$4 sm:$0xff]  }
 0xc00   : > { %7247 = vmatprep.subr.bf16.mxu0 %v12272_v0  ;;  %7181 = vmatprep.subr.bf16.mxu1 %v12317_v38  ;;  %v12348_v0 = vld [vmem:[%s14278_s0 + $0x28] ss:$16 sps:$4 sm:$0xff]   ;;  %v12353_v38 = vld [vmem:[%s14278_s0 + $0x44] ss:$16 sps:$4 sm:$0xff]  }
 0xc03   : > { %7248 = vmatpush1.bf16.msra.mxu0 %v12270_v39  ;;  %7182 = vmatpush1.bf16.msra.mxu1 %v12315_v40  ;;  %v12356_v39 = vld [vmem:[%s14278_s0 + $0x4c] ss:$16 sps:$4 sm:$0xff]   ;;  %v12351_v40 = vld [vmem:[%s14278_s0 + $0x40] ss:$16 sps:$4 sm:$0xff]  }
 0xc04   : > { %7249 = vmatprep.subr.bf16.mxu0 %v12278_v2  ;;  %7183 = vmatprep.subr.bf16.mxu1 %v12323_v41  ;;  %v12354_v2 = vld [vmem:[%s14278_s0 + $0x48] ss:$16 sps:$4 sm:$0xff]   ;;  %v12359_v41 = vld [vmem:[%s14278_s0 + $0x64] ss:$16 sps:$4 sm:$0xff]  }
 0xc05   : > { %v5217_v16 = vpop.f32.mrb[64].mxu0 }
 0xc06   : > { %v5218_v45 = vadd.f32 %v5217_v16, %v13796_v46  ;;  %v5219_v7 = vpop.f32.mrb[65].mxu0  ;;  %v12288_v46 = vld [vmem:[%s14278_s0 + $0x6e8] ss:$16 sps:$4 sm:$0xff]   ;;  %v12368_v16 = vld [vmem:[%s14278_s0 + $0x8c] ss:$16 sps:$4 sm:$0xff]  }
 0xc07   : > { %v5220_v18 = vadd.f32 %v5219_v7, %v13798_v47  ;;  %v5221_v48 = vpop.f32.mrb[66].mxu0  ;;  %7250 = vmatpush1.bf16.msra.mxu0 %v12276_v42  ;;  %7184 = vmatpush1.bf16.msra.mxu1 %v12321_v5  ;;  %v12333_v47 = vld [vmem:[%s14278_s0 + $0x7e0] ss:$16 sps:$4 sm:$0xff]   ;;  %v12362_v42 = vld [vmem:[%s14278_s0 + $0x6c] ss:$16 sps:$4 sm:$0xff]  }
 0xc08   : > { %v5222_v51 = vpop.f32.mrb[67].mxu0  ;;  %7251 = vmatprep.subr.bf16.mxu0 %v12284_v57  ;;  %7185 = vmatprep.subr.bf16.mxu1 %v12329_v44  ;;  %v12357_v5 = vld [vmem:[%s14278_s0 + $0x60] ss:$16 sps:$4 sm:$0xff]   ;;  %v12360_v57 = vld [vmem:[%s14278_s0 + $0x68] ss:$16 sps:$4 sm:$0xff]  }
 0xc09   : > { %v12365_v44 = vld [vmem:[%s14278_s0 + $0x84] ss:$16 sps:$4 sm:$0xff]   ;;  %v12366_v7 = vld [vmem:[%s14278_s0 + $0x88] ss:$16 sps:$4 sm:$0xff]   ;;  %v12374_v48 = vld [vmem:[%s14278_s0 + $0xac] ss:$16 sps:$4 sm:$0xff]  }
 0xc0a   : > { %v12377_v51 = vld [vmem:[%s14278_s0 + $0xc4] ss:$16 sps:$4 sm:$0xff]  }
 0xc0b   : > { %7252 = vmatpush1.bf16.msra.mxu0 %v12282_v49  ;;  %7186 = vmatpush1.bf16.msra.mxu1 %v12327_v50  ;;  %v12369_v49 = vld [vmem:[%s14278_s0 + $0xa0] ss:$16 sps:$4 sm:$0xff]   ;;  %v12372_v50 = vld [vmem:[%s14278_s0 + $0xa8] ss:$16 sps:$4 sm:$0xff]  }
 0xc0c   : > { %7253 = vmatprep.subr.bf16.mxu0 %v12290_v53  ;;  %7187 = vmatprep.subr.bf16.mxu1 %v12335_v55  ;;  %v12380_v53 = vld [vmem:[%s14278_s0 + $0xcc] ss:$16 sps:$4 sm:$0xff]   ;;  %v12375_v55 = vld [vmem:[%s14278_s0 + $0xc0] ss:$16 sps:$4 sm:$0xff]  }
 0xc0f   : > { %7254 = vmatpush1.bf16.msra.mxu0 %v12288_v46  ;;  %7188 = vmatpush1.bf16.msra.mxu1 %v12333_v47  ;;  %v12378_v46 = vld [vmem:[%s14278_s0 + $0xc8] ss:$16 sps:$4 sm:$0xff]   ;;  %v12383_v47 = vld [vmem:[%s14278_s0 + $0xe4] ss:$16 sps:$4 sm:$0xff]  }
 0xc10   : > { %7255 = vmatprep.subr.bf16.mxu0 %v12296_v54  ;;  %7920 = vmatprep.subr.bf16.mxu1 %v12341_v56  ;;  %v12386_v54 = vld [vmem:[%s14278_s0 + $0xec] ss:$16 sps:$4 sm:$0xff]   ;;  %v12381_v56 = vld [vmem:[%s14278_s0 + $0xe0] ss:$16 sps:$4 sm:$0xff]  }
 0xc13   : > { %7256 = vmatpush1.bf16.msra.mxu0 %v12294_v58  ;;  %v12384_v58 = vld [vmem:[%s14278_s0 + $0xe8] ss:$16 sps:$4 sm:$0xff]  }
 0xc14   : > { %7257 = vmatprep.subr.bf16.mxu0 %v12302_v59  ;;  %v12389_v59 = vld [vmem:[%s14278_s0 + $0x104] ss:$16 sps:$4 sm:$0xff]  }
 0xc17   : > { %7258 = vmatpush1.bf16.msra.mxu0 %v12300_v43  ;;  %v12392_v43 = vld [vmem:[%s14278_s0 + $0x10c] ss:$16 sps:$4 sm:$0xff]  }
 0xc18   : > { %7259 = vmatprep.subr.bf16.mxu0 %v12308_v1  ;;  %v12387_v1 = vld [vmem:[%s14278_s0 + $0x100] ss:$16 sps:$4 sm:$0xff]  }
 0xc1b   : > { %7260 = vmatpush1.bf16.msra.mxu0 %v12306_v3  ;;  %v12390_v3 = vld [vmem:[%s14278_s0 + $0x108] ss:$16 sps:$4 sm:$0xff]  }
 0xc1c   : > { %7261 = vmatprep.subr.bf16.mxu0 %v12314_v6  ;;  %v12395_v6 = vld [vmem:[%s14278_s0 + $0x124] ss:$16 sps:$4 sm:$0xff]  }
 0xc1f   : > { %7262 = vmatpush1.bf16.msra.mxu0 %v12312_v8  ;;  %v12398_v8 = vld [vmem:[%s14278_s0 + $0x12c] ss:$16 sps:$4 sm:$0xff]  }
 0xc20   : > { %7263 = vmatprep.subr.bf16.mxu0 %v12320_v10  ;;  %v12393_v10 = vld [vmem:[%s14278_s0 + $0x120] ss:$16 sps:$4 sm:$0xff]  }
 0xc23   : > { %7264 = vmatpush1.bf16.msra.mxu0 %v12318_v9  ;;  %v12396_v9 = vld [vmem:[%s14278_s0 + $0x128] ss:$16 sps:$4 sm:$0xff]  }
 0xc24   : > { %7265 = vmatprep.subr.bf16.mxu0 %v12326_v12  ;;  %v12401_v12 = vld [vmem:[%s14278_s0 + $0x144] ss:$16 sps:$4 sm:$0xff]  }
 0xc27   : > { %7266 = vmatpush1.bf16.msra.mxu0 %v12324_v13  ;;  %v12404_v13 = vld [vmem:[%s14278_s0 + $0x14c] ss:$16 sps:$4 sm:$0xff]  }
 0xc28   : > { %7267 = vmatprep.subr.bf16.mxu0 %v12332_v14  ;;  %v12399_v14 = vld [vmem:[%s14278_s0 + $0x140] ss:$16 sps:$4 sm:$0xff]  }
 0xc2b   : > { %7268 = vmatpush1.bf16.msra.mxu0 %v12330_v15  ;;  %v12402_v15 = vld [vmem:[%s14278_s0 + $0x148] ss:$16 sps:$4 sm:$0xff]  }
 0xc2c   : > { %7269 = vmatprep.subr.bf16.mxu0 %v12338_v17  ;;  %v12407_v17 = vld [vmem:[%s14278_s0 + $0x164] ss:$16 sps:$4 sm:$0xff]  }
 0xc2f   : > { %7270 = vmatpush1.bf16.msra.mxu0 %v12336_v19  ;;  %v12410_v19 = vld [vmem:[%s14278_s0 + $0x16c] ss:$16 sps:$4 sm:$0xff]  }
 0xc30   : > { %8002 = vmatprep.subr.bf16.mxu0 %v12344_v20  ;;  %v12405_v20 = vld [vmem:[%s14278_s0 + $0x160] ss:$16 sps:$4 sm:$0xff]  }
 0xc45   : > { %v5686_v4 = vpop.f32.mrb[68].mxu0 }
 0xc46   : > { %v5695_v24 = vadd.f32 %v5686_v4, %v5218_v45  ;;  %v5688_v25 = vpop.f32.mrb[69].mxu0  ;;  %v12363_v45 = vld [vmem:[%s14278_s0 + $0x80] ss:$16 sps:$4 sm:$0xff]   ;;  %v12413_v4 = vld [vmem:[%s14278_s0 + $0x184] ss:$16 sps:$4 sm:$0xff]  }
 0xc47   : > { %v5696_v62 = vadd.f32 %v5688_v25, %v5220_v18  ;;  %v5690_v26 = vpop.f32.mrb[70].mxu0  ;;  %v12371_v18 = vld [vmem:[%s14278_s0 + $0xa4] ss:$16 sps:$4 sm:$0xff]   ;;  %v12414_v25 = vld [vmem:[%s14278_s0 + $0x188] ss:$16 sps:$4 sm:$0xff]  }
 0xc48   : > { %v5721_v28 = vadd.f32 %v5710_v22, %v5695_v24  ;;  %v5691_v29 = vpop.f32.mrb[71].mxu0  ;;  %v12408_v22 = vld [vmem:[%s14278_s0 + $0x168] ss:$16 sps:$4 sm:$0xff]   ;;  %v12411_v24 = vld [vmem:[%s14278_s0 + $0x180] ss:$16 sps:$4 sm:$0xff]  }
 0xc49   : > { %v5722_v11 = vadd.f32 %v5714_v23, %v5696_v62  ;;  %v12416_v23 = vld [vmem:[%s14278_s0 + $0x18c] ss:$16 sps:$4 sm:$0xff]   ;;  %v12419_v62 = vld [vmem:[%s14278_s0 + $0x1a4] ss:$16 sps:$4 sm:$0xff]   ;;  %v12420_v29 = vld [vmem:[%s14278_s0 + $0x1a8] ss:$16 sps:$4 sm:$0xff]  }
 0xc4a   : > { %v6213_v52 = vmax.f32 %v5721_v28, 0.0  ;;  %v12422_v26 = vld [vmem:[%s14278_s0 + $0x1ac] ss:$16 sps:$4 sm:$0xff]   ;;  %v12417_v28 = vld [vmem:[%s14278_s0 + $0x1a0] ss:$16 sps:$4 sm:$0xff]  }
 0xc4b   : > { %v6214_v30 = vmax.f32 %v5722_v11, 0.0  ;;  %v12425_v11 = vld [vmem:[%s14278_s0 + $0x1c4] ss:$16 sps:$4 sm:$0xff]  }
 0xc4c   : > { %v6345_v35 = vpack.c.bf16 %v6213_v52, %v6213_v52  ;;  %v12428_v52 = vld [vmem:[%s14278_s0 + $0x1cc] ss:$16 sps:$4 sm:$0xff]  }
 0xc4d   : > { %v6346_v31 = vpack.c.bf16 %v6214_v30, %v6214_v30  ;;  %v12423_v30 = vld [vmem:[%s14278_s0 + $0x1c0] ss:$16 sps:$4 sm:$0xff]  }
 0xc4f   : > { %7189 = vmatprep.mubr.bf16.mxu1 %v6346_v31  ;;  %7271 = vmatprep.mubr.bf16.mxu0 %v6346_v31  ;;  %v12426_v31 = vld [vmem:[%s14278_s0 + $0x1c8] ss:$16 sps:$4 sm:$0xff]  }
 0xc50   : > { %7190 = vmatmul.mubr.bf16.vlgmr.msra.gmra.mrb[40].mxu1 %v6345_v35  ;;  %7272 = vmatmul.mubr.bf16.vlgmr.msra.gmra.mrb[72].mxu0 %v6345_v35  ;;  %v12429_v35 = vld [vmem:[%s14278_s0 + $0x1e0] ss:$16 sps:$4 sm:$0xff]  }
 0xc51   : > { %7921 = vmatpush1.bf16.msra.mxu1 %v12339_v33  ;;  %8003 = vmatpush1.bf16.msra.mxu0 %v12342_v34  ;;  %v12431_v33 = vld [vmem:[%s14278_s0 + $0x1e4] ss:$16 sps:$4 sm:$0xff]   ;;  %v12434_v34 = vld [vmem:[%s14278_s0 + $0x1ec] ss:$16 sps:$4 sm:$0xff]  }
 0xc52   : > { %7922 = vmatprep.subr.bf16.mxu1 %v12347_v36  ;;  %8004 = vmatprep.subr.bf16.mxu0 %v12350_v37  ;;  %v12432_v36 = vld [vmem:[%s14278_s0 + $0x1e8] ss:$16 sps:$4 sm:$0xff]   ;;  %v12437_v37 = vld [vmem:[%s14278_s0 + $0x204] ss:$16 sps:$4 sm:$0xff]  }
 0xc53   : > { %7952 = vmatprep.mubr.bf16.mxu1 %v12767_v32  ;;  %8034 = vmatprep.mubr.bf16.mxu0 %v12767_v32 }
 0xc55   : > { %7923 = vmatpush1.bf16.msra.mxu1 %v12345_v27  ;;  %8005 = vmatpush1.bf16.msra.mxu0 %v12348_v0  ;;  %v12440_v27 = vld [vmem:[%s14278_s0 + $0x20c] ss:$16 sps:$4 sm:$0xff]   ;;  %v12435_v0 = vld [vmem:[%s14278_s0 + $0x200] ss:$16 sps:$4 sm:$0xff]  }
 0xc56   : > { %7924 = vmatprep.subr.bf16.mxu1 %v12353_v38  ;;  %8006 = vmatprep.subr.bf16.mxu0 %v12356_v39  ;;  %v12438_v38 = vld [vmem:[%s14278_s0 + $0x208] ss:$16 sps:$4 sm:$0xff]   ;;  %v12443_v39 = vld [vmem:[%s14278_s0 + $0x224] ss:$16 sps:$4 sm:$0xff]  }
 0xc59   : > { %7925 = vmatpush1.bf16.msra.mxu1 %v12351_v40  ;;  %8007 = vmatpush1.bf16.msra.mxu0 %v12354_v2  ;;  %v12446_v40 = vld [vmem:[%s14278_s0 + $0x22c] ss:$16 sps:$4 sm:$0xff]   ;;  %v12441_v2 = vld [vmem:[%s14278_s0 + $0x220] ss:$16 sps:$4 sm:$0xff]  }
 0xc5a   : > { %7926 = vmatprep.subr.bf16.mxu1 %v12359_v41  ;;  %8008 = vmatprep.subr.bf16.mxu0 %v12362_v42  ;;  %v12444_v41 = vld [vmem:[%s14278_s0 + $0x228] ss:$16 sps:$4 sm:$0xff]   ;;  %v12449_v42 = vld [vmem:[%s14278_s0 + $0x244] ss:$16 sps:$4 sm:$0xff]  }
 0xc5d   : > { %7927 = vmatpush1.bf16.msra.mxu1 %v12357_v5  ;;  %8009 = vmatpush1.bf16.msra.mxu0 %v12360_v57  ;;  %v12452_v5 = vld [vmem:[%s14278_s0 + $0x24c] ss:$16 sps:$4 sm:$0xff]   ;;  %v12447_v57 = vld [vmem:[%s14278_s0 + $0x240] ss:$16 sps:$4 sm:$0xff]  }
 0xc5e   : > { %7928 = vmatprep.subr.bf16.mxu1 %v12365_v44  ;;  %8010 = vmatprep.subr.bf16.mxu0 %v12368_v16  ;;  %v12450_v44 = vld [vmem:[%s14278_s0 + $0x248] ss:$16 sps:$4 sm:$0xff]   ;;  %v12455_v16 = vld [vmem:[%s14278_s0 + $0x264] ss:$16 sps:$4 sm:$0xff]  }
 0xc61   : > { %7929 = vmatpush1.bf16.msra.mxu1 %v12363_v45  ;;  %8011 = vmatpush1.bf16.msra.mxu0 %v12366_v7  ;;  %v12458_v45 = vld [vmem:[%s14278_s0 + $0x26c] ss:$16 sps:$4 sm:$0xff]   ;;  %v12453_v7 = vld [vmem:[%s14278_s0 + $0x260] ss:$16 sps:$4 sm:$0xff]  }
 0xc62   : > { %7930 = vmatprep.subr.bf16.mxu1 %v12371_v18  ;;  %8012 = vmatprep.subr.bf16.mxu0 %v12374_v48  ;;  %v12456_v18 = vld [vmem:[%s14278_s0 + $0x268] ss:$16 sps:$4 sm:$0xff]   ;;  %v12461_v48 = vld [vmem:[%s14278_s0 + $0x284] ss:$16 sps:$4 sm:$0xff]  }
 0xc65   : > { %7931 = vmatpush1.bf16.msra.mxu1 %v12369_v49  ;;  %8013 = vmatpush1.bf16.msra.mxu0 %v12372_v50  ;;  %v12464_v49 = vld [vmem:[%s14278_s0 + $0x28c] ss:$16 sps:$4 sm:$0xff]   ;;  %v12459_v50 = vld [vmem:[%s14278_s0 + $0x280] ss:$16 sps:$4 sm:$0xff]  }
 0xc66   : > { %7932 = vmatprep.subr.bf16.mxu1 %v12377_v51  ;;  %8014 = vmatprep.subr.bf16.mxu0 %v12380_v53  ;;  %v12462_v51 = vld [vmem:[%s14278_s0 + $0x288] ss:$16 sps:$4 sm:$0xff]   ;;  %v12467_v53 = vld [vmem:[%s14278_s0 + $0x2a4] ss:$16 sps:$4 sm:$0xff]  }
 0xc69   : > { %7933 = vmatpush1.bf16.msra.mxu1 %v12375_v55  ;;  %8015 = vmatpush1.bf16.msra.mxu0 %v12378_v46  ;;  %v12470_v55 = vld [vmem:[%s14278_s0 + $0x2ac] ss:$16 sps:$4 sm:$0xff]   ;;  %v12465_v46 = vld [vmem:[%s14278_s0 + $0x2a0] ss:$16 sps:$4 sm:$0xff]  }
 0xc6a   : > { %7934 = vmatprep.subr.bf16.mxu1 %v12383_v47  ;;  %8016 = vmatprep.subr.bf16.mxu0 %v12386_v54  ;;  %v12468_v47 = vld [vmem:[%s14278_s0 + $0x2a8] ss:$16 sps:$4 sm:$0xff]   ;;  %v12473_v54 = vld [vmem:[%s14278_s0 + $0x2c4] ss:$16 sps:$4 sm:$0xff]  }
 0xc6d   : > { %7935 = vmatpush1.bf16.msra.mxu1 %v12381_v56  ;;  %8017 = vmatpush1.bf16.msra.mxu0 %v12384_v58  ;;  %v12476_v56 = vld [vmem:[%s14278_s0 + $0x2cc] ss:$16 sps:$4 sm:$0xff]   ;;  %v12471_v58 = vld [vmem:[%s14278_s0 + $0x2c0] ss:$16 sps:$4 sm:$0xff]  }
 0xc6e   : > { %7936 = vmatprep.subr.bf16.mxu1 %v12389_v59  ;;  %8018 = vmatprep.subr.bf16.mxu0 %v12392_v43  ;;  %v12474_v59 = vld [vmem:[%s14278_s0 + $0x2c8] ss:$16 sps:$4 sm:$0xff]   ;;  %v12479_v43 = vld [vmem:[%s14278_s0 + $0x2e4] ss:$16 sps:$4 sm:$0xff]  }
 0xc71   : > { %7937 = vmatpush1.bf16.msra.mxu1 %v12387_v1  ;;  %8019 = vmatpush1.bf16.msra.mxu0 %v12390_v3  ;;  %v12482_v1 = vld [vmem:[%s14278_s0 + $0x2ec] ss:$16 sps:$4 sm:$0xff]   ;;  %v12477_v3 = vld [vmem:[%s14278_s0 + $0x2e0] ss:$16 sps:$4 sm:$0xff]  }
 0xc72   : > { %7938 = vmatprep.subr.bf16.mxu1 %v12395_v6  ;;  %8020 = vmatprep.subr.bf16.mxu0 %v12398_v8  ;;  %v12480_v6 = vld [vmem:[%s14278_s0 + $0x2e8] ss:$16 sps:$4 sm:$0xff]   ;;  %v12485_v8 = vld [vmem:[%s14278_s0 + $0x304] ss:$16 sps:$4 sm:$0xff]  }
 0xc75   : > { %7939 = vmatpush1.bf16.msra.mxu1 %v12393_v10  ;;  %8021 = vmatpush1.bf16.msra.mxu0 %v12396_v9  ;;  %v12488_v10 = vld [vmem:[%s14278_s0 + $0x30c] ss:$16 sps:$4 sm:$0xff]   ;;  %v12483_v9 = vld [vmem:[%s14278_s0 + $0x300] ss:$16 sps:$4 sm:$0xff]  }
 0xc76   : > { %7940 = vmatprep.subr.bf16.mxu1 %v12401_v12  ;;  %8022 = vmatprep.subr.bf16.mxu0 %v12404_v13  ;;  %v12486_v12 = vld [vmem:[%s14278_s0 + $0x308] ss:$16 sps:$4 sm:$0xff]   ;;  %v12491_v13 = vld [vmem:[%s14278_s0 + $0x324] ss:$16 sps:$4 sm:$0xff]  }
 0xc79   : > { %7941 = vmatpush1.bf16.msra.mxu1 %v12399_v14  ;;  %8023 = vmatpush1.bf16.msra.mxu0 %v12402_v15  ;;  %v12494_v14 = vld [vmem:[%s14278_s0 + $0x32c] ss:$16 sps:$4 sm:$0xff]   ;;  %v12489_v15 = vld [vmem:[%s14278_s0 + $0x320] ss:$16 sps:$4 sm:$0xff]  }
 0xc7a   : > { %7942 = vmatprep.subr.bf16.mxu1 %v12407_v17  ;;  %8024 = vmatprep.subr.bf16.mxu0 %v12410_v19  ;;  %v12492_v17 = vld [vmem:[%s14278_s0 + $0x328] ss:$16 sps:$4 sm:$0xff]   ;;  %v12497_v19 = vld [vmem:[%s14278_s0 + $0x344] ss:$16 sps:$4 sm:$0xff]  }
 0xc7d   : > { %7943 = vmatpush1.bf16.msra.mxu1 %v12405_v20  ;;  %8025 = vmatpush1.bf16.msra.mxu0 %v12408_v22  ;;  %v12500_v20 = vld [vmem:[%s14278_s0 + $0x34c] ss:$16 sps:$4 sm:$0xff]   ;;  %v12495_v22 = vld [vmem:[%s14278_s0 + $0x340] ss:$16 sps:$4 sm:$0xff]  }
 0xc7e   : > { %7944 = vmatprep.subr.bf16.mxu1 %v12413_v4  ;;  %8026 = vmatprep.subr.bf16.mxu0 %v12416_v23  ;;  %v12498_v4 = vld [vmem:[%s14278_s0 + $0x348] ss:$16 sps:$4 sm:$0xff]   ;;  %v12503_v23 = vld [vmem:[%s14278_s0 + $0x364] ss:$16 sps:$4 sm:$0xff]  }
 0xc81   : > { %7945 = vmatpush1.bf16.msra.mxu1 %v12411_v24  ;;  %8027 = vmatpush1.bf16.msra.mxu0 %v12414_v25  ;;  %v12506_v24 = vld [vmem:[%s14278_s0 + $0x36c] ss:$16 sps:$4 sm:$0xff]   ;;  %v12501_v25 = vld [vmem:[%s14278_s0 + $0x360] ss:$16 sps:$4 sm:$0xff]  }
 0xc82   : > { %7946 = vmatprep.subr.bf16.mxu1 %v12419_v62  ;;  %8028 = vmatprep.subr.bf16.mxu0 %v12422_v26  ;;  %v12504_v62 = vld [vmem:[%s14278_s0 + $0x368] ss:$16 sps:$4 sm:$0xff]   ;;  %v12509_v26 = vld [vmem:[%s14278_s0 + $0x384] ss:$16 sps:$4 sm:$0xff]  }
 0xc85   : > { %7947 = vmatpush1.bf16.msra.mxu1 %v12417_v28  ;;  %8029 = vmatpush1.bf16.msra.mxu0 %v12420_v29  ;;  %v12512_v28 = vld [vmem:[%s14278_s0 + $0x38c] ss:$16 sps:$4 sm:$0xff]   ;;  %v12507_v29 = vld [vmem:[%s14278_s0 + $0x380] ss:$16 sps:$4 sm:$0xff]  }
 0xc86   : > { %7948 = vmatprep.subr.bf16.mxu1 %v12425_v11  ;;  %8030 = vmatprep.subr.bf16.mxu0 %v12428_v52  ;;  %v12510_v11 = vld [vmem:[%s14278_s0 + $0x388] ss:$16 sps:$4 sm:$0xff]   ;;  %v12515_v52 = vld [vmem:[%s14278_s0 + $0x3a4] ss:$16 sps:$4 sm:$0xff]  }
 0xc89   : > { %7949 = vmatpush1.bf16.msra.mxu1 %v12423_v30  ;;  %8031 = vmatpush1.bf16.msra.mxu0 %v12426_v31  ;;  %v12518_v30 = vld [vmem:[%s14278_s0 + $0x3ac] ss:$16 sps:$4 sm:$0xff]   ;;  %v12513_v31 = vld [vmem:[%s14278_s0 + $0x3a0] ss:$16 sps:$4 sm:$0xff]  }
 0xc8a   : > { %7950 = vmatprep.subr.bf16.mxu1 %v12431_v33  ;;  %8032 = vmatprep.subr.bf16.mxu0 %v12434_v34  ;;  %v12516_v33 = vld [vmem:[%s14278_s0 + $0x3a8] ss:$16 sps:$4 sm:$0xff]   ;;  %v12521_v34 = vld [vmem:[%s14278_s0 + $0x3c4] ss:$16 sps:$4 sm:$0xff]  }
 0xc8d   : > { %7951 = vmatpush1.bf16.msra.mxu1 %v12429_v35  ;;  %8033 = vmatpush1.bf16.msra.mxu0 %v12432_v36  ;;  %v12524_v35 = vld [vmem:[%s14278_s0 + $0x3cc] ss:$16 sps:$4 sm:$0xff]   ;;  %v12519_v36 = vld [vmem:[%s14278_s0 + $0x3c0] ss:$16 sps:$4 sm:$0xff]  }
 0xc8e   : > { %7961 = vmatprep.subr.bf16.mxu1 %v12437_v37  ;;  %8043 = vmatprep.subr.bf16.mxu0 %v12440_v27  ;;  %v12522_v37 = vld [vmem:[%s14278_s0 + $0x3c8] ss:$16 sps:$4 sm:$0xff]   ;;  %v12527_v27 = vld [vmem:[%s14278_s0 + $0x3e4] ss:$16 sps:$4 sm:$0xff]  }
 0xc90   : > { %7953 = vmatmul.mubr.bf16.vlgmr.msra.gmra.mrb[40].mxu1 %v12767_v32  ;;  %8035 = vmatmul.mubr.bf16.vlgmr.msra.gmra.mrb[72].mxu0 %v12767_v32 }
 0xc91   : > { %7962 = vmatpush1.bf16.msra.mxu1 %v12435_v0  ;;  %8044 = vmatpush1.bf16.msra.mxu0 %v12438_v38  ;;  %v12530_v0 = vld [vmem:[%s14278_s0 + $0x3ec] ss:$16 sps:$4 sm:$0xff]   ;;  %v12525_v38 = vld [vmem:[%s14278_s0 + $0x3e0] ss:$16 sps:$4 sm:$0xff]  }
 0xc92   : > { %7963 = vmatprep.subr.bf16.mxu1 %v12443_v39  ;;  %8045 = vmatprep.subr.bf16.mxu0 %v12446_v40  ;;  %v12528_v39 = vld [vmem:[%s14278_s0 + $0x3e8] ss:$16 sps:$4 sm:$0xff]   ;;  %v12533_v40 = vld [vmem:[%s14278_s0 + $0x804] ss:$16 sps:$4 sm:$0xff]  }
 0xc93   : > { %7993 = vmatprep.mubr.bf16.mxu1 %v12767_v32  ;;  %8075 = vmatprep.mubr.bf16.mxu0 %v12767_v32 }
 0xc95   : > { %7964 = vmatpush1.bf16.msra.mxu1 %v12441_v2  ;;  %8046 = vmatpush1.bf16.msra.mxu0 %v12444_v41  ;;  %v12536_v2 = vld [vmem:[%s14278_s0 + $0x80c] ss:$16 sps:$4 sm:$0xff]   ;;  %v12531_v41 = vld [vmem:[%s14278_s0 + $0x800] ss:$16 sps:$4 sm:$0xff]  }
 0xc96   : > { %7965 = vmatprep.subr.bf16.mxu1 %v12449_v42  ;;  %8047 = vmatprep.subr.bf16.mxu0 %v12452_v5  ;;  %v12534_v42 = vld [vmem:[%s14278_s0 + $0x808] ss:$16 sps:$4 sm:$0xff]   ;;  %v12539_v5 = vld [vmem:[%s14278_s0 + $0x824] ss:$16 sps:$4 sm:$0xff]  }
 0xc99   : > { %7966 = vmatpush1.bf16.msra.mxu1 %v12447_v57  ;;  %8048 = vmatpush1.bf16.msra.mxu0 %v12450_v44  ;;  %v12542_v57 = vld [vmem:[%s14278_s0 + $0x82c] ss:$16 sps:$4 sm:$0xff]   ;;  %v12537_v44 = vld [vmem:[%s14278_s0 + $0x820] ss:$16 sps:$4 sm:$0xff]  }
 0xc9a   : > { %7967 = vmatprep.subr.bf16.mxu1 %v12455_v16  ;;  %8049 = vmatprep.subr.bf16.mxu0 %v12458_v45  ;;  %v12540_v16 = vld [vmem:[%s14278_s0 + $0x828] ss:$16 sps:$4 sm:$0xff]   ;;  %v12545_v45 = vld [vmem:[%s14278_s0 + $0x844] ss:$16 sps:$4 sm:$0xff]  }
 0xc9d   : > { %7968 = vmatpush1.bf16.msra.mxu1 %v12453_v7  ;;  %8050 = vmatpush1.bf16.msra.mxu0 %v12456_v18  ;;  %v12548_v7 = vld [vmem:[%s14278_s0 + $0x84c] ss:$16 sps:$4 sm:$0xff]   ;;  %v12543_v18 = vld [vmem:[%s14278_s0 + $0x840] ss:$16 sps:$4 sm:$0xff]  }
 0xc9e   : > { %7969 = vmatprep.subr.bf16.mxu1 %v12461_v48  ;;  %8051 = vmatprep.subr.bf16.mxu0 %v12464_v49  ;;  %v12546_v48 = vld [vmem:[%s14278_s0 + $0x848] ss:$16 sps:$4 sm:$0xff]   ;;  %v12551_v49 = vld [vmem:[%s14278_s0 + $0x864] ss:$16 sps:$4 sm:$0xff]  }
 0xca1   : > { %7970 = vmatpush1.bf16.msra.mxu1 %v12459_v50  ;;  %8052 = vmatpush1.bf16.msra.mxu0 %v12462_v51  ;;  %v12554_v50 = vld [vmem:[%s14278_s0 + $0x86c] ss:$16 sps:$4 sm:$0xff]   ;;  %v12549_v51 = vld [vmem:[%s14278_s0 + $0x860] ss:$16 sps:$4 sm:$0xff]  }
 0xca2   : > { %7971 = vmatprep.subr.bf16.mxu1 %v12467_v53  ;;  %8053 = vmatprep.subr.bf16.mxu0 %v12470_v55  ;;  %v12552_v53 = vld [vmem:[%s14278_s0 + $0x868] ss:$16 sps:$4 sm:$0xff]   ;;  %v12557_v55 = vld [vmem:[%s14278_s0 + $0x884] ss:$16 sps:$4 sm:$0xff]  }
 0xca5   : > { %7972 = vmatpush1.bf16.msra.mxu1 %v12465_v46  ;;  %8054 = vmatpush1.bf16.msra.mxu0 %v12468_v47  ;;  %v12560_v46 = vld [vmem:[%s14278_s0 + $0x88c] ss:$16 sps:$4 sm:$0xff]   ;;  %v12555_v47 = vld [vmem:[%s14278_s0 + $0x880] ss:$16 sps:$4 sm:$0xff]  }
 0xca6   : > { %7973 = vmatprep.subr.bf16.mxu1 %v12473_v54  ;;  %8055 = vmatprep.subr.bf16.mxu0 %v12476_v56  ;;  %v12558_v54 = vld [vmem:[%s14278_s0 + $0x888] ss:$16 sps:$4 sm:$0xff]   ;;  %v12563_v56 = vld [vmem:[%s14278_s0 + $0x8a4] ss:$16 sps:$4 sm:$0xff]  }
 0xca9   : > { %7974 = vmatpush1.bf16.msra.mxu1 %v12471_v58  ;;  %8056 = vmatpush1.bf16.msra.mxu0 %v12474_v59  ;;  %v12566_v58 = vld [vmem:[%s14278_s0 + $0x8ac] ss:$16 sps:$4 sm:$0xff]   ;;  %v12561_v59 = vld [vmem:[%s14278_s0 + $0x8a0] ss:$16 sps:$4 sm:$0xff]  }
 0xcaa   : > { %7975 = vmatprep.subr.bf16.mxu1 %v12479_v43  ;;  %8057 = vmatprep.subr.bf16.mxu0 %v12482_v1  ;;  %v12564_v43 = vld [vmem:[%s14278_s0 + $0x8a8] ss:$16 sps:$4 sm:$0xff]   ;;  %v12569_v1 = vld [vmem:[%s14278_s0 + $0x8c4] ss:$16 sps:$4 sm:$0xff]  }
 0xcad   : > { %7976 = vmatpush1.bf16.msra.mxu1 %v12477_v3  ;;  %8058 = vmatpush1.bf16.msra.mxu0 %v12480_v6  ;;  %v12572_v3 = vld [vmem:[%s14278_s0 + $0x8cc] ss:$16 sps:$4 sm:$0xff]   ;;  %v12567_v6 = vld [vmem:[%s14278_s0 + $0x8c0] ss:$16 sps:$4 sm:$0xff]  }
 0xcae   : > { %7977 = vmatprep.subr.bf16.mxu1 %v12485_v8  ;;  %8059 = vmatprep.subr.bf16.mxu0 %v12488_v10  ;;  %v12570_v8 = vld [vmem:[%s14278_s0 + $0x8c8] ss:$16 sps:$4 sm:$0xff]   ;;  %v12575_v10 = vld [vmem:[%s14278_s0 + $0x8e4] ss:$16 sps:$4 sm:$0xff]  }
 0xcb1   : > { %7978 = vmatpush1.bf16.msra.mxu1 %v12483_v9  ;;  %8060 = vmatpush1.bf16.msra.mxu0 %v12486_v12  ;;  %v12578_v9 = vld [vmem:[%s14278_s0 + $0x8ec] ss:$16 sps:$4 sm:$0xff]   ;;  %v12573_v12 = vld [vmem:[%s14278_s0 + $0x8e0] ss:$16 sps:$4 sm:$0xff]  }
 0xcb2   : > { %7979 = vmatprep.subr.bf16.mxu1 %v12491_v13  ;;  %8061 = vmatprep.subr.bf16.mxu0 %v12494_v14  ;;  %v12576_v13 = vld [vmem:[%s14278_s0 + $0x8e8] ss:$16 sps:$4 sm:$0xff]   ;;  %v12581_v14 = vld [vmem:[%s14278_s0 + $0x904] ss:$16 sps:$4 sm:$0xff]  }
 0xcb5   : > { %7980 = vmatpush1.bf16.msra.mxu1 %v12489_v15  ;;  %8062 = vmatpush1.bf16.msra.mxu0 %v12492_v17  ;;  %v12584_v15 = vld [vmem:[%s14278_s0 + $0x90c] ss:$16 sps:$4 sm:$0xff]   ;;  %v12579_v17 = vld [vmem:[%s14278_s0 + $0x900] ss:$16 sps:$4 sm:$0xff]  }
 0xcb6   : > { %7981 = vmatprep.subr.bf16.mxu1 %v12497_v19  ;;  %8063 = vmatprep.subr.bf16.mxu0 %v12500_v20  ;;  %v12582_v19 = vld [vmem:[%s14278_s0 + $0x908] ss:$16 sps:$4 sm:$0xff]   ;;  %v12587_v20 = vld [vmem:[%s14278_s0 + $0x924] ss:$16 sps:$4 sm:$0xff]  }
 0xcb9   : > { %7982 = vmatpush1.bf16.msra.mxu1 %v12495_v22  ;;  %8064 = vmatpush1.bf16.msra.mxu0 %v12498_v4  ;;  %v12590_v22 = vld [vmem:[%s14278_s0 + $0x92c] ss:$16 sps:$4 sm:$0xff]   ;;  %v12585_v4 = vld [vmem:[%s14278_s0 + $0x920] ss:$16 sps:$4 sm:$0xff]  }
 0xcba   : > { %7983 = vmatprep.subr.bf16.mxu1 %v12503_v23  ;;  %8065 = vmatprep.subr.bf16.mxu0 %v12506_v24  ;;  %v12588_v23 = vld [vmem:[%s14278_s0 + $0x928] ss:$16 sps:$4 sm:$0xff]   ;;  %v12593_v24 = vld [vmem:[%s14278_s0 + $0x944] ss:$16 sps:$4 sm:$0xff]  }
 0xcbd   : > { %7984 = vmatpush1.bf16.msra.mxu1 %v12501_v25  ;;  %8066 = vmatpush1.bf16.msra.mxu0 %v12504_v62  ;;  %v12596_v25 = vld [vmem:[%s14278_s0 + $0x94c] ss:$16 sps:$4 sm:$0xff]   ;;  %v12591_v62 = vld [vmem:[%s14278_s0 + $0x940] ss:$16 sps:$4 sm:$0xff]  }
 0xcbe   : > { %7985 = vmatprep.subr.bf16.mxu1 %v12509_v26  ;;  %8067 = vmatprep.subr.bf16.mxu0 %v12512_v28  ;;  %v12594_v26 = vld [vmem:[%s14278_s0 + $0x948] ss:$16 sps:$4 sm:$0xff]   ;;  %v12599_v28 = vld [vmem:[%s14278_s0 + $0x964] ss:$16 sps:$4 sm:$0xff]  }
 0xcc1   : > { %7986 = vmatpush1.bf16.msra.mxu1 %v12507_v29  ;;  %8068 = vmatpush1.bf16.msra.mxu0 %v12510_v11  ;;  %v12602_v29 = vld [vmem:[%s14278_s0 + $0x96c] ss:$16 sps:$4 sm:$0xff]   ;;  %v12597_v11 = vld [vmem:[%s14278_s0 + $0x960] ss:$16 sps:$4 sm:$0xff]  }
 0xcc2   : > { %7987 = vmatprep.subr.bf16.mxu1 %v12515_v52  ;;  %8069 = vmatprep.subr.bf16.mxu0 %v12518_v30  ;;  %v12600_v52 = vld [vmem:[%s14278_s0 + $0x968] ss:$16 sps:$4 sm:$0xff]   ;;  %v12605_v30 = vld [vmem:[%s14278_s0 + $0x984] ss:$16 sps:$4 sm:$0xff]  }
 0xcc5   : > { %7988 = vmatpush1.bf16.msra.mxu1 %v12513_v31  ;;  %8070 = vmatpush1.bf16.msra.mxu0 %v12516_v33  ;;  %v12608_v31 = vld [vmem:[%s14278_s0 + $0x98c] ss:$16 sps:$4 sm:$0xff]   ;;  %v12603_v33 = vld [vmem:[%s14278_s0 + $0x980] ss:$16 sps:$4 sm:$0xff]  }
 0xcc6   : > { %7989 = vmatprep.subr.bf16.mxu1 %v12521_v34  ;;  %8071 = vmatprep.subr.bf16.mxu0 %v12524_v35  ;;  %v12606_v34 = vld [vmem:[%s14278_s0 + $0x988] ss:$16 sps:$4 sm:$0xff]   ;;  %v12611_v35 = vld [vmem:[%s14278_s0 + $0x9a4] ss:$16 sps:$4 sm:$0xff]  }
 0xcc9   : > { %7990 = vmatpush1.bf16.msra.mxu1 %v12519_v36  ;;  %8072 = vmatpush1.bf16.msra.mxu0 %v12522_v37  ;;  %v12614_v36 = vld [vmem:[%s14278_s0 + $0x9ac] ss:$16 sps:$4 sm:$0xff]   ;;  %v12609_v37 = vld [vmem:[%s14278_s0 + $0x9a0] ss:$16 sps:$4 sm:$0xff]  }
 0xcca   : > { %7991 = vmatprep.subr.bf16.mxu1 %v12527_v27  ;;  %8073 = vmatprep.subr.bf16.mxu0 %v12530_v0  ;;  %v12612_v27 = vld [vmem:[%s14278_s0 + $0x9a8] ss:$16 sps:$4 sm:$0xff]   ;;  %v12617_v0 = vld [vmem:[%s14278_s0 + $0x9c4] ss:$16 sps:$4 sm:$0xff]  }
 0xccd   : > { %7992 = vmatpush1.bf16.msra.mxu1 %v12525_v38  ;;  %8074 = vmatpush1.bf16.msra.mxu0 %v12528_v39  ;;  %v12620_v38 = vld [vmem:[%s14278_s0 + $0x9cc] ss:$16 sps:$4 sm:$0xff]   ;;  %v12615_v39 = vld [vmem:[%s14278_s0 + $0x9c0] ss:$16 sps:$4 sm:$0xff]  }
 0xcce   : > { %8853 = vmatprep.subr.bf16.mxu1 %v12533_v40  ;;  %8935 = vmatprep.subr.bf16.mxu0 %v12536_v2  ;;  %v12618_v40 = vld [vmem:[%s14278_s0 + $0x9c8] ss:$16 sps:$4 sm:$0xff]   ;;  %v12623_v2 = vld [vmem:[%s14278_s0 + $0x9e4] ss:$16 sps:$4 sm:$0xff]  }
 0xcd0   : > { %7994 = vmatmul.mubr.bf16.vlgmr.msra.gmra.mrb[40].mxu1 %v12767_v32  ;;  %8076 = vmatmul.mubr.bf16.vlgmr.msra.gmra.mrb[72].mxu0 %v12767_v32 }
 0xcd1   : > { %8854 = vmatpush1.bf16.msra.mxu1 %v12531_v41  ;;  %8936 = vmatpush1.bf16.msra.mxu0 %v12534_v42  ;;  %v12626_v41 = vld [vmem:[%s14278_s0 + $0x9ec] ss:$16 sps:$4 sm:$0xff]   ;;  %v12621_v42 = vld [vmem:[%s14278_s0 + $0x9e0] ss:$16 sps:$4 sm:$0xff]  }
 0xcd2   : > { %8855 = vmatprep.subr.bf16.mxu1 %v12539_v5  ;;  %8937 = vmatprep.subr.bf16.mxu0 %v12542_v57  ;;  %v12624_v5 = vld [vmem:[%s14278_s0 + $0x9e8] ss:$16 sps:$4 sm:$0xff]   ;;  %v12629_v57 = vld [vmem:[%s14278_s0 + $0xa04] ss:$16 sps:$4 sm:$0xff]  }
 0xcd3   : > { %8885 = vmatprep.mubr.bf16.mxu1 %v12767_v32  ;;  %8967 = vmatprep.mubr.bf16.mxu0 %v12767_v32 }
 0xcd5   : > { %8856 = vmatpush1.bf16.msra.mxu1 %v12537_v44  ;;  %8938 = vmatpush1.bf16.msra.mxu0 %v12540_v16  ;;  %v12632_v44 = vld [vmem:[%s14278_s0 + $0xa0c] ss:$16 sps:$4 sm:$0xff]   ;;  %v12627_v16 = vld [vmem:[%s14278_s0 + $0xa00] ss:$16 sps:$4 sm:$0xff]  }
 0xcd6   : > { %8857 = vmatprep.subr.bf16.mxu1 %v12545_v45  ;;  %8939 = vmatprep.subr.bf16.mxu0 %v12548_v7  ;;  %v12630_v45 = vld [vmem:[%s14278_s0 + $0xa08] ss:$16 sps:$4 sm:$0xff]   ;;  %v12635_v7 = vld [vmem:[%s14278_s0 + $0xa24] ss:$16 sps:$4 sm:$0xff]  }
 0xcd9   : > { %8858 = vmatpush1.bf16.msra.mxu1 %v12543_v18  ;;  %8940 = vmatpush1.bf16.msra.mxu0 %v12546_v48  ;;  %v12638_v18 = vld [vmem:[%s14278_s0 + $0xa2c] ss:$16 sps:$4 sm:$0xff]   ;;  %v12633_v48 = vld [vmem:[%s14278_s0 + $0xa20] ss:$16 sps:$4 sm:$0xff]  }
 0xcda   : > { %8859 = vmatprep.subr.bf16.mxu1 %v12551_v49  ;;  %8941 = vmatprep.subr.bf16.mxu0 %v12554_v50  ;;  %v12636_v49 = vld [vmem:[%s14278_s0 + $0xa28] ss:$16 sps:$4 sm:$0xff]   ;;  %v12641_v50 = vld [vmem:[%s14278_s0 + $0xa44] ss:$16 sps:$4 sm:$0xff]  }
 0xcdd   : > { %8860 = vmatpush1.bf16.msra.mxu1 %v12549_v51  ;;  %8942 = vmatpush1.bf16.msra.mxu0 %v12552_v53  ;;  %v12644_v51 = vld [vmem:[%s14278_s0 + $0xa4c] ss:$16 sps:$4 sm:$0xff]   ;;  %v12639_v53 = vld [vmem:[%s14278_s0 + $0xa40] ss:$16 sps:$4 sm:$0xff]  }
 0xcde   : > { %8861 = vmatprep.subr.bf16.mxu1 %v12557_v55  ;;  %8943 = vmatprep.subr.bf16.mxu0 %v12560_v46  ;;  %v12642_v55 = vld [vmem:[%s14278_s0 + $0xa48] ss:$16 sps:$4 sm:$0xff]   ;;  %v12647_v46 = vld [vmem:[%s14278_s0 + $0xa64] ss:$16 sps:$4 sm:$0xff]  }
 0xce1   : > { %8862 = vmatpush1.bf16.msra.mxu1 %v12555_v47  ;;  %8944 = vmatpush1.bf16.msra.mxu0 %v12558_v54  ;;  %v12650_v47 = vld [vmem:[%s14278_s0 + $0xa6c] ss:$16 sps:$4 sm:$0xff]   ;;  %v12645_v54 = vld [vmem:[%s14278_s0 + $0xa60] ss:$16 sps:$4 sm:$0xff]  }
 0xce2   : > { %8863 = vmatprep.subr.bf16.mxu1 %v12563_v56  ;;  %8945 = vmatprep.subr.bf16.mxu0 %v12566_v58  ;;  %v12648_v56 = vld [vmem:[%s14278_s0 + $0xa68] ss:$16 sps:$4 sm:$0xff]   ;;  %v12653_v58 = vld [vmem:[%s14278_s0 + $0xa84] ss:$16 sps:$4 sm:$0xff]  }
 0xce5   : > { %8864 = vmatpush1.bf16.msra.mxu1 %v12561_v59  ;;  %8946 = vmatpush1.bf16.msra.mxu0 %v12564_v43  ;;  %v12656_v59 = vld [vmem:[%s14278_s0 + $0xa8c] ss:$16 sps:$4 sm:$0xff]   ;;  %v12651_v43 = vld [vmem:[%s14278_s0 + $0xa80] ss:$16 sps:$4 sm:$0xff]  }
 0xce6   : > { %8865 = vmatprep.subr.bf16.mxu1 %v12569_v1  ;;  %8947 = vmatprep.subr.bf16.mxu0 %v12572_v3  ;;  %v12654_v1 = vld [vmem:[%s14278_s0 + $0xa88] ss:$16 sps:$4 sm:$0xff]   ;;  %v12659_v3 = vld [vmem:[%s14278_s0 + $0xaa4] ss:$16 sps:$4 sm:$0xff]  }
 0xce9   : > { %8866 = vmatpush1.bf16.msra.mxu1 %v12567_v6  ;;  %8948 = vmatpush1.bf16.msra.mxu0 %v12570_v8  ;;  %v12662_v6 = vld [vmem:[%s14278_s0 + $0xaac] ss:$16 sps:$4 sm:$0xff]   ;;  %v12657_v8 = vld [vmem:[%s14278_s0 + $0xaa0] ss:$16 sps:$4 sm:$0xff]  }
 0xcea   : > { %8867 = vmatprep.subr.bf16.mxu1 %v12575_v10  ;;  %8949 = vmatprep.subr.bf16.mxu0 %v12578_v9  ;;  %v12660_v10 = vld [vmem:[%s14278_s0 + $0xaa8] ss:$16 sps:$4 sm:$0xff]   ;;  %v12665_v9 = vld [vmem:[%s14278_s0 + $0xac4] ss:$16 sps:$4 sm:$0xff]  }
 0xced   : > { %8868 = vmatpush1.bf16.msra.mxu1 %v12573_v12  ;;  %8950 = vmatpush1.bf16.msra.mxu0 %v12576_v13  ;;  %v12668_v12 = vld [vmem:[%s14278_s0 + $0xacc] ss:$16 sps:$4 sm:$0xff]   ;;  %v12663_v13 = vld [vmem:[%s14278_s0 + $0xac0] ss:$16 sps:$4 sm:$0xff]  }
 0xcee   : > { %8869 = vmatprep.subr.bf16.mxu1 %v12581_v14  ;;  %8951 = vmatprep.subr.bf16.mxu0 %v12584_v15  ;;  %v12666_v14 = vld [vmem:[%s14278_s0 + $0xac8] ss:$16 sps:$4 sm:$0xff]   ;;  %v12671_v15 = vld [vmem:[%s14278_s0 + $0xae4] ss:$16 sps:$4 sm:$0xff]  }
 0xcf1   : > { %8870 = vmatpush1.bf16.msra.mxu1 %v12579_v17  ;;  %8952 = vmatpush1.bf16.msra.mxu0 %v12582_v19  ;;  %v12674_v17 = vld [vmem:[%s14278_s0 + $0xaec] ss:$16 sps:$4 sm:$0xff]   ;;  %v12669_v19 = vld [vmem:[%s14278_s0 + $0xae0] ss:$16 sps:$4 sm:$0xff]  }
 0xcf2   : > { %8871 = vmatprep.subr.bf16.mxu1 %v12587_v20  ;;  %8953 = vmatprep.subr.bf16.mxu0 %v12590_v22  ;;  %v12672_v20 = vld [vmem:[%s14278_s0 + $0xae8] ss:$16 sps:$4 sm:$0xff]   ;;  %v12677_v22 = vld [vmem:[%s14278_s0 + $0xb04] ss:$16 sps:$4 sm:$0xff]  }
 0xcf5   : > { %8872 = vmatpush1.bf16.msra.mxu1 %v12585_v4  ;;  %8954 = vmatpush1.bf16.msra.mxu0 %v12588_v23  ;;  %v12680_v4 = vld [vmem:[%s14278_s0 + $0xb0c] ss:$16 sps:$4 sm:$0xff]   ;;  %v12675_v23 = vld [vmem:[%s14278_s0 + $0xb00] ss:$16 sps:$4 sm:$0xff]  }
 0xcf6   : > { %8873 = vmatprep.subr.bf16.mxu1 %v12593_v24  ;;  %8955 = vmatprep.subr.bf16.mxu0 %v12596_v25  ;;  %v12678_v24 = vld [vmem:[%s14278_s0 + $0xb08] ss:$16 sps:$4 sm:$0xff]   ;;  %v12683_v25 = vld [vmem:[%s14278_s0 + $0xb24] ss:$16 sps:$4 sm:$0xff]  }
 0xcf9   : > { %8874 = vmatpush1.bf16.msra.mxu1 %v12591_v62  ;;  %8956 = vmatpush1.bf16.msra.mxu0 %v12594_v26  ;;  %v12686_v62 = vld [vmem:[%s14278_s0 + $0xb2c] ss:$16 sps:$4 sm:$0xff]   ;;  %v12681_v26 = vld [vmem:[%s14278_s0 + $0xb20] ss:$16 sps:$4 sm:$0xff]  }
 0xcfa   : > { %8875 = vmatprep.subr.bf16.mxu1 %v12599_v28  ;;  %8957 = vmatprep.subr.bf16.mxu0 %v12602_v29  ;;  %v12684_v28 = vld [vmem:[%s14278_s0 + $0xb28] ss:$16 sps:$4 sm:$0xff]   ;;  %v12689_v29 = vld [vmem:[%s14278_s0 + $0xb44] ss:$16 sps:$4 sm:$0xff]  }
 0xcfd   : > { %8876 = vmatpush1.bf16.msra.mxu1 %v12597_v11  ;;  %8958 = vmatpush1.bf16.msra.mxu0 %v12600_v52  ;;  %v12692_v11 = vld [vmem:[%s14278_s0 + $0xb4c] ss:$16 sps:$4 sm:$0xff]   ;;  %v12687_v52 = vld [vmem:[%s14278_s0 + $0xb40] ss:$16 sps:$4 sm:$0xff]  }
 0xcfe   : > { %8877 = vmatprep.subr.bf16.mxu1 %v12605_v30  ;;  %8959 = vmatprep.subr.bf16.mxu0 %v12608_v31  ;;  %v12690_v30 = vld [vmem:[%s14278_s0 + $0xb48] ss:$16 sps:$4 sm:$0xff]   ;;  %v12695_v31 = vld [vmem:[%s14278_s0 + $0xb64] ss:$16 sps:$4 sm:$0xff]  }
 0xd01   : > { %8878 = vmatpush1.bf16.msra.mxu1 %v12603_v33  ;;  %8960 = vmatpush1.bf16.msra.mxu0 %v12606_v34  ;;  %v12698_v33 = vld [vmem:[%s14278_s0 + $0xb6c] ss:$16 sps:$4 sm:$0xff]   ;;  %v12693_v34 = vld [vmem:[%s14278_s0 + $0xb60] ss:$16 sps:$4 sm:$0xff]  }
 0xd02   : > { %8879 = vmatprep.subr.bf16.mxu1 %v12611_v35  ;;  %8961 = vmatprep.subr.bf16.mxu0 %v12614_v36  ;;  %v12696_v35 = vld [vmem:[%s14278_s0 + $0xb68] ss:$16 sps:$4 sm:$0xff]   ;;  %v12701_v36 = vld [vmem:[%s14278_s0 + $0xb84] ss:$16 sps:$4 sm:$0xff]  }
 0xd05   : > { %8880 = vmatpush1.bf16.msra.mxu1 %v12609_v37  ;;  %8962 = vmatpush1.bf16.msra.mxu0 %v12612_v27  ;;  %v12704_v37 = vld [vmem:[%s14278_s0 + $0xb8c] ss:$16 sps:$4 sm:$0xff]   ;;  %v12699_v27 = vld [vmem:[%s14278_s0 + $0xb80] ss:$16 sps:$4 sm:$0xff]  }
 0xd06   : > { %8881 = vmatprep.subr.bf16.mxu1 %v12617_v0  ;;  %8963 = vmatprep.subr.bf16.mxu0 %v12620_v38  ;;  %v12702_v0 = vld [vmem:[%s14278_s0 + $0xb88] ss:$16 sps:$4 sm:$0xff]   ;;  %v12707_v38 = vld [vmem:[%s14278_s0 + $0xba4] ss:$16 sps:$4 sm:$0xff]  }
 0xd09   : > { %8882 = vmatpush1.bf16.msra.mxu1 %v12615_v39  ;;  %8964 = vmatpush1.bf16.msra.mxu0 %v12618_v40  ;;  %v12710_v39 = vld [vmem:[%s14278_s0 + $0xbac] ss:$16 sps:$4 sm:$0xff]   ;;  %v12705_v40 = vld [vmem:[%s14278_s0 + $0xba0] ss:$16 sps:$4 sm:$0xff]  }
 0xd0a   : > { %8883 = vmatprep.subr.bf16.mxu1 %v12623_v2  ;;  %8965 = vmatprep.subr.bf16.mxu0 %v12626_v41  ;;  %v12708_v2 = vld [vmem:[%s14278_s0 + $0xba8] ss:$16 sps:$4 sm:$0xff]   ;;  %v12713_v41 = vld [vmem:[%s14278_s0 + $0xbc4] ss:$16 sps:$4 sm:$0xff]  }
 0xd0d   : > { %8884 = vmatpush1.bf16.msra.mxu1 %v12621_v42  ;;  %8966 = vmatpush1.bf16.msra.mxu0 %v12624_v5  ;;  %v12716_v42 = vld [vmem:[%s14278_s0 + $0xbcc] ss:$16 sps:$4 sm:$0xff]   ;;  %v12711_v5 = vld [vmem:[%s14278_s0 + $0xbc0] ss:$16 sps:$4 sm:$0xff]  }
 0xd0e   : > { %8894 = vmatprep.subr.bf16.mxu1 %v12629_v57  ;;  %8976 = vmatprep.subr.bf16.mxu0 %v12632_v44  ;;  %v12714_v57 = vld [vmem:[%s14278_s0 + $0xbc8] ss:$16 sps:$4 sm:$0xff]   ;;  %v12719_v44 = vld [vmem:[%s14278_s0 + $0xbe4] ss:$16 sps:$4 sm:$0xff]  }
 0xd10   : > { %8886 = vmatmul.mubr.bf16.vlgmr.msra.gmra.mrb[40].mxu1 %v12767_v32  ;;  %8968 = vmatmul.mubr.bf16.vlgmr.msra.gmra.mrb[72].mxu0 %v12767_v32 }
 0xd11   : > { %8895 = vmatpush1.bf16.msra.mxu1 %v12627_v16  ;;  %8977 = vmatpush1.bf16.msra.mxu0 %v12630_v45  ;;  %v12722_v16 = vld [vmem:[%s14278_s0 + $0xbec] ss:$16 sps:$4 sm:$0xff]   ;;  %v12717_v45 = vld [vmem:[%s14278_s0 + $0xbe0] ss:$16 sps:$4 sm:$0xff]  }
 0xd12   : > { %8896 = vmatprep.subr.bf16.mxu1 %v12635_v7  ;;  %8978 = vmatprep.subr.bf16.mxu0 %v12638_v18  ;;  %v12720_v7 = vld [vmem:[%s14278_s0 + $0xbe8] ss:$16 sps:$4 sm:$0xff]   ;;  %v5787_v18 = vld [vmem:[%s12911_s24] sm:$0xf] }
 0xd13   : > { %8926 = vmatprep.mubr.bf16.mxu1 %v12767_v32  ;;  %9008 = vmatprep.mubr.bf16.mxu0 %v12767_v32 }
 0xd15   : > { %8897 = vmatpush1.bf16.msra.mxu1 %v12633_v48  ;;  %8979 = vmatpush1.bf16.msra.mxu0 %v12636_v49  ;;  %v9021_v48 = vld [vmem:[%s14280_s18] sm:$0xf]  ;;  %v6112_v49 = vrot.slane %v5787_v18, %v13387_v60 }
 0xd16   : > { %8898 = vmatprep.subr.bf16.mxu1 %v12641_v50  ;;  %8980 = vmatprep.subr.bf16.mxu0 %v12644_v51  ;;  %v6120_v50 = vrot.slane %v5787_v18, %v13936_v21  ;;  %v6116_v51 = vrot.slane %v5787_v18, %v13391_v63 }
 0xd19   : > { %8899 = vmatpush1.bf16.msra.mxu1 %v12639_v53  ;;  %8981 = vmatpush1.bf16.msra.mxu0 %v12642_v55  ;;  %v6124_v53 = vrot.slane %v5787_v18, %v13939_v61  ;;  %v9026_v55 = vrot.slane %v9021_v48, %v13387_v60 }
 0xd1a   : > { %8900 = vmatprep.subr.bf16.mxu1 %v12647_v46  ;;  %8982 = vmatprep.subr.bf16.mxu0 %v12650_v47  ;;  %v9034_v46 = vrot.slane %v9021_v48, %v13936_v21 }
 0xd1d   : > { %8901 = vmatpush1.bf16.msra.mxu1 %v12645_v54  ;;  %8983 = vmatpush1.bf16.msra.mxu0 %v12648_v56  ;;  %v9059_v54 = vld [vmem:[%s12916_s27] sm:$0xf] }
 0xd1e   : > { %8902 = vmatprep.subr.bf16.mxu1 %v12653_v58  ;;  %8984 = vmatprep.subr.bf16.mxu0 %v12656_v59  ;;  %v9030_v58 = vrot.slane %v9021_v48, %v13391_v63 }
 0xd21   : > { %8903 = vmatpush1.bf16.msra.mxu1 %v12651_v43  ;;  %8985 = vmatpush1.bf16.msra.mxu0 %v12654_v1 }
 0xd22   : > { %8904 = vmatprep.subr.bf16.mxu1 %v12659_v3  ;;  %8986 = vmatprep.subr.bf16.mxu0 %v12662_v6 }
 0xd25   : > { %8905 = vmatpush1.bf16.msra.mxu1 %v12657_v8  ;;  %8987 = vmatpush1.bf16.msra.mxu0 %v12660_v10 }
 0xd26   : > { %8906 = vmatprep.subr.bf16.mxu1 %v12665_v9  ;;  %8988 = vmatprep.subr.bf16.mxu0 %v12668_v12 }
 0xd29   : > { %8907 = vmatpush1.bf16.msra.mxu1 %v12663_v13  ;;  %8989 = vmatpush1.bf16.msra.mxu0 %v12666_v14  ;;  %v9064_v13 = vrot.slane %v9059_v54, %v13387_v60 }
 0xd2a   : > { %8908 = vmatprep.subr.bf16.mxu1 %v12671_v15  ;;  %8990 = vmatprep.subr.bf16.mxu0 %v12674_v17 }
 0xd2d   : > { %8909 = vmatpush1.bf16.msra.mxu1 %v12669_v19  ;;  %8991 = vmatpush1.bf16.msra.mxu0 %v12672_v20  ;;  %v9068_v20 = vrot.slane %v9059_v54, %v13391_v63 }
 0xd2e   : > { %8910 = vmatprep.subr.bf16.mxu1 %v12677_v22  ;;  %8992 = vmatprep.subr.bf16.mxu0 %v12680_v4  ;;  %v9072_v4 = vrot.slane %v9059_v54, %v13936_v21 }
 0xd31   : > { %8911 = vmatpush1.bf16.msra.mxu1 %v12675_v23  ;;  %8993 = vmatpush1.bf16.msra.mxu0 %v12678_v24 }
 0xd32   : > { %8912 = vmatprep.subr.bf16.mxu1 %v12683_v25  ;;  %8994 = vmatprep.subr.bf16.mxu0 %v12686_v62 }
 0xd35   : > { %8913 = vmatpush1.bf16.msra.mxu1 %v12681_v26  ;;  %8995 = vmatpush1.bf16.msra.mxu0 %v12684_v28  ;;  %v9076_v26 = vrot.slane %v9059_v54, %v13939_v61 }
 0xd36   : > { %8914 = vmatprep.subr.bf16.mxu1 %v12689_v29  ;;  %8996 = vmatprep.subr.bf16.mxu0 %v12692_v11 }
 0xd39   : > { %8915 = vmatpush1.bf16.msra.mxu1 %v12687_v52  ;;  %8997 = vmatpush1.bf16.msra.mxu0 %v12690_v30 }
 0xd3a   : > { %8916 = vmatprep.subr.bf16.mxu1 %v12695_v31  ;;  %8998 = vmatprep.subr.bf16.mxu0 %v12698_v33 }
 0xd3d   : > { %8917 = vmatpush1.bf16.msra.mxu1 %v12693_v34  ;;  %8999 = vmatpush1.bf16.msra.mxu0 %v12696_v35  ;;  %v9094_v35 = vld [vmem:[#allocation2] sm:$0x1] }
 0xd3e   : > { %8918 = vmatprep.subr.bf16.mxu1 %v12701_v36  ;;  %9000 = vmatprep.subr.bf16.mxu0 %v12704_v37 }
 0xd41   : > { %8919 = vmatpush1.bf16.msra.mxu1 %v12699_v27  ;;  %9001 = vmatpush1.bf16.msra.mxu0 %v12702_v0 }
 0xd42   : > { %8920 = vmatprep.subr.bf16.mxu1 %v12707_v38  ;;  %9002 = vmatprep.subr.bf16.mxu0 %v12710_v39 }
 0xd45   : > { %8921 = vmatpush1.bf16.msra.mxu1 %v12705_v40  ;;  %9003 = vmatpush1.bf16.msra.mxu0 %v12708_v2 }
 0xd46   : > { %8922 = vmatprep.subr.bf16.mxu1 %v12713_v41  ;;  %9004 = vmatprep.subr.bf16.mxu0 %v12716_v42 }
 0xd49   : > { %8923 = vmatpush1.bf16.msra.mxu1 %v12711_v5  ;;  %9005 = vmatpush1.bf16.msra.mxu0 %v12714_v57 }
 0xd4a   : > { %8924 = vmatprep.subr.bf16.mxu1 %v12719_v44  ;;  %9006 = vmatprep.subr.bf16.mxu0 %v12722_v16 }
 0xd4d   : > { %8925 = vmatpush1.bf16.msra.mxu1 %v12717_v45  ;;  %9007 = vmatpush1.bf16.msra.mxu0 %v12720_v7 }
 0xd50   : > { %8927 = vmatmul.mubr.bf16.vlgmr.msra.gmra.mrb[40].mxu1 %v12767_v32  ;;  %9009 = vmatmul.mubr.bf16.vlgmr.msra.gmra.mrb[72].mxu0 %v12767_v32  ;;  %v9038_v32 = vrot.slane %v9021_v48, %v13939_v61 }
 0xe23   : > { %v8928_v47 = vpop.f32.mrb[40].mxu1  ;;  %v9010_v56 = vpop.f32.mrb[72].mxu0 }
 0xe24   : > { %v11268_v59 = vadd.f32 %v8928_v47, %v6112_v49  ;;  %v11272_v43 = vadd.f32 %v9010_v56, %v6120_v50  ;;  %v8930_v1 = vpop.f32.mrb[41].mxu1  ;;  %v9012_v3 = vpop.f32.mrb[73].mxu0 }
 0xe25   : > { %v11270_v6 = vadd.f32 %v8930_v1, %v6116_v51  ;;  %v11274_v8 = vadd.f32 %v9012_v3, %v6124_v53  ;;  %v8932_v10 = vpop.f32.mrb[42].mxu1  ;;  %v9014_v9 = vpop.f32.mrb[74].mxu0 }
 0xe26   : > { %v11269_v12 = vadd.f32 %v11268_v59, %v9026_v55  ;;  %v11273_v14 = vadd.f32 %v11272_v43, %v9034_v46  ;;  %v8933_v15 = vpop.f32.mrb[43].mxu1  ;;  %v9015_v17 = vpop.f32.mrb[75].mxu0 }
 0xe27   : > { %v11271_v19 = vadd.f32 %v11270_v6, %v9030_v58  ;;  %v11275_v22 = vadd.f32 %v11274_v8, %v9038_v32 }
 0xe28   : > { %v9051_v23 = vmax.f32 %v11269_v12, 0.0  ;;  %v9053_v24 = vmax.f32 %v11273_v14, 0.0 }
 0xe29   : > { %v9052_v25 = vmax.f32 %v11271_v19, 0.0  ;;  %v9054_v62 = vmax.f32 %v11275_v22, 0.0 }
 0xe2a   : > { %v9081_v28 = vmul.f32 %v9064_v13, %v9051_v23  ;;  %v9083_v11 = vmul.f32 %v9072_v4, %v9053_v24 }
 0xe2b   : > { %v9082_v29 = vmul.f32 %v9068_v20, %v9052_v25  ;;  %v9084_v52 = vmul.f32 %v9076_v26, %v9054_v62 }
 0xe2c   : > { %v9085_v60 = vsel %vm1990_vm7, %v9081_v28, 0.0  ;;  %v9088_v63 = vsel %vm1990_vm7, %v9083_v11, 0.0 }
 0xe2d   : > { %v9086_v30 = vsel %vm1990_vm7, %v9082_v29, 0.0  ;;  %v9090_v33 = vsel %vm1990_vm7, %v9084_v52, 0.0 }
 0xe2e   : > { %v9087_v31 = vadd.f32 %v9086_v30, %v9085_v60 }
 0xe30   : > { %v9089_v21 = vadd.f32 %v9088_v63, %v9087_v31 }
 0xe32   : > { %v9091_v34 = vadd.f32 %v9090_v33, %v9089_v21 }
 0xe34   : > { %9092 = vadd.xlane.f32.xlu0 %v9091_v34 }
 0xec1   : > { %v9093_v61 = vpop.xlane.xlu0 %9092 }
 0xec2   : > { %v9095_v36 = vadd.f32 %v9094_v35, %v9093_v61 }
 0xec4   : > { %v10799_v37 = vmul.f32 -1.442695, %v9095_v36 }
 0xec6   : > { %12723 = vpow2.f32 %v10799_v37 }
 0xed0   : > { %v12724_v27 = vpop.eup %12723 }
 0xed1   : > { %v9099_v0 = vadd.f32 1.0, %v12724_v27 }
 0xed3   : > { %12725 = vrcp.f32 %v9099_v0 }
 0xedd   : > { %v12726_v38 = vpop.eup %12725 }
 0xede   : > { %11349 = vpush %v12726_v38 }
 0xf0f   : > { %s11350_s10 = spop %11349 }
 0xf10   : > { %v9104_v39 = vstv %s11350_s10 }
 0xf11   : > { %9106 = vst [vmem:[%s930_s2] sm:$0xff] %v9104_v39 }
 0xf12 PF: > { %s73_s15 = sadd.s32 1, %s12733_s15  }
 0xf13   : > { %p70_p4 = scmp.ge.s32.totalorder %s73_s15, 4  }
 0xf15   :  { %72 = sbr.rel (!%p70_p4) target bundleno = 54 (0x36), region = 219 }

</bundles_post_ra>
